<compile_context>
chip_gen: v5e
topology: v5e:2x2
jax: 0.10.0
libtpu: 0.0.40
codegen_flags: <defaults>
</compile_context>

<pallas_src>
import functools

import jax
import jax.numpy as jnp
from jax.experimental import pallas as pl
from jax.experimental.pallas import tpu as pltpu

D_IN, D_HID, D_OUT = 2048, 1024, 512


def _round_up(v, m):
    return ((v + m - 1) // m) * m


def _default_tm():
    """256 on v5e (MXU already ~7us/tile there), 512 elsewhere (v6e/v7x)."""
    try:
        kind = jax.devices()[0].device_kind.lower()
    except Exception:
        return 256
    if "v5e" in kind or "v5 lite" in kind or "v5lite" in kind:
        return 256
    return 512


def prepare_head_params(w1, b1, w2, b2):
    """Cast/reshape params ONCE (cache the result; do not call per forward).

    w1: [2048, 1024], b1: [1024], w2: [1024, 512], b2: [512]  (any float dtype).
    Returns (w1_bf16, b1_f32[1,1024], w2_bf16, b2_f32[1,512]).
    """
    return (
        w1.astype(jnp.bfloat16),
        b1.astype(jnp.float32).reshape(1, D_HID),
        w2.astype(jnp.bfloat16),
        b2.astype(jnp.float32).reshape(1, D_OUT),
    )


def head_kernel(x_ref, w1_ref, b1_ref, w2_ref, b2_ref, o_ref):
    # x_ref: (TM, D_IN) f32        w1_ref: (D_IN, D_HID) bf16   b1_ref: (1, D_HID) f32
    # w2_ref: (D_HID, D_OUT) bf16  b2_ref: (1, D_OUT) f32       o_ref: (TM, D_OUT)
    # In-kernel bf16 cast of the activation (cheap VPU work, hidden under MXU).
    x_bf = x_ref[...].astype(jnp.bfloat16)

    # First linear: bf16 MXU fast path, f32 accumulation; bias + ReLU in f32.
    h = jnp.dot(x_bf, w1_ref[...], preferred_element_type=jnp.float32)
    h = jnp.maximum(h + b1_ref[...], 0.0)

    # Second linear: cast hidden back to bf16 for the MXU, accumulate in f32.
    y = jnp.dot(h.astype(jnp.bfloat16), w2_ref[...],
                preferred_element_type=jnp.float32)
    o_ref[...] = (y + b2_ref[...]).astype(o_ref.dtype)


def head_forward(x, params, *, tm=None, out_dtype=None):
    """relu(x @ w1 + b1) @ w2 + b2.   x: [B, 2048] -> [B, 512].

    `params` is the tuple from prepare_head_params (bf16 weights cached once).
    Ragged B is handled via a masked partial last block (no pad/slice HBM pass).
    """
    B = x.shape[0]
    out_dtype = x.dtype if out_dtype is None else out_dtype
    w1_bf, b1_f32, w2_bf, b2_f32 = params

    if tm is None:
        tm = _default_tm()

    # Batch tile: multiple of 16 (bf16-friendly), no larger than needed.
    tm_eff = min(_round_up(tm, 16), _round_up(B, 16))
    grid_m = pl.cdiv(B, tm_eff)
    # If everything fits in one tile, split into 2 steps so both v7x TensorCores
    # get work (per-step overhead ~0.35us, negligible on v5e/v6e too).
    if grid_m == 1 and B > 16:
        tm_eff = max(16, _round_up(pl.cdiv(B, 2), 16))
        grid_m = pl.cdiv(B, tm_eff)

    # Grid-resident operands (constant index_map) only need a single VMEM buffer.
    resident = functools.partial(pl.BlockSpec, pipeline_mode=pl.Buffered(1))

    flops = 2 * B * (D_IN * D_HID + D_HID * D_OUT)
    bytes_accessed = (
        B * D_IN * x.dtype.itemsize
        + D_IN * D_HID * 2 + D_HID * 4          # W1 bf16, b1 f32
        + D_HID * D_OUT * 2 + D_OUT * 4         # W2 bf16, b2 f32
        + B * D_OUT * jnp.dtype(out_dtype).itemsize
    )

    return pl.pallas_call(
        head_kernel,
        out_shape=jax.ShapeDtypeStruct((B, D_OUT), out_dtype),
        grid_spec=pltpu.PrefetchScalarGridSpec(
            num_scalar_prefetch=0,
            grid=(grid_m,),
            in_specs=[
                pl.BlockSpec((tm_eff, D_IN), lambda i: (i, 0)),   # x tile (pipelined)
                resident((D_IN, D_HID), lambda i: (0, 0)),        # W1 (resident, bf16)
                resident((1, D_HID), lambda i: (0, 0)),           # b1 (f32)
                resident((D_HID, D_OUT), lambda i: (0, 0)),       # W2 (resident, bf16)
                resident((1, D_OUT), lambda i: (0, 0)),           # b2 (f32)
            ],
            out_specs=pl.BlockSpec((tm_eff, D_OUT), lambda i: (i, 0)),
        ),
        compiler_params=pltpu.CompilerParams(
            # TODO(synk): on v7x, verify "parallel" shards batch tiles across both
            # TensorCores; switch to pltpu.CORE_PARALLEL / core_map if it does not.
            dimension_semantics=("parallel",),
            vmem_limit_bytes=48 << 20,
        ),
        cost_estimate=pl.CostEstimate(
            flops=flops, transcendentals=0, bytes_accessed=bytes_accessed),
    )(x, w1_bf, b1_f32, w2_bf, b2_f32)


def init_params(key):
    """uniform(-1/sqrt(fan_in), 1/sqrt(fan_in)) like nn.Linear, stored [in, out]."""
    k1, k2, k3, k4 = jax.random.split(key, 4)
    bound1 = 1.0 / jnp.sqrt(D_IN)
    bound2 = 1.0 / jnp.sqrt(D_HID)
    w1 = jax.random.uniform(k1, (D_IN, D_HID), jnp.float32, -bound1, bound1)
    b1 = jax.random.uniform(k2, (D_HID,), jnp.float32, -bound1, bound1)
    w2 = jax.random.uniform(k3, (D_HID, D_OUT), jnp.float32, -bound2, bound2)
    b2 = jax.random.uniform(k4, (D_OUT,), jnp.float32, -bound2, bound2)
    return w1, b1, w2, b2


if __name__ == "__main__":
    key = jax.random.PRNGKey(0)
    kx, kx2, kp = jax.random.split(key, 3)

    w1, b1, w2, b2 = init_params(kp)
    params = prepare_head_params(w1, b1, w2, b2)   # cast weights ONCE

    def ref(x):
        return jnp.maximum(x @ w1 + b1[None, :], 0.0) @ w2 + b2[None, :]

    # Case 1: tiny batch (B=12 < one 16-row tile -> masked partial block).
    B1 = 12
    x1 = jax.random.normal(kx, (B1, D_IN), jnp.float32)
    out1 = jax.block_until_ready(head_forward(x1, params))
    assert out1.shape == (B1, D_OUT), out1.shape
    assert jnp.allclose(out1, ref(x1), atol=5e-2, rtol=5e-2), "mismatch (B=12)"

    # Case 2: B=40 -> tile split into 2 grid steps with a ragged last block.
    B2 = 40
    x2 = jax.random.normal(kx2, (B2, D_IN), jnp.float32)
    out2 = jax.block_until_ready(head_forward(x2, params))
    assert out2.shape == (B2, D_OUT), out2.shape
    assert jnp.allclose(out2, ref(x2), atol=5e-2, rtol=5e-2), "mismatch (B=40)"

    print("KERNEL_OK")
</pallas_src>

<mosaic_0001>
module attributes {stable_mosaic.version = 11 : i64} {
  func.func @head_kernel(%arg0: i32, %arg1: memref<16x2048xf32, #tpu.memory_space<vmem>>, %arg2: memref<2048x1024xbf16, #tpu.memory_space<vmem>>, %arg3: memref<1x1024xf32, #tpu.memory_space<vmem>>, %arg4: memref<1024x512xbf16, #tpu.memory_space<vmem>>, %arg5: memref<1x512xf32, #tpu.memory_space<vmem>>, %arg6: memref<16x512xf32, #tpu.memory_space<vmem>>) attributes {dimension_semantics = [#tpu.dimension_semantics<parallel>], iteration_bounds = array<i64: 1>, scalar_prefetch = 0 : i64, scratch_operands = 0 : i64, tpu.core_type = #tpu.core_type<tc>, window_params = [{transform_indices = @transform_0, window_bounds = array<i64: 16, 2048>}, {pipeline_mode = #tpu.pipeline_mode<synchronous>, transform_indices = @transform_1, window_bounds = array<i64: 2048, 1024>}, {pipeline_mode = #tpu.pipeline_mode<synchronous>, transform_indices = @transform_2, window_bounds = array<i64: 1, 1024>}, {pipeline_mode = #tpu.pipeline_mode<synchronous>, transform_indices = @transform_3, window_bounds = array<i64: 1024, 512>}, {pipeline_mode = #tpu.pipeline_mode<synchronous>, transform_indices = @transform_4, window_bounds = array<i64: 1, 512>}, {transform_indices = @transform_5, window_bounds = array<i64: 16, 512>}]} {
    %c0 = arith.constant 0 : index
    %c0_0 = arith.constant 0 : index
    %0 = vector.load %arg1[%c0, %c0_0] : memref<16x2048xf32, #tpu.memory_space<vmem>>, vector<16x2048xf32>
    %1 = arith.truncf %0 : vector<16x2048xf32> to vector<16x2048xbf16>
    %c0_1 = arith.constant 0 : index
    %c0_2 = arith.constant 0 : index
    %2 = vector.load %arg2[%c0_1, %c0_2] : memref<2048x1024xbf16, #tpu.memory_space<vmem>>, vector<2048x1024xbf16>
    %cst = arith.constant dense<0.000000e+00> : vector<16x1024xf32>
    %3 = tpu.matmul %1, %2, %cst {dimension_numbers = #tpu.dot_dimension_numbers<[1], [0], [0], [1], [0, 0, 1, 1], [], []>} : vector<16x2048xbf16>, vector<2048x1024xbf16>, vector<16x1024xf32> -> vector<16x1024xf32>
    %c0_3 = arith.constant 0 : index
    %c0_4 = arith.constant 0 : index
    %4 = vector.load %arg3[%c0_3, %c0_4] : memref<1x1024xf32, #tpu.memory_space<vmem>>, vector<1x1024xf32>
    %5 = vector.broadcast %4 : vector<1x1024xf32> to vector<16x1024xf32>
    %6 = arith.addf %3, %5 : vector<16x1024xf32>
    %cst_5 = arith.constant 0.000000e+00 : f32
    %7 = vector.broadcast %cst_5 : f32 to vector<16x1024xf32>
    %8 = arith.maximumf %6, %7 : vector<16x1024xf32>
    %9 = arith.truncf %8 : vector<16x1024xf32> to vector<16x1024xbf16>
    %c0_6 = arith.constant 0 : index
    %c0_7 = arith.constant 0 : index
    %10 = vector.load %arg4[%c0_6, %c0_7] : memref<1024x512xbf16, #tpu.memory_space<vmem>>, vector<1024x512xbf16>
    %cst_8 = arith.constant dense<0.000000e+00> : vector<16x512xf32>
    %11 = tpu.matmul %9, %10, %cst_8 {dimension_numbers = #tpu.dot_dimension_numbers<[1], [0], [0], [1], [0, 0, 1, 1], [], []>} : vector<16x1024xbf16>, vector<1024x512xbf16>, vector<16x512xf32> -> vector<16x512xf32>
    %c0_9 = arith.constant 0 : index
    %c0_10 = arith.constant 0 : index
    %12 = vector.load %arg5[%c0_9, %c0_10] : memref<1x512xf32, #tpu.memory_space<vmem>>, vector<1x512xf32>
    %13 = vector.broadcast %12 : vector<1x512xf32> to vector<16x512xf32>
    %14 = arith.addf %11, %13 : vector<16x512xf32>
    %c0_11 = arith.constant 0 : index
    %c0_12 = arith.constant 0 : index
    %15 = vector.load %arg6[%c0_11, %c0_12] : memref<16x512xf32, #tpu.memory_space<vmem>>, vector<16x512xf32>
    tpu.vector_store %arg6[%c0_11, %c0_12], %14 {strides = array<i32>} : memref<16x512xf32, #tpu.memory_space<vmem>>, vector<16x512xf32>,
    return
  }
  func.func @transform_0(%arg0: i32) -> (i32, i32) {
    %c0_i32 = arith.constant 0 : i32
    %c0_i32_0 = arith.constant 0 : i32
    return %arg0, %c0_i32 : i32, i32
  }
  func.func @transform_1(%arg0: i32) -> (i32, i32) {
    %c0_i32 = arith.constant 0 : i32
    %c0_i32_0 = arith.constant 0 : i32
    %c0_i32_1 = arith.constant 0 : i32
    return %c0_i32, %c0_i32_0 : i32, i32
  }
  func.func @transform_2(%arg0: i32) -> (i32, i32) {
    %c0_i32 = arith.constant 0 : i32
    %c0_i32_0 = arith.constant 0 : i32
    %c0_i32_1 = arith.constant 0 : i32
    return %c0_i32, %c0_i32_0 : i32, i32
  }
  func.func @transform_3(%arg0: i32) -> (i32, i32) {
    %c0_i32 = arith.constant 0 : i32
    %c0_i32_0 = arith.constant 0 : i32
    %c0_i32_1 = arith.constant 0 : i32
    return %c0_i32, %c0_i32_0 : i32, i32
  }
  func.func @transform_4(%arg0: i32) -> (i32, i32) {
    %c0_i32 = arith.constant 0 : i32
    %c0_i32_0 = arith.constant 0 : i32
    %c0_i32_1 = arith.constant 0 : i32
    return %c0_i32, %c0_i32_0 : i32, i32
  }
  func.func @transform_5(%arg0: i32) -> (i32, i32) {
    %c0_i32 = arith.constant 0 : i32
    %c0_i32_0 = arith.constant 0 : i32
    return %arg0, %c0_i32 : i32, i32
  }
}

</mosaic_0001>

<bundles_post_ra>
// kernel: tpu_custom_call.1
= control target key start
LH: loop header
LB: loop body
LE: loop exit
PB: predicated region body
PF: predicated region fallthrough
CT: control target
= control target key end

     0   :  { %10 = vsyncpa [#allocation3], 0  ;;  %s17548_s0 = inlined_call_operand.hbm [shape: f32[12,2048], index: 0, kind: input, shape index: {}]   ;;  %s17549_s1 = inlined_call_operand.hbm [shape: bf16[2048,1024], index: 1, kind: input, shape index: {}]   ;;  %s17550_s2 = inlined_call_operand.hbm [shape: f32[1,1024], index: 2, kind: input, shape index: {}]   ;;  %s17551_s3 = inlined_call_operand.hbm [shape: bf16[1024,512], index: 3, kind: input, shape index: {}]   ;;  %s17552_s4 = inlined_call_operand.hbm [shape: f32[1,512], index: 4, kind: input, shape index: {}]   ;;  %s17553_s5 = inlined_call_operand.hbm [shape: f32[12,512], index: 5, kind: output, shape index: {}]  }
   0x1   :  { %11 = vsyncpa [#allocation6], 0 }
   0x2   :  { %12 = vsyncpa [#allocation9], 0  ;;  %s31_s20 = sshll.u32 %s17549_s1, 4  ;;  %s32_s20 = int_to_ptr.hbm [resolvable:$true] %s31_s20 }
   0x3   :  { %13 = vsyncpa [#allocation4], 0  ;;  %s16714_s21 = smov [#allocation5]   ;;  %s55_s25 = sshll.u32 %s17551_s3, 4  ;;  %s56_s25 = int_to_ptr.hbm [resolvable:$true] %s55_s25 }
   0x4   :  { %s33_s22 = sshll.u32 %s16714_s21, 4  ;;  %s16715_s26 = smov 512   ;;  %s34_s22 = int_to_ptr.vmem [resolvable:$true] %s33_s22 }
   0x5   :  { %s16716_s27 = smov 32   ;;  %s16717_s28 = smov [#allocation8]  }
   0x6   :  { %39 = dma.hbm_to_vmem [thread:$0]  %s32_s20, 131072, %s34_s22, [#allocation6], %s16715_s26, %s16715_s26, %s16716_s27  }
   0x7   :  { %s57_s29 = sshll.u32 %s16717_s28, 4  ;;  %s16718_s1 = smov 256   ;;  %s58_s29 = int_to_ptr.vmem [resolvable:$true] %s57_s29 }
   0x8   :  { %s16719_s30 = smov 16   ;;  %s18_s8 = sshll.u32 %s17548_s0, 4  ;;  %s19_s8 = int_to_ptr.hbm [resolvable:$true] %s18_s8 }
   0x9   :  { %63 = dma.hbm_to_vmem [thread:$0]  %s56_s25, 32768, %s58_s29, [#allocation9], %s16718_s1, %s16718_s1, %s16719_s30  }
   0xa   :  { %s16720_s9 = smov [#allocation2]   ;;  %s45_s12 = sshll.u32 %s17550_s2, 4  ;;  %s46_s12 = int_to_ptr.hbm [resolvable:$true] %s45_s12 }
   0xb   :  { %s20_s3 = sshll.u32 %s16720_s9, 4  ;;  %s16721_s13 = smov 2048   ;;  %s21_s3 = int_to_ptr.vmem [resolvable:$true] %s20_s3 }
   0xc   :  { %s16722_s14 = smov 128   ;;  %s16723_s15 = smov [#allocation7]  }
   0xd   :  { %26 = dma.hbm_to_vmem [thread:$0]  %s19_s8, 4096, %s21_s3, [#allocation3], %s16721_s13, %s16721_s13, %s16722_s14  }
   0xe   :  { %s47_s16 = sshll.u32 %s16723_s15, 4  ;;  %s69_s19 = sshll.u32 %s17552_s4, 4  ;;  %s48_s16 = int_to_ptr.vmem [resolvable:$true] %s47_s16  ;;  %s70_s19 = int_to_ptr.hbm [resolvable:$true] %s69_s19 }
   0xf   :  { %50 = dma.hbm_to_vmem [thread:$0]  %s46_s12, 128, %s48_s16, [#allocation6]  }
  0x10   :  { %s16724_s0 = smov [#allocation10]  }
  0x11   :  { %s71_s20 = sshll.u32 %s16724_s0, 4  ;;  %s72_s20 = int_to_ptr.vmem [resolvable:$true] %s71_s20 }
  0x12   :  { %74 = dma.hbm_to_vmem [thread:$0]  %s70_s19, 64, %s72_s20, [#allocation9]  }
  0x13   :  { %16706 = dma.done.wait [#allocation3], 4096  }
  0x14   :  { %16707 = vsyncadd [#allocation3], 4294963200 }
  0x15   :  { %16708 = dma.done.wait [#allocation6], 131200  }
  0x16   :  { %16709 = vsyncadd [#allocation6], 4294836096 }
  0x17   :  { %16710 = dma.done.wait [#allocation9], 32832  }
  0x18   :  { %16711 = vsyncadd [#allocation9], 4294934464  ;;  %v10370_v0 = vld [vmem:[#allocation5 + $0x1c0] sm:$0xf]  ;;  %s16725_s2 = smov [#allocation11]   ;;  %s10129_s23 = sshll.u32 %s17553_s5, 4  ;;  %s10130_s23 = int_to_ptr.hbm [resolvable:$true] %s10129_s23 }
  0x19   :  { %v15324_v1 = vld [vmem:[#allocation5 + $0x1dc] sm:$0xf0]  ;;  %s10127_s4 = sshll.u32 %s16725_s2, 4  ;;  %s10128_s4 = int_to_ptr.vmem [resolvable:$true] %s10127_s4 }
  0x1a   :  { %v10626_v2 = vld [vmem:[#allocation5 + $0x3c0] sm:$0xf]  ;;  %v10371_v3 = vor.u32 %v15324_v1, %v10370_v0 }
  0x1b   :  { %v15388_v4 = vld [vmem:[#allocation5 + $0x3dc] sm:$0xf0] }
  0x1c   :  { %v10882_v5 = vld [vmem:[#allocation5 + $0x5c0] sm:$0xf]  ;;  %v10627_v7 = vor.u32 %v15388_v4, %v10626_v2  ;;  %6305 = vmatpush.bf16.msra.mxu0 %v10371_v3 }
  0x1d   :  { %v15452_v6 = vld [vmem:[#allocation5 + $0x5dc] sm:$0xf0] }
  0x1e   :  { %v10883_v8 = vor.u32 %v15452_v6, %v10882_v5  ;;  %v11138_v9 = vld [vmem:[#allocation5 + $0x7c0] sm:$0xf]  ;;  %6319 = vmatpush.bf16.msra.mxu1 %v10627_v7 }
  0x1f   :  { %v15516_v10 = vld [vmem:[#allocation5 + $0x7dc] sm:$0xf0] }
  0x20   :  { %v10338_v11 = vld [vmem:[#allocation5 + $0x180] sm:$0xf]  ;;  %v11139_v12 = vor.u32 %v15516_v10, %v11138_v9  ;;  %6333 = vmatpush.bf16.msra.mxu2 %v10883_v8 }
  0x21   :  { %v15316_v13 = vld [vmem:[#allocation5 + $0x19c] sm:$0xf0] }
  0x22   :  { %v10594_v14 = vld [vmem:[#allocation5 + $0x380] sm:$0xf]  ;;  %v10339_v16 = vor.u32 %v15316_v13, %v10338_v11  ;;  %6347 = vmatpush.bf16.msra.mxu3 %v11139_v12 }
  0x23   :  { %v15380_v15 = vld [vmem:[#allocation5 + $0x39c] sm:$0xf0] }
  0x24   :  { %v10595_v17 = vor.u32 %v15380_v15, %v10594_v14  ;;  %v10850_v18 = vld [vmem:[#allocation5 + $0x580] sm:$0xf]  ;;  %6306 = vmatpush.bf16.msra.mxu0 %v10339_v16 }
  0x25   :  { %v15444_v19 = vld [vmem:[#allocation5 + $0x59c] sm:$0xf0] }
  0x26   :  { %v11106_v20 = vld [vmem:[#allocation5 + $0x780] sm:$0xf]  ;;  %v10851_v21 = vor.u32 %v15444_v19, %v10850_v18  ;;  %6320 = vmatpush.bf16.msra.mxu1 %v10595_v17 }
  0x27   :  { %v15508_v22 = vld [vmem:[#allocation5 + $0x79c] sm:$0xf0] }
  0x28   :  { %v10306_v23 = vld [vmem:[#allocation5 + $0x140] sm:$0xf]  ;;  %v11107_v25 = vor.u32 %v15508_v22, %v11106_v20  ;;  %6334 = vmatpush.bf16.msra.mxu2 %v10851_v21 }
  0x29   :  { %v15308_v24 = vld [vmem:[#allocation5 + $0x15c] sm:$0xf0] }
  0x2a   :  { %v10562_v26 = vld [vmem:[#allocation5 + $0x340] sm:$0xf]  ;;  %v10307_v29 = vor.u32 %v15308_v24, %v10306_v23  ;;  %6348 = vmatpush.bf16.msra.mxu3 %v11107_v25 }
  0x2b   :  { %v15372_v27 = vld [vmem:[#allocation5 + $0x35c] sm:$0xf0] }
  0x2c   :  { %v10818_v28 = vld [vmem:[#allocation5 + $0x540] sm:$0xf]  ;;  %v10563_v33 = vor.u32 %v15372_v27, %v10562_v26  ;;  %6307 = vmatpush.bf16.msra.mxu0 %v10307_v29 }
  0x2d   :  { %v15436_v30 = vld [vmem:[#allocation5 + $0x55c] sm:$0xf0] }
  0x2e   :  { %v11074_v31 = vld [vmem:[#allocation5 + $0x740] sm:$0xf]  ;;  %v10819_v34 = vor.u32 %v15436_v30, %v10818_v28  ;;  %6321 = vmatpush.bf16.msra.mxu1 %v10563_v33 }
  0x2f   :  { %v15500_v32 = vld [vmem:[#allocation5 + $0x75c] sm:$0xf0] }
  0x30   :  { %v10274_v35 = vld [vmem:[#allocation5 + $0x100] sm:$0xf]  ;;  %v11075_v38 = vor.u32 %v15500_v32, %v11074_v31  ;;  %6335 = vmatpush.bf16.msra.mxu2 %v10819_v34 }
  0x31   :  { %v15300_v36 = vld [vmem:[#allocation5 + $0x11c] sm:$0xf0] }
  0x32   :  { %v10530_v37 = vld [vmem:[#allocation5 + $0x300] sm:$0xf]  ;;  %v10275_v44 = vor.u32 %v15300_v36, %v10274_v35  ;;  %6349 = vmatpush.bf16.msra.mxu3 %v11075_v38 }
  0x33   :  { %v15364_v39 = vld [vmem:[#allocation5 + $0x31c] sm:$0xf0] }
  0x34   :  { %v10786_v40 = vld [vmem:[#allocation5 + $0x500] sm:$0xf]  ;;  %v10531_v45 = vor.u32 %v15364_v39, %v10530_v37  ;;  %6308 = vmatpush.bf16.msra.mxu0 %v10275_v44 }
  0x35   :  { %v15428_v41 = vld [vmem:[#allocation5 + $0x51c] sm:$0xf0] }
  0x36   :  { %v11042_v42 = vld [vmem:[#allocation5 + $0x700] sm:$0xf]  ;;  %v10787_v46 = vor.u32 %v15428_v41, %v10786_v40  ;;  %6322 = vmatpush.bf16.msra.mxu1 %v10531_v45 }
  0x37   :  { %v15492_v43 = vld [vmem:[#allocation5 + $0x71c] sm:$0xf0] }
  0x38   :  { %v10242_v47 = vld [vmem:[#allocation5 + $0xc0] sm:$0xf]  ;;  %v11043_v50 = vor.u32 %v15492_v43, %v11042_v42  ;;  %6336 = vmatpush.bf16.msra.mxu2 %v10787_v46 }
  0x39   :  { %v15292_v48 = vld [vmem:[#allocation5 + $0xdc] sm:$0xf0] }
  0x3a   :  { %v10498_v49 = vld [vmem:[#allocation5 + $0x2c0] sm:$0xf]  ;;  %v10243_v56 = vor.u32 %v15292_v48, %v10242_v47  ;;  %6350 = vmatpush.bf16.msra.mxu3 %v11043_v50 }
  0x3b   :  { %v15356_v51 = vld [vmem:[#allocation5 + $0x2dc] sm:$0xf0] }
  0x3c   :  { %v10754_v52 = vld [vmem:[#allocation5 + $0x4c0] sm:$0xf]  ;;  %v10499_v57 = vor.u32 %v15356_v51, %v10498_v49  ;;  %6309 = vmatpush.bf16.msra.mxu0 %v10243_v56 }
  0x3d   :  { %v15420_v53 = vld [vmem:[#allocation5 + $0x4dc] sm:$0xf0] }
  0x3e   :  { %v11010_v54 = vld [vmem:[#allocation5 + $0x6c0] sm:$0xf]  ;;  %v10755_v58 = vor.u32 %v15420_v53, %v10754_v52  ;;  %6323 = vmatpush.bf16.msra.mxu1 %v10499_v57 }
  0x3f   :  { %v15484_v55 = vld [vmem:[#allocation5 + $0x6dc] sm:$0xf0] }
  0x40   :  { %v10210_v59 = vld [vmem:[#allocation5 + $0x80] sm:$0xf]  ;;  %v11011_v62 = vor.u32 %v15484_v55, %v11010_v54  ;;  %6337 = vmatpush.bf16.msra.mxu2 %v10755_v58  ;;  %v97_v54 = vld [vmem:[#allocation2 + $0x10] sm:$0xff] }
  0x41   :  { %v15284_v60 = vld [vmem:[#allocation5 + $0x9c] sm:$0xf0] }
  0x42   :  { %v10466_v61 = vld [vmem:[#allocation5 + $0x280] sm:$0xf]  ;;  %v10211_v4 = vor.u32 %v15284_v60, %v10210_v59  ;;  %6351 = vmatpush.bf16.msra.mxu3 %v11011_v62  ;;  %v113_v59 = vld [vmem:[#allocation2 + $0x90] sm:$0xff] }
  0x43   :  { %v15348_v63 = vld [vmem:[#allocation5 + $0x29c] sm:$0xf0] }
  0x44   :  { %v10722_v0 = vld [vmem:[#allocation5 + $0x480] sm:$0xf]  ;;  %v10467_v5 = vor.u32 %v15348_v63, %v10466_v61  ;;  %6310 = vmatpush.bf16.msra.mxu0 %v10211_v4 }
  0x45   :  { %v15412_v1 = vld [vmem:[#allocation5 + $0x49c] sm:$0xf0] }
  0x46   :  { %v10978_v2 = vld [vmem:[#allocation5 + $0x680] sm:$0xf]  ;;  %v10723_v6 = vor.u32 %v15412_v1, %v10722_v0  ;;  %6324 = vmatpush.bf16.msra.mxu1 %v10467_v5  ;;  %v16776_v1 = vpack.c.bf16 %v113_v59, %v97_v54 }
  0x47   :  { %v15476_v3 = vld [vmem:[#allocation5 + $0x69c] sm:$0xf0] }
  0x48   :  { %v10178_v7 = vld [vmem:[#allocation5 + $0x40] sm:$0xf]  ;;  %v10979_v10 = vor.u32 %v15476_v3, %v10978_v2  ;;  %6338 = vmatpush.bf16.msra.mxu2 %v10723_v6  ;;  %v96_v6 = vld [vmem:[#allocation2 + $0x8] sm:$0xff] }
  0x49   :  { %v15276_v8 = vld [vmem:[#allocation5 + $0x5c] sm:$0xf0] }
  0x4a   :  { %v10434_v9 = vld [vmem:[#allocation5 + $0x240] sm:$0xf]  ;;  %v10179_v16 = vor.u32 %v15276_v8, %v10178_v7  ;;  %6352 = vmatpush.bf16.msra.mxu3 %v10979_v10  ;;  %v112_v7 = vld [vmem:[#allocation2 + $0x88] sm:$0xff]  ;;  %v98_v8 = vld [vmem:[#allocation2 + $0x18] sm:$0xff] }
  0x4b   :  { %v15340_v11 = vld [vmem:[#allocation5 + $0x25c] sm:$0xf0]  ;;  %v16780_v10 = vpack.c.bf16 %v112_v7, %v96_v6 }
  0x4c   :  { %v10690_v12 = vld [vmem:[#allocation5 + $0x440] sm:$0xf]  ;;  %v10435_v19 = vor.u32 %v15340_v11, %v10434_v9  ;;  %6311 = vmatpush.bf16.msra.mxu0 %v10179_v16  ;;  %v114_v11 = vld [vmem:[#allocation2 + $0x98] sm:$0xff] }
  0x4d   :  { %v15404_v13 = vld [vmem:[#allocation5 + $0x45c] sm:$0xf0] }
  0x4e   :  { %v10946_v14 = vld [vmem:[#allocation5 + $0x640] sm:$0xf]  ;;  %v10691_v20 = vor.u32 %v15404_v13, %v10690_v12  ;;  %6325 = vmatpush.bf16.msra.mxu1 %v10435_v19 }
  0x4f   :  { %v15468_v15 = vld [vmem:[#allocation5 + $0x65c] sm:$0xf0] }
  0x50   :  { %v10146_v17 = vld [vmem:[#allocation5] sm:$0xf]  ;;  %v10947_v24 = vor.u32 %v15468_v15, %v10946_v14  ;;  %6339 = vmatpush.bf16.msra.mxu2 %v10691_v20 }
  0x51   :  { %v15268_v18 = vld [vmem:[#allocation5 + $0x1c] sm:$0xf0] }
  0x52   :  { %v10402_v21 = vld [vmem:[#allocation5 + $0x200] sm:$0xf]  ;;  %v10147_v31 = vor.u32 %v15268_v18, %v10146_v17  ;;  %6353 = vmatpush.bf16.msra.mxu3 %v10947_v24  ;;  %v16782_v17 = vpack.c.bf16 %v114_v11, %v98_v8 }
  0x53   :  { %v15332_v22 = vld [vmem:[#allocation5 + $0x21c] sm:$0xf0] }
  0x54   :  { %v10658_v23 = vld [vmem:[#allocation5 + $0x400] sm:$0xf]  ;;  %v10403_v35 = vor.u32 %v15332_v22, %v10402_v21  ;;  %6312 = vmatpush.bf16.msra.mxu0 %v10147_v31 }
  0x55   :  { %v15396_v25 = vld [vmem:[#allocation5 + $0x41c] sm:$0xf0] }
  0x56   :  { %v10914_v26 = vld [vmem:[#allocation5 + $0x600] sm:$0xf]  ;;  %v10659_v36 = vor.u32 %v15396_v25, %v10658_v23  ;;  %6326 = vmatpush.bf16.msra.mxu1 %v10403_v35 }
  0x57   :  { %v15460_v27 = vld [vmem:[#allocation5 + $0x61c] sm:$0xf0] }
  0x58   :  { %v11394_v28 = vld [vmem:[#allocation5 + $0x9c0] sm:$0xf]  ;;  %v10915_v39 = vor.u32 %v15460_v27, %v10914_v26  ;;  %6340 = vmatpush.bf16.msra.mxu2 %v10659_v36 }
  0x59   :  { %v15580_v29 = vld [vmem:[#allocation5 + $0x9dc] sm:$0xf0]  ;;  %6327 = vmatmul.bf16.vlgmr.msra.gmra.mxu1 %v16780_v10 }
  0x5a   :  { %v11650_v30 = vld [vmem:[#allocation5 + $0xbc0] sm:$0xf]  ;;  %v11395_v40 = vor.u32 %v15580_v29, %v11394_v28  ;;  %6354 = vmatpush.bf16.msra.mxu3 %v10915_v39 }
  0x5b   :  { %v15644_v32 = vld [vmem:[#allocation5 + $0xbdc] sm:$0xf0]  ;;  %6341 = vmatmul.bf16.vlgmr.msra.gmra.mxu2 %v16776_v1 }
  0x5c   :  { %v11906_v33 = vld [vmem:[#allocation5 + $0xdc0] sm:$0xf]  ;;  %v11651_v43 = vor.u32 %v15644_v32, %v11650_v30  ;;  %6361 = vmatpush.bf16.msrb.mxu0 %v11395_v40 }
  0x5d   :  { %v15708_v34 = vld [vmem:[#allocation5 + $0xddc] sm:$0xf0]  ;;  %6355 = vmatmul.bf16.vlgmr.msra.gmra.mxu3 %v16782_v17 }
  0x5e   :  { %v12162_v37 = vld [vmem:[#allocation5 + $0xfc0] sm:$0xf]  ;;  %v11907_v44 = vor.u32 %v15708_v34, %v11906_v33  ;;  %6375 = vmatpush.bf16.msrb.mxu1 %v11651_v43 }
  0x5f   :  { %v15772_v38 = vld [vmem:[#allocation5 + $0xfdc] sm:$0xf0] }
  0x60   :  { %v11362_v41 = vld [vmem:[#allocation5 + $0x980] sm:$0xf]  ;;  %v12163_v48 = vor.u32 %v15772_v38, %v12162_v37  ;;  %6389 = vmatpush.bf16.msrb.mxu2 %v11907_v44 }
  0x61   :  { %v15572_v42 = vld [vmem:[#allocation5 + $0x99c] sm:$0xf0] }
  0x62   :  { %v11618_v45 = vld [vmem:[#allocation5 + $0xb80] sm:$0xf]  ;;  %v11363_v55 = vor.u32 %v15572_v42, %v11362_v41  ;;  %6403 = vmatpush.bf16.msrb.mxu3 %v12163_v48 }
  0x63   :  { %v15636_v46 = vld [vmem:[#allocation5 + $0xb9c] sm:$0xf0] }
  0x64   :  { %v11874_v47 = vld [vmem:[#allocation5 + $0xd80] sm:$0xf]  ;;  %v11619_v60 = vor.u32 %v15636_v46, %v11618_v45  ;;  %6362 = vmatpush.bf16.msrb.mxu0 %v11363_v55 }
  0x65   :  { %v15700_v49 = vld [vmem:[#allocation5 + $0xd9c] sm:$0xf0] }
  0x66   :  { %v12130_v50 = vld [vmem:[#allocation5 + $0xf80] sm:$0xf]  ;;  %v11875_v61 = vor.u32 %v15700_v49, %v11874_v47  ;;  %6376 = vmatpush.bf16.msrb.mxu1 %v11619_v60 }
  0x67   :  { %v15764_v51 = vld [vmem:[#allocation5 + $0xf9c] sm:$0xf0] }
  0x68   :  { %v95_v52 = vld [vmem:[#allocation2] sm:$0xff]  ;;  %v12131_v2 = vor.u32 %v15764_v51, %v12130_v50  ;;  %6390 = vmatpush.bf16.msrb.mxu2 %v11875_v61 }
  0x69   :  { %v111_v53 = vld [vmem:[#allocation2 + $0x80] sm:$0xff] }
  0x6a   :  { %v11330_v56 = vld [vmem:[#allocation5 + $0x940] sm:$0xf]  ;;  %v16774_v58 = vpack.c.bf16 %v111_v53, %v95_v52  ;;  %6404 = vmatpush.bf16.msrb.mxu3 %v12131_v2 }
  0x6b   :  { %v15564_v57 = vld [vmem:[#allocation5 + $0x95c] sm:$0xf0] }
  0x6c   :  { %v11586_v62 = vld [vmem:[#allocation5 + $0xb40] sm:$0xf]  ;;  %6313 = vmatmul.bf16.vlgmr.msra.gmra.mxu0 %v16774_v58  ;;  %v11331_v9 = vor.u32 %v15564_v57, %v11330_v56 }
  0x6d   :  { %v15628_v63 = vld [vmem:[#allocation5 + $0xb5c] sm:$0xf0] }
  0x6e   :  { %v11842_v0 = vld [vmem:[#allocation5 + $0xd40] sm:$0xf]  ;;  %v11587_v12 = vor.u32 %v15628_v63, %v11586_v62  ;;  %6363 = vmatpush.bf16.msrb.mxu0 %v11331_v9 }
  0x6f   :  { %v15692_v3 = vld [vmem:[#allocation5 + $0xd5c] sm:$0xf0] }
  0x70   :  { %v12098_v4 = vld [vmem:[#allocation5 + $0xf40] sm:$0xf]  ;;  %v11843_v13 = vor.u32 %v15692_v3, %v11842_v0  ;;  %6377 = vmatpush.bf16.msrb.mxu1 %v11587_v12 }
  0x71   :  { %v15756_v5 = vld [vmem:[#allocation5 + $0xf5c] sm:$0xf0] }
  0x72   :  { %v11298_v14 = vld [vmem:[#allocation5 + $0x900] sm:$0xf]  ;;  %v12099_v18 = vor.u32 %v15756_v5, %v12098_v4  ;;  %6391 = vmatpush.bf16.msrb.mxu2 %v11843_v13 }
  0x73   :  { %v15556_v15 = vld [vmem:[#allocation5 + $0x91c] sm:$0xf0] }
  0x74   :  { %v11554_v16 = vld [vmem:[#allocation5 + $0xb00] sm:$0xf]  ;;  %v11299_v24 = vor.u32 %v15556_v15, %v11298_v14  ;;  %6405 = vmatpush.bf16.msrb.mxu3 %v12099_v18 }
  0x75   :  { %v15620_v19 = vld [vmem:[#allocation5 + $0xb1c] sm:$0xf0] }
  0x76   :  { %v11810_v20 = vld [vmem:[#allocation5 + $0xd00] sm:$0xf]  ;;  %v11555_v25 = vor.u32 %v15620_v19, %v11554_v16  ;;  %6364 = vmatpush.bf16.msrb.mxu0 %v11299_v24 }
  0x77   :  { %v15684_v21 = vld [vmem:[#allocation5 + $0xd1c] sm:$0xf0] }
  0x78   :  { %v12066_v22 = vld [vmem:[#allocation5 + $0xf00] sm:$0xf]  ;;  %v11811_v26 = vor.u32 %v15684_v21, %v11810_v20  ;;  %6378 = vmatpush.bf16.msrb.mxu1 %v11555_v25  ;;  %v101_v25 = vld [vmem:[#allocation2 + $0x30] sm:$0xff] }
  0x79   :  { %v15748_v23 = vld [vmem:[#allocation5 + $0xf1c] sm:$0xf0] }
  0x7a   :  { %v11266_v27 = vld [vmem:[#allocation5 + $0x8c0] sm:$0xf]  ;;  %v12067_v30 = vor.u32 %v15748_v23, %v12066_v22  ;;  %6392 = vmatpush.bf16.msrb.mxu2 %v11811_v26  ;;  %v117_v26 = vld [vmem:[#allocation2 + $0xb0] sm:$0xff] }
  0x7b   :  { %v15548_v28 = vld [vmem:[#allocation5 + $0x8dc] sm:$0xf0] }
  0x7c   :  { %v11522_v29 = vld [vmem:[#allocation5 + $0xac0] sm:$0xf]  ;;  %v11267_v36 = vor.u32 %v15548_v28, %v11266_v27  ;;  %6406 = vmatpush.bf16.msrb.mxu3 %v12067_v30  ;;  %v100_v27 = vld [vmem:[#allocation2 + $0x28] sm:$0xff] }
  0x7d   :  { %v15612_v31 = vld [vmem:[#allocation5 + $0xadc] sm:$0xf0]  ;;  %v116_v30 = vld [vmem:[#allocation2 + $0xa8] sm:$0xff] }
  0x7e   :  { %v11778_v32 = vld [vmem:[#allocation5 + $0xcc0] sm:$0xf]  ;;  %v11523_v37 = vor.u32 %v15612_v31, %v11522_v29  ;;  %6365 = vmatpush.bf16.msrb.mxu0 %v11267_v36  ;;  %v102_v31 = vld [vmem:[#allocation2 + $0x38] sm:$0xff] }
  0x7f   :  { %v15676_v33 = vld [vmem:[#allocation5 + $0xcdc] sm:$0xf0] }
  0x80   :  { %v12034_v34 = vld [vmem:[#allocation5 + $0xec0] sm:$0xf]  ;;  %v11779_v38 = vor.u32 %v15676_v33, %v11778_v32  ;;  %6379 = vmatpush.bf16.msrb.mxu1 %v11523_v37  ;;  %v118_v32 = vld [vmem:[#allocation2 + $0xb8] sm:$0xff] }
  0x81   :  { %v15740_v35 = vld [vmem:[#allocation5 + $0xedc] sm:$0xf0] }
  0x82   :  { %v11234_v39 = vld [vmem:[#allocation5 + $0x880] sm:$0xf]  ;;  %v12035_v42 = vor.u32 %v15740_v35, %v12034_v34  ;;  %6393 = vmatpush.bf16.msrb.mxu2 %v11779_v38 }
  0x83   :  { %v15540_v40 = vld [vmem:[#allocation5 + $0x89c] sm:$0xf0] }
  0x84   :  { %v11490_v41 = vld [vmem:[#allocation5 + $0xa80] sm:$0xf]  ;;  %v11235_v48 = vor.u32 %v15540_v40, %v11234_v39  ;;  %6407 = vmatpush.bf16.msrb.mxu3 %v12035_v42 }
  0x85   :  { %v15604_v43 = vld [vmem:[#allocation5 + $0xa9c] sm:$0xf0] }
  0x86   :  { %v11746_v44 = vld [vmem:[#allocation5 + $0xc80] sm:$0xf]  ;;  %v11491_v50 = vor.u32 %v15604_v43, %v11490_v41  ;;  %6366 = vmatpush.bf16.msrb.mxu0 %v11235_v48  ;;  %v16788_v43 = vpack.c.bf16 %v117_v26, %v101_v25 }
  0x87   :  { %v15668_v45 = vld [vmem:[#allocation5 + $0xc9c] sm:$0xf0] }
  0x88   :  { %v12002_v46 = vld [vmem:[#allocation5 + $0xe80] sm:$0xf]  ;;  %v11747_v51 = vor.u32 %v15668_v45, %v11746_v44  ;;  %6380 = vmatpush.bf16.msrb.mxu1 %v11491_v50  ;;  %v16790_v44 = vpack.c.bf16 %v116_v30, %v100_v27 }
  0x89   :  { %v15732_v47 = vld [vmem:[#allocation5 + $0xe9c] sm:$0xf0] }
  0x8a   :  { %v11202_v49 = vld [vmem:[#allocation5 + $0x840] sm:$0xf]  ;;  %v12003_v55 = vor.u32 %v15732_v47, %v12002_v46  ;;  %6394 = vmatpush.bf16.msrb.mxu2 %v11747_v51  ;;  %v16792_v47 = vpack.c.bf16 %v118_v32, %v102_v31 }
  0x8b   :  { %v15532_v52 = vld [vmem:[#allocation5 + $0x85c] sm:$0xf0] }
  0x8c   :  { %v11458_v53 = vld [vmem:[#allocation5 + $0xa40] sm:$0xf]  ;;  %v11203_v63 = vor.u32 %v15532_v52, %v11202_v49  ;;  %6408 = vmatpush.bf16.msrb.mxu3 %v12003_v55 }
  0x8d   :  { %v15596_v54 = vld [vmem:[#allocation5 + $0xa5c] sm:$0xf0] }
  0x8e   :  { %v11714_v56 = vld [vmem:[#allocation5 + $0xc40] sm:$0xf]  ;;  %v11459_v5 = vor.u32 %v15596_v54, %v11458_v53  ;;  %6367 = vmatpush.bf16.msrb.mxu0 %v11203_v63 }
  0x8f   :  { %v15660_v57 = vld [vmem:[#allocation5 + $0xc5c] sm:$0xf0] }
  0x90   :  { %v11970_v59 = vld [vmem:[#allocation5 + $0xe40] sm:$0xf]  ;;  %v11715_v6 = vor.u32 %v15660_v57, %v11714_v56  ;;  %6381 = vmatpush.bf16.msrb.mxu1 %v11459_v5 }
  0x91   :  { %v15724_v60 = vld [vmem:[#allocation5 + $0xe5c] sm:$0xf0] }
  0x92   :  { %v11170_v61 = vld [vmem:[#allocation5 + $0x800] sm:$0xf]  ;;  %v11971_v11 = vor.u32 %v15724_v60, %v11970_v59  ;;  %6395 = vmatpush.bf16.msrb.mxu2 %v11715_v6 }
  0x93   :  { %v15524_v62 = vld [vmem:[#allocation5 + $0x81c] sm:$0xf0] }
  0x94   :  { %v11426_v0 = vld [vmem:[#allocation5 + $0xa00] sm:$0xf]  ;;  %v11171_v19 = vor.u32 %v15524_v62, %v11170_v61  ;;  %6409 = vmatpush.bf16.msrb.mxu3 %v11971_v11 }
  0x95   :  { %v15588_v2 = vld [vmem:[#allocation5 + $0xa1c] sm:$0xf0] }
  0x96   :  { %v11682_v3 = vld [vmem:[#allocation5 + $0xc00] sm:$0xf]  ;;  %v11427_v23 = vor.u32 %v15588_v2, %v11426_v0  ;;  %6368 = vmatpush.bf16.msrb.mxu0 %v11171_v19 }
  0x97   :  { %v15652_v4 = vld [vmem:[#allocation5 + $0xc1c] sm:$0xf0] }
  0x98   :  { %v11938_v7 = vld [vmem:[#allocation5 + $0xe00] sm:$0xf]  ;;  %v11683_v24 = vor.u32 %v15652_v4, %v11682_v3  ;;  %6382 = vmatpush.bf16.msrb.mxu1 %v11427_v23 }
  0x99   :  { %v15716_v8 = vld [vmem:[#allocation5 + $0xe1c] sm:$0xf0] }
  0x9a   :  { %v12418_v9 = vld [vmem:[#allocation5 + $0x11c0] sm:$0xf]  ;;  %v11939_v28 = vor.u32 %v15716_v8, %v11938_v7  ;;  %6396 = vmatpush.bf16.msrb.mxu2 %v11683_v24 }
  0x9b   :  { %v15836_v12 = vld [vmem:[#allocation5 + $0x11dc] sm:$0xf0]  ;;  %6383 = vmatmul.bf16.vlgmr.msrb.gmra.mxu1 %v16790_v44 }
  0x9c   :  { %v12674_v13 = vld [vmem:[#allocation5 + $0x13c0] sm:$0xf]  ;;  %v12419_v29 = vor.u32 %v15836_v12, %v12418_v9  ;;  %6410 = vmatpush.bf16.msrb.mxu3 %v11939_v28 }
  0x9d   :  { %v15900_v14 = vld [vmem:[#allocation5 + $0x13dc] sm:$0xf0]  ;;  %6397 = vmatmul.bf16.vlgmr.msrb.gmra.mxu2 %v16788_v43 }
  0x9e   :  { %v12930_v15 = vld [vmem:[#allocation5 + $0x15c0] sm:$0xf]  ;;  %v12675_v33 = vor.u32 %v15900_v14, %v12674_v13  ;;  %6417 = vmatpush.bf16.msra.mxu0 %v12419_v29 }
  0x9f   :  { %v15964_v16 = vld [vmem:[#allocation5 + $0x15dc] sm:$0xf0]  ;;  %6411 = vmatmul.bf16.vlgmr.msrb.gmra.mxu3 %v16792_v47 }
  0xa0   :  { %v13186_v18 = vld [vmem:[#allocation5 + $0x17c0] sm:$0xf]  ;;  %v12931_v34 = vor.u32 %v15964_v16, %v12930_v15  ;;  %6431 = vmatpush.bf16.msra.mxu1 %v12675_v33 }
  0xa1   :  { %v16028_v20 = vld [vmem:[#allocation5 + $0x17dc] sm:$0xf0] }
  0xa2   :  { %v99_v21 = vld [vmem:[#allocation2 + $0x20] sm:$0xff]  ;;  %v13187_v38 = vor.u32 %v16028_v20, %v13186_v18  ;;  %6445 = vmatpush.bf16.msra.mxu2 %v12931_v34 }
  0xa3   :  { %v115_v22 = vld [vmem:[#allocation2 + $0xa0] sm:$0xff] }
  0xa4   :  { %v12386_v35 = vld [vmem:[#allocation5 + $0x1180] sm:$0xf]  ;;  %v16786_v39 = vpack.c.bf16 %v115_v22, %v99_v21  ;;  %6459 = vmatpush.bf16.msra.mxu3 %v13187_v38 }
  0xa5   :  { %v15828_v36 = vld [vmem:[#allocation5 + $0x119c] sm:$0xf0] }
  0xa6   :  { %v12642_v37 = vld [vmem:[#allocation5 + $0x1380] sm:$0xf]  ;;  %v12387_v48 = vor.u32 %v15828_v36, %v12386_v35  ;;  %6369 = vmatmul.bf16.vlgmr.msrb.gmra.mxu0 %v16786_v39 }
  0xa7   :  { %v15892_v40 = vld [vmem:[#allocation5 + $0x139c] sm:$0xf0] }
  0xa8   :  { %v12898_v41 = vld [vmem:[#allocation5 + $0x1580] sm:$0xf]  ;;  %v12643_v49 = vor.u32 %v15892_v40, %v12642_v37  ;;  %6418 = vmatpush.bf16.msra.mxu0 %v12387_v48 }
  0xa9   :  { %v15956_v42 = vld [vmem:[#allocation5 + $0x159c] sm:$0xf0] }
  0xaa   :  { %v13154_v45 = vld [vmem:[#allocation5 + $0x1780] sm:$0xf]  ;;  %v12899_v50 = vor.u32 %v15956_v42, %v12898_v41  ;;  %6432 = vmatpush.bf16.msra.mxu1 %v12643_v49 }
  0xab   :  { %v16020_v46 = vld [vmem:[#allocation5 + $0x179c] sm:$0xf0] }
  0xac   :  { %v12354_v51 = vld [vmem:[#allocation5 + $0x1140] sm:$0xf]  ;;  %v13155_v54 = vor.u32 %v16020_v46, %v13154_v45  ;;  %6446 = vmatpush.bf16.msra.mxu2 %v12899_v50 }
  0xad   :  { %v15820_v52 = vld [vmem:[#allocation5 + $0x115c] sm:$0xf0] }
  0xae   :  { %v12610_v53 = vld [vmem:[#allocation5 + $0x1340] sm:$0xf]  ;;  %v12355_v61 = vor.u32 %v15820_v52, %v12354_v51  ;;  %6460 = vmatpush.bf16.msra.mxu3 %v13155_v54 }
  0xaf   :  { %v15884_v55 = vld [vmem:[#allocation5 + $0x135c] sm:$0xf0] }
  0xb0   :  { %v12866_v56 = vld [vmem:[#allocation5 + $0x1540] sm:$0xf]  ;;  %v12611_v62 = vor.u32 %v15884_v55, %v12610_v53  ;;  %6419 = vmatpush.bf16.msra.mxu0 %v12355_v61 }
  0xb1   :  { %v15948_v57 = vld [vmem:[#allocation5 + $0x155c] sm:$0xf0] }
  0xb2   :  { %v13122_v59 = vld [vmem:[#allocation5 + $0x1740] sm:$0xf]  ;;  %v12867_v63 = vor.u32 %v15948_v57, %v12866_v56  ;;  %6433 = vmatpush.bf16.msra.mxu1 %v12611_v62 }
  0xb3   :  { %v16012_v60 = vld [vmem:[#allocation5 + $0x175c] sm:$0xf0] }
  0xb4   :  { %v12322_v0 = vld [vmem:[#allocation5 + $0x1100] sm:$0xf]  ;;  %v13123_v4 = vor.u32 %v16012_v60, %v13122_v59  ;;  %6447 = vmatpush.bf16.msra.mxu2 %v12867_v63 }
  0xb5   :  { %v15812_v2 = vld [vmem:[#allocation5 + $0x111c] sm:$0xf0] }
  0xb6   :  { %v12578_v3 = vld [vmem:[#allocation5 + $0x1300] sm:$0xf]  ;;  %v12323_v11 = vor.u32 %v15812_v2, %v12322_v0  ;;  %6461 = vmatpush.bf16.msra.mxu3 %v13123_v4 }
  0xb7   :  { %v15876_v5 = vld [vmem:[#allocation5 + $0x131c] sm:$0xf0] }
  0xb8   :  { %v12834_v6 = vld [vmem:[#allocation5 + $0x1500] sm:$0xf]  ;;  %v12579_v12 = vor.u32 %v15876_v5, %v12578_v3  ;;  %6420 = vmatpush.bf16.msra.mxu0 %v12323_v11 }
  0xb9   :  { %v15940_v7 = vld [vmem:[#allocation5 + $0x151c] sm:$0xf0] }
  0xba   :  { %v13090_v8 = vld [vmem:[#allocation5 + $0x1700] sm:$0xf]  ;;  %v12835_v13 = vor.u32 %v15940_v7, %v12834_v6  ;;  %6434 = vmatpush.bf16.msra.mxu1 %v12579_v12 }
  0xbb   :  { %v16004_v9 = vld [vmem:[#allocation5 + $0x171c] sm:$0xf0] }
  0xbc   :  { %v12290_v14 = vld [vmem:[#allocation5 + $0x10c0] sm:$0xf]  ;;  %v13091_v18 = vor.u32 %v16004_v9, %v13090_v8  ;;  %6448 = vmatpush.bf16.msra.mxu2 %v12835_v13 }
  0xbd   :  { %v15804_v15 = vld [vmem:[#allocation5 + $0x10dc] sm:$0xf0] }
  0xbe   :  { %v12546_v16 = vld [vmem:[#allocation5 + $0x12c0] sm:$0xf]  ;;  %v12291_v24 = vor.u32 %v15804_v15, %v12290_v14  ;;  %6462 = vmatpush.bf16.msra.mxu3 %v13091_v18  ;;  %v121_v18 = vld [vmem:[#allocation2 + $0xd0] sm:$0xff] }
  0xbf   :  { %v15868_v19 = vld [vmem:[#allocation5 + $0x12dc] sm:$0xf0] }
  0xc0   :  { %v12802_v20 = vld [vmem:[#allocation5 + $0x14c0] sm:$0xf]  ;;  %v12547_v25 = vor.u32 %v15868_v19, %v12546_v16  ;;  %6421 = vmatpush.bf16.msra.mxu0 %v12291_v24  ;;  %v105_v16 = vld [vmem:[#allocation2 + $0x50] sm:$0xff]  ;;  %v104_v19 = vld [vmem:[#allocation2 + $0x48] sm:$0xff] }
  0xc1   :  { %v15932_v21 = vld [vmem:[#allocation5 + $0x14dc] sm:$0xf0]  ;;  %v122_v24 = vld [vmem:[#allocation2 + $0xd8] sm:$0xff] }
  0xc2   :  { %v13058_v22 = vld [vmem:[#allocation5 + $0x16c0] sm:$0xf]  ;;  %v12803_v26 = vor.u32 %v15932_v21, %v12802_v20  ;;  %6435 = vmatpush.bf16.msra.mxu1 %v12547_v25 }
  0xc3   :  { %v15996_v23 = vld [vmem:[#allocation5 + $0x16dc] sm:$0xf0] }
  0xc4   :  { %v12258_v27 = vld [vmem:[#allocation5 + $0x1080] sm:$0xf]  ;;  %v13059_v30 = vor.u32 %v15996_v23, %v13058_v22  ;;  %6449 = vmatpush.bf16.msra.mxu2 %v12803_v26  ;;  %v120_v22 = vld [vmem:[#allocation2 + $0xc8] sm:$0xff]  ;;  %v106_v23 = vld [vmem:[#allocation2 + $0x58] sm:$0xff] }
  0xc5   :  { %v15796_v28 = vld [vmem:[#allocation5 + $0x109c] sm:$0xf0] }
  0xc6   :  { %v12514_v29 = vld [vmem:[#allocation5 + $0x1280] sm:$0xf]  ;;  %v12259_v36 = vor.u32 %v15796_v28, %v12258_v27  ;;  %6463 = vmatpush.bf16.msra.mxu3 %v13059_v30 }
  0xc7   :  { %v15860_v31 = vld [vmem:[#allocation5 + $0x129c] sm:$0xf0] }
  0xc8   :  { %v12770_v32 = vld [vmem:[#allocation5 + $0x1480] sm:$0xf]  ;;  %v12515_v38 = vor.u32 %v15860_v31, %v12514_v29  ;;  %6422 = vmatpush.bf16.msra.mxu0 %v12259_v36  ;;  %v16802_v36 = vpack.c.bf16 %v120_v22, %v104_v19 }
  0xc9   :  { %v15924_v33 = vld [vmem:[#allocation5 + $0x149c] sm:$0xf0] }
  0xca   :  { %v13026_v34 = vld [vmem:[#allocation5 + $0x1680] sm:$0xf]  ;;  %v12771_v40 = vor.u32 %v15924_v33, %v12770_v32  ;;  %6436 = vmatpush.bf16.msra.mxu1 %v12515_v38 }
  0xcb   :  { %v15988_v35 = vld [vmem:[#allocation5 + $0x169c] sm:$0xf0] }
  0xcc   :  { %v12226_v37 = vld [vmem:[#allocation5 + $0x1040] sm:$0xf]  ;;  %v13027_v46 = vor.u32 %v15988_v35, %v13026_v34  ;;  %6450 = vmatpush.bf16.msra.mxu2 %v12771_v40  ;;  %v16800_v35 = vpack.c.bf16 %v121_v18, %v105_v16  ;;  %v16804_v40 = vpack.c.bf16 %v122_v24, %v106_v23 }
  0xcd   :  { %v15788_v41 = vld [vmem:[#allocation5 + $0x105c] sm:$0xf0] }
  0xce   :  { %v12482_v42 = vld [vmem:[#allocation5 + $0x1240] sm:$0xf]  ;;  %v12227_v54 = vor.u32 %v15788_v41, %v12226_v37  ;;  %6464 = vmatpush.bf16.msra.mxu3 %v13027_v46 }
  0xcf   :  { %v15852_v45 = vld [vmem:[#allocation5 + $0x125c] sm:$0xf0] }
  0xd0   :  { %v12738_v48 = vld [vmem:[#allocation5 + $0x1440] sm:$0xf]  ;;  %v12483_v60 = vor.u32 %v15852_v45, %v12482_v42  ;;  %6423 = vmatpush.bf16.msra.mxu0 %v12227_v54 }
  0xd1   :  { %v15916_v49 = vld [vmem:[#allocation5 + $0x145c] sm:$0xf0] }
  0xd2   :  { %v12994_v50 = vld [vmem:[#allocation5 + $0x1640] sm:$0xf]  ;;  %v12739_v61 = vor.u32 %v15916_v49, %v12738_v48  ;;  %6437 = vmatpush.bf16.msra.mxu1 %v12483_v60 }
  0xd3   :  { %v15980_v51 = vld [vmem:[#allocation5 + $0x165c] sm:$0xf0] }
  0xd4   :  { %v12194_v52 = vld [vmem:[#allocation5 + $0x1000] sm:$0xf]  ;;  %v12995_v2 = vor.u32 %v15980_v51, %v12994_v50  ;;  %6451 = vmatpush.bf16.msra.mxu2 %v12739_v61 }
  0xd5   :  { %v15780_v53 = vld [vmem:[#allocation5 + $0x101c] sm:$0xf0] }
  0xd6   :  { %v12450_v55 = vld [vmem:[#allocation5 + $0x1200] sm:$0xf]  ;;  %v12195_v9 = vor.u32 %v15780_v53, %v12194_v52  ;;  %6465 = vmatpush.bf16.msra.mxu3 %v12995_v2 }
  0xd7   :  { %v15844_v56 = vld [vmem:[#allocation5 + $0x121c] sm:$0xf0] }
  0xd8   :  { %v12706_v57 = vld [vmem:[#allocation5 + $0x1400] sm:$0xf]  ;;  %v12451_v14 = vor.u32 %v15844_v56, %v12450_v55  ;;  %6424 = vmatpush.bf16.msra.mxu0 %v12195_v9 }
  0xd9   :  { %v15908_v59 = vld [vmem:[#allocation5 + $0x141c] sm:$0xf0] }
  0xda   :  { %v12962_v62 = vld [vmem:[#allocation5 + $0x1600] sm:$0xf]  ;;  %v12707_v15 = vor.u32 %v15908_v59, %v12706_v57  ;;  %6438 = vmatpush.bf16.msra.mxu1 %v12451_v14 }
  0xdb   :  { %v15972_v63 = vld [vmem:[#allocation5 + $0x161c] sm:$0xf0] }
  0xdc   :  { %v13442_v0 = vld [vmem:[#allocation5 + $0x19c0] sm:$0xf]  ;;  %v12963_v20 = vor.u32 %v15972_v63, %v12962_v62  ;;  %6452 = vmatpush.bf16.msra.mxu2 %v12707_v15 }
  0xdd   :  { %v16092_v3 = vld [vmem:[#allocation5 + $0x19dc] sm:$0xf0]  ;;  %6439 = vmatmul.bf16.vlgmr.msra.gmra.mxu1 %v16802_v36 }
  0xde   :  { %v13698_v4 = vld [vmem:[#allocation5 + $0x1bc0] sm:$0xf]  ;;  %v13443_v21 = vor.u32 %v16092_v3, %v13442_v0  ;;  %6466 = vmatpush.bf16.msra.mxu3 %v12963_v20 }
  0xdf   :  { %v16156_v5 = vld [vmem:[#allocation5 + $0x1bdc] sm:$0xf0]  ;;  %6453 = vmatmul.bf16.vlgmr.msra.gmra.mxu2 %v16800_v35 }
  0xe0   :  { %v13954_v6 = vld [vmem:[#allocation5 + $0x1dc0] sm:$0xf]  ;;  %v13699_v25 = vor.u32 %v16156_v5, %v13698_v4  ;;  %6473 = vmatpush.bf16.msrb.mxu0 %v13443_v21 }
  0xe1   :  { %v16220_v7 = vld [vmem:[#allocation5 + $0x1ddc] sm:$0xf0]  ;;  %6467 = vmatmul.bf16.vlgmr.msra.gmra.mxu3 %v16804_v40 }
  0xe2   :  { %v14210_v8 = vld [vmem:[#allocation5 + $0x1fc0] sm:$0xf]  ;;  %v13955_v26 = vor.u32 %v16220_v7, %v13954_v6  ;;  %6487 = vmatpush.bf16.msrb.mxu1 %v13699_v25 }
  0xe3   :  { %v16284_v11 = vld [vmem:[#allocation5 + $0x1fdc] sm:$0xf0] }
  0xe4   :  { %v103_v12 = vld [vmem:[#allocation2 + $0x40] sm:$0xff]  ;;  %v14211_v30 = vor.u32 %v16284_v11, %v14210_v8  ;;  %6501 = vmatpush.bf16.msrb.mxu2 %v13955_v26 }
  0xe5   :  { %v119_v13 = vld [vmem:[#allocation2 + $0xc0] sm:$0xff] }
  0xe6   :  { %v13410_v27 = vld [vmem:[#allocation5 + $0x1980] sm:$0xf]  ;;  %v16798_v31 = vpack.c.bf16 %v119_v13, %v103_v12  ;;  %6515 = vmatpush.bf16.msrb.mxu3 %v14211_v30 }
  0xe7   :  { %v16084_v28 = vld [vmem:[#allocation5 + $0x199c] sm:$0xf0] }
  0xe8   :  { %v13666_v29 = vld [vmem:[#allocation5 + $0x1b80] sm:$0xf]  ;;  %v13411_v41 = vor.u32 %v16084_v28, %v13410_v27  ;;  %6425 = vmatmul.bf16.vlgmr.msra.gmra.mxu0 %v16798_v31 }
  0xe9   :  { %v16148_v32 = vld [vmem:[#allocation5 + $0x1b9c] sm:$0xf0] }
  0xea   :  { %v13922_v33 = vld [vmem:[#allocation5 + $0x1d80] sm:$0xf]  ;;  %v13667_v42 = vor.u32 %v16148_v32, %v13666_v29  ;;  %6474 = vmatpush.bf16.msrb.mxu0 %v13411_v41 }
  0xeb   :  { %v16212_v34 = vld [vmem:[#allocation5 + $0x1d9c] sm:$0xf0] }
  0xec   :  { %v14178_v37 = vld [vmem:[#allocation5 + $0x1f80] sm:$0xf]  ;;  %v13923_v45 = vor.u32 %v16212_v34, %v13922_v33  ;;  %6488 = vmatpush.bf16.msrb.mxu1 %v13667_v42 }
  0xed   :  { %v16276_v38 = vld [vmem:[#allocation5 + $0x1f9c] sm:$0xf0] }
  0xee   :  { %v13378_v46 = vld [vmem:[#allocation5 + $0x1940] sm:$0xf]  ;;  %v14179_v50 = vor.u32 %v16276_v38, %v14178_v37  ;;  %6502 = vmatpush.bf16.msrb.mxu2 %v13923_v45 }
  0xef   :  { %v16076_v48 = vld [vmem:[#allocation5 + $0x195c] sm:$0xf0] }
  0xf0   :  { %v13634_v49 = vld [vmem:[#allocation5 + $0x1b40] sm:$0xf]  ;;  %v13379_v56 = vor.u32 %v16076_v48, %v13378_v46  ;;  %6516 = vmatpush.bf16.msrb.mxu3 %v14179_v50 }
  0xf1   :  { %v16140_v51 = vld [vmem:[#allocation5 + $0x1b5c] sm:$0xf0] }
  0xf2   :  { %v13890_v52 = vld [vmem:[#allocation5 + $0x1d40] sm:$0xf]  ;;  %v13635_v57 = vor.u32 %v16140_v51, %v13634_v49  ;;  %6475 = vmatpush.bf16.msrb.mxu0 %v13379_v56 }
  0xf3   :  { %v16204_v53 = vld [vmem:[#allocation5 + $0x1d5c] sm:$0xf0] }
  0xf4   :  { %v14146_v54 = vld [vmem:[#allocation5 + $0x1f40] sm:$0xf]  ;;  %v13891_v59 = vor.u32 %v16204_v53, %v13890_v52  ;;  %6489 = vmatpush.bf16.msrb.mxu1 %v13635_v57 }
  0xf5   :  { %v16268_v55 = vld [vmem:[#allocation5 + $0x1f5c] sm:$0xf0] }
  0xf6   :  { %v13346_v60 = vld [vmem:[#allocation5 + $0x1900] sm:$0xf]  ;;  %v14147_v63 = vor.u32 %v16268_v55, %v14146_v54  ;;  %6503 = vmatpush.bf16.msrb.mxu2 %v13891_v59 }
  0xf7   :  { %v16068_v61 = vld [vmem:[#allocation5 + $0x191c] sm:$0xf0] }
  0xf8   :  { %v13602_v62 = vld [vmem:[#allocation5 + $0x1b00] sm:$0xf]  ;;  %v13347_v6 = vor.u32 %v16068_v61, %v13346_v60  ;;  %6517 = vmatpush.bf16.msrb.mxu3 %v14147_v63 }
  0xf9   :  { %v16132_v0 = vld [vmem:[#allocation5 + $0x1b1c] sm:$0xf0] }
  0xfa   :  { %v13858_v2 = vld [vmem:[#allocation5 + $0x1d00] sm:$0xf]  ;;  %v13603_v7 = vor.u32 %v16132_v0, %v13602_v62  ;;  %6476 = vmatpush.bf16.msrb.mxu0 %v13347_v6  ;;  %v15320_v0 = vld [vmem:[#allocation5 + $0x1c4] sm:$0xf] }
  0xfb   :  { %v16196_v3 = vld [vmem:[#allocation5 + $0x1d1c] sm:$0xf0]  ;;  %v15448_v6 = vld [vmem:[#allocation5 + $0x5c4] sm:$0xf] }
  0xfc   :  { %v14114_v4 = vld [vmem:[#allocation5 + $0x1f00] sm:$0xf]  ;;  %v13859_v8 = vor.u32 %v16196_v3, %v13858_v2  ;;  %6490 = vmatpush.bf16.msrb.mxu1 %v13603_v7  ;;  %v10372_v3 = vld [vmem:[#allocation5 + $0x1e0] sm:$0xf0] }
  0xfd   :  { %v16260_v5 = vld [vmem:[#allocation5 + $0x1f1c] sm:$0xf0]  ;;  %v10884_v7 = vld [vmem:[#allocation5 + $0x5e0] sm:$0xf0] }
  0xfe   :  { %v13314_v9 = vld [vmem:[#allocation5 + $0x18c0] sm:$0xf]  ;;  %v14115_v13 = vor.u32 %v16260_v5, %v14114_v4  ;;  %6504 = vmatpush.bf16.msrb.mxu2 %v13859_v8  ;;  %v15384_v4 = vld [vmem:[#allocation5 + $0x3c4] sm:$0xf] }
  0xff   :  { %v16060_v11 = vld [vmem:[#allocation5 + $0x18dc] sm:$0xf0]  ;;  %v10628_v5 = vld [vmem:[#allocation5 + $0x3e0] sm:$0xf0] }
 0x100   :  { %v13570_v12 = vld [vmem:[#allocation5 + $0x1ac0] sm:$0xf]  ;;  %v13315_v20 = vor.u32 %v16060_v11, %v13314_v9  ;;  %6518 = vmatpush.bf16.msrb.mxu3 %v14115_v13  ;;  %v15512_v8 = vld [vmem:[#allocation5 + $0x7c4] sm:$0xf] }
 0x101   :  { %v16124_v14 = vld [vmem:[#allocation5 + $0x1adc] sm:$0xf0]  ;;  %v11140_v11 = vld [vmem:[#allocation5 + $0x7e0] sm:$0xf0] }
 0x102   :  { %v13826_v15 = vld [vmem:[#allocation5 + $0x1cc0] sm:$0xf]  ;;  %v13571_v21 = vor.u32 %v16124_v14, %v13570_v12  ;;  %6477 = vmatpush.bf16.msrb.mxu0 %v13315_v20 }
 0x103   :  { %v16188_v16 = vld [vmem:[#allocation5 + $0x1cdc] sm:$0xf0] }
 0x104   :  { %v14082_v18 = vld [vmem:[#allocation5 + $0x1ec0] sm:$0xf]  ;;  %v13827_v22 = vor.u32 %v16188_v16, %v13826_v15  ;;  %6491 = vmatpush.bf16.msrb.mxu1 %v13571_v21  ;;  %v109_v16 = vld [vmem:[#allocation2 + $0x70] sm:$0xff]  ;;  %v10375_v21 = vor.u32 %v15320_v0, %v10372_v3  ;;  %v15296_v0 = vld [vmem:[#allocation5 + $0x104] sm:$0xf] }
 0x105   :  { %v16252_v19 = vld [vmem:[#allocation5 + $0x1edc] sm:$0xf0]  ;;  %v15360_v3 = vld [vmem:[#allocation5 + $0x304] sm:$0xf] }
 0x106   :  { %v13282_v23 = vld [vmem:[#allocation5 + $0x1880] sm:$0xf]  ;;  %v14083_v26 = vor.u32 %v16252_v19, %v14082_v18  ;;  %6505 = vmatpush.bf16.msrb.mxu2 %v13827_v22  ;;  %v125_v18 = vld [vmem:[#allocation2 + $0xf0] sm:$0xff]  ;;  %v108_v19 = vld [vmem:[#allocation2 + $0x68] sm:$0xff] }
 0x107   :  { %v16052_v24 = vld [vmem:[#allocation5 + $0x189c] sm:$0xf0]  ;;  %v124_v22 = vld [vmem:[#allocation2 + $0xe8] sm:$0xff] }
 0x108   :  { %v13538_v25 = vld [vmem:[#allocation5 + $0x1a80] sm:$0xf]  ;;  %v13283_v33 = vor.u32 %v16052_v24, %v13282_v23  ;;  %6519 = vmatpush.bf16.msrb.mxu3 %v14083_v26  ;;  %v110_v23 = vld [vmem:[#allocation2 + $0x78] sm:$0xff]  ;;  %v10887_v26 = vor.u32 %v15448_v6, %v10884_v7  ;;  %v15424_v6 = vld [vmem:[#allocation5 + $0x504] sm:$0xf] }
 0x109   :  { %v16116_v27 = vld [vmem:[#allocation5 + $0x1a9c] sm:$0xf0]  ;;  %v126_v24 = vld [vmem:[#allocation2 + $0xf8] sm:$0xff]  ;;  %v10788_v7 = vld [vmem:[#allocation5 + $0x520] sm:$0xf0] }
 0x10a   :  { %v13794_v28 = vld [vmem:[#allocation5 + $0x1c80] sm:$0xf]  ;;  %v13539_v37 = vor.u32 %v16116_v27, %v13538_v25  ;;  %6478 = vmatpush.bf16.msrb.mxu0 %v13283_v33  ;;  %v10631_v25 = vor.u32 %v15384_v4, %v10628_v5  ;;  %v15312_v27 = vld [vmem:[#allocation5 + $0x184] sm:$0xf] }
 0x10b   :  { %v16180_v29 = vld [vmem:[#allocation5 + $0x1c9c] sm:$0xf0]  ;;  %v10596_v33 = vld [vmem:[#allocation5 + $0x3a0] sm:$0xf0] }
 0x10c   :  { %v14050_v30 = vld [vmem:[#allocation5 + $0x1e80] sm:$0xf]  ;;  %v13795_v38 = vor.u32 %v16180_v29, %v13794_v28  ;;  %6492 = vmatpush.bf16.msrb.mxu1 %v13539_v37  ;;  %v10340_v28 = vld [vmem:[#allocation5 + $0x1a0] sm:$0xf0] }
 0x10d   :  { %v16244_v32 = vld [vmem:[#allocation5 + $0x1e9c] sm:$0xf0]  ;;  %v15376_v29 = vld [vmem:[#allocation5 + $0x384] sm:$0xf] }
 0x10e   :  { %v13250_v34 = vld [vmem:[#allocation5 + $0x1840] sm:$0xf]  ;;  %v14051_v46 = vor.u32 %v16244_v32, %v14050_v30  ;;  %6506 = vmatpush.bf16.msrb.mxu2 %v13795_v38  ;;  %v11143_v30 = vor.u32 %v15512_v8, %v11140_v11  ;;  %v10852_v37 = vld [vmem:[#allocation5 + $0x5a0] sm:$0xf0]  ;;  %v16812_v38 = vpack.c.bf16 %v125_v18, %v109_v16 }
 0x10f   :  { %v16044_v41 = vld [vmem:[#allocation5 + $0x185c] sm:$0xf0]  ;;  %v10532_v5 = vld [vmem:[#allocation5 + $0x320] sm:$0xf0] }
 0x110   :  { %v13506_v42 = vld [vmem:[#allocation5 + $0x1a40] sm:$0xf]  ;;  %v13251_v54 = vor.u32 %v16044_v41, %v13250_v34  ;;  %6520 = vmatpush.bf16.msrb.mxu3 %v14051_v46  ;;  %v15440_v34 = vld [vmem:[#allocation5 + $0x584] sm:$0xf]  ;;  %v16814_v41 = vpack.c.bf16 %v124_v22, %v108_v19  ;;  %v16816_v46 = vpack.c.bf16 %v126_v24, %v110_v23 }
 0x111   :  { %v16108_v45 = vld [vmem:[#allocation5 + $0x1a5c] sm:$0xf0]  ;;  %v15488_v8 = vld [vmem:[#allocation5 + $0x704] sm:$0xf] }
 0x112   :  { %v13762_v48 = vld [vmem:[#allocation5 + $0x1c40] sm:$0xf]  ;;  %v13507_v60 = vor.u32 %v16108_v45, %v13506_v42  ;;  %6479 = vmatpush.bf16.msrb.mxu0 %v13251_v54  ;;  %v15504_v42 = vld [vmem:[#allocation5 + $0x784] sm:$0xf] }
 0x113   :  { %v16172_v49 = vld [vmem:[#allocation5 + $0x1c5c] sm:$0xf0]  ;;  %v11108_v45 = vld [vmem:[#allocation5 + $0x7a0] sm:$0xf0] }
 0x114   :  { %v14018_v50 = vld [vmem:[#allocation5 + $0x1e40] sm:$0xf]  ;;  %v13763_v61 = vor.u32 %v16172_v49, %v13762_v48  ;;  %6493 = vmatpush.bf16.msrb.mxu1 %v13507_v60  ;;  %v10343_v48 = vor.u32 %v15312_v27, %v10340_v28  ;;  %v10599_v49 = vor.u32 %v15376_v29, %v10596_v33  ;;  %v11111_v54 = vor.u32 %v15504_v42, %v11108_v45  ;;  %v11076_v60 = vld [vmem:[#allocation5 + $0x760] sm:$0xf0] }
 0x115   :  { %v16236_v51 = vld [vmem:[#allocation5 + $0x1e5c] sm:$0xf0]  ;;  %v15352_v16 = vld [vmem:[#allocation5 + $0x2c4] sm:$0xf] }
 0x116   :  { %v13218_v52 = vld [vmem:[#allocation5 + $0x1800] sm:$0xf]  ;;  %v14019_v2 = vor.u32 %v16236_v51, %v14018_v50  ;;  %6507 = vmatpush.bf16.msrb.mxu2 %v13763_v61  ;;  %v10855_v50 = vor.u32 %v15440_v34, %v10852_v37  ;;  %v15304_v51 = vld [vmem:[#allocation5 + $0x144] sm:$0xf] }
 0x117   :  { %v16036_v53 = vld [vmem:[#allocation5 + $0x181c] sm:$0xf0]  ;;  %v10500_v19 = vld [vmem:[#allocation5 + $0x2e0] sm:$0xf0] }
 0x118   :  { %v13474_v55 = vld [vmem:[#allocation5 + $0x1a00] sm:$0xf]  ;;  %v13219_v9 = vor.u32 %v16036_v53, %v13218_v52  ;;  %6521 = vmatpush.bf16.msrb.mxu3 %v14019_v2  ;;  %v10308_v52 = vld [vmem:[#allocation5 + $0x160] sm:$0xf0] }
 0x119   :  { %v16100_v56 = vld [vmem:[#allocation5 + $0x1a1c] sm:$0xf0]  ;;  %v15368_v53 = vld [vmem:[#allocation5 + $0x344] sm:$0xf]  ;;  %v10311_v61 = vor.u32 %v15304_v51, %v10308_v52 }
 0x11a   :  { %v13730_v57 = vld [vmem:[#allocation5 + $0x1c00] sm:$0xf]  ;;  %v13475_v14 = vor.u32 %v16100_v56, %v13474_v55  ;;  %6480 = vmatpush.bf16.msrb.mxu0 %v13219_v9  ;;  %v10564_v55 = vld [vmem:[#allocation5 + $0x360] sm:$0xf0] }
 0x11b   :  { %v16164_v59 = vld [vmem:[#allocation5 + $0x1c1c] sm:$0xf0]  ;;  %v15432_v56 = vld [vmem:[#allocation5 + $0x544] sm:$0xf] }
 0x11c   :  { %v13986_v62 = vld [vmem:[#allocation5 + $0x1e00] sm:$0xf]  ;;  %v13731_v15 = vor.u32 %v16164_v59, %v13730_v57  ;;  %6494 = vmatpush.bf16.msrb.mxu1 %v13475_v14  ;;  %v10820_v57 = vld [vmem:[#allocation5 + $0x560] sm:$0xf0] }
 0x11d   :  { %v16228_v63 = vld [vmem:[#allocation5 + $0x1e1c] sm:$0xf0]  ;;  %v15496_v59 = vld [vmem:[#allocation5 + $0x744] sm:$0xf] }
 0x11e   :  { %v107_v12 = vld [vmem:[#allocation2 + $0x60] sm:$0xff]  ;;  %v13987_v20 = vor.u32 %v16228_v63, %v13986_v62  ;;  %6508 = vmatpush.bf16.msrb.mxu2 %v13731_v15  ;;  %6529 = vmatpush.bf16.msra.mxu0 %v10375_v21  ;;  %v10567_v62 = vor.u32 %v15368_v53, %v10564_v55  ;;  %v10823_v63 = vor.u32 %v15432_v56, %v10820_v57 }
 0x11f   :  { %v123_v13 = vld [vmem:[#allocation2 + $0xe0] sm:$0xff]  ;;  %6495 = vmatmul.bf16.vlgmr.msrb.gmra.mxu1 %v16814_v41  ;;  %v11079_v4 = vor.u32 %v15496_v59, %v11076_v60 }
 0x120   :  { %v16810_v32 = vpack.c.bf16 %v123_v13, %v107_v12  ;;  %6522 = vmatpush.bf16.msrb.mxu3 %v13987_v20  ;;  %6543 = vmatpush.bf16.msra.mxu1 %v10631_v25  ;;  %v10276_v2 = vld [vmem:[#allocation5 + $0x120] sm:$0xf0]  ;;  %v10535_v12 = vor.u32 %v15360_v3, %v10532_v5  ;;  %v10791_v13 = vor.u32 %v15424_v6, %v10788_v7 }
 0x121   :  { %6509 = vmatmul.bf16.vlgmr.msrb.gmra.mxu2 %v16812_v38  ;;  %v11044_v9 = vld [vmem:[#allocation5 + $0x720] sm:$0xf0]  ;;  %v10279_v11 = vor.u32 %v15296_v0, %v10276_v2  ;;  %v10503_v25 = vor.u32 %v15352_v16, %v10500_v19 }
 0x122   :  { %6557 = vmatpush.bf16.msra.mxu2 %v10887_v26  ;;  %6481 = vmatmul.bf16.vlgmr.msrb.gmra.mxu0 %v16810_v32  ;;  %v15288_v14 = vld [vmem:[#allocation5 + $0xc4] sm:$0xf]  ;;  %v11047_v18 = vor.u32 %v15488_v8, %v11044_v9 }
 0x123   :  { %6523 = vmatmul.bf16.vlgmr.msrb.gmra.mxu3 %v16816_v46  ;;  %6530 = vmatpush.bf16.msra.mxu0 %v10343_v48  ;;  %v10244_v15 = vld [vmem:[#allocation5 + $0xe0] sm:$0xf0] }
 0x124   :  { %6571 = vmatpush.bf16.msra.mxu3 %v11143_v30  ;;  %6544 = vmatpush.bf16.msra.mxu1 %v10599_v49  ;;  %v15416_v20 = vld [vmem:[#allocation5 + $0x4c4] sm:$0xf]  ;;  %v10247_v24 = vor.u32 %v15288_v14, %v10244_v15 }
 0x125   :  { %v10756_v21 = vld [vmem:[#allocation5 + $0x4e0] sm:$0xf0] }
 0x126   :  { %6558 = vmatpush.bf16.msra.mxu2 %v10855_v50  ;;  %v15480_v22 = vld [vmem:[#allocation5 + $0x6c4] sm:$0xf]  ;;  %v10759_v26 = vor.u32 %v15416_v20, %v10756_v21 }
 0x127   :  { %6531 = vmatpush.bf16.msra.mxu0 %v10311_v61  ;;  %v11012_v23 = vld [vmem:[#allocation5 + $0x6e0] sm:$0xf0] }
 0x128   :  { %6572 = vmatpush.bf16.msra.mxu3 %v11111_v54  ;;  %6545 = vmatpush.bf16.msra.mxu1 %v10567_v62  ;;  %v15280_v27 = vld [vmem:[#allocation5 + $0x84] sm:$0xf]  ;;  %v11015_v30 = vor.u32 %v15480_v22, %v11012_v23 }
 0x129   :  { %v10212_v28 = vld [vmem:[#allocation5 + $0xa0] sm:$0xf0] }
 0x12a   :  { %6559 = vmatpush.bf16.msra.mxu2 %v10823_v63  ;;  %v15344_v29 = vld [vmem:[#allocation5 + $0x284] sm:$0xf]  ;;  %v10215_v48 = vor.u32 %v15280_v27, %v10212_v28 }
 0x12b   :  { %6532 = vmatpush.bf16.msra.mxu0 %v10279_v11  ;;  %v10468_v33 = vld [vmem:[#allocation5 + $0x2a0] sm:$0xf0] }
 0x12c   :  { %6573 = vmatpush.bf16.msra.mxu3 %v11079_v4  ;;  %6546 = vmatpush.bf16.msra.mxu1 %v10535_v12  ;;  %v15408_v34 = vld [vmem:[#allocation5 + $0x484] sm:$0xf]  ;;  %v10471_v49 = vor.u32 %v15344_v29, %v10468_v33 }
 0x12d   :  { %v10724_v37 = vld [vmem:[#allocation5 + $0x4a0] sm:$0xf0] }
 0x12e   :  { %6560 = vmatpush.bf16.msra.mxu2 %v10791_v13  ;;  %v15472_v42 = vld [vmem:[#allocation5 + $0x684] sm:$0xf]  ;;  %v10727_v50 = vor.u32 %v15408_v34, %v10724_v37 }
 0x12f   :  { %v10980_v45 = vld [vmem:[#allocation5 + $0x6a0] sm:$0xf0]  ;;  %6533 = vmatpush.bf16.msra.mxu0 %v10247_v24 }
 0x130   :  { %6574 = vmatpush.bf16.msra.mxu3 %v11047_v18  ;;  %6547 = vmatpush.bf16.msra.mxu1 %v10503_v25  ;;  %v15272_v51 = vld [vmem:[#allocation5 + $0x44] sm:$0xf]  ;;  %v10983_v54 = vor.u32 %v15472_v42, %v10980_v45 }
 0x131   :  { %v10180_v52 = vld [vmem:[#allocation5 + $0x60] sm:$0xf0] }
 0x132   :  { %6561 = vmatpush.bf16.msra.mxu2 %v10759_v26  ;;  %v15336_v53 = vld [vmem:[#allocation5 + $0x244] sm:$0xf]  ;;  %v10183_v61 = vor.u32 %v15272_v51, %v10180_v52 }
 0x133   :  { %v10436_v55 = vld [vmem:[#allocation5 + $0x260] sm:$0xf0]  ;;  %6534 = vmatpush.bf16.msra.mxu0 %v10215_v48 }
 0x134   :  { %6575 = vmatpush.bf16.msra.mxu3 %v11015_v30  ;;  %v15400_v56 = vld [vmem:[#allocation5 + $0x444] sm:$0xf]  ;;  %6548 = vmatpush.bf16.msra.mxu1 %v10471_v49  ;;  %v10439_v0 = vor.u32 %v15336_v53, %v10436_v55 }
 0x135   :  { %v10692_v57 = vld [vmem:[#allocation5 + $0x460] sm:$0xf0] }
 0x136   :  { %v15464_v59 = vld [vmem:[#allocation5 + $0x644] sm:$0xf]  ;;  %6562 = vmatpush.bf16.msra.mxu2 %v10727_v50  ;;  %v10695_v2 = vor.u32 %v15400_v56, %v10692_v57 }
 0x137   :  { %v10948_v60 = vld [vmem:[#allocation5 + $0x660] sm:$0xf0]  ;;  %6535 = vmatpush.bf16.msra.mxu0 %v10183_v61 }
 0x138   :  { %v15264_v62 = vld [vmem:[#allocation5 + $0x4] sm:$0xf]  ;;  %6576 = vmatpush.bf16.msra.mxu3 %v10983_v54  ;;  %v10951_v6 = vor.u32 %v15464_v59, %v10948_v60  ;;  %6549 = vmatpush.bf16.msra.mxu1 %v10439_v0 }
 0x139   :  { %v10148_v63 = vld [vmem:[#allocation5 + $0x20] sm:$0xf0] }
 0x13a   :  { %v15328_v3 = vld [vmem:[#allocation5 + $0x204] sm:$0xf]  ;;  %v10151_v14 = vor.u32 %v15264_v62, %v10148_v63  ;;  %6563 = vmatpush.bf16.msra.mxu2 %v10695_v2 }
 0x13b   :  { %v10404_v4 = vld [vmem:[#allocation5 + $0x220] sm:$0xf0] }
 0x13c   :  { %v15392_v5 = vld [vmem:[#allocation5 + $0x404] sm:$0xf]  ;;  %v10407_v19 = vor.u32 %v15328_v3, %v10404_v4  ;;  %6577 = vmatpush.bf16.msra.mxu3 %v10951_v6  ;;  %6536 = vmatpush.bf16.msra.mxu0 %v10151_v14 }
 0x13d   :  { %v10660_v7 = vld [vmem:[#allocation5 + $0x420] sm:$0xf0] }
 0x13e   :  { %v15456_v8 = vld [vmem:[#allocation5 + $0x604] sm:$0xf]  ;;  %v10663_v20 = vor.u32 %v15392_v5, %v10660_v7  ;;  %6550 = vmatpush.bf16.msra.mxu1 %v10407_v19 }
 0x13f   :  { %v10916_v9 = vld [vmem:[#allocation5 + $0x620] sm:$0xf0]  ;;  %6537 = vmatmul.bf16.vlgmr.msra.gmra.mxu0 %v16774_v58 }
 0x140   :  { %v15576_v11 = vld [vmem:[#allocation5 + $0x9c4] sm:$0xf]  ;;  %v10919_v23 = vor.u32 %v15456_v8, %v10916_v9  ;;  %6564 = vmatpush.bf16.msra.mxu2 %v10663_v20 }
 0x141   :  { %v11396_v12 = vld [vmem:[#allocation5 + $0x9e0] sm:$0xf0]  ;;  %6551 = vmatmul.bf16.vlgmr.msra.gmra.mxu1 %v16780_v10 }
 0x142   :  { %v15640_v13 = vld [vmem:[#allocation5 + $0xbc4] sm:$0xf]  ;;  %v11399_v24 = vor.u32 %v15576_v11, %v11396_v12  ;;  %6578 = vmatpush.bf16.msra.mxu3 %v10919_v23 }
 0x143   :  { %v11652_v15 = vld [vmem:[#allocation5 + $0xbe0] sm:$0xf0]  ;;  %6565 = vmatmul.bf16.vlgmr.msra.gmra.mxu2 %v16776_v1 }
 0x144   :  { %v15704_v16 = vld [vmem:[#allocation5 + $0xdc4] sm:$0xf]  ;;  %v11655_v25 = vor.u32 %v15640_v13, %v11652_v15  ;;  %6585 = vmatpush.bf16.msrb.mxu0 %v11399_v24  ;;  %v6314_v13 = vpop.f32.mrf.mxu0 }
 0x145   :  { %v11908_v18 = vld [vmem:[#allocation5 + $0xde0] sm:$0xf0]  ;;  %6579 = vmatmul.bf16.vlgmr.msra.gmra.mxu3 %v16782_v17 }
 0x146   :  { %v15768_v21 = vld [vmem:[#allocation5 + $0xfc4] sm:$0xf]  ;;  %v11911_v26 = vor.u32 %v15704_v16, %v11908_v18  ;;  %6599 = vmatpush.bf16.msrb.mxu1 %v11655_v25 }
 0x147   :  { %v12164_v22 = vld [vmem:[#allocation5 + $0xfe0] sm:$0xf0] }
 0x148   :  { %v15568_v27 = vld [vmem:[#allocation5 + $0x984] sm:$0xf]  ;;  %v12167_v30 = vor.u32 %v15768_v21, %v12164_v22  ;;  %6613 = vmatpush.bf16.msrb.mxu2 %v11911_v26 }
 0x149   :  { %v11364_v28 = vld [vmem:[#allocation5 + $0x9a0] sm:$0xf0] }
 0x14a   :  { %v15632_v29 = vld [vmem:[#allocation5 + $0xb84] sm:$0xf]  ;;  %v11367_v48 = vor.u32 %v15568_v27, %v11364_v28  ;;  %6627 = vmatpush.bf16.msrb.mxu3 %v12167_v30  ;;  %v6328_v28 = vpop.f32.mrf.mxu1 }
 0x14b   :  { %v11620_v33 = vld [vmem:[#allocation5 + $0xba0] sm:$0xf0] }
 0x14c   :  { %v15696_v34 = vld [vmem:[#allocation5 + $0xd84] sm:$0xf]  ;;  %v11623_v50 = vor.u32 %v15632_v29, %v11620_v33  ;;  %6586 = vmatpush.bf16.msrb.mxu0 %v11367_v48 }
 0x14d   :  { %v11876_v37 = vld [vmem:[#allocation5 + $0xda0] sm:$0xf0] }
 0x14e   :  { %v15760_v42 = vld [vmem:[#allocation5 + $0xf84] sm:$0xf]  ;;  %v11879_v51 = vor.u32 %v15696_v34, %v11876_v37  ;;  %6600 = vmatpush.bf16.msrb.mxu1 %v11623_v50 }
 0x14f   :  { %v12132_v45 = vld [vmem:[#allocation5 + $0xfa0] sm:$0xf0] }
 0x150   :  { %v15560_v49 = vld [vmem:[#allocation5 + $0x944] sm:$0xf]  ;;  %v12135_v55 = vor.u32 %v15760_v42, %v12132_v45  ;;  %6614 = vmatpush.bf16.msrb.mxu2 %v11879_v51 }
 0x151   :  { %v11332_v52 = vld [vmem:[#allocation5 + $0x960] sm:$0xf0] }
 0x152   :  { %v15624_v53 = vld [vmem:[#allocation5 + $0xb44] sm:$0xf]  ;;  %v11335_v62 = vor.u32 %v15560_v49, %v11332_v52  ;;  %6628 = vmatpush.bf16.msrb.mxu3 %v12135_v55  ;;  %v6342_v52 = vpop.f32.mrf.mxu2 }
 0x153   :  { %v16822_v54 = vld [vmem:[#allocation7] sm:$0xff] }
 0x154   :  { %v11588_v56 = vld [vmem:[#allocation5 + $0xb60] sm:$0xf0]  ;;  %v17555_v63 = vperm.slane %v16822_v54, 0  ;;  %6587 = vmatpush.bf16.msrb.mxu0 %v11335_v62 }
 0x155   :  { %v15688_v57 = vld [vmem:[#allocation5 + $0xd44] sm:$0xf]  ;;  %v11591_v0 = vor.u32 %v15624_v53, %v11588_v56 }
 0x156   :  { %v11844_v59 = vld [vmem:[#allocation5 + $0xd60] sm:$0xf0]  ;;  %v6315_v15 = vadd.f32 %v6314_v13, %v17555_v63  ;;  %v15725_v63 = vld [vmem:[#allocation5 + $0xe64] sm:$0xf0] }
 0x157   :  { %v15752_v60 = vld [vmem:[#allocation5 + $0xf44] sm:$0xf]  ;;  %v11847_v2 = vor.u32 %v15688_v57, %v11844_v59  ;;  %6601 = vmatpush.bf16.msrb.mxu1 %v11591_v0 }
 0x158   :  { %v12100_v61 = vld [vmem:[#allocation5 + $0xf60] sm:$0xf0]  ;;  %v6329_v30 = vadd.f32 %v6328_v28, %v6315_v15 }
 0x159   :  { %v15552_v3 = vld [vmem:[#allocation5 + $0x904] sm:$0xf]  ;;  %v12103_v6 = vor.u32 %v15752_v60, %v12100_v61  ;;  %6615 = vmatpush.bf16.msrb.mxu2 %v11847_v2 }
 0x15a   :  { %v11300_v4 = vld [vmem:[#allocation5 + $0x920] sm:$0xf0]  ;;  %v6343_v56 = vadd.f32 %v6342_v52, %v6329_v30 }
 0x15b   :  { %v15616_v5 = vld [vmem:[#allocation5 + $0xb04] sm:$0xf]  ;;  %v11303_v14 = vor.u32 %v15552_v3, %v11300_v4  ;;  %6629 = vmatpush.bf16.msrb.mxu3 %v12103_v6  ;;  %v6356_v6 = vpop.f32.mrf.mxu3 }
 0x15c   :  { %v11556_v7 = vld [vmem:[#allocation5 + $0xb20] sm:$0xf0] }
 0x15d   :  { %v15680_v8 = vld [vmem:[#allocation5 + $0xd04] sm:$0xf]  ;;  %v11559_v16 = vor.u32 %v15616_v5, %v11556_v7  ;;  %6588 = vmatpush.bf16.msrb.mxu0 %v11303_v14 }
 0x15e   :  { %v11812_v9 = vld [vmem:[#allocation5 + $0xd20] sm:$0xf0] }
 0x15f   :  { %v15744_v11 = vld [vmem:[#allocation5 + $0xf04] sm:$0xf]  ;;  %v11815_v18 = vor.u32 %v15680_v8, %v11812_v9  ;;  %6602 = vmatpush.bf16.msrb.mxu1 %v11559_v16  ;;  %v16831_v9 = vadd.f32 %v6356_v6, %v6343_v56 }
 0x160   :  { %v12068_v12 = vld [vmem:[#allocation5 + $0xf20] sm:$0xf0] }
 0x161   :  { %v15544_v19 = vld [vmem:[#allocation5 + $0x8c4] sm:$0xf]  ;;  %v12071_v22 = vor.u32 %v15744_v11, %v12068_v12  ;;  %6616 = vmatpush.bf16.msrb.mxu2 %v11815_v18 }
 0x162   :  { %v11268_v20 = vld [vmem:[#allocation5 + $0x8e0] sm:$0xf0] }
 0x163   :  { %v15608_v21 = vld [vmem:[#allocation5 + $0xac4] sm:$0xf]  ;;  %v11271_v29 = vor.u32 %v15544_v19, %v11268_v20  ;;  %6630 = vmatpush.bf16.msrb.mxu3 %v12071_v22 }
 0x164   :  { %v11524_v23 = vld [vmem:[#allocation5 + $0xae0] sm:$0xf0] }
 0x165   :  { %v15672_v24 = vld [vmem:[#allocation5 + $0xcc4] sm:$0xf]  ;;  %v11527_v33 = vor.u32 %v15608_v21, %v11524_v23  ;;  %6589 = vmatpush.bf16.msrb.mxu0 %v11271_v29 }
 0x166   :  { %v11780_v25 = vld [vmem:[#allocation5 + $0xce0] sm:$0xf0] }
 0x167   :  { %v15736_v26 = vld [vmem:[#allocation5 + $0xec4] sm:$0xf]  ;;  %v11783_v34 = vor.u32 %v15672_v24, %v11780_v25  ;;  %6603 = vmatpush.bf16.msrb.mxu1 %v11527_v33 }
 0x168   :  { %v12036_v27 = vld [vmem:[#allocation5 + $0xee0] sm:$0xf0] }
 0x169   :  { %v15536_v37 = vld [vmem:[#allocation5 + $0x884] sm:$0xf]  ;;  %v12039_v48 = vor.u32 %v15736_v26, %v12036_v27  ;;  %6617 = vmatpush.bf16.msrb.mxu2 %v11783_v34 }
 0x16a   :  { %v11236_v42 = vld [vmem:[#allocation5 + $0x8a0] sm:$0xf0] }
 0x16b   :  { %v15600_v45 = vld [vmem:[#allocation5 + $0xa84] sm:$0xf]  ;;  %v11239_v57 = vor.u32 %v15536_v37, %v11236_v42  ;;  %6631 = vmatpush.bf16.msrb.mxu3 %v12039_v48 }
 0x16c   :  { %v11492_v49 = vld [vmem:[#allocation5 + $0xaa0] sm:$0xf0] }
 0x16d   :  { %v15664_v50 = vld [vmem:[#allocation5 + $0xc84] sm:$0xf]  ;;  %v11495_v59 = vor.u32 %v15600_v45, %v11492_v49  ;;  %6590 = vmatpush.bf16.msrb.mxu0 %v11239_v57 }
 0x16e   :  { %v11748_v51 = vld [vmem:[#allocation5 + $0xca0] sm:$0xf0] }
 0x16f   :  { %v15728_v53 = vld [vmem:[#allocation5 + $0xe84] sm:$0xf]  ;;  %v11751_v60 = vor.u32 %v15664_v50, %v11748_v51  ;;  %6604 = vmatpush.bf16.msrb.mxu1 %v11495_v59  ;;  %v16833_v51 = vpop.f32.mrf.mxu0 }
 0x170   :  { %v12004_v55 = vld [vmem:[#allocation5 + $0xea0] sm:$0xf0] }
 0x171   :  { %v15528_v61 = vld [vmem:[#allocation5 + $0x844] sm:$0xf]  ;;  %v12007_v2 = vor.u32 %v15728_v53, %v12004_v55  ;;  %6618 = vmatpush.bf16.msrb.mxu2 %v11751_v60 }
 0x172   :  { %v11204_v62 = vld [vmem:[#allocation5 + $0x860] sm:$0xf0] }
 0x173   :  { %v15592_v0 = vld [vmem:[#allocation5 + $0xa44] sm:$0xf]  ;;  %v11207_v11 = vor.u32 %v15528_v61, %v11204_v62  ;;  %6632 = vmatpush.bf16.msrb.mxu3 %v12007_v2 }
 0x174   :  { %v11460_v3 = vld [vmem:[#allocation5 + $0xa60] sm:$0xf0] }
 0x175   :  { %v15656_v4 = vld [vmem:[#allocation5 + $0xc44] sm:$0xf]  ;;  %v11463_v14 = vor.u32 %v15592_v0, %v11460_v3  ;;  %6591 = vmatpush.bf16.msrb.mxu0 %v11207_v11  ;;  %v16835_v0 = vpop.f32.mrf.mxu1 }
 0x176   :  { %v11716_v5 = vld [vmem:[#allocation5 + $0xc60] sm:$0xf0] }
 0x177   :  { %v15720_v7 = vld [vmem:[#allocation5 + $0xe44] sm:$0xf]  ;;  %v11719_v15 = vor.u32 %v15656_v4, %v11716_v5  ;;  %6605 = vmatpush.bf16.msrb.mxu1 %v11463_v14 }
 0x178   :  { %v11972_v8 = vld [vmem:[#allocation5 + $0xe60] sm:$0xf0] }
 0x179   :  { %v15520_v12 = vld [vmem:[#allocation5 + $0x804] sm:$0xf]  ;;  %v11975_v20 = vor.u32 %v15720_v7, %v11972_v8  ;;  %6619 = vmatpush.bf16.msrb.mxu2 %v11719_v15 }
 0x17a   :  { %v11172_v13 = vld [vmem:[#allocation5 + $0x820] sm:$0xf0] }
 0x17b   :  { %v15584_v16 = vld [vmem:[#allocation5 + $0xa04] sm:$0xf]  ;;  %v11175_v27 = vor.u32 %v15520_v12, %v11172_v13  ;;  %6633 = vmatpush.bf16.msrb.mxu3 %v11975_v20 }
 0x17c   :  { %v11428_v18 = vld [vmem:[#allocation5 + $0xa20] sm:$0xf0] }
 0x17d   :  { %v15648_v19 = vld [vmem:[#allocation5 + $0xc04] sm:$0xf]  ;;  %v11431_v33 = vor.u32 %v15584_v16, %v11428_v18  ;;  %6592 = vmatpush.bf16.msrb.mxu0 %v11175_v27  ;;  %v16841_v18 = vpop.f32.mrf.mxu2 }
 0x17e   :  { %v11684_v21 = vld [vmem:[#allocation5 + $0xc20] sm:$0xf0] }
 0x17f   :  { %v15712_v22 = vld [vmem:[#allocation5 + $0xe04] sm:$0xf]  ;;  %v11687_v34 = vor.u32 %v15648_v19, %v11684_v21  ;;  %6606 = vmatpush.bf16.msrb.mxu1 %v11431_v33 }
 0x180   :  { %v11940_v23 = vld [vmem:[#allocation5 + $0xe20] sm:$0xf0]  ;;  %6593 = vmatmul.bf16.vlgmr.msrb.gmra.mxu0 %v16786_v39 }
 0x181   :  { %v15832_v24 = vld [vmem:[#allocation5 + $0x11c4] sm:$0xf]  ;;  %v11943_v45 = vor.u32 %v15712_v22, %v11940_v23  ;;  %6620 = vmatpush.bf16.msrb.mxu2 %v11687_v34 }
 0x182   :  { %v12420_v25 = vld [vmem:[#allocation5 + $0x11e0] sm:$0xf0]  ;;  %6607 = vmatmul.bf16.vlgmr.msrb.gmra.mxu1 %v16790_v44 }
 0x183   :  { %v15896_v26 = vld [vmem:[#allocation5 + $0x13c4] sm:$0xf]  ;;  %v12423_v48 = vor.u32 %v15832_v24, %v12420_v25  ;;  %6634 = vmatpush.bf16.msrb.mxu3 %v11943_v45  ;;  %v16843_v25 = vpop.f32.mrf.mxu3 }
 0x184   :  { %v12676_v28 = vld [vmem:[#allocation5 + $0x13e0] sm:$0xf0]  ;;  %6621 = vmatmul.bf16.vlgmr.msrb.gmra.mxu2 %v16788_v43 }
 0x185   :  { %v15960_v29 = vld [vmem:[#allocation5 + $0x15c4] sm:$0xf]  ;;  %v12679_v49 = vor.u32 %v15896_v26, %v12676_v28  ;;  %6641 = vmatpush.bf16.msra.mxu0 %v12423_v48  ;;  %v6384_v48 = vpop.f32.mrf.mxu1 }
 0x186   :  { %v12932_v30 = vld [vmem:[#allocation5 + $0x15e0] sm:$0xf0]  ;;  %6635 = vmatmul.bf16.vlgmr.msrb.gmra.mxu3 %v16792_v47 }
 0x187   :  { %v16024_v37 = vld [vmem:[#allocation5 + $0x17c4] sm:$0xf]  ;;  %v12935_v50 = vor.u32 %v15960_v29, %v12932_v30  ;;  %6655 = vmatpush.bf16.msra.mxu1 %v12679_v49  ;;  %v6370_v29 = vpop.f32.mrf.mxu0 }
 0x188   :  { %v13188_v42 = vld [vmem:[#allocation5 + $0x17e0] sm:$0xf0]  ;;  %v6371_v34 = vadd.f32 %v6370_v29, %v16831_v9 }
 0x189   :  { %v15824_v52 = vld [vmem:[#allocation5 + $0x1184] sm:$0xf]  ;;  %v13191_v56 = vor.u32 %v16024_v37, %v13188_v42  ;;  %6669 = vmatpush.bf16.msra.mxu2 %v12935_v50 }
 0x18a   :  { %v12388_v53 = vld [vmem:[#allocation5 + $0x11a0] sm:$0xf0] }
 0x18b   :  { %v15888_v55 = vld [vmem:[#allocation5 + $0x1384] sm:$0xf]  ;;  %v12391_v2 = vor.u32 %v15824_v52, %v12388_v53  ;;  %6683 = vmatpush.bf16.msra.mxu3 %v13191_v56 }
 0x18c   :  { %v12644_v57 = vld [vmem:[#allocation5 + $0x13a0] sm:$0xf0] }
 0x18d   :  { %v15952_v59 = vld [vmem:[#allocation5 + $0x1584] sm:$0xf]  ;;  %v12647_v3 = vor.u32 %v15888_v55, %v12644_v57  ;;  %6642 = vmatpush.bf16.msra.mxu0 %v12391_v2  ;;  %v6385_v55 = vadd.f32 %v6384_v48, %v6371_v34 }
 0x18e   :  { %v12900_v60 = vld [vmem:[#allocation5 + $0x15a0] sm:$0xf0] }
 0x18f   :  { %v16016_v61 = vld [vmem:[#allocation5 + $0x1784] sm:$0xf]  ;;  %v12903_v4 = vor.u32 %v15952_v59, %v12900_v60  ;;  %6656 = vmatpush.bf16.msra.mxu1 %v12647_v3 }
 0x190   :  { %v13156_v62 = vld [vmem:[#allocation5 + $0x17a0] sm:$0xf0] }
 0x191   :  { %v15816_v5 = vld [vmem:[#allocation5 + $0x1144] sm:$0xf]  ;;  %v13159_v8 = vor.u32 %v16016_v61, %v13156_v62  ;;  %6670 = vmatpush.bf16.msra.mxu2 %v12903_v4 }
 0x192   :  { %v12356_v6 = vld [vmem:[#allocation5 + $0x1160] sm:$0xf0] }
 0x193   :  { %v15880_v7 = vld [vmem:[#allocation5 + $0x1344] sm:$0xf]  ;;  %v12359_v16 = vor.u32 %v15816_v5, %v12356_v6  ;;  %6684 = vmatpush.bf16.msra.mxu3 %v13159_v8 }
 0x194   :  { %v12612_v11 = vld [vmem:[#allocation5 + $0x1360] sm:$0xf0] }
 0x195   :  { %v15944_v12 = vld [vmem:[#allocation5 + $0x1544] sm:$0xf]  ;;  %v12615_v19 = vor.u32 %v15880_v7, %v12612_v11  ;;  %6643 = vmatpush.bf16.msra.mxu0 %v12359_v16  ;;  %v6398_v7 = vpop.f32.mrf.mxu2  ;;  %v6412_v16 = vpop.f32.mrf.mxu3 }
 0x196   :  { %v12868_v13 = vld [vmem:[#allocation5 + $0x1560] sm:$0xf0] }
 0x197   :  { %v16008_v14 = vld [vmem:[#allocation5 + $0x1744] sm:$0xf]  ;;  %v12871_v20 = vor.u32 %v15944_v12, %v12868_v13  ;;  %6657 = vmatpush.bf16.msra.mxu1 %v12615_v19  ;;  %v6399_v13 = vadd.f32 %v6398_v7, %v6385_v55 }
 0x198   :  { %v13124_v15 = vld [vmem:[#allocation5 + $0x1760] sm:$0xf0] }
 0x199   :  { %v15808_v21 = vld [vmem:[#allocation5 + $0x1104] sm:$0xf]  ;;  %v13127_v24 = vor.u32 %v16008_v14, %v13124_v15  ;;  %6671 = vmatpush.bf16.msra.mxu2 %v12871_v20  ;;  %v16846_v20 = vadd.f32 %v6412_v16, %v6399_v13 }
 0x19a   :  { %v12324_v22 = vld [vmem:[#allocation5 + $0x1120] sm:$0xf0] }
 0x19b   :  { %v15872_v23 = vld [vmem:[#allocation5 + $0x1304] sm:$0xf]  ;;  %v12327_v37 = vor.u32 %v15808_v21, %v12324_v22  ;;  %6685 = vmatpush.bf16.msra.mxu3 %v13127_v24 }
 0x19c   :  { %v12580_v26 = vld [vmem:[#allocation5 + $0x1320] sm:$0xf0] }
 0x19d   :  { %v15936_v27 = vld [vmem:[#allocation5 + $0x1504] sm:$0xf]  ;;  %v12583_v42 = vor.u32 %v15872_v23, %v12580_v26  ;;  %6644 = vmatpush.bf16.msra.mxu0 %v12327_v37 }
 0x19e   :  { %v12836_v28 = vld [vmem:[#allocation5 + $0x1520] sm:$0xf0] }
 0x19f   :  { %v16000_v30 = vld [vmem:[#allocation5 + $0x1704] sm:$0xf]  ;;  %v12839_v45 = vor.u32 %v15936_v27, %v12836_v28  ;;  %6658 = vmatpush.bf16.msra.mxu1 %v12583_v42 }
 0x1a0   :  { %v13092_v33 = vld [vmem:[#allocation5 + $0x1720] sm:$0xf0] }
 0x1a1   :  { %v15800_v49 = vld [vmem:[#allocation5 + $0x10c4] sm:$0xf]  ;;  %v13095_v53 = vor.u32 %v16000_v30, %v13092_v33  ;;  %6672 = vmatpush.bf16.msra.mxu2 %v12839_v45 }
 0x1a2   :  { %v12292_v50 = vld [vmem:[#allocation5 + $0x10e0] sm:$0xf0] }
 0x1a3   :  { %v15864_v52 = vld [vmem:[#allocation5 + $0x12c4] sm:$0xf]  ;;  %v12295_v62 = vor.u32 %v15800_v49, %v12292_v50  ;;  %6686 = vmatpush.bf16.msra.mxu3 %v13095_v53 }
 0x1a4   :  { %v12548_v56 = vld [vmem:[#allocation5 + $0x12e0] sm:$0xf0] }
 0x1a5   :  { %v15928_v57 = vld [vmem:[#allocation5 + $0x14c4] sm:$0xf]  ;;  %v12551_v9 = vor.u32 %v15864_v52, %v12548_v56  ;;  %6645 = vmatpush.bf16.msra.mxu0 %v12295_v62 }
 0x1a6   :  { %v12804_v59 = vld [vmem:[#allocation5 + $0x14e0] sm:$0xf0] }
 0x1a7   :  { %v15992_v60 = vld [vmem:[#allocation5 + $0x16c4] sm:$0xf]  ;;  %v12807_v2 = vor.u32 %v15928_v57, %v12804_v59  ;;  %6659 = vmatpush.bf16.msra.mxu1 %v12551_v9 }
 0x1a8   :  { %v13060_v61 = vld [vmem:[#allocation5 + $0x16e0] sm:$0xf0] }
 0x1a9   :  { %v15792_v3 = vld [vmem:[#allocation5 + $0x1084] sm:$0xf]  ;;  %v13063_v6 = vor.u32 %v15992_v60, %v13060_v61  ;;  %6673 = vmatpush.bf16.msra.mxu2 %v12807_v2 }
 0x1aa   :  { %v12260_v4 = vld [vmem:[#allocation5 + $0x10a0] sm:$0xf0] }
 0x1ab   :  { %v15856_v5 = vld [vmem:[#allocation5 + $0x1284] sm:$0xf]  ;;  %v12263_v19 = vor.u32 %v15792_v3, %v12260_v4  ;;  %6687 = vmatpush.bf16.msra.mxu3 %v13063_v6 }
 0x1ac   :  { %v12516_v8 = vld [vmem:[#allocation5 + $0x12a0] sm:$0xf0] }
 0x1ad   :  { %v15920_v11 = vld [vmem:[#allocation5 + $0x1484] sm:$0xf]  ;;  %v12519_v21 = vor.u32 %v15856_v5, %v12516_v8  ;;  %6646 = vmatpush.bf16.msra.mxu0 %v12263_v19 }
 0x1ae   :  { %v12772_v12 = vld [vmem:[#allocation5 + $0x14a0] sm:$0xf0] }
 0x1af   :  { %v15984_v14 = vld [vmem:[#allocation5 + $0x1684] sm:$0xf]  ;;  %v12775_v22 = vor.u32 %v15920_v11, %v12772_v12  ;;  %6660 = vmatpush.bf16.msra.mxu1 %v12519_v21 }
 0x1b0   :  { %v13028_v15 = vld [vmem:[#allocation5 + $0x16a0] sm:$0xf0] }
 0x1b1   :  { %v15784_v23 = vld [vmem:[#allocation5 + $0x1044] sm:$0xf]  ;;  %v13031_v27 = vor.u32 %v15984_v14, %v13028_v15  ;;  %6674 = vmatpush.bf16.msra.mxu2 %v12775_v22 }
 0x1b2   :  { %v12228_v24 = vld [vmem:[#allocation5 + $0x1060] sm:$0xf0] }
 0x1b3   :  { %v15848_v26 = vld [vmem:[#allocation5 + $0x1244] sm:$0xf]  ;;  %v12231_v37 = vor.u32 %v15784_v23, %v12228_v24  ;;  %6688 = vmatpush.bf16.msra.mxu3 %v13031_v27 }
 0x1b4   :  { %v12484_v28 = vld [vmem:[#allocation5 + $0x1260] sm:$0xf0] }
 0x1b5   :  { %v15912_v29 = vld [vmem:[#allocation5 + $0x1444] sm:$0xf]  ;;  %v12487_v48 = vor.u32 %v15848_v26, %v12484_v28  ;;  %6647 = vmatpush.bf16.msra.mxu0 %v12231_v37  ;;  %v16848_v26 = vpop.f32.mrf.mxu0 }
 0x1b6   :  { %v12740_v30 = vld [vmem:[#allocation5 + $0x1460] sm:$0xf0]  ;;  %17565 = vst [vmem:[#allocation16_spill] sm:$0xff] %v16848_v26  ;;  %v13682_v26 = vld [vmem:[#allocation5 + $0x1b90] sm:$0xf] }
 0x1b7   :  { %v15976_v33 = vld [vmem:[#allocation5 + $0x1644] sm:$0xf]  ;;  %v12743_v49 = vor.u32 %v15912_v29, %v12740_v30  ;;  %6661 = vmatpush.bf16.msra.mxu1 %v12487_v48  ;;  %v16850_v29 = vpop.f32.mrf.mxu1 }
 0x1b8   :  { %v12996_v34 = vld [vmem:[#allocation5 + $0x1660] sm:$0xf0]  ;;  %17566 = vst [vmem:[#allocation17_spill] sm:$0xff] %v16850_v29  ;;  %v16145_v29 = vld [vmem:[#allocation5 + $0x1b8c] sm:$0xf] }
 0x1b9   :  { %v15776_v42 = vld [vmem:[#allocation5 + $0x1004] sm:$0xf]  ;;  %v12999_v55 = vor.u32 %v15976_v33, %v12996_v34  ;;  %6675 = vmatpush.bf16.msra.mxu2 %v12743_v49 }
 0x1ba   :  { %v12196_v45 = vld [vmem:[#allocation5 + $0x1020] sm:$0xf0] }
 0x1bb   :  { %v15840_v50 = vld [vmem:[#allocation5 + $0x1204] sm:$0xf]  ;;  %v12199_v9 = vor.u32 %v15776_v42, %v12196_v45  ;;  %6689 = vmatpush.bf16.msra.mxu3 %v12999_v55 }
 0x1bc   :  { %v12452_v52 = vld [vmem:[#allocation5 + $0x1220] sm:$0xf0] }
 0x1bd   :  { %v15904_v53 = vld [vmem:[#allocation5 + $0x1404] sm:$0xf]  ;;  %v12455_v5 = vor.u32 %v15840_v50, %v12452_v52  ;;  %6648 = vmatpush.bf16.msra.mxu0 %v12199_v9  ;;  %v16856_v9 = vpop.f32.mrf.mxu2 }
 0x1be   :  { %v12708_v56 = vld [vmem:[#allocation5 + $0x1420] sm:$0xf0]  ;;  %17567 = vst [vmem:[#allocation18_spill] sm:$0xff] %v16856_v9  ;;  %v13420_v9 = vld [vmem:[#allocation5 + $0x19a8] sm:$0xf0] }
 0x1bf   :  { %v15968_v57 = vld [vmem:[#allocation5 + $0x1604] sm:$0xf]  ;;  %v12711_v6 = vor.u32 %v15904_v53, %v12708_v56  ;;  %6662 = vmatpush.bf16.msra.mxu1 %v12455_v5 }
 0x1c0   :  { %v12964_v59 = vld [vmem:[#allocation5 + $0x1620] sm:$0xf0]  ;;  %6649 = vmatmul.bf16.vlgmr.msra.gmra.mxu0 %v16798_v31 }
 0x1c1   :  { %v16088_v60 = vld [vmem:[#allocation5 + $0x19c4] sm:$0xf]  ;;  %v12967_v11 = vor.u32 %v15968_v57, %v12964_v59  ;;  %6676 = vmatpush.bf16.msra.mxu2 %v12711_v6  ;;  %v16858_v6 = vpop.f32.mrf.mxu3 }
 0x1c2   :  { %v13444_v61 = vld [vmem:[#allocation5 + $0x19e0] sm:$0xf0]  ;;  %6663 = vmatmul.bf16.vlgmr.msra.gmra.mxu1 %v16802_v36  ;;  %17568 = vst [vmem:[#allocation19_spill] sm:$0xff] %v16858_v6  ;;  %v10860_v6 = vld [vmem:[#allocation5 + $0x5a8] sm:$0xf0] }
 0x1c3   :  { %v16152_v62 = vld [vmem:[#allocation5 + $0x1bc4] sm:$0xf]  ;;  %v13447_v12 = vor.u32 %v16088_v60, %v13444_v61  ;;  %6690 = vmatpush.bf16.msra.mxu3 %v12967_v11 }
 0x1c4   :  { %v13700_v2 = vld [vmem:[#allocation5 + $0x1be0] sm:$0xf0]  ;;  %6677 = vmatmul.bf16.vlgmr.msra.gmra.mxu2 %v16800_v35 }
 0x1c5   :  { %v16216_v3 = vld [vmem:[#allocation5 + $0x1dc4] sm:$0xf]  ;;  %v13703_v13 = vor.u32 %v16152_v62, %v13700_v2  ;;  %6697 = vmatpush.bf16.msrb.mxu0 %v13447_v12 }
 0x1c6   :  { %v13956_v4 = vld [vmem:[#allocation5 + $0x1de0] sm:$0xf0]  ;;  %6691 = vmatmul.bf16.vlgmr.msra.gmra.mxu3 %v16804_v40 }
 0x1c7   :  { %v16280_v7 = vld [vmem:[#allocation5 + $0x1fc4] sm:$0xf]  ;;  %v13959_v14 = vor.u32 %v16216_v3, %v13956_v4  ;;  %6711 = vmatpush.bf16.msrb.mxu1 %v13703_v13 }
 0x1c8   :  { %v14212_v8 = vld [vmem:[#allocation5 + $0x1fe0] sm:$0xf0] }
 0x1c9   :  { %v16080_v15 = vld [vmem:[#allocation5 + $0x1984] sm:$0xf]  ;;  %v14215_v21 = vor.u32 %v16280_v7, %v14212_v8  ;;  %6725 = vmatpush.bf16.msrb.mxu2 %v13959_v14  ;;  %v6426_v7 = vpop.f32.mrf.mxu0  ;;  %v6440_v14 = vpop.f32.mrf.mxu1 }
 0x1ca   :  { %v13412_v16 = vld [vmem:[#allocation5 + $0x19a0] sm:$0xf0]  ;;  %v6427_v12 = vadd.f32 %v6426_v7, %v16846_v20 }
 0x1cb   :  { %v16144_v19 = vld [vmem:[#allocation5 + $0x1b84] sm:$0xf]  ;;  %v13415_v30 = vor.u32 %v16080_v15, %v13412_v16  ;;  %6739 = vmatpush.bf16.msrb.mxu3 %v14215_v21 }
 0x1cc   :  { %v13668_v22 = vld [vmem:[#allocation5 + $0x1ba0] sm:$0xf0] }
 0x1cd   :  { %v16208_v23 = vld [vmem:[#allocation5 + $0x1d84] sm:$0xf]  ;;  %v13671_v33 = vor.u32 %v16144_v19, %v13668_v22  ;;  %6698 = vmatpush.bf16.msrb.mxu0 %v13415_v30 }
 0x1ce   :  { %v13924_v24 = vld [vmem:[#allocation5 + $0x1da0] sm:$0xf0] }
 0x1cf   :  { %v16272_v27 = vld [vmem:[#allocation5 + $0x1f84] sm:$0xf]  ;;  %v13927_v34 = vor.u32 %v16208_v23, %v13924_v24  ;;  %6712 = vmatpush.bf16.msrb.mxu1 %v13671_v33  ;;  %v6441_v24 = vadd.f32 %v6440_v14, %v6427_v12 }
 0x1d0   :  { %v14180_v28 = vld [vmem:[#allocation5 + $0x1fa0] sm:$0xf0] }
 0x1d1   :  { %v16072_v37 = vld [vmem:[#allocation5 + $0x1944] sm:$0xf]  ;;  %v14183_v48 = vor.u32 %v16272_v27, %v14180_v28  ;;  %6726 = vmatpush.bf16.msrb.mxu2 %v13927_v34 }
 0x1d2   :  { %v13380_v42 = vld [vmem:[#allocation5 + $0x1960] sm:$0xf0] }
 0x1d3   :  { %v16136_v45 = vld [vmem:[#allocation5 + $0x1b44] sm:$0xf]  ;;  %v13383_v56 = vor.u32 %v16072_v37, %v13380_v42  ;;  %6740 = vmatpush.bf16.msrb.mxu3 %v14183_v48 }
 0x1d4   :  { %v13636_v49 = vld [vmem:[#allocation5 + $0x1b60] sm:$0xf0] }
 0x1d5   :  { %v16200_v50 = vld [vmem:[#allocation5 + $0x1d44] sm:$0xf]  ;;  %v13639_v57 = vor.u32 %v16136_v45, %v13636_v49  ;;  %6699 = vmatpush.bf16.msrb.mxu0 %v13383_v56 }
 0x1d6   :  { %v13892_v52 = vld [vmem:[#allocation5 + $0x1d60] sm:$0xf0] }
 0x1d7   :  { %v16264_v53 = vld [vmem:[#allocation5 + $0x1f44] sm:$0xf]  ;;  %v13895_v59 = vor.u32 %v16200_v50, %v13892_v52  ;;  %6713 = vmatpush.bf16.msrb.mxu1 %v13639_v57  ;;  %v6454_v52 = vpop.f32.mrf.mxu2 }
 0x1d8   :  { %v14148_v55 = vld [vmem:[#allocation5 + $0x1f60] sm:$0xf0]  ;;  %v6455_v57 = vadd.f32 %v6454_v52, %v6441_v24  ;;  %v10890_v52 = vld [vmem:[#allocation5 + $0x5c8] sm:$0xf] }
 0x1d9   :  { %v16064_v60 = vld [vmem:[#allocation5 + $0x1904] sm:$0xf]  ;;  %v14151_v2 = vor.u32 %v16264_v53, %v14148_v55  ;;  %6727 = vmatpush.bf16.msrb.mxu2 %v13895_v59  ;;  %v6468_v59 = vpop.f32.mrf.mxu3 }
 0x1da   :  { %v13348_v61 = vld [vmem:[#allocation5 + $0x1920] sm:$0xf0] }
 0x1db   :  { %v16128_v62 = vld [vmem:[#allocation5 + $0x1b04] sm:$0xf]  ;;  %v13351_v13 = vor.u32 %v16064_v60, %v13348_v61  ;;  %6741 = vmatpush.bf16.msrb.mxu3 %v14151_v2  ;;  %v16861_v2 = vadd.f32 %v6468_v59, %v6455_v57  ;;  %v11146_v57 = vld [vmem:[#allocation5 + $0x7c8] sm:$0xf] }
 0x1dc   :  { %v13604_v3 = vld [vmem:[#allocation5 + $0x1b20] sm:$0xf0]  ;;  %v15517_v59 = vld [vmem:[#allocation5 + $0x7e4] sm:$0xf0] }
 0x1dd   :  { %v16192_v4 = vld [vmem:[#allocation5 + $0x1d04] sm:$0xf]  ;;  %v13607_v15 = vor.u32 %v16128_v62, %v13604_v3  ;;  %6700 = vmatpush.bf16.msrb.mxu0 %v13351_v13 }
 0x1de   :  { %v13860_v5 = vld [vmem:[#allocation5 + $0x1d20] sm:$0xf0] }
 0x1df   :  { %v16256_v8 = vld [vmem:[#allocation5 + $0x1f04] sm:$0xf]  ;;  %v13863_v16 = vor.u32 %v16192_v4, %v13860_v5  ;;  %6714 = vmatpush.bf16.msrb.mxu1 %v13607_v15 }
 0x1e0   :  { %v14116_v11 = vld [vmem:[#allocation5 + $0x1f20] sm:$0xf0] }
 0x1e1   :  { %v16056_v19 = vld [vmem:[#allocation5 + $0x18c4] sm:$0xf]  ;;  %v14119_v23 = vor.u32 %v16256_v8, %v14116_v11  ;;  %6728 = vmatpush.bf16.msrb.mxu2 %v13863_v16 }
 0x1e2   :  { %v13316_v21 = vld [vmem:[#allocation5 + $0x18e0] sm:$0xf0] }
 0x1e3   :  { %v16120_v22 = vld [vmem:[#allocation5 + $0x1ac4] sm:$0xf]  ;;  %v13319_v37 = vor.u32 %v16056_v19, %v13316_v21  ;;  %6742 = vmatpush.bf16.msrb.mxu3 %v14119_v23 }
 0x1e4   :  { %v13572_v27 = vld [vmem:[#allocation5 + $0x1ae0] sm:$0xf0] }
 0x1e5   :  { %v16184_v28 = vld [vmem:[#allocation5 + $0x1cc4] sm:$0xf]  ;;  %v13575_v20 = vor.u32 %v16120_v22, %v13572_v27  ;;  %6701 = vmatpush.bf16.msrb.mxu0 %v13319_v37 }
 0x1e6   :  { %v13828_v30 = vld [vmem:[#allocation5 + $0x1ce0] sm:$0xf0] }
 0x1e7   :  { %v16248_v33 = vld [vmem:[#allocation5 + $0x1ec4] sm:$0xf]  ;;  %v13831_v42 = vor.u32 %v16184_v28, %v13828_v30  ;;  %6715 = vmatpush.bf16.msrb.mxu1 %v13575_v20 }
 0x1e8   :  { %v14084_v34 = vld [vmem:[#allocation5 + $0x1ee0] sm:$0xf0] }
 0x1e9   :  { %v16048_v45 = vld [vmem:[#allocation5 + $0x1884] sm:$0xf]  ;;  %v14087_v50 = vor.u32 %v16248_v33, %v14084_v34  ;;  %6729 = vmatpush.bf16.msrb.mxu2 %v13831_v42  ;;  %v10378_v42 = vld [vmem:[#allocation5 + $0x1c8] sm:$0xf] }
 0x1ea   :  { %v13284_v48 = vld [vmem:[#allocation5 + $0x18a0] sm:$0xf0] }
 0x1eb   :  { %v16112_v49 = vld [vmem:[#allocation5 + $0x1a84] sm:$0xf]  ;;  %v13287_v62 = vor.u32 %v16048_v45, %v13284_v48  ;;  %6743 = vmatpush.bf16.msrb.mxu3 %v14087_v50  ;;  %v15325_v45 = vld [vmem:[#allocation5 + $0x1e4] sm:$0xf0] }
 0x1ec   :  { %v13540_v53 = vld [vmem:[#allocation5 + $0x1aa0] sm:$0xf0]  ;;  %v10634_v48 = vld [vmem:[#allocation5 + $0x3c8] sm:$0xf] }
 0x1ed   :  { %v16176_v55 = vld [vmem:[#allocation5 + $0x1c84] sm:$0xf]  ;;  %v13543_v3 = vor.u32 %v16112_v49, %v13540_v53  ;;  %6702 = vmatpush.bf16.msrb.mxu0 %v13287_v62  ;;  %v15389_v50 = vld [vmem:[#allocation5 + $0x3e4] sm:$0xf0] }
 0x1ee   :  { %v13796_v56 = vld [vmem:[#allocation5 + $0x1ca0] sm:$0xf0]  ;;  %v15453_v53 = vld [vmem:[#allocation5 + $0x5e4] sm:$0xf0]  ;;  %v10635_v62 = vor.u32 %v15389_v50, %v10634_v48 }
 0x1ef   :  { %v16240_v60 = vld [vmem:[#allocation5 + $0x1e84] sm:$0xf]  ;;  %v13799_v4 = vor.u32 %v16176_v55, %v13796_v56  ;;  %6716 = vmatpush.bf16.msrb.mxu1 %v13543_v3  ;;  %v10891_v3 = vor.u32 %v15453_v53, %v10890_v52  ;;  %v10282_v50 = vld [vmem:[#allocation5 + $0x108] sm:$0xf] }
 0x1f0   :  { %v14052_v61 = vld [vmem:[#allocation5 + $0x1ea0] sm:$0xf0]  ;;  %v15301_v52 = vld [vmem:[#allocation5 + $0x124] sm:$0xf0] }
 0x1f1   :  { %v16040_v5 = vld [vmem:[#allocation5 + $0x1844] sm:$0xf]  ;;  %v14055_v11 = vor.u32 %v16240_v60, %v14052_v61  ;;  %6730 = vmatpush.bf16.msrb.mxu2 %v13799_v4  ;;  %v10379_v61 = vor.u32 %v15325_v45, %v10378_v42  ;;  %v10346_v4 = vld [vmem:[#allocation5 + $0x188] sm:$0xf] }
 0x1f2   :  { %v13252_v7 = vld [vmem:[#allocation5 + $0x1860] sm:$0xf0]  ;;  %v15501_v42 = vld [vmem:[#allocation5 + $0x764] sm:$0xf0] }
 0x1f3   :  { %v16104_v8 = vld [vmem:[#allocation5 + $0x1a44] sm:$0xf]  ;;  %v13255_v19 = vor.u32 %v16040_v5, %v13252_v7  ;;  %6744 = vmatpush.bf16.msrb.mxu3 %v14055_v11  ;;  %v15317_v5 = vld [vmem:[#allocation5 + $0x1a4] sm:$0xf0] }
 0x1f4   :  { %v13508_v12 = vld [vmem:[#allocation5 + $0x1a60] sm:$0xf0]  ;;  %v10602_v7 = vld [vmem:[#allocation5 + $0x388] sm:$0xf] }
 0x1f5   :  { %v16168_v13 = vld [vmem:[#allocation5 + $0x1c44] sm:$0xf]  ;;  %v13511_v23 = vor.u32 %v16104_v8, %v13508_v12  ;;  %6703 = vmatpush.bf16.msrb.mxu0 %v13255_v19  ;;  %v11147_v8 = vor.u32 %v15517_v59, %v11146_v57  ;;  %v15381_v11 = vld [vmem:[#allocation5 + $0x3a4] sm:$0xf0]  ;;  %v16865_v19 = vpop.f32.mrf.mxu1 }
 0x1f6   :  { %v13764_v14 = vld [vmem:[#allocation5 + $0x1c60] sm:$0xf0]  ;;  %v10858_v12 = vld [vmem:[#allocation5 + $0x588] sm:$0xf]  ;;  %17570 = vst [vmem:[#allocation21_spill] sm:$0xff] %v16865_v19 }
 0x1f7   :  { %v16232_v15 = vld [vmem:[#allocation5 + $0x1e44] sm:$0xf]  ;;  %v13767_v24 = vor.u32 %v16168_v13, %v13764_v14  ;;  %6717 = vmatpush.bf16.msrb.mxu1 %v13511_v23  ;;  %v15445_v13 = vld [vmem:[#allocation5 + $0x5a4] sm:$0xf0]  ;;  %v16863_v14 = vpop.f32.mrf.mxu0 }
 0x1f8   :  { %v14020_v16 = vld [vmem:[#allocation5 + $0x1e60] sm:$0xf0]  ;;  %17569 = vst [vmem:[#allocation20_spill] sm:$0xff] %v16863_v14  ;;  %v10859_v23 = vor.u32 %v15445_v13, %v10858_v12  ;;  %v10538_v53 = vld [vmem:[#allocation5 + $0x308] sm:$0xf] }
 0x1f9   :  { %v16032_v21 = vld [vmem:[#allocation5 + $0x1804] sm:$0xf]  ;;  %v14023_v33 = vor.u32 %v16232_v15, %v14020_v16  ;;  %6731 = vmatpush.bf16.msrb.mxu2 %v13767_v24  ;;  %v11114_v15 = vld [vmem:[#allocation5 + $0x788] sm:$0xf]  ;;  %v15377_v14 = vld [vmem:[#allocation5 + $0x38c] sm:$0xf] }
 0x1fa   :  { %v13220_v22 = vld [vmem:[#allocation5 + $0x1820] sm:$0xf0]  ;;  %v15509_v16 = vld [vmem:[#allocation5 + $0x7a4] sm:$0xf0] }
 0x1fb   :  { %v16096_v27 = vld [vmem:[#allocation5 + $0x1a04] sm:$0xf]  ;;  %v13223_v49 = vor.u32 %v16032_v21, %v13220_v22  ;;  %6745 = vmatpush.bf16.msrb.mxu3 %v14023_v33  ;;  %v10347_v21 = vor.u32 %v15317_v5, %v10346_v4  ;;  %v10603_v22 = vor.u32 %v15381_v11, %v10602_v7  ;;  %v10314_v24 = vld [vmem:[#allocation5 + $0x148] sm:$0xf]  ;;  %v10283_v7 = vor.u32 %v15301_v52, %v10282_v50 }
 0x1fc   :  { %v13476_v28 = vld [vmem:[#allocation5 + $0x1a20] sm:$0xf0]  ;;  %v15373_v33 = vld [vmem:[#allocation5 + $0x364] sm:$0xf0] }
 0x1fd   :  { %v16160_v30 = vld [vmem:[#allocation5 + $0x1c04] sm:$0xf]  ;;  %v13479_v55 = vor.u32 %v16096_v27, %v13476_v28  ;;  %6704 = vmatpush.bf16.msrb.mxu0 %v13223_v49  ;;  %v15309_v27 = vld [vmem:[#allocation5 + $0x164] sm:$0xf0] }
 0x1fe   :  { %v13732_v34 = vld [vmem:[#allocation5 + $0x1c20] sm:$0xf0]  ;;  %v10570_v28 = vld [vmem:[#allocation5 + $0x348] sm:$0xf]  ;;  %v10315_v45 = vor.u32 %v15309_v27, %v10314_v24 }
 0x1ff   :  { %v16224_v37 = vld [vmem:[#allocation5 + $0x1e04] sm:$0xf]  ;;  %v13735_v56 = vor.u32 %v16160_v30, %v13732_v34  ;;  %6718 = vmatpush.bf16.msrb.mxu1 %v13479_v55  ;;  %v11115_v30 = vor.u32 %v15509_v16, %v11114_v15  ;;  %v10826_v34 = vld [vmem:[#allocation5 + $0x548] sm:$0xf]  ;;  %v10571_v48 = vor.u32 %v15373_v33, %v10570_v28  ;;  %v16871_v55 = vpop.f32.mrf.mxu2 }
 0x200   :  { %v13988_v20 = vld [vmem:[#allocation5 + $0x1e20] sm:$0xf0]  ;;  %6705 = vmatmul.bf16.vlgmr.msrb.gmra.mxu0 %v16810_v32  ;;  %17571 = vst [vmem:[#allocation22_spill] sm:$0xff] %v16871_v55  ;;  %v15365_v57 = vld [vmem:[#allocation5 + $0x324] sm:$0xf0] }
 0x201   :  { %v13991_v60 = vor.u32 %v16224_v37, %v13988_v20  ;;  %6732 = vmatpush.bf16.msrb.mxu2 %v13735_v56  ;;  %6753 = vmatpush.bf16.msra.mxu0 %v10379_v61  ;;  %v15437_v37 = vld [vmem:[#allocation5 + $0x564] sm:$0xf0]  ;;  %v16873_v61 = vpop.f32.mrf.mxu3  ;;  %v10539_v11 = vor.u32 %v15365_v57, %v10538_v53 }
 0x202   :  { %6719 = vmatmul.bf16.vlgmr.msrb.gmra.mxu1 %v16814_v41  ;;  %v11082_v20 = vld [vmem:[#allocation5 + $0x748] sm:$0xf]  ;;  %v10827_v49 = vor.u32 %v15437_v37, %v10826_v34  ;;  %17572 = vst [vmem:[#allocation23_spill] sm:$0xff] %v16873_v61 }
 0x203   :  { %6746 = vmatpush.bf16.msrb.mxu3 %v13991_v60  ;;  %6767 = vmatpush.bf16.msra.mxu1 %v10635_v62  ;;  %v11083_v56 = vor.u32 %v15501_v42, %v11082_v20  ;;  %v10794_v59 = vld [vmem:[#allocation5 + $0x508] sm:$0xf]  ;;  %v6482_v62 = vpop.f32.mrf.mxu0 }
 0x204   :  { %6733 = vmatmul.bf16.vlgmr.msrb.gmra.mxu2 %v16812_v38  ;;  %v15429_v60 = vld [vmem:[#allocation5 + $0x524] sm:$0xf0]  ;;  %v6483_v5 = vadd.f32 %v6482_v62, %v16861_v2 }
 0x205   :  { %6781 = vmatpush.bf16.msra.mxu2 %v10891_v3  ;;  %6754 = vmatpush.bf16.msra.mxu0 %v10347_v21  ;;  %v11050_v3 = vld [vmem:[#allocation5 + $0x708] sm:$0xf]  ;;  %v10795_v12 = vor.u32 %v15429_v60, %v10794_v59 }
 0x206   :  { %6747 = vmatmul.bf16.vlgmr.msrb.gmra.mxu3 %v16816_v46  ;;  %v15493_v4 = vld [vmem:[#allocation5 + $0x724] sm:$0xf0] }
 0x207   :  { %6795 = vmatpush.bf16.msra.mxu3 %v11147_v8  ;;  %6768 = vmatpush.bf16.msra.mxu1 %v10603_v22  ;;  %v6496_v8 = vpop.f32.mrf.mxu1  ;;  %v10250_v13 = vld [vmem:[#allocation5 + $0xc8] sm:$0xf]  ;;  %v11051_v21 = vor.u32 %v15493_v4, %v11050_v3 }
 0x208   :  { %v15293_v15 = vld [vmem:[#allocation5 + $0xe4] sm:$0xf0]  ;;  %v6497_v22 = vadd.f32 %v6496_v8, %v6483_v5 }
 0x209   :  { %6782 = vmatpush.bf16.msra.mxu2 %v10859_v23  ;;  %6755 = vmatpush.bf16.msra.mxu0 %v10315_v45  ;;  %v10506_v16 = vld [vmem:[#allocation5 + $0x2c8] sm:$0xf]  ;;  %v10251_v33 = vor.u32 %v15293_v15, %v10250_v13 }
 0x20a   :  { %v15357_v23 = vld [vmem:[#allocation5 + $0x2e4] sm:$0xf0] }
 0x20b   :  { %6796 = vmatpush.bf16.msra.mxu3 %v11115_v30  ;;  %6769 = vmatpush.bf16.msra.mxu1 %v10571_v48  ;;  %v10762_v24 = vld [vmem:[#allocation5 + $0x4c8] sm:$0xf]  ;;  %v10507_v2 = vor.u32 %v15357_v23, %v10506_v16  ;;  %v6510_v48 = vpop.f32.mrf.mxu2 }
 0x20c   :  { %v15421_v27 = vld [vmem:[#allocation5 + $0x4e4] sm:$0xf0]  ;;  %v6511_v53 = vadd.f32 %v6510_v48, %v6497_v22 }
 0x20d   :  { %6783 = vmatpush.bf16.msra.mxu2 %v10827_v49  ;;  %v11018_v28 = vld [vmem:[#allocation5 + $0x6c8] sm:$0xf]  ;;  %6756 = vmatpush.bf16.msra.mxu0 %v10283_v7  ;;  %v10763_v34 = vor.u32 %v15421_v27, %v10762_v24 }
 0x20e   :  { %v15485_v30 = vld [vmem:[#allocation5 + $0x6e4] sm:$0xf0] }
 0x20f   :  { %6797 = vmatpush.bf16.msra.mxu3 %v11083_v56  ;;  %6770 = vmatpush.bf16.msra.mxu1 %v10539_v11  ;;  %v10218_v37 = vld [vmem:[#allocation5 + $0x88] sm:$0xf]  ;;  %v11019_v45 = vor.u32 %v15485_v30, %v11018_v28  ;;  %v6524_v56 = vpop.f32.mrf.mxu3 }
 0x210   :  { %v15285_v20 = vld [vmem:[#allocation5 + $0xa4] sm:$0xf0]  ;;  %v16876_v62 = vadd.f32 %v6524_v56, %v6511_v53 }
 0x211   :  { %6784 = vmatpush.bf16.msra.mxu2 %v10795_v12  ;;  %v10474_v42 = vld [vmem:[#allocation5 + $0x288] sm:$0xf]  ;;  %6757 = vmatpush.bf16.msra.mxu0 %v10251_v33  ;;  %v10219_v60 = vor.u32 %v15285_v20, %v10218_v37 }
 0x212   :  { %v15349_v49 = vld [vmem:[#allocation5 + $0x2a4] sm:$0xf0]  ;;  %17573 = vst [vmem:[#allocation24_spill] sm:$0xff] %v16876_v62 }
 0x213   :  { %6798 = vmatpush.bf16.msra.mxu3 %v11051_v21  ;;  %v10730_v50 = vld [vmem:[#allocation5 + $0x488] sm:$0xf]  ;;  %6771 = vmatpush.bf16.msra.mxu1 %v10507_v2  ;;  %v10475_v3 = vor.u32 %v15349_v49, %v10474_v42 }
 0x214   :  { %v15413_v52 = vld [vmem:[#allocation5 + $0x4a4] sm:$0xf0] }
 0x215   :  { %v10986_v57 = vld [vmem:[#allocation5 + $0x688] sm:$0xf]  ;;  %6785 = vmatpush.bf16.msra.mxu2 %v10763_v34  ;;  %v10731_v4 = vor.u32 %v15413_v52, %v10730_v50  ;;  %6758 = vmatpush.bf16.msra.mxu0 %v10219_v60 }
 0x216   :  { %v15477_v59 = vld [vmem:[#allocation5 + $0x6a4] sm:$0xf0] }
 0x217   :  { %v10186_v5 = vld [vmem:[#allocation5 + $0x48] sm:$0xf]  ;;  %6799 = vmatpush.bf16.msra.mxu3 %v11019_v45  ;;  %v10987_v11 = vor.u32 %v15477_v59, %v10986_v57  ;;  %6772 = vmatpush.bf16.msra.mxu1 %v10475_v3 }
 0x218   :  { %v15277_v7 = vld [vmem:[#allocation5 + $0x64] sm:$0xf0] }
 0x219   :  { %v10442_v8 = vld [vmem:[#allocation5 + $0x248] sm:$0xf]  ;;  %v10187_v22 = vor.u32 %v15277_v7, %v10186_v5  ;;  %6786 = vmatpush.bf16.msra.mxu2 %v10731_v4 }
 0x21a   :  { %v15341_v12 = vld [vmem:[#allocation5 + $0x264] sm:$0xf0] }
 0x21b   :  { %v10698_v13 = vld [vmem:[#allocation5 + $0x448] sm:$0xf]  ;;  %v10443_v27 = vor.u32 %v15341_v12, %v10442_v8  ;;  %6800 = vmatpush.bf16.msra.mxu3 %v10987_v11  ;;  %6759 = vmatpush.bf16.msra.mxu0 %v10187_v22 }
 0x21c   :  { %v15405_v15 = vld [vmem:[#allocation5 + $0x464] sm:$0xf0] }
 0x21d   :  { %v10954_v16 = vld [vmem:[#allocation5 + $0x648] sm:$0xf]  ;;  %v10699_v28 = vor.u32 %v15405_v15, %v10698_v13  ;;  %6773 = vmatpush.bf16.msra.mxu1 %v10443_v27 }
 0x21e   :  { %v15469_v21 = vld [vmem:[#allocation5 + $0x664] sm:$0xf0] }
 0x21f   :  { %v10154_v23 = vld [vmem:[#allocation5 + $0x8] sm:$0xf]  ;;  %v10955_v34 = vor.u32 %v15469_v21, %v10954_v16  ;;  %6787 = vmatpush.bf16.msra.mxu2 %v10699_v28 }
 0x220   :  { %v15269_v24 = vld [vmem:[#allocation5 + $0x24] sm:$0xf0] }
 0x221   :  { %v10410_v30 = vld [vmem:[#allocation5 + $0x208] sm:$0xf]  ;;  %v10155_v50 = vor.u32 %v15269_v24, %v10154_v23  ;;  %6801 = vmatpush.bf16.msra.mxu3 %v10955_v34  ;;  %v16878_v23 = vpop.f32.mrf.mxu0 }
 0x222   :  { %v15333_v33 = vld [vmem:[#allocation5 + $0x224] sm:$0xf0]  ;;  %17574 = vst [vmem:[#allocation25_spill] sm:$0xff] %v16878_v23 }
 0x223   :  { %v10666_v2 = vld [vmem:[#allocation5 + $0x408] sm:$0xf]  ;;  %v10411_v57 = vor.u32 %v15333_v33, %v10410_v30  ;;  %6760 = vmatpush.bf16.msra.mxu0 %v10155_v50  ;;  %v16880_v30 = vpop.f32.mrf.mxu1 }
 0x224   :  { %v15397_v37 = vld [vmem:[#allocation5 + $0x424] sm:$0xf0]  ;;  %17575 = vst [vmem:[#allocation26_spill] sm:$0xff] %v16880_v30 }
 0x225   :  { %v10922_v20 = vld [vmem:[#allocation5 + $0x608] sm:$0xf]  ;;  %v10667_v59 = vor.u32 %v15397_v37, %v10666_v2  ;;  %6774 = vmatpush.bf16.msra.mxu1 %v10411_v57 }
 0x226   :  { %v15461_v42 = vld [vmem:[#allocation5 + $0x624] sm:$0xf0]  ;;  %6761 = vmatmul.bf16.vlgmr.msra.gmra.mxu0 %v16774_v58 }
 0x227   :  { %v11402_v45 = vld [vmem:[#allocation5 + $0x9c8] sm:$0xf]  ;;  %v10923_v4 = vor.u32 %v15461_v42, %v10922_v20  ;;  %6788 = vmatpush.bf16.msra.mxu2 %v10667_v59 }
 0x228   :  { %v15581_v48 = vld [vmem:[#allocation5 + $0x9e4] sm:$0xf0]  ;;  %6775 = vmatmul.bf16.vlgmr.msra.gmra.mxu1 %v16780_v10 }
 0x229   :  { %v11658_v49 = vld [vmem:[#allocation5 + $0xbc8] sm:$0xf]  ;;  %v11403_v5 = vor.u32 %v15581_v48, %v11402_v45  ;;  %6802 = vmatpush.bf16.msra.mxu3 %v10923_v4 }
 0x22a   :  { %v15645_v52 = vld [vmem:[#allocation5 + $0xbe4] sm:$0xf0]  ;;  %6789 = vmatmul.bf16.vlgmr.msra.gmra.mxu2 %v16776_v1 }
 0x22b   :  { %v11914_v53 = vld [vmem:[#allocation5 + $0xdc8] sm:$0xf]  ;;  %v11659_v7 = vor.u32 %v15645_v52, %v11658_v49  ;;  %6809 = vmatpush.bf16.msrb.mxu0 %v11403_v5 }
 0x22c   :  { %v15709_v56 = vld [vmem:[#allocation5 + $0xde4] sm:$0xf0]  ;;  %6803 = vmatmul.bf16.vlgmr.msra.gmra.mxu3 %v16782_v17 }
 0x22d   :  { %v12170_v60 = vld [vmem:[#allocation5 + $0xfc8] sm:$0xf]  ;;  %v11915_v8 = vor.u32 %v15709_v56, %v11914_v53  ;;  %6823 = vmatpush.bf16.msrb.mxu1 %v11659_v7  ;;  %v16886_v56 = vld [vmem:[#allocation7] sm:$0xff]  ;;  %v16889_v7 = vpop.f32.mrf.mxu2 }
 0x22e   :  { %v15773_v3 = vld [vmem:[#allocation5 + $0xfe4] sm:$0xf0]  ;;  %v17554_v57 = vperm.slane %v16886_v56, 1  ;;  %17576 = vst [vmem:[#allocation27_spill] sm:$0xff] %v16889_v7 }
 0x22f   :  { %v11370_v11 = vld [vmem:[#allocation5 + $0x988] sm:$0xf]  ;;  %v12171_v15 = vor.u32 %v15773_v3, %v12170_v60  ;;  %6837 = vmatpush.bf16.msrb.mxu2 %v11915_v8 }
 0x230   :  { %v15573_v12 = vld [vmem:[#allocation5 + $0x9a4] sm:$0xf0] }
 0x231   :  { %v11626_v13 = vld [vmem:[#allocation5 + $0xb88] sm:$0xf]  ;;  %v11371_v28 = vor.u32 %v15573_v12, %v11370_v11  ;;  %6851 = vmatpush.bf16.msrb.mxu3 %v12171_v15 }
 0x232   :  { %v15637_v16 = vld [vmem:[#allocation5 + $0xba4] sm:$0xf0] }
 0x233   :  { %v11882_v21 = vld [vmem:[#allocation5 + $0xd88] sm:$0xf]  ;;  %v11627_v33 = vor.u32 %v15637_v16, %v11626_v13  ;;  %6810 = vmatpush.bf16.msrb.mxu0 %v11371_v28 }
 0x234   :  { %v15701_v22 = vld [vmem:[#allocation5 + $0xda4] sm:$0xf0] }
 0x235   :  { %v12138_v24 = vld [vmem:[#allocation5 + $0xf88] sm:$0xf]  ;;  %v11883_v2 = vor.u32 %v15701_v22, %v11882_v21  ;;  %6824 = vmatpush.bf16.msrb.mxu1 %v11627_v33  ;;  %v6538_v21 = vpop.f32.mrf.mxu0  ;;  %v16891_v22 = vpop.f32.mrf.mxu3 }
 0x236   :  { %v15765_v27 = vld [vmem:[#allocation5 + $0xfa4] sm:$0xf0]  ;;  %17577 = vst [vmem:[#allocation28_spill] sm:$0xff] %v16891_v22 }
 0x237   :  { %v11338_v34 = vld [vmem:[#allocation5 + $0x948] sm:$0xf]  ;;  %v12139_v42 = vor.u32 %v15765_v27, %v12138_v24  ;;  %6838 = vmatpush.bf16.msrb.mxu2 %v11883_v2  ;;  %v6539_v27 = vadd.f32 %v6538_v21, %v17554_v57 }
 0x238   :  { %v15565_v37 = vld [vmem:[#allocation5 + $0x964] sm:$0xf0] }
 0x239   :  { %v11594_v20 = vld [vmem:[#allocation5 + $0xb48] sm:$0xf]  ;;  %v11339_v53 = vor.u32 %v15565_v37, %v11338_v34  ;;  %6852 = vmatpush.bf16.msrb.mxu3 %v12139_v42 }
 0x23a   :  { %v15629_v45 = vld [vmem:[#allocation5 + $0xb64] sm:$0xf0] }
 0x23b   :  { %v11850_v48 = vld [vmem:[#allocation5 + $0xd48] sm:$0xf]  ;;  %v11595_v59 = vor.u32 %v15629_v45, %v11594_v20  ;;  %6811 = vmatpush.bf16.msrb.mxu0 %v11339_v53  ;;  %v6552_v20 = vpop.f32.mrf.mxu1 }
 0x23c   :  { %v15693_v49 = vld [vmem:[#allocation5 + $0xd64] sm:$0xf0] }
 0x23d   :  { %v12106_v50 = vld [vmem:[#allocation5 + $0xf48] sm:$0xf]  ;;  %v11851_v60 = vor.u32 %v15693_v49, %v11850_v48  ;;  %6825 = vmatpush.bf16.msrb.mxu1 %v11595_v59 }
 0x23e   :  { %v15757_v52 = vld [vmem:[#allocation5 + $0xf64] sm:$0xf0] }
 0x23f   :  { %v11306_v3 = vld [vmem:[#allocation5 + $0x908] sm:$0xf]  ;;  %v12107_v8 = vor.u32 %v15757_v52, %v12106_v50  ;;  %6839 = vmatpush.bf16.msrb.mxu2 %v11851_v60  ;;  %v6553_v50 = vadd.f32 %v6552_v20, %v6539_v27 }
 0x240   :  { %v15557_v4 = vld [vmem:[#allocation5 + $0x924] sm:$0xf0] }
 0x241   :  { %v11562_v5 = vld [vmem:[#allocation5 + $0xb08] sm:$0xf]  ;;  %v11307_v24 = vor.u32 %v15557_v4, %v11306_v3  ;;  %6853 = vmatpush.bf16.msrb.mxu3 %v12107_v8 }
 0x242   :  { %v15621_v11 = vld [vmem:[#allocation5 + $0xb24] sm:$0xf0] }
 0x243   :  { %v11818_v12 = vld [vmem:[#allocation5 + $0xd08] sm:$0xf]  ;;  %v11563_v28 = vor.u32 %v15621_v11, %v11562_v5  ;;  %6812 = vmatpush.bf16.msrb.mxu0 %v11307_v24  ;;  %v6580_v24 = vpop.f32.mrf.mxu3 }
 0x244   :  { %v15685_v13 = vld [vmem:[#allocation5 + $0xd24] sm:$0xf0] }
 0x245   :  { %v12074_v15 = vld [vmem:[#allocation5 + $0xf08] sm:$0xf]  ;;  %v11819_v33 = vor.u32 %v15685_v13, %v11818_v12  ;;  %6826 = vmatpush.bf16.msrb.mxu1 %v11563_v28 }
 0x246   :  { %v15749_v16 = vld [vmem:[#allocation5 + $0xf24] sm:$0xf0] }
 0x247   :  { %v11274_v2 = vld [vmem:[#allocation5 + $0x8c8] sm:$0xf]  ;;  %v12075_v42 = vor.u32 %v15749_v16, %v12074_v15  ;;  %6840 = vmatpush.bf16.msrb.mxu2 %v11819_v33  ;;  %v6566_v16 = vpop.f32.mrf.mxu2 }
 0x248   :  { %v15549_v34 = vld [vmem:[#allocation5 + $0x8e4] sm:$0xf0]  ;;  %v6567_v27 = vadd.f32 %v6566_v16, %v6553_v50 }
 0x249   :  { %v11530_v37 = vld [vmem:[#allocation5 + $0xac8] sm:$0xf]  ;;  %v11275_v3 = vor.u32 %v15549_v34, %v11274_v2  ;;  %6854 = vmatpush.bf16.msrb.mxu3 %v12075_v42 }
 0x24a   :  { %v15613_v45 = vld [vmem:[#allocation5 + $0xae4] sm:$0xf0] }
 0x24b   :  { %v11786_v48 = vld [vmem:[#allocation5 + $0xcc8] sm:$0xf]  ;;  %v11531_v59 = vor.u32 %v15613_v45, %v11530_v37  ;;  %6813 = vmatpush.bf16.msrb.mxu0 %v11275_v3  ;;  %v16895_v45 = vadd.f32 %v6580_v24, %v6567_v27 }
 0x24c   :  { %v15677_v49 = vld [vmem:[#allocation5 + $0xce4] sm:$0xf0] }
 0x24d   :  { %v12042_v52 = vld [vmem:[#allocation5 + $0xec8] sm:$0xf]  ;;  %v11787_v60 = vor.u32 %v15677_v49, %v11786_v48  ;;  %6827 = vmatpush.bf16.msrb.mxu1 %v11531_v59 }
 0x24e   :  { %v15741_v53 = vld [vmem:[#allocation5 + $0xee4] sm:$0xf0] }
 0x24f   :  { %v11242_v4 = vld [vmem:[#allocation5 + $0x888] sm:$0xf]  ;;  %v12043_v12 = vor.u32 %v15741_v53, %v12042_v52  ;;  %6841 = vmatpush.bf16.msrb.mxu2 %v11787_v60 }
 0x250   :  { %v15541_v5 = vld [vmem:[#allocation5 + $0x8a4] sm:$0xf0] }
 0x251   :  { %v11498_v11 = vld [vmem:[#allocation5 + $0xa88] sm:$0xf]  ;;  %v11243_v20 = vor.u32 %v15541_v5, %v11242_v4  ;;  %6855 = vmatpush.bf16.msrb.mxu3 %v12043_v12 }
 0x252   :  { %v15605_v13 = vld [vmem:[#allocation5 + $0xaa4] sm:$0xf0] }
 0x253   :  { %v11754_v8 = vld [vmem:[#allocation5 + $0xc88] sm:$0xf]  ;;  %v11499_v28 = vor.u32 %v15605_v13, %v11498_v11  ;;  %6814 = vmatpush.bf16.msrb.mxu0 %v11243_v20 }
 0x254   :  { %v15669_v15 = vld [vmem:[#allocation5 + $0xca4] sm:$0xf0] }
 0x255   :  { %v12010_v21 = vld [vmem:[#allocation5 + $0xe88] sm:$0xf]  ;;  %v11755_v33 = vor.u32 %v15669_v15, %v11754_v8  ;;  %6828 = vmatpush.bf16.msrb.mxu1 %v11499_v28 }
 0x256   :  { %v15733_v57 = vld [vmem:[#allocation5 + $0xea4] sm:$0xf0] }
 0x257   :  { %v11210_v2 = vld [vmem:[#allocation5 + $0x848] sm:$0xf]  ;;  %v12011_v42 = vor.u32 %v15733_v57, %v12010_v21  ;;  %6842 = vmatpush.bf16.msrb.mxu2 %v11755_v33 }
 0x258   :  { %v15533_v34 = vld [vmem:[#allocation5 + $0x864] sm:$0xf0] }
 0x259   :  { %v11466_v37 = vld [vmem:[#allocation5 + $0xa48] sm:$0xf]  ;;  %v11211_v50 = vor.u32 %v15533_v34, %v11210_v2  ;;  %6856 = vmatpush.bf16.msrb.mxu3 %v12011_v42 }
 0x25a   :  { %v15597_v48 = vld [vmem:[#allocation5 + $0xa64] sm:$0xf0] }
 0x25b   :  { %v11722_v49 = vld [vmem:[#allocation5 + $0xc48] sm:$0xf]  ;;  %v11467_v59 = vor.u32 %v15597_v48, %v11466_v37  ;;  %6815 = vmatpush.bf16.msrb.mxu0 %v11211_v50 }
 0x25c   :  { %v15661_v52 = vld [vmem:[#allocation5 + $0xc64] sm:$0xf0] }
 0x25d   :  { %v11978_v53 = vld [vmem:[#allocation5 + $0xe48] sm:$0xf]  ;;  %v11723_v60 = vor.u32 %v15661_v52, %v11722_v49  ;;  %6829 = vmatpush.bf16.msrb.mxu1 %v11467_v59 }
 0x25e   :  { %v11178_v3 = vld [vmem:[#allocation5 + $0x808] sm:$0xf]  ;;  %v11979_v8 = vor.u32 %v15725_v63, %v11978_v53  ;;  %v16897_v53 = vpop.f32.mrf.mxu0 }
 0x25f   :  { %v15525_v4 = vld [vmem:[#allocation5 + $0x824] sm:$0xf0]  ;;  %6843 = vmatpush.bf16.msrb.mxu2 %v11723_v60 }
 0x260   :  { %v11434_v5 = vld [vmem:[#allocation5 + $0xa08] sm:$0xf]  ;;  %v11179_v20 = vor.u32 %v15525_v4, %v11178_v3  ;;  %6857 = vmatpush.bf16.msrb.mxu3 %v11979_v8 }
 0x261   :  { %v15589_v11 = vld [vmem:[#allocation5 + $0xa24] sm:$0xf0] }
 0x262   :  { %v11690_v13 = vld [vmem:[#allocation5 + $0xc08] sm:$0xf]  ;;  %v11435_v28 = vor.u32 %v15589_v11, %v11434_v5  ;;  %6816 = vmatpush.bf16.msrb.mxu0 %v11179_v20  ;;  %v16899_v11 = vpop.f32.mrf.mxu1 }
 0x263   :  { %v15653_v12 = vld [vmem:[#allocation5 + $0xc24] sm:$0xf0] }
 0x264   :  { %v11946_v57 = vld [vmem:[#allocation5 + $0xe08] sm:$0xf]  ;;  %v11691_v33 = vor.u32 %v15653_v12, %v11690_v13  ;;  %6830 = vmatpush.bf16.msrb.mxu1 %v11435_v28 }
 0x265   :  { %v15717_v15 = vld [vmem:[#allocation5 + $0xe24] sm:$0xf0]  ;;  %6817 = vmatmul.bf16.vlgmr.msrb.gmra.mxu0 %v16786_v39 }
 0x266   :  { %v12426_v16 = vld [vmem:[#allocation5 + $0x11c8] sm:$0xf]  ;;  %v11947_v42 = vor.u32 %v15717_v15, %v11946_v57  ;;  %6844 = vmatpush.bf16.msrb.mxu2 %v11691_v33 }
 0x267   :  { %v15837_v21 = vld [vmem:[#allocation5 + $0x11e4] sm:$0xf0]  ;;  %6831 = vmatmul.bf16.vlgmr.msrb.gmra.mxu1 %v16790_v44 }
 0x268   :  { %v12682_v27 = vld [vmem:[#allocation5 + $0x13c8] sm:$0xf]  ;;  %v12427_v63 = vor.u32 %v15837_v21, %v12426_v16  ;;  %6858 = vmatpush.bf16.msrb.mxu3 %v11947_v42 }
 0x269   :  { %v15901_v24 = vld [vmem:[#allocation5 + $0x13e4] sm:$0xf0]  ;;  %6845 = vmatmul.bf16.vlgmr.msrb.gmra.mxu2 %v16788_v43 }
 0x26a   :  { %v12938_v2 = vld [vmem:[#allocation5 + $0x15c8] sm:$0xf]  ;;  %v12683_v49 = vor.u32 %v15901_v24, %v12682_v27  ;;  %6865 = vmatpush.bf16.msra.mxu0 %v12427_v63  ;;  %v16907_v63 = vpop.f32.mrf.mxu3 }
 0x26b   :  { %v15965_v34 = vld [vmem:[#allocation5 + $0x15e4] sm:$0xf0]  ;;  %6859 = vmatmul.bf16.vlgmr.msrb.gmra.mxu3 %v16792_v47 }
 0x26c   :  { %v13194_v37 = vld [vmem:[#allocation5 + $0x17c8] sm:$0xf]  ;;  %v12939_v52 = vor.u32 %v15965_v34, %v12938_v2  ;;  %6879 = vmatpush.bf16.msra.mxu1 %v12683_v49 }
 0x26d   :  { %v16029_v48 = vld [vmem:[#allocation5 + $0x17e4] sm:$0xf0] }
 0x26e   :  { %v12394_v62 = vld [vmem:[#allocation5 + $0x1188] sm:$0xf]  ;;  %v13195_v3 = vor.u32 %v16029_v48, %v13194_v37  ;;  %6893 = vmatpush.bf16.msra.mxu2 %v12939_v52 }
 0x26f   :  { %v15829_v22 = vld [vmem:[#allocation5 + $0x11a4] sm:$0xf0] }
 0x270   :  { %v12650_v50 = vld [vmem:[#allocation5 + $0x1388] sm:$0xf]  ;;  %v12395_v13 = vor.u32 %v15829_v22, %v12394_v62  ;;  %6907 = vmatpush.bf16.msra.mxu3 %v13195_v3  ;;  %v16905_v22 = vpop.f32.mrf.mxu2  ;;  %v6594_v3 = vpop.f32.mrf.mxu0 }
 0x271   :  { %v15893_v4 = vld [vmem:[#allocation5 + $0x13a4] sm:$0xf0] }
 0x272   :  { %v12906_v7 = vld [vmem:[#allocation5 + $0x1588] sm:$0xf]  ;;  %v12651_v8 = vor.u32 %v15893_v4, %v12650_v50  ;;  %6866 = vmatpush.bf16.msra.mxu0 %v12395_v13 }
 0x273   :  { %v15957_v59 = vld [vmem:[#allocation5 + $0x15a4] sm:$0xf0] }
 0x274   :  { %v13162_v60 = vld [vmem:[#allocation5 + $0x1788] sm:$0xf]  ;;  %v12907_v12 = vor.u32 %v15957_v59, %v12906_v7  ;;  %6880 = vmatpush.bf16.msra.mxu1 %v12651_v8 }
 0x275   :  { %v16021_v5 = vld [vmem:[#allocation5 + $0x17a4] sm:$0xf0] }
 0x276   :  { %v12362_v57 = vld [vmem:[#allocation5 + $0x1148] sm:$0xf]  ;;  %v13163_v21 = vor.u32 %v16021_v5, %v13162_v60  ;;  %6894 = vmatpush.bf16.msra.mxu2 %v12907_v12  ;;  %v6595_v60 = vadd.f32 %v6594_v3, %v16895_v45  ;;  %v6608_v12 = vpop.f32.mrf.mxu1 }
 0x277   :  { %v15821_v15 = vld [vmem:[#allocation5 + $0x1164] sm:$0xf0] }
 0x278   :  { %v12618_v16 = vld [vmem:[#allocation5 + $0x1348] sm:$0xf]  ;;  %v12363_v7 = vor.u32 %v15821_v15, %v12362_v57  ;;  %6908 = vmatpush.bf16.msra.mxu3 %v13163_v21  ;;  %v16912_v19 = vpop.f32.mrf.mxu0 }
 0x279   :  { %v15885_v27 = vld [vmem:[#allocation5 + $0x1364] sm:$0xf0]  ;;  %17578 = vst [vmem:[#allocation29_spill] sm:$0xff] %v16912_v19 }
 0x27a   :  { %v12874_v20 = vld [vmem:[#allocation5 + $0x1548] sm:$0xf]  ;;  %v12619_v34 = vor.u32 %v15885_v27, %v12618_v16  ;;  %6867 = vmatpush.bf16.msra.mxu0 %v12363_v7  ;;  %v6609_v27 = vadd.f32 %v6608_v12, %v6595_v60  ;;  %v6636_v60 = vpop.f32.mrf.mxu3 }
 0x27b   :  { %v15949_v24 = vld [vmem:[#allocation5 + $0x1564] sm:$0xf0] }
 0x27c   :  { %v13130_v2 = vld [vmem:[#allocation5 + $0x1748] sm:$0xf]  ;;  %v12875_v28 = vor.u32 %v15949_v24, %v12874_v20  ;;  %6881 = vmatpush.bf16.msra.mxu1 %v12619_v34 }
 0x27d   :  { %v16013_v62 = vld [vmem:[#allocation5 + $0x1764] sm:$0xf0] }
 0x27e   :  { %v12330_v33 = vld [vmem:[#allocation5 + $0x1108] sm:$0xf]  ;;  %v13131_v42 = vor.u32 %v16013_v62, %v13130_v2  ;;  %6895 = vmatpush.bf16.msra.mxu2 %v12875_v28 }
 0x27f   :  { %v15813_v37 = vld [vmem:[#allocation5 + $0x1124] sm:$0xf0] }
 0x280   :  { %v12586_v48 = vld [vmem:[#allocation5 + $0x1308] sm:$0xf]  ;;  %v12331_v5 = vor.u32 %v15813_v37, %v12330_v33  ;;  %6909 = vmatpush.bf16.msra.mxu3 %v13131_v42 }
 0x281   :  { %v15877_v49 = vld [vmem:[#allocation5 + $0x1324] sm:$0xf0] }
 0x282   :  { %v12842_v52 = vld [vmem:[#allocation5 + $0x1508] sm:$0xf]  ;;  %v12587_v13 = vor.u32 %v15877_v49, %v12586_v48  ;;  %6868 = vmatpush.bf16.msra.mxu0 %v12331_v5  ;;  %v6622_v49 = vpop.f32.mrf.mxu2 }
 0x283   :  { %v15941_v50 = vld [vmem:[#allocation5 + $0x1524] sm:$0xf0]  ;;  %v6623_v3 = vadd.f32 %v6622_v49, %v6609_v27 }
 0x284   :  { %v13098_v4 = vld [vmem:[#allocation5 + $0x1708] sm:$0xf]  ;;  %v12843_v8 = vor.u32 %v15941_v50, %v12842_v52  ;;  %6882 = vmatpush.bf16.msra.mxu1 %v12587_v13 }
 0x285   :  { %v16005_v59 = vld [vmem:[#allocation5 + $0x1724] sm:$0xf0]  ;;  %v16910_v13 = vadd.f32 %v6636_v60, %v6623_v3 }
 0x286   :  { %v12298_v57 = vld [vmem:[#allocation5 + $0x10c8] sm:$0xf]  ;;  %v13099_v21 = vor.u32 %v16005_v59, %v13098_v4  ;;  %6896 = vmatpush.bf16.msra.mxu2 %v12843_v8 }
 0x287   :  { %v15805_v15 = vld [vmem:[#allocation5 + $0x10e4] sm:$0xf0] }
 0x288   :  { %v12554_v16 = vld [vmem:[#allocation5 + $0x12c8] sm:$0xf]  ;;  %v12299_v7 = vor.u32 %v15805_v15, %v12298_v57  ;;  %6910 = vmatpush.bf16.msra.mxu3 %v13099_v21 }
 0x289   :  { %v15869_v20 = vld [vmem:[#allocation5 + $0x12e4] sm:$0xf0] }
 0x28a   :  { %v12810_v24 = vld [vmem:[#allocation5 + $0x14c8] sm:$0xf]  ;;  %v12555_v45 = vor.u32 %v15869_v20, %v12554_v16  ;;  %6869 = vmatpush.bf16.msra.mxu0 %v12299_v7 }
 0x28b   :  { %v15933_v2 = vld [vmem:[#allocation5 + $0x14e4] sm:$0xf0] }
 0x28c   :  { %v13066_v62 = vld [vmem:[#allocation5 + $0x16c8] sm:$0xf]  ;;  %v12811_v34 = vor.u32 %v15933_v2, %v12810_v24  ;;  %6883 = vmatpush.bf16.msra.mxu1 %v12555_v45 }
 0x28d   :  { %v15997_v30 = vld [vmem:[#allocation5 + $0x16e4] sm:$0xf0] }
 0x28e   :  { %v12266_v28 = vld [vmem:[#allocation5 + $0x1088] sm:$0xf]  ;;  %v13067_v48 = vor.u32 %v15997_v30, %v13066_v62  ;;  %6897 = vmatpush.bf16.msra.mxu2 %v12811_v34 }
 0x28f   :  { %v15797_v33 = vld [vmem:[#allocation5 + $0x10a4] sm:$0xf0] }
 0x290   :  { %v12522_v37 = vld [vmem:[#allocation5 + $0x1288] sm:$0xf]  ;;  %v12267_v5 = vor.u32 %v15797_v33, %v12266_v28  ;;  %6911 = vmatpush.bf16.msra.mxu3 %v13067_v48 }
 0x291   :  { %v15861_v42 = vld [vmem:[#allocation5 + $0x12a4] sm:$0xf0] }
 0x292   :  { %v12778_v52 = vld [vmem:[#allocation5 + $0x1488] sm:$0xf]  ;;  %v12523_v8 = vor.u32 %v15861_v42, %v12522_v37  ;;  %6870 = vmatpush.bf16.msra.mxu0 %v12267_v5 }
 0x293   :  { %v15925_v50 = vld [vmem:[#allocation5 + $0x14a4] sm:$0xf0] }
 0x294   :  { %v13034_v4 = vld [vmem:[#allocation5 + $0x1688] sm:$0xf]  ;;  %v12779_v12 = vor.u32 %v15925_v50, %v12778_v52  ;;  %6884 = vmatpush.bf16.msra.mxu1 %v12523_v8 }
 0x295   :  { %v15989_v59 = vld [vmem:[#allocation5 + $0x16a4] sm:$0xf0] }
 0x296   :  { %v12234_v57 = vld [vmem:[#allocation5 + $0x1048] sm:$0xf]  ;;  %v13035_v30 = vor.u32 %v15989_v59, %v13034_v4  ;;  %6898 = vmatpush.bf16.msra.mxu2 %v12779_v12 }
 0x297   :  { %v15789_v15 = vld [vmem:[#allocation5 + $0x1064] sm:$0xf0] }
 0x298   :  { %v12490_v16 = vld [vmem:[#allocation5 + $0x1248] sm:$0xf]  ;;  %v12235_v62 = vor.u32 %v15789_v15, %v12234_v57  ;;  %6912 = vmatpush.bf16.msra.mxu3 %v13035_v30 }
 0x299   :  { %v15853_v21 = vld [vmem:[#allocation5 + $0x1264] sm:$0xf0] }
 0x29a   :  { %v12746_v20 = vld [vmem:[#allocation5 + $0x1448] sm:$0xf]  ;;  %v12491_v45 = vor.u32 %v15853_v21, %v12490_v16  ;;  %6871 = vmatpush.bf16.msra.mxu0 %v12235_v62 }
 0x29b   :  { %v15917_v24 = vld [vmem:[#allocation5 + $0x1464] sm:$0xf0] }
 0x29c   :  { %v13002_v27 = vld [vmem:[#allocation5 + $0x1648] sm:$0xf]  ;;  %v12747_v34 = vor.u32 %v15917_v24, %v12746_v20  ;;  %6885 = vmatpush.bf16.msra.mxu1 %v12491_v45 }
 0x29d   :  { %v15981_v2 = vld [vmem:[#allocation5 + $0x1664] sm:$0xf0] }
 0x29e   :  { %v12202_v7 = vld [vmem:[#allocation5 + $0x1008] sm:$0xf]  ;;  %v13003_v42 = vor.u32 %v15981_v2, %v13002_v27  ;;  %6899 = vmatpush.bf16.msra.mxu2 %v12747_v34 }
 0x29f   :  { %v15781_v28 = vld [vmem:[#allocation5 + $0x1024] sm:$0xf0] }
 0x2a0   :  { %v12458_v33 = vld [vmem:[#allocation5 + $0x1208] sm:$0xf]  ;;  %v12203_v60 = vor.u32 %v15781_v28, %v12202_v7  ;;  %6913 = vmatpush.bf16.msra.mxu3 %v13003_v42 }
 0x2a1   :  { %v15845_v37 = vld [vmem:[#allocation5 + $0x1224] sm:$0xf0] }
 0x2a2   :  { %v12714_v49 = vld [vmem:[#allocation5 + $0x1408] sm:$0xf]  ;;  %v12459_v8 = vor.u32 %v15845_v37, %v12458_v33  ;;  %6872 = vmatpush.bf16.msra.mxu0 %v12203_v60  ;;  %v16914_v33 = vpop.f32.mrf.mxu1 }
 0x2a3   :  { %v15909_v48 = vld [vmem:[#allocation5 + $0x1424] sm:$0xf0]  ;;  %17579 = vst [vmem:[#allocation30_spill] sm:$0xff] %v16914_v33  ;;  %v13068_v33 = vld [vmem:[#allocation5 + $0x16e8] sm:$0xf0] }
 0x2a4   :  { %v12970_v52 = vld [vmem:[#allocation5 + $0x1608] sm:$0xf]  ;;  %v12715_v12 = vor.u32 %v15909_v48, %v12714_v49  ;;  %6886 = vmatpush.bf16.msra.mxu1 %v12459_v8 }
 0x2a5   :  { %v15973_v50 = vld [vmem:[#allocation5 + $0x1624] sm:$0xf0]  ;;  %6873 = vmatmul.bf16.vlgmr.msra.gmra.mxu0 %v16798_v31 }
 0x2a6   :  { %v13450_v3 = vld [vmem:[#allocation5 + $0x19c8] sm:$0xf]  ;;  %v12971_v30 = vor.u32 %v15973_v50, %v12970_v52  ;;  %6900 = vmatpush.bf16.msra.mxu2 %v12715_v12 }
 0x2a7   :  { %v16093_v4 = vld [vmem:[#allocation5 + $0x19e4] sm:$0xf0]  ;;  %6887 = vmatmul.bf16.vlgmr.msra.gmra.mxu1 %v16802_v36 }
 0x2a8   :  { %v13706_v59 = vld [vmem:[#allocation5 + $0x1bc8] sm:$0xf]  ;;  %v13451_v20 = vor.u32 %v16093_v4, %v13450_v3  ;;  %6914 = vmatpush.bf16.msra.mxu3 %v12971_v30 }
 0x2a9   :  { %v16157_v5 = vld [vmem:[#allocation5 + $0x1be4] sm:$0xf0]  ;;  %6901 = vmatmul.bf16.vlgmr.msra.gmra.mxu2 %v16800_v35 }
 0x2aa   :  { %v13962_v57 = vld [vmem:[#allocation5 + $0x1dc8] sm:$0xf]  ;;  %v13707_v24 = vor.u32 %v16157_v5, %v13706_v59  ;;  %6921 = vmatpush.bf16.msrb.mxu0 %v13451_v20 }
 0x2ab   :  { %v16221_v15 = vld [vmem:[#allocation5 + $0x1de4] sm:$0xf0]  ;;  %6915 = vmatmul.bf16.vlgmr.msra.gmra.mxu3 %v16804_v40 }
 0x2ac   :  { %v14218_v16 = vld [vmem:[#allocation5 + $0x1fc8] sm:$0xf]  ;;  %v13963_v27 = vor.u32 %v16221_v15, %v13962_v57  ;;  %6935 = vmatpush.bf16.msrb.mxu1 %v13707_v24 }
 0x2ad   :  { %v16285_v21 = vld [vmem:[#allocation5 + $0x1fe4] sm:$0xf0] }
 0x2ae   :  { %v13418_v2 = vld [vmem:[#allocation5 + $0x1988] sm:$0xf]  ;;  %v14219_v62 = vor.u32 %v16285_v21, %v14218_v16  ;;  %6949 = vmatpush.bf16.msrb.mxu2 %v13963_v27  ;;  %v16920_v16 = vpop.f32.mrf.mxu2  ;;  %v16922_v27 = vpop.f32.mrf.mxu3 }
 0x2af   :  { %v16085_v23 = vld [vmem:[#allocation5 + $0x19a4] sm:$0xf0]  ;;  %17580 = vst [vmem:[#allocation31_spill] sm:$0xff] %v16920_v16 }
 0x2b0   :  { %v13674_v61 = vld [vmem:[#allocation5 + $0x1b88] sm:$0xf]  ;;  %v13419_v37 = vor.u32 %v16085_v23, %v13418_v2  ;;  %6963 = vmatpush.bf16.msrb.mxu3 %v14219_v62  ;;  %17581 = vst [vmem:[#allocation32_spill] sm:$0xff] %v16922_v27  ;;  %v6650_v2 = vpop.f32.mrf.mxu0  ;;  %v10348_v27 = vld [vmem:[#allocation5 + $0x1a8] sm:$0xf0] }
 0x2b1   :  { %v16149_v7 = vld [vmem:[#allocation5 + $0x1ba4] sm:$0xf0] }
 0x2b2   :  { %v13930_v28 = vld [vmem:[#allocation5 + $0x1d88] sm:$0xf]  ;;  %v13675_v49 = vor.u32 %v16149_v7, %v13674_v61  ;;  %6922 = vmatpush.bf16.msrb.mxu0 %v13419_v37 }
 0x2b3   :  { %v16213_v55 = vld [vmem:[#allocation5 + $0x1da4] sm:$0xf0] }
 0x2b4   :  { %v14186_v45 = vld [vmem:[#allocation5 + $0x1f88] sm:$0xf]  ;;  %v13931_v42 = vor.u32 %v16213_v55, %v13930_v28  ;;  %6936 = vmatpush.bf16.msrb.mxu1 %v13675_v49  ;;  %v6651_v28 = vadd.f32 %v6650_v2, %v16910_v13 }
 0x2b5   :  { %v16277_v34 = vld [vmem:[#allocation5 + $0x1fa4] sm:$0xf0] }
 0x2b6   :  { %v13386_v48 = vld [vmem:[#allocation5 + $0x1948] sm:$0xf]  ;;  %v14187_v3 = vor.u32 %v16277_v34, %v14186_v45  ;;  %6950 = vmatpush.bf16.msrb.mxu2 %v13931_v42  ;;  %v6664_v34 = vpop.f32.mrf.mxu1 }
 0x2b7   :  { %v16077_v52 = vld [vmem:[#allocation5 + $0x1964] sm:$0xf0] }
 0x2b8   :  { %v13642_v50 = vld [vmem:[#allocation5 + $0x1b48] sm:$0xf]  ;;  %v13387_v55 = vor.u32 %v16077_v52, %v13386_v48  ;;  %6964 = vmatpush.bf16.msrb.mxu3 %v14187_v3  ;;  %v6665_v3 = vadd.f32 %v6664_v34, %v6651_v28  ;;  %v16927_v16 = vpop.f32.mrf.mxu0 }
 0x2b9   :  { %v16141_v4 = vld [vmem:[#allocation5 + $0x1b64] sm:$0xf0]  ;;  %17582 = vst [vmem:[#allocation33_spill] sm:$0xff] %v16927_v16  ;;  %v15953_v16 = vld [vmem:[#allocation5 + $0x158c] sm:$0xf] }
 0x2ba   :  { %v13898_v59 = vld [vmem:[#allocation5 + $0x1d48] sm:$0xf]  ;;  %v13643_v61 = vor.u32 %v16141_v4, %v13642_v50  ;;  %6923 = vmatpush.bf16.msrb.mxu0 %v13387_v55 }
 0x2bb   :  { %v16205_v60 = vld [vmem:[#allocation5 + $0x1d64] sm:$0xf0] }
 0x2bc   :  { %v14154_v5 = vld [vmem:[#allocation5 + $0x1f48] sm:$0xf]  ;;  %v13899_v57 = vor.u32 %v16205_v60, %v13898_v59  ;;  %6937 = vmatpush.bf16.msrb.mxu1 %v13643_v61 }
 0x2bd   :  { %v16269_v23 = vld [vmem:[#allocation5 + $0x1f64] sm:$0xf0] }
 0x2be   :  { %v13354_v15 = vld [vmem:[#allocation5 + $0x1908] sm:$0xf]  ;;  %v14155_v21 = vor.u32 %v16269_v23, %v14154_v5  ;;  %6951 = vmatpush.bf16.msrb.mxu2 %v13899_v57 }
 0x2bf   :  { %v16069_v8 = vld [vmem:[#allocation5 + $0x1924] sm:$0xf0] }
 0x2c0   :  { %v13610_v12 = vld [vmem:[#allocation5 + $0x1b08] sm:$0xf]  ;;  %v13355_v45 = vor.u32 %v16069_v8, %v13354_v15  ;;  %6965 = vmatpush.bf16.msrb.mxu3 %v14155_v21 }
 0x2c1   :  { %v16133_v30 = vld [vmem:[#allocation5 + $0x1b24] sm:$0xf0] }
 0x2c2   :  { %v13866_v20 = vld [vmem:[#allocation5 + $0x1d08] sm:$0xf]  ;;  %v13611_v37 = vor.u32 %v16133_v30, %v13610_v12  ;;  %6924 = vmatpush.bf16.msrb.mxu0 %v13355_v45  ;;  %v6678_v30 = vpop.f32.mrf.mxu2 }
 0x2c3   :  { %v16197_v24 = vld [vmem:[#allocation5 + $0x1d24] sm:$0xf0]  ;;  %v6679_v2 = vadd.f32 %v6678_v30, %v6665_v3 }
 0x2c4   :  { %v14122_v62 = vld [vmem:[#allocation5 + $0x1f08] sm:$0xf]  ;;  %v13867_v49 = vor.u32 %v16197_v24, %v13866_v20  ;;  %6938 = vmatpush.bf16.msrb.mxu1 %v13611_v37 }
 0x2c5   :  { %v16261_v7 = vld [vmem:[#allocation5 + $0x1f24] sm:$0xf0] }
 0x2c6   :  { %v13322_v42 = vld [vmem:[#allocation5 + $0x18c8] sm:$0xf]  ;;  %v14123_v50 = vor.u32 %v16261_v7, %v14122_v62  ;;  %6952 = vmatpush.bf16.msrb.mxu2 %v13867_v49  ;;  %v6692_v62 = vpop.f32.mrf.mxu3 }
 0x2c7   :  { %v16061_v48 = vld [vmem:[#allocation5 + $0x18e4] sm:$0xf0]  ;;  %v16925_v34 = vadd.f32 %v6692_v62, %v6679_v2  ;;  %v15321_v2 = vld [vmem:[#allocation5 + $0x1cc] sm:$0xf] }
 0x2c8   :  { %v13578_v52 = vld [vmem:[#allocation5 + $0x1ac8] sm:$0xf]  ;;  %v13323_v55 = vor.u32 %v16061_v48, %v13322_v42  ;;  %6966 = vmatpush.bf16.msrb.mxu3 %v14123_v50  ;;  %v10380_v62 = vld [vmem:[#allocation5 + $0x1e8] sm:$0xf0] }
 0x2c9   :  { %v16125_v4 = vld [vmem:[#allocation5 + $0x1ae4] sm:$0xf0] }
 0x2ca   :  { %v13834_v59 = vld [vmem:[#allocation5 + $0x1cc8] sm:$0xf]  ;;  %v13579_v13 = vor.u32 %v16125_v4, %v13578_v52  ;;  %6925 = vmatpush.bf16.msrb.mxu0 %v13323_v55 }
 0x2cb   :  { %v16189_v60 = vld [vmem:[#allocation5 + $0x1ce4] sm:$0xf0] }
 0x2cc   :  { %v14090_v5 = vld [vmem:[#allocation5 + $0x1ec8] sm:$0xf]  ;;  %v13835_v61 = vor.u32 %v16189_v60, %v13834_v59  ;;  %6939 = vmatpush.bf16.msrb.mxu1 %v13579_v13 }
 0x2cd   :  { %v16253_v23 = vld [vmem:[#allocation5 + $0x1ee4] sm:$0xf0] }
 0x2ce   :  { %v13290_v57 = vld [vmem:[#allocation5 + $0x1888] sm:$0xf]  ;;  %v14091_v12 = vor.u32 %v16253_v23, %v14090_v5  ;;  %6953 = vmatpush.bf16.msrb.mxu2 %v13835_v61 }
 0x2cf   :  { %v16053_v15 = vld [vmem:[#allocation5 + $0x18a4] sm:$0xf0] }
 0x2d0   :  { %v13546_v8 = vld [vmem:[#allocation5 + $0x1a88] sm:$0xf]  ;;  %v13291_v45 = vor.u32 %v16053_v15, %v13290_v57  ;;  %6967 = vmatpush.bf16.msrb.mxu3 %v14091_v12 }
 0x2d1   :  { %v16117_v21 = vld [vmem:[#allocation5 + $0x1aa4] sm:$0xf0] }
 0x2d2   :  { %v13802_v20 = vld [vmem:[#allocation5 + $0x1c88] sm:$0xf]  ;;  %v13547_v37 = vor.u32 %v16117_v21, %v13546_v8  ;;  %6926 = vmatpush.bf16.msrb.mxu0 %v13291_v45  ;;  %v10636_v45 = vld [vmem:[#allocation5 + $0x3e8] sm:$0xf0] }
 0x2d3   :  { %v16181_v24 = vld [vmem:[#allocation5 + $0x1ca4] sm:$0xf0] }
 0x2d4   :  { %v14058_v7 = vld [vmem:[#allocation5 + $0x1e88] sm:$0xf]  ;;  %v13803_v49 = vor.u32 %v16181_v24, %v13802_v20  ;;  %6940 = vmatpush.bf16.msrb.mxu1 %v13547_v37 }
 0x2d5   :  { %v16245_v28 = vld [vmem:[#allocation5 + $0x1ea4] sm:$0xf0] }
 0x2d6   :  { %v13258_v42 = vld [vmem:[#allocation5 + $0x1848] sm:$0xf]  ;;  %v14059_v50 = vor.u32 %v16245_v28, %v14058_v7  ;;  %6954 = vmatpush.bf16.msrb.mxu2 %v13803_v49  ;;  %v15385_v7 = vld [vmem:[#allocation5 + $0x3cc] sm:$0xf] }
 0x2d7   :  { %v16045_v48 = vld [vmem:[#allocation5 + $0x1864] sm:$0xf0] }
 0x2d8   :  { %v13514_v52 = vld [vmem:[#allocation5 + $0x1a48] sm:$0xf]  ;;  %v13259_v23 = vor.u32 %v16045_v48, %v13258_v42  ;;  %6968 = vmatpush.bf16.msrb.mxu3 %v14059_v50  ;;  %v15449_v42 = vld [vmem:[#allocation5 + $0x5cc] sm:$0xf] }
 0x2d9   :  { %v16109_v4 = vld [vmem:[#allocation5 + $0x1a64] sm:$0xf0]  ;;  %v10892_v48 = vld [vmem:[#allocation5 + $0x5e8] sm:$0xf0] }
 0x2da   :  { %v13770_v59 = vld [vmem:[#allocation5 + $0x1c48] sm:$0xf]  ;;  %v13515_v13 = vor.u32 %v16109_v4, %v13514_v52  ;;  %6927 = vmatpush.bf16.msrb.mxu0 %v13259_v23  ;;  %v15513_v52 = vld [vmem:[#allocation5 + $0x7cc] sm:$0xf] }
 0x2db   :  { %v16173_v60 = vld [vmem:[#allocation5 + $0x1c64] sm:$0xf0]  ;;  %v11148_v4 = vld [vmem:[#allocation5 + $0x7e8] sm:$0xf0] }
 0x2dc   :  { %v14026_v3 = vld [vmem:[#allocation5 + $0x1e48] sm:$0xf]  ;;  %v13771_v61 = vor.u32 %v16173_v60, %v13770_v59  ;;  %6941 = vmatpush.bf16.msrb.mxu1 %v13515_v13  ;;  %v10383_v59 = vor.u32 %v15321_v2, %v10380_v62  ;;  %v10639_v60 = vor.u32 %v15385_v7, %v10636_v45  ;;  %v11151_v23 = vor.u32 %v15513_v52, %v11148_v4  ;;  %v15505_v13 = vld [vmem:[#allocation5 + $0x78c] sm:$0xf]  ;;  %v16935_v52 = vpop.f32.mrf.mxu2 }
 0x2dd   :  { %v16237_v5 = vld [vmem:[#allocation5 + $0x1e64] sm:$0xf0]  ;;  %v10572_v62 = vld [vmem:[#allocation5 + $0x368] sm:$0xf0]  ;;  %17584 = vst [vmem:[#allocation35_spill] sm:$0xff] %v16935_v52 }
 0x2de   :  { %v13226_v55 = vld [vmem:[#allocation5 + $0x1808] sm:$0xf]  ;;  %v14027_v21 = vor.u32 %v16237_v5, %v14026_v3  ;;  %6955 = vmatpush.bf16.msrb.mxu2 %v13771_v61  ;;  %v10895_v3 = vor.u32 %v15449_v42, %v10892_v48  ;;  %v15313_v5 = vld [vmem:[#allocation5 + $0x18c] sm:$0xf] }
 0x2df   :  { %v16037_v57 = vld [vmem:[#allocation5 + $0x1824] sm:$0xf0]  ;;  %v11116_v61 = vld [vmem:[#allocation5 + $0x7a8] sm:$0xf0] }
 0x2e0   :  { %v13482_v15 = vld [vmem:[#allocation5 + $0x1a08] sm:$0xf]  ;;  %v13227_v28 = vor.u32 %v16037_v57, %v13226_v55  ;;  %6969 = vmatpush.bf16.msrb.mxu3 %v14027_v21  ;;  %v10604_v55 = vld [vmem:[#allocation5 + $0x3a8] sm:$0xf0]  ;;  %v11119_v2 = vor.u32 %v15505_v13, %v11116_v61 }
 0x2e1   :  { %v16101_v8 = vld [vmem:[#allocation5 + $0x1a24] sm:$0xf0]  ;;  %v15441_v57 = vld [vmem:[#allocation5 + $0x58c] sm:$0xf] }
 0x2e2   :  { %v13738_v30 = vld [vmem:[#allocation5 + $0x1c08] sm:$0xf]  ;;  %v13483_v37 = vor.u32 %v16101_v8, %v13482_v15  ;;  %6928 = vmatpush.bf16.msrb.mxu0 %v13227_v28  ;;  %v16929_v15 = vpop.f32.mrf.mxu1  ;;  %v10351_v8 = vor.u32 %v15313_v5, %v10348_v27  ;;  %v10863_v21 = vor.u32 %v15441_v57, %v10860_v6  ;;  %v15433_v7 = vld [vmem:[#allocation5 + $0x54c] sm:$0xf]  ;;  %v6706_v5 = vpop.f32.mrf.mxu0 }
 0x2e3   :  { %v16165_v12 = vld [vmem:[#allocation5 + $0x1c24] sm:$0xf0]  ;;  %17583 = vst [vmem:[#allocation34_spill] sm:$0xff] %v16929_v15  ;;  %v10828_v28 = vld [vmem:[#allocation5 + $0x568] sm:$0xf0]  ;;  %v6707_v57 = vadd.f32 %v6706_v5, %v16925_v34 }
 0x2e4   :  { %v13994_v20 = vld [vmem:[#allocation5 + $0x1e08] sm:$0xf]  ;;  %v13739_v49 = vor.u32 %v16165_v12, %v13738_v30  ;;  %6942 = vmatpush.bf16.msrb.mxu1 %v13483_v37  ;;  %v10607_v30 = vor.u32 %v15377_v14, %v10604_v55  ;;  %v15305_v12 = vld [vmem:[#allocation5 + $0x14c] sm:$0xf]  ;;  %v10831_v42 = vor.u32 %v15433_v7, %v10828_v28 }
 0x2e5   :  { %v16229_v24 = vld [vmem:[#allocation5 + $0x1e24] sm:$0xf0]  ;;  %6929 = vmatmul.bf16.vlgmr.msrb.gmra.mxu0 %v16810_v32  ;;  %v15497_v45 = vld [vmem:[#allocation5 + $0x74c] sm:$0xf] }
 0x2e6   :  { %v13995_v50 = vor.u32 %v16229_v24, %v13994_v20  ;;  %6956 = vmatpush.bf16.msrb.mxu2 %v13739_v49  ;;  %6977 = vmatpush.bf16.msra.mxu0 %v10383_v59  ;;  %v10316_v20 = vld [vmem:[#allocation5 + $0x168] sm:$0xf0] }
 0x2e7   :  { %v15369_v24 = vld [vmem:[#allocation5 + $0x34c] sm:$0xf]  ;;  %6943 = vmatmul.bf16.vlgmr.msrb.gmra.mxu1 %v16814_v41  ;;  %v10319_v6 = vor.u32 %v15305_v12, %v10316_v20 }
 0x2e8   :  { %6970 = vmatpush.bf16.msrb.mxu3 %v13995_v50  ;;  %6991 = vmatpush.bf16.msra.mxu1 %v10639_v60  ;;  %v11084_v27 = vld [vmem:[#allocation5 + $0x768] sm:$0xf0]  ;;  %v10575_v14 = vor.u32 %v15369_v24, %v10572_v62 }
 0x2e9   :  { %6957 = vmatmul.bf16.vlgmr.msrb.gmra.mxu2 %v16812_v38  ;;  %v15297_v48 = vld [vmem:[#allocation5 + $0x10c] sm:$0xf]  ;;  %v11087_v4 = vor.u32 %v15497_v45, %v11084_v27 }
 0x2ea   :  { %7005 = vmatpush.bf16.msra.mxu2 %v10895_v3  ;;  %6978 = vmatpush.bf16.msra.mxu0 %v10351_v8  ;;  %v10284_v37 = vld [vmem:[#allocation5 + $0x128] sm:$0xf0]  ;;  %v16937_v3 = vpop.f32.mrf.mxu3  ;;  %v6720_v61 = vpop.f32.mrf.mxu1 }
 0x2eb   :  { %6971 = vmatmul.bf16.vlgmr.msrb.gmra.mxu3 %v16816_v46  ;;  %v15361_v49 = vld [vmem:[#allocation5 + $0x30c] sm:$0xf]  ;;  %17585 = vst [vmem:[#allocation36_spill] sm:$0xff] %v16937_v3  ;;  %v10287_v13 = vor.u32 %v15297_v48, %v10284_v37  ;;  %v16942_v15 = vpop.f32.mrf.mxu0 }
 0x2ec   :  { %7019 = vmatpush.bf16.msra.mxu3 %v11151_v23  ;;  %6992 = vmatpush.bf16.msra.mxu1 %v10607_v30  ;;  %v10540_v50 = vld [vmem:[#allocation5 + $0x328] sm:$0xf0]  ;;  %17587 = vst [vmem:[#allocation38_spill] sm:$0xff] %v16942_v15 }
 0x2ed   :  { %v15425_v59 = vld [vmem:[#allocation5 + $0x50c] sm:$0xf]  ;;  %v10543_v8 = vor.u32 %v15361_v49, %v10540_v50  ;;  %v6734_v50 = vpop.f32.mrf.mxu2 }
 0x2ee   :  { %7006 = vmatpush.bf16.msra.mxu2 %v10863_v21  ;;  %v10796_v60 = vld [vmem:[#allocation5 + $0x528] sm:$0xf0]  ;;  %6979 = vmatpush.bf16.msra.mxu0 %v10319_v6 }
 0x2ef   :  { %v15489_v23 = vld [vmem:[#allocation5 + $0x70c] sm:$0xf]  ;;  %v10799_v30 = vor.u32 %v15425_v59, %v10796_v60 }
 0x2f0   :  { %7020 = vmatpush.bf16.msra.mxu3 %v11119_v2  ;;  %v11052_v55 = vld [vmem:[#allocation5 + $0x728] sm:$0xf0]  ;;  %6993 = vmatpush.bf16.msra.mxu1 %v10575_v14  ;;  %v6721_v2 = vadd.f32 %v6720_v61, %v6707_v57 }
 0x2f1   :  { %v15289_v21 = vld [vmem:[#allocation5 + $0xcc] sm:$0xf]  ;;  %v11055_v24 = vor.u32 %v15489_v23, %v11052_v55 }
 0x2f2   :  { %7007 = vmatpush.bf16.msra.mxu2 %v10831_v42  ;;  %v10252_v12 = vld [vmem:[#allocation5 + $0xe8] sm:$0xf0]  ;;  %6980 = vmatpush.bf16.msra.mxu0 %v10287_v13  ;;  %v6735_v5 = vadd.f32 %v6734_v50, %v6721_v2  ;;  %v6748_v23 = vpop.f32.mrf.mxu3 }
 0x2f3   :  { %v15353_v20 = vld [vmem:[#allocation5 + $0x2cc] sm:$0xf]  ;;  %v10255_v6 = vor.u32 %v15289_v21, %v10252_v12 }
 0x2f4   :  { %7021 = vmatpush.bf16.msra.mxu3 %v11087_v4  ;;  %v10508_v62 = vld [vmem:[#allocation5 + $0x2e8] sm:$0xf0]  ;;  %6994 = vmatpush.bf16.msra.mxu1 %v10543_v8  ;;  %v16940_v61 = vadd.f32 %v6748_v23, %v6735_v5 }
 0x2f5   :  { %v15417_v7 = vld [vmem:[#allocation5 + $0x4cc] sm:$0xf]  ;;  %v10511_v34 = vor.u32 %v15353_v20, %v10508_v62 }
 0x2f6   :  { %v10764_v28 = vld [vmem:[#allocation5 + $0x4e8] sm:$0xf0]  ;;  %7008 = vmatpush.bf16.msra.mxu2 %v10799_v30  ;;  %6981 = vmatpush.bf16.msra.mxu0 %v10255_v6  ;;  %17586 = vst [vmem:[#allocation37_spill] sm:$0xff] %v16940_v61 }
 0x2f7   :  { %v15481_v45 = vld [vmem:[#allocation5 + $0x6cc] sm:$0xf]  ;;  %v10767_v14 = vor.u32 %v15417_v7, %v10764_v28 }
 0x2f8   :  { %v11020_v27 = vld [vmem:[#allocation5 + $0x6e8] sm:$0xf0]  ;;  %7022 = vmatpush.bf16.msra.mxu3 %v11055_v24  ;;  %6995 = vmatpush.bf16.msra.mxu1 %v10511_v34 }
 0x2f9   :  { %v15281_v42 = vld [vmem:[#allocation5 + $0x8c] sm:$0xf]  ;;  %v11023_v49 = vor.u32 %v15481_v45, %v11020_v27 }
 0x2fa   :  { %v10220_v48 = vld [vmem:[#allocation5 + $0xa8] sm:$0xf0]  ;;  %7009 = vmatpush.bf16.msra.mxu2 %v10767_v14 }
 0x2fb   :  { %v15345_v37 = vld [vmem:[#allocation5 + $0x28c] sm:$0xf]  ;;  %v10223_v13 = vor.u32 %v15281_v42, %v10220_v48 }
 0x2fc   :  { %v10476_v4 = vld [vmem:[#allocation5 + $0x2a8] sm:$0xf0]  ;;  %7023 = vmatpush.bf16.msra.mxu3 %v11023_v49 }
 0x2fd   :  { %v15409_v59 = vld [vmem:[#allocation5 + $0x48c] sm:$0xf]  ;;  %v10479_v8 = vor.u32 %v15345_v37, %v10476_v4  ;;  %6982 = vmatpush.bf16.msra.mxu0 %v10223_v13 }
 0x2fe   :  { %v10732_v60 = vld [vmem:[#allocation5 + $0x4a8] sm:$0xf0] }
 0x2ff   :  { %v15473_v55 = vld [vmem:[#allocation5 + $0x68c] sm:$0xf]  ;;  %v10735_v30 = vor.u32 %v15409_v59, %v10732_v60  ;;  %6996 = vmatpush.bf16.msra.mxu1 %v10479_v8 }
 0x300   :  { %v10988_v57 = vld [vmem:[#allocation5 + $0x6a8] sm:$0xf0] }
 0x301   :  { %v15273_v21 = vld [vmem:[#allocation5 + $0x4c] sm:$0xf]  ;;  %v10991_v24 = vor.u32 %v15473_v55, %v10988_v57  ;;  %7010 = vmatpush.bf16.msra.mxu2 %v10735_v30 }
 0x302   :  { %v10188_v12 = vld [vmem:[#allocation5 + $0x68] sm:$0xf0] }
 0x303   :  { %v15337_v20 = vld [vmem:[#allocation5 + $0x24c] sm:$0xf]  ;;  %v10191_v27 = vor.u32 %v15273_v21, %v10188_v12  ;;  %7024 = vmatpush.bf16.msra.mxu3 %v10991_v24 }
 0x304   :  { %v10444_v62 = vld [vmem:[#allocation5 + $0x268] sm:$0xf0] }
 0x305   :  { %v15401_v7 = vld [vmem:[#allocation5 + $0x44c] sm:$0xf]  ;;  %v10447_v34 = vor.u32 %v15337_v20, %v10444_v62  ;;  %6983 = vmatpush.bf16.msra.mxu0 %v10191_v27 }
 0x306   :  { %v10700_v28 = vld [vmem:[#allocation5 + $0x468] sm:$0xf0] }
 0x307   :  { %v15465_v2 = vld [vmem:[#allocation5 + $0x64c] sm:$0xf]  ;;  %v10703_v14 = vor.u32 %v15401_v7, %v10700_v28  ;;  %6997 = vmatpush.bf16.msra.mxu1 %v10447_v34 }
 0x308   :  { %v10956_v45 = vld [vmem:[#allocation5 + $0x668] sm:$0xf0] }
 0x309   :  { %v15265_v6 = vld [vmem:[#allocation5 + $0xc] sm:$0xf]  ;;  %v10959_v4 = vor.u32 %v15465_v2, %v10956_v45  ;;  %7011 = vmatpush.bf16.msra.mxu2 %v10703_v14 }
 0x30a   :  { %v10156_v42 = vld [vmem:[#allocation5 + $0x28] sm:$0xf0] }
 0x30b   :  { %v15329_v48 = vld [vmem:[#allocation5 + $0x20c] sm:$0xf]  ;;  %v10159_v57 = vor.u32 %v15265_v6, %v10156_v42  ;;  %7025 = vmatpush.bf16.msra.mxu3 %v10959_v4 }
 0x30c   :  { %v10412_v37 = vld [vmem:[#allocation5 + $0x228] sm:$0xf0] }
 0x30d   :  { %v15393_v50 = vld [vmem:[#allocation5 + $0x40c] sm:$0xf]  ;;  %v10415_v8 = vor.u32 %v15329_v48, %v10412_v37  ;;  %6984 = vmatpush.bf16.msra.mxu0 %v10159_v57  ;;  %v16944_v37 = vpop.f32.mrf.mxu1 }
 0x30e   :  { %v10668_v49 = vld [vmem:[#allocation5 + $0x428] sm:$0xf0]  ;;  %17588 = vst [vmem:[#allocation39_spill] sm:$0xff] %v16944_v37 }
 0x30f   :  { %v15457_v59 = vld [vmem:[#allocation5 + $0x60c] sm:$0xf]  ;;  %v10671_v30 = vor.u32 %v15393_v50, %v10668_v49  ;;  %6998 = vmatpush.bf16.msra.mxu1 %v10415_v8 }
 0x310   :  { %v10924_v60 = vld [vmem:[#allocation5 + $0x628] sm:$0xf0]  ;;  %6985 = vmatmul.bf16.vlgmr.msra.gmra.mxu0 %v16774_v58 }
 0x311   :  { %v15577_v5 = vld [vmem:[#allocation5 + $0x9cc] sm:$0xf]  ;;  %v10927_v24 = vor.u32 %v15457_v59, %v10924_v60  ;;  %7012 = vmatpush.bf16.msra.mxu2 %v10671_v30 }
 0x312   :  { %v11404_v23 = vld [vmem:[#allocation5 + $0x9e8] sm:$0xf0]  ;;  %6999 = vmatmul.bf16.vlgmr.msra.gmra.mxu1 %v16780_v10 }
 0x313   :  { %v15641_v55 = vld [vmem:[#allocation5 + $0xbcc] sm:$0xf]  ;;  %v11407_v7 = vor.u32 %v15577_v5, %v11404_v23  ;;  %7026 = vmatpush.bf16.msra.mxu3 %v10927_v24  ;;  %v16953_v24 = vpop.f32.mrf.mxu2 }
 0x314   :  { %v11660_v13 = vld [vmem:[#allocation5 + $0xbe8] sm:$0xf0]  ;;  %7013 = vmatmul.bf16.vlgmr.msra.gmra.mxu2 %v16776_v1  ;;  %17589 = vst [vmem:[#allocation40_spill] sm:$0xff] %v16953_v24 }
 0x315   :  { %v15705_v21 = vld [vmem:[#allocation5 + $0xdcc] sm:$0xf]  ;;  %v11663_v28 = vor.u32 %v15641_v55, %v11660_v13  ;;  %7033 = vmatpush.bf16.msrb.mxu0 %v11407_v7 }
 0x316   :  { %v11916_v12 = vld [vmem:[#allocation5 + $0xde8] sm:$0xf0]  ;;  %7027 = vmatmul.bf16.vlgmr.msra.gmra.mxu3 %v16782_v17 }
 0x317   :  { %v15769_v20 = vld [vmem:[#allocation5 + $0xfcc] sm:$0xf]  ;;  %v11919_v2 = vor.u32 %v15705_v21, %v11916_v12  ;;  %7047 = vmatpush.bf16.msrb.mxu1 %v11663_v28 }
 0x318   :  { %v12172_v62 = vld [vmem:[#allocation5 + $0xfe8] sm:$0xf0] }
 0x319   :  { %v15569_v45 = vld [vmem:[#allocation5 + $0x98c] sm:$0xf]  ;;  %v12175_v27 = vor.u32 %v15769_v20, %v12172_v62  ;;  %7061 = vmatpush.bf16.msrb.mxu2 %v11919_v2 }
 0x31a   :  { %v11372_v61 = vld [vmem:[#allocation5 + $0x9a8] sm:$0xf0] }
 0x31b   :  { %v15633_v3 = vld [vmem:[#allocation5 + $0xb8c] sm:$0xf]  ;;  %v11375_v48 = vor.u32 %v15569_v45, %v11372_v61  ;;  %7075 = vmatpush.bf16.msrb.mxu3 %v12175_v27 }
 0x31c   :  { %v11628_v6 = vld [vmem:[#allocation5 + $0xba8] sm:$0xf0] }
 0x31d   :  { %v15697_v42 = vld [vmem:[#allocation5 + $0xd8c] sm:$0xf]  ;;  %v11631_v50 = vor.u32 %v15633_v3, %v11628_v6  ;;  %7034 = vmatpush.bf16.msrb.mxu0 %v11375_v48 }
 0x31e   :  { %v11884_v52 = vld [vmem:[#allocation5 + $0xda8] sm:$0xf0] }
 0x31f   :  { %v15761_v34 = vld [vmem:[#allocation5 + $0xf8c] sm:$0xf]  ;;  %v11887_v4 = vor.u32 %v15697_v42, %v11884_v52  ;;  %v16950_v52 = vld [vmem:[#allocation7] sm:$0xff]  ;;  %7048 = vmatpush.bf16.msrb.mxu1 %v11631_v50  ;;  %v6762_v42 = vpop.f32.mrf.mxu0 }
 0x320   :  { %v12140_v14 = vld [vmem:[#allocation5 + $0xfa8] sm:$0xf0]  ;;  %v17558_v3 = vperm.slane %v16950_v52, 2 }
 0x321   :  { %v15561_v49 = vld [vmem:[#allocation5 + $0x94c] sm:$0xf]  ;;  %v12143_v5 = vor.u32 %v15761_v34, %v12140_v14  ;;  %7062 = vmatpush.bf16.msrb.mxu2 %v11887_v4  ;;  %v16955_v34 = vpop.f32.mrf.mxu3 }
 0x322   :  { %v11340_v59 = vld [vmem:[#allocation5 + $0x968] sm:$0xf0]  ;;  %17590 = vst [vmem:[#allocation41_spill] sm:$0xff] %v16955_v34  ;;  %v6763_v48 = vadd.f32 %v6762_v42, %v17558_v3 }
 0x323   :  { %v15625_v60 = vld [vmem:[#allocation5 + $0xb4c] sm:$0xf]  ;;  %v11343_v61 = vor.u32 %v15561_v49, %v11340_v59  ;;  %7076 = vmatpush.bf16.msrb.mxu3 %v12143_v5  ;;  %v6776_v5 = vpop.f32.mrf.mxu1 }
 0x324   :  { %v11596_v23 = vld [vmem:[#allocation5 + $0xb68] sm:$0xf0] }
 0x325   :  { %v15689_v55 = vld [vmem:[#allocation5 + $0xd4c] sm:$0xf]  ;;  %v11599_v12 = vor.u32 %v15625_v60, %v11596_v23  ;;  %7035 = vmatpush.bf16.msrb.mxu0 %v11343_v61 }
 0x326   :  { %v11852_v57 = vld [vmem:[#allocation5 + $0xd68] sm:$0xf0] }
 0x327   :  { %v15753_v13 = vld [vmem:[#allocation5 + $0xf4c] sm:$0xf]  ;;  %v11855_v8 = vor.u32 %v15689_v55, %v11852_v57  ;;  %7049 = vmatpush.bf16.msrb.mxu1 %v11599_v12 }
 0x328   :  { %v12108_v21 = vld [vmem:[#allocation5 + $0xf68] sm:$0xf0] }
 0x329   :  { %v15553_v30 = vld [vmem:[#allocation5 + $0x90c] sm:$0xf]  ;;  %v12111_v7 = vor.u32 %v15753_v13, %v12108_v21  ;;  %7063 = vmatpush.bf16.msrb.mxu2 %v11855_v8  ;;  %v6777_v21 = vadd.f32 %v6776_v5, %v6763_v48 }
 0x32a   :  { %v11308_v20 = vld [vmem:[#allocation5 + $0x928] sm:$0xf0] }
 0x32b   :  { %v15617_v62 = vld [vmem:[#allocation5 + $0xb0c] sm:$0xf]  ;;  %v11311_v14 = vor.u32 %v15553_v30, %v11308_v20  ;;  %7077 = vmatpush.bf16.msrb.mxu3 %v12111_v7 }
 0x32c   :  { %v11564_v28 = vld [vmem:[#allocation5 + $0xb28] sm:$0xf0] }
 0x32d   :  { %v15681_v2 = vld [vmem:[#allocation5 + $0xd0c] sm:$0xf]  ;;  %v11567_v50 = vor.u32 %v15617_v62, %v11564_v28  ;;  %7036 = vmatpush.bf16.msrb.mxu0 %v11311_v14  ;;  %v6804_v14 = vpop.f32.mrf.mxu3 }
 0x32e   :  { %v11820_v45 = vld [vmem:[#allocation5 + $0xd28] sm:$0xf0] }
 0x32f   :  { %v15745_v27 = vld [vmem:[#allocation5 + $0xf0c] sm:$0xf]  ;;  %v11823_v4 = vor.u32 %v15681_v2, %v11820_v45  ;;  %7050 = vmatpush.bf16.msrb.mxu1 %v11567_v50 }
 0x330   :  { %v12076_v6 = vld [vmem:[#allocation5 + $0xf28] sm:$0xf0] }
 0x331   :  { %v15545_v49 = vld [vmem:[#allocation5 + $0x8cc] sm:$0xf]  ;;  %v12079_v23 = vor.u32 %v15745_v27, %v12076_v6  ;;  %7064 = vmatpush.bf16.msrb.mxu2 %v11823_v4  ;;  %v6790_v6 = vpop.f32.mrf.mxu2 }
 0x332   :  { %v11276_v59 = vld [vmem:[#allocation5 + $0x8e8] sm:$0xf0]  ;;  %v6791_v48 = vadd.f32 %v6790_v6, %v6777_v21 }
 0x333   :  { %v15609_v60 = vld [vmem:[#allocation5 + $0xacc] sm:$0xf]  ;;  %v11279_v30 = vor.u32 %v15545_v49, %v11276_v59  ;;  %7078 = vmatpush.bf16.msrb.mxu3 %v12079_v23 }
 0x334   :  { %v11532_v55 = vld [vmem:[#allocation5 + $0xae8] sm:$0xf0] }
 0x335   :  { %v15673_v57 = vld [vmem:[#allocation5 + $0xccc] sm:$0xf]  ;;  %v11535_v12 = vor.u32 %v15609_v60, %v11532_v55  ;;  %7037 = vmatpush.bf16.msrb.mxu0 %v11279_v30  ;;  %v16959_v55 = vadd.f32 %v6804_v14, %v6791_v48 }
 0x336   :  { %v11788_v13 = vld [vmem:[#allocation5 + $0xce8] sm:$0xf0] }
 0x337   :  { %v15737_v34 = vld [vmem:[#allocation5 + $0xecc] sm:$0xf]  ;;  %v11791_v8 = vor.u32 %v15673_v57, %v11788_v13  ;;  %7051 = vmatpush.bf16.msrb.mxu1 %v11535_v12 }
 0x338   :  { %v12044_v61 = vld [vmem:[#allocation5 + $0xee8] sm:$0xf0] }
 0x339   :  { %v15537_v20 = vld [vmem:[#allocation5 + $0x88c] sm:$0xf]  ;;  %v12047_v2 = vor.u32 %v15737_v34, %v12044_v61  ;;  %7065 = vmatpush.bf16.msrb.mxu2 %v11791_v8 }
 0x33a   :  { %v11244_v62 = vld [vmem:[#allocation5 + $0x8a8] sm:$0xf0] }
 0x33b   :  { %v15601_v28 = vld [vmem:[#allocation5 + $0xa8c] sm:$0xf]  ;;  %v11247_v5 = vor.u32 %v15537_v20, %v11244_v62  ;;  %7079 = vmatpush.bf16.msrb.mxu3 %v12047_v2 }
 0x33c   :  { %v11500_v45 = vld [vmem:[#allocation5 + $0xaa8] sm:$0xf0] }
 0x33d   :  { %v15665_v7 = vld [vmem:[#allocation5 + $0xc8c] sm:$0xf]  ;;  %v11503_v50 = vor.u32 %v15601_v28, %v11500_v45  ;;  %7038 = vmatpush.bf16.msrb.mxu0 %v11247_v5 }
 0x33e   :  { %v11756_v27 = vld [vmem:[#allocation5 + $0xca8] sm:$0xf0] }
 0x33f   :  { %v15729_v42 = vld [vmem:[#allocation5 + $0xe8c] sm:$0xf]  ;;  %v11759_v4 = vor.u32 %v15665_v7, %v11756_v27  ;;  %7052 = vmatpush.bf16.msrb.mxu1 %v11503_v50 }
 0x340   :  { %v12012_v3 = vld [vmem:[#allocation5 + $0xea8] sm:$0xf0] }
 0x341   :  { %v15529_v49 = vld [vmem:[#allocation5 + $0x84c] sm:$0xf]  ;;  %v12015_v34 = vor.u32 %v15729_v42, %v12012_v3  ;;  %7066 = vmatpush.bf16.msrb.mxu2 %v11759_v4 }
 0x342   :  { %v11212_v59 = vld [vmem:[#allocation5 + $0x868] sm:$0xf0] }
 0x343   :  { %v15593_v60 = vld [vmem:[#allocation5 + $0xa4c] sm:$0xf]  ;;  %v11215_v21 = vor.u32 %v15529_v49, %v11212_v59  ;;  %7080 = vmatpush.bf16.msrb.mxu3 %v12015_v34 }
 0x344   :  { %v11468_v23 = vld [vmem:[#allocation5 + $0xa68] sm:$0xf0] }
 0x345   :  { %v15657_v57 = vld [vmem:[#allocation5 + $0xc4c] sm:$0xf]  ;;  %v11471_v12 = vor.u32 %v15593_v60, %v11468_v23  ;;  %7039 = vmatpush.bf16.msrb.mxu0 %v11215_v21 }
 0x346   :  { %v11724_v13 = vld [vmem:[#allocation5 + $0xc68] sm:$0xf0] }
 0x347   :  { %v15721_v61 = vld [vmem:[#allocation5 + $0xe4c] sm:$0xf]  ;;  %v11727_v8 = vor.u32 %v15657_v57, %v11724_v13  ;;  %7053 = vmatpush.bf16.msrb.mxu1 %v11471_v12 }
 0x348   :  { %v11980_v24 = vld [vmem:[#allocation5 + $0xe68] sm:$0xf0] }
 0x349   :  { %v15521_v30 = vld [vmem:[#allocation5 + $0x80c] sm:$0xf]  ;;  %v11983_v7 = vor.u32 %v15721_v61, %v11980_v24  ;;  %7067 = vmatpush.bf16.msrb.mxu2 %v11727_v8  ;;  %v16961_v61 = vpop.f32.mrf.mxu0 }
 0x34a   :  { %v11180_v20 = vld [vmem:[#allocation5 + $0x828] sm:$0xf0] }
 0x34b   :  { %v15585_v62 = vld [vmem:[#allocation5 + $0xa0c] sm:$0xf]  ;;  %v11183_v5 = vor.u32 %v15521_v30, %v11180_v20  ;;  %7081 = vmatpush.bf16.msrb.mxu3 %v11983_v7 }
 0x34c   :  { %v11436_v28 = vld [vmem:[#allocation5 + $0xa28] sm:$0xf0] }
 0x34d   :  { %v15649_v45 = vld [vmem:[#allocation5 + $0xc0c] sm:$0xf]  ;;  %v11439_v50 = vor.u32 %v15585_v62, %v11436_v28  ;;  %7040 = vmatpush.bf16.msrb.mxu0 %v11183_v5  ;;  %v16963_v28 = vpop.f32.mrf.mxu1 }
 0x34e   :  { %v11692_v2 = vld [vmem:[#allocation5 + $0xc28] sm:$0xf0] }
 0x34f   :  { %v15713_v3 = vld [vmem:[#allocation5 + $0xe0c] sm:$0xf]  ;;  %v11695_v4 = vor.u32 %v15649_v45, %v11692_v2  ;;  %7054 = vmatpush.bf16.msrb.mxu1 %v11439_v50 }
 0x350   :  { %v11948_v27 = vld [vmem:[#allocation5 + $0xe28] sm:$0xf0]  ;;  %7041 = vmatmul.bf16.vlgmr.msrb.gmra.mxu0 %v16786_v39 }
 0x351   :  { %v15833_v6 = vld [vmem:[#allocation5 + $0x11cc] sm:$0xf]  ;;  %v11951_v34 = vor.u32 %v15713_v3, %v11948_v27  ;;  %7068 = vmatpush.bf16.msrb.mxu2 %v11695_v4 }
 0x352   :  { %v12428_v42 = vld [vmem:[#allocation5 + $0x11e8] sm:$0xf0]  ;;  %7055 = vmatmul.bf16.vlgmr.msrb.gmra.mxu1 %v16790_v44 }
 0x353   :  { %v15897_v48 = vld [vmem:[#allocation5 + $0x13cc] sm:$0xf]  ;;  %v12431_v24 = vor.u32 %v15833_v6, %v12428_v42  ;;  %7082 = vmatpush.bf16.msrb.mxu3 %v11951_v34 }
 0x354   :  { %v12684_v14 = vld [vmem:[#allocation5 + $0x13e8] sm:$0xf0]  ;;  %7069 = vmatmul.bf16.vlgmr.msrb.gmra.mxu2 %v16788_v43 }
 0x355   :  { %v15961_v49 = vld [vmem:[#allocation5 + $0x15cc] sm:$0xf]  ;;  %v12687_v57 = vor.u32 %v15897_v48, %v12684_v14  ;;  %7089 = vmatpush.bf16.msra.mxu0 %v12431_v24  ;;  %v16971_v24 = vpop.f32.mrf.mxu3 }
 0x356   :  { %v12940_v59 = vld [vmem:[#allocation5 + $0x15e8] sm:$0xf0]  ;;  %7083 = vmatmul.bf16.vlgmr.msrb.gmra.mxu3 %v16792_v47  ;;  %17592 = vst [vmem:[#allocation43_spill] sm:$0xff] %v16971_v24 }
 0x357   :  { %v16025_v60 = vld [vmem:[#allocation5 + $0x17cc] sm:$0xf]  ;;  %v12943_v13 = vor.u32 %v15961_v49, %v12940_v59  ;;  %7103 = vmatpush.bf16.msra.mxu1 %v12687_v57 }
 0x358   :  { %v13196_v23 = vld [vmem:[#allocation5 + $0x17e8] sm:$0xf0] }
 0x359   :  { %v15825_v37 = vld [vmem:[#allocation5 + $0x118c] sm:$0xf]  ;;  %v13199_v30 = vor.u32 %v16025_v60, %v13196_v23  ;;  %7117 = vmatpush.bf16.msra.mxu2 %v12943_v13 }
 0x35a   :  { %v12396_v15 = vld [vmem:[#allocation5 + $0x11a8] sm:$0xf0] }
 0x35b   :  { %v15889_v21 = vld [vmem:[#allocation5 + $0x138c] sm:$0xf]  ;;  %v12399_v45 = vor.u32 %v15825_v37, %v12396_v15  ;;  %7131 = vmatpush.bf16.msra.mxu3 %v13199_v30  ;;  %v16969_v37 = vpop.f32.mrf.mxu2  ;;  %v6818_v30 = vpop.f32.mrf.mxu0 }
 0x35c   :  { %v12652_v20 = vld [vmem:[#allocation5 + $0x13a8] sm:$0xf0]  ;;  %17591 = vst [vmem:[#allocation42_spill] sm:$0xff] %v16969_v37  ;;  %v16214_v37 = vld [vmem:[#allocation5 + $0x1dac] sm:$0xf0] }
 0x35d   :  { %v12908_v12 = vld [vmem:[#allocation5 + $0x15a8] sm:$0xf0]  ;;  %v12655_v7 = vor.u32 %v15889_v21, %v12652_v20  ;;  %7090 = vmatpush.bf16.msra.mxu0 %v12399_v45 }
 0x35e   :  { %v16017_v8 = vld [vmem:[#allocation5 + $0x178c] sm:$0xf]  ;;  %v12911_v2 = vor.u32 %v15953_v16, %v12908_v12 }
 0x35f   :  { %v13164_v62 = vld [vmem:[#allocation5 + $0x17a8] sm:$0xf0]  ;;  %7104 = vmatpush.bf16.msra.mxu1 %v12655_v7 }
 0x360   :  { %v15817_v3 = vld [vmem:[#allocation5 + $0x114c] sm:$0xf]  ;;  %v13167_v42 = vor.u32 %v16017_v8, %v13164_v62  ;;  %7118 = vmatpush.bf16.msra.mxu2 %v12911_v2  ;;  %v6819_v8 = vadd.f32 %v6818_v30, %v16959_v55  ;;  %v6832_v2 = vpop.f32.mrf.mxu1 }
 0x361   :  { %v12364_v27 = vld [vmem:[#allocation5 + $0x1168] sm:$0xf0] }
 0x362   :  { %v15881_v6 = vld [vmem:[#allocation5 + $0x134c] sm:$0xf]  ;;  %v12367_v16 = vor.u32 %v15817_v3, %v12364_v27  ;;  %7132 = vmatpush.bf16.msra.mxu3 %v13167_v42 }
 0x363   :  { %v12620_v48 = vld [vmem:[#allocation5 + $0x1368] sm:$0xf0]  ;;  %v16976_v19 = vpop.f32.mrf.mxu0 }
 0x364   :  { %v15945_v5 = vld [vmem:[#allocation5 + $0x154c] sm:$0xf]  ;;  %v12623_v59 = vor.u32 %v15881_v6, %v12620_v48  ;;  %7091 = vmatpush.bf16.msra.mxu0 %v12367_v16  ;;  %v6833_v48 = vadd.f32 %v6832_v2, %v6819_v8  ;;  %v6860_v8 = vpop.f32.mrf.mxu3  ;;  %17593 = vst [vmem:[#allocation44_spill] sm:$0xff] %v16976_v19 }
 0x365   :  { %v12876_v14 = vld [vmem:[#allocation5 + $0x1568] sm:$0xf0] }
 0x366   :  { %v16009_v49 = vld [vmem:[#allocation5 + $0x174c] sm:$0xf]  ;;  %v12879_v50 = vor.u32 %v15945_v5, %v12876_v14  ;;  %7105 = vmatpush.bf16.msra.mxu1 %v12623_v59 }
 0x367   :  { %v13132_v15 = vld [vmem:[#allocation5 + $0x1768] sm:$0xf0] }
 0x368   :  { %v15809_v4 = vld [vmem:[#allocation5 + $0x110c] sm:$0xf]  ;;  %v13135_v34 = vor.u32 %v16009_v49, %v13132_v15  ;;  %7119 = vmatpush.bf16.msra.mxu2 %v12879_v50 }
 0x369   :  { %v12332_v60 = vld [vmem:[#allocation5 + $0x1128] sm:$0xf0] }
 0x36a   :  { %v15873_v23 = vld [vmem:[#allocation5 + $0x130c] sm:$0xf]  ;;  %v12335_v62 = vor.u32 %v15809_v4, %v12332_v60  ;;  %7133 = vmatpush.bf16.msra.mxu3 %v13135_v34 }
 0x36b   :  { %v12588_v57 = vld [vmem:[#allocation5 + $0x1328] sm:$0xf0] }
 0x36c   :  { %v15937_v13 = vld [vmem:[#allocation5 + $0x150c] sm:$0xf]  ;;  %v12591_v45 = vor.u32 %v15873_v23, %v12588_v57  ;;  %7092 = vmatpush.bf16.msra.mxu0 %v12335_v62  ;;  %v6846_v57 = vpop.f32.mrf.mxu2 }
 0x36d   :  { %v12844_v21 = vld [vmem:[#allocation5 + $0x1528] sm:$0xf0]  ;;  %v6847_v30 = vadd.f32 %v6846_v57, %v6833_v48 }
 0x36e   :  { %v16001_v20 = vld [vmem:[#allocation5 + $0x170c] sm:$0xf]  ;;  %v12847_v7 = vor.u32 %v15937_v13, %v12844_v21  ;;  %7106 = vmatpush.bf16.msra.mxu1 %v12591_v45 }
 0x36f   :  { %v13100_v12 = vld [vmem:[#allocation5 + $0x1728] sm:$0xf0]  ;;  %v16974_v45 = vadd.f32 %v6860_v8, %v6847_v30 }
 0x370   :  { %v15801_v3 = vld [vmem:[#allocation5 + $0x10cc] sm:$0xf]  ;;  %v13103_v42 = vor.u32 %v16001_v20, %v13100_v12  ;;  %7120 = vmatpush.bf16.msra.mxu2 %v12847_v7 }
 0x371   :  { %v12300_v27 = vld [vmem:[#allocation5 + $0x10e8] sm:$0xf0] }
 0x372   :  { %v15865_v6 = vld [vmem:[#allocation5 + $0x12cc] sm:$0xf]  ;;  %v12303_v16 = vor.u32 %v15801_v3, %v12300_v27  ;;  %7134 = vmatpush.bf16.msra.mxu3 %v13103_v42 }
 0x373   :  { %v12556_v5 = vld [vmem:[#allocation5 + $0x12e8] sm:$0xf0] }
 0x374   :  { %v15929_v14 = vld [vmem:[#allocation5 + $0x14cc] sm:$0xf]  ;;  %v12559_v55 = vor.u32 %v15865_v6, %v12556_v5  ;;  %7093 = vmatpush.bf16.msra.mxu0 %v12303_v16 }
 0x375   :  { %v12812_v49 = vld [vmem:[#allocation5 + $0x14e8] sm:$0xf0] }
 0x376   :  { %v15993_v15 = vld [vmem:[#allocation5 + $0x16cc] sm:$0xf]  ;;  %v12815_v59 = vor.u32 %v15929_v14, %v12812_v49  ;;  %7107 = vmatpush.bf16.msra.mxu1 %v12559_v55 }
 0x377   :  { %v15793_v50 = vld [vmem:[#allocation5 + $0x108c] sm:$0xf]  ;;  %v13071_v23 = vor.u32 %v15993_v15, %v13068_v33 }
 0x378   :  { %v12268_v4 = vld [vmem:[#allocation5 + $0x10a8] sm:$0xf0]  ;;  %7121 = vmatpush.bf16.msra.mxu2 %v12815_v59 }
 0x379   :  { %v15857_v60 = vld [vmem:[#allocation5 + $0x128c] sm:$0xf]  ;;  %v12271_v62 = vor.u32 %v15793_v50, %v12268_v4  ;;  %7135 = vmatpush.bf16.msra.mxu3 %v13071_v23 }
 0x37a   :  { %v12524_v34 = vld [vmem:[#allocation5 + $0x12a8] sm:$0xf0] }
 0x37b   :  { %v15921_v13 = vld [vmem:[#allocation5 + $0x148c] sm:$0xf]  ;;  %v12527_v7 = vor.u32 %v15857_v60, %v12524_v34  ;;  %7094 = vmatpush.bf16.msra.mxu0 %v12271_v62 }
 0x37c   :  { %v12780_v21 = vld [vmem:[#allocation5 + $0x14a8] sm:$0xf0] }
 0x37d   :  { %v15985_v20 = vld [vmem:[#allocation5 + $0x168c] sm:$0xf]  ;;  %v12783_v2 = vor.u32 %v15921_v13, %v12780_v21  ;;  %7108 = vmatpush.bf16.msra.mxu1 %v12527_v7 }
 0x37e   :  { %v13036_v12 = vld [vmem:[#allocation5 + $0x16a8] sm:$0xf0] }
 0x37f   :  { %v15785_v3 = vld [vmem:[#allocation5 + $0x104c] sm:$0xf]  ;;  %v13039_v33 = vor.u32 %v15985_v20, %v13036_v12  ;;  %7122 = vmatpush.bf16.msra.mxu2 %v12783_v2 }
 0x380   :  { %v12236_v27 = vld [vmem:[#allocation5 + $0x1068] sm:$0xf0] }
 0x381   :  { %v15849_v6 = vld [vmem:[#allocation5 + $0x124c] sm:$0xf]  ;;  %v12239_v15 = vor.u32 %v15785_v3, %v12236_v27  ;;  %7136 = vmatpush.bf16.msra.mxu3 %v13039_v33 }
 0x382   :  { %v12492_v42 = vld [vmem:[#allocation5 + $0x1268] sm:$0xf0] }
 0x383   :  { %v15913_v5 = vld [vmem:[#allocation5 + $0x144c] sm:$0xf]  ;;  %v12495_v55 = vor.u32 %v15849_v6, %v12492_v42  ;;  %7095 = vmatpush.bf16.msra.mxu0 %v12239_v15 }
 0x384   :  { %v12748_v14 = vld [vmem:[#allocation5 + $0x1468] sm:$0xf0] }
 0x385   :  { %v15977_v48 = vld [vmem:[#allocation5 + $0x164c] sm:$0xf]  ;;  %v12751_v59 = vor.u32 %v15913_v5, %v12748_v14  ;;  %7109 = vmatpush.bf16.msra.mxu1 %v12495_v55 }
 0x386   :  { %v13004_v49 = vld [vmem:[#allocation5 + $0x1668] sm:$0xf0] }
 0x387   :  { %v15777_v16 = vld [vmem:[#allocation5 + $0x100c] sm:$0xf]  ;;  %v13007_v34 = vor.u32 %v15977_v48, %v13004_v49  ;;  %7123 = vmatpush.bf16.msra.mxu2 %v12751_v59 }
 0x388   :  { %v12204_v50 = vld [vmem:[#allocation5 + $0x1028] sm:$0xf0] }
 0x389   :  { %v15841_v4 = vld [vmem:[#allocation5 + $0x120c] sm:$0xf]  ;;  %v12207_v8 = vor.u32 %v15777_v16, %v12204_v50  ;;  %7137 = vmatpush.bf16.msra.mxu3 %v13007_v34 }
 0x38a   :  { %v12460_v60 = vld [vmem:[#allocation5 + $0x1228] sm:$0xf0] }
 0x38b   :  { %v15905_v57 = vld [vmem:[#allocation5 + $0x140c] sm:$0xf]  ;;  %v12463_v7 = vor.u32 %v15841_v4, %v12460_v60  ;;  %7096 = vmatpush.bf16.msra.mxu0 %v12207_v8  ;;  %v16978_v4 = vpop.f32.mrf.mxu1 }
 0x38c   :  { %v12716_v23 = vld [vmem:[#allocation5 + $0x1428] sm:$0xf0]  ;;  %17594 = vst [vmem:[#allocation45_spill] sm:$0xff] %v16978_v4  ;;  %v15446_v4 = vld [vmem:[#allocation5 + $0x5ac] sm:$0xf0] }
 0x38d   :  { %v15969_v13 = vld [vmem:[#allocation5 + $0x160c] sm:$0xf]  ;;  %v12719_v2 = vor.u32 %v15905_v57, %v12716_v23  ;;  %7110 = vmatpush.bf16.msra.mxu1 %v12463_v7 }
 0x38e   :  { %v12972_v21 = vld [vmem:[#allocation5 + $0x1628] sm:$0xf0]  ;;  %7097 = vmatmul.bf16.vlgmr.msra.gmra.mxu0 %v16798_v31 }
 0x38f   :  { %v16089_v30 = vld [vmem:[#allocation5 + $0x19cc] sm:$0xf]  ;;  %v12975_v33 = vor.u32 %v15969_v13, %v12972_v21  ;;  %7124 = vmatpush.bf16.msra.mxu2 %v12719_v2 }
 0x390   :  { %v13452_v20 = vld [vmem:[#allocation5 + $0x19e8] sm:$0xf0]  ;;  %7111 = vmatmul.bf16.vlgmr.msra.gmra.mxu1 %v16802_v36 }
 0x391   :  { %v16153_v12 = vld [vmem:[#allocation5 + $0x1bcc] sm:$0xf]  ;;  %v13455_v5 = vor.u32 %v16089_v30, %v13452_v20  ;;  %7138 = vmatpush.bf16.msra.mxu3 %v12975_v33 }
 0x392   :  { %v13708_v62 = vld [vmem:[#allocation5 + $0x1be8] sm:$0xf0]  ;;  %7125 = vmatmul.bf16.vlgmr.msra.gmra.mxu2 %v16800_v35 }
 0x393   :  { %v16217_v3 = vld [vmem:[#allocation5 + $0x1dcc] sm:$0xf]  ;;  %v13711_v14 = vor.u32 %v16153_v12, %v13708_v62  ;;  %7145 = vmatpush.bf16.msrb.mxu0 %v13455_v5 }
 0x394   :  { %v13964_v27 = vld [vmem:[#allocation5 + $0x1de8] sm:$0xf0]  ;;  %7139 = vmatmul.bf16.vlgmr.msra.gmra.mxu3 %v16804_v40 }
 0x395   :  { %v16281_v6 = vld [vmem:[#allocation5 + $0x1fcc] sm:$0xf]  ;;  %v13967_v48 = vor.u32 %v16217_v3, %v13964_v27  ;;  %7159 = vmatpush.bf16.msrb.mxu1 %v13711_v14 }
 0x396   :  { %v14220_v42 = vld [vmem:[#allocation5 + $0x1fe8] sm:$0xf0] }
 0x397   :  { %v16081_v49 = vld [vmem:[#allocation5 + $0x198c] sm:$0xf]  ;;  %v14223_v15 = vor.u32 %v16281_v6, %v14220_v42  ;;  %7173 = vmatpush.bf16.msrb.mxu2 %v13967_v48  ;;  %v16984_v6 = vpop.f32.mrf.mxu2  ;;  %v16986_v48 = vpop.f32.mrf.mxu3 }
 0x398   :  { %v13676_v16 = vld [vmem:[#allocation5 + $0x1ba8] sm:$0xf0]  ;;  %v13423_v60 = vor.u32 %v16081_v49, %v13420_v9  ;;  %17595 = vst [vmem:[#allocation46_spill] sm:$0xff] %v16984_v6  ;;  %v6874_v49 = vpop.f32.mrf.mxu0  ;;  %v10610_v6 = vld [vmem:[#allocation5 + $0x390] sm:$0xf] }
 0x399   :  { %v16209_v50 = vld [vmem:[#allocation5 + $0x1d8c] sm:$0xf]  ;;  %v13679_v57 = vor.u32 %v16145_v29, %v13676_v16  ;;  %7187 = vmatpush.bf16.msrb.mxu3 %v14223_v15  ;;  %17596 = vst [vmem:[#allocation47_spill] sm:$0xff] %v16986_v48  ;;  %v15318_v48 = vld [vmem:[#allocation5 + $0x1ac] sm:$0xf0] }
 0x39a   :  { %v13932_v24 = vld [vmem:[#allocation5 + $0x1da8] sm:$0xf0]  ;;  %7146 = vmatpush.bf16.msrb.mxu0 %v13423_v60 }
 0x39b   :  { %v16273_v55 = vld [vmem:[#allocation5 + $0x1f8c] sm:$0xf]  ;;  %v13935_v34 = vor.u32 %v16209_v50, %v13932_v24  ;;  %7160 = vmatpush.bf16.msrb.mxu1 %v13679_v57  ;;  %v6875_v50 = vadd.f32 %v6874_v49, %v16974_v45 }
 0x39c   :  { %v14188_v59 = vld [vmem:[#allocation5 + $0x1fa8] sm:$0xf0] }
 0x39d   :  { %v16073_v23 = vld [vmem:[#allocation5 + $0x194c] sm:$0xf]  ;;  %v14191_v30 = vor.u32 %v16273_v55, %v14188_v59  ;;  %7174 = vmatpush.bf16.msrb.mxu2 %v13935_v34  ;;  %v6888_v59 = vpop.f32.mrf.mxu1 }
 0x39e   :  { %v13388_v13 = vld [vmem:[#allocation5 + $0x1968] sm:$0xf0] }
 0x39f   :  { %v16137_v21 = vld [vmem:[#allocation5 + $0x1b4c] sm:$0xf]  ;;  %v13391_v29 = vor.u32 %v16073_v23, %v13388_v13  ;;  %7188 = vmatpush.bf16.msrb.mxu3 %v14191_v30  ;;  %v6889_v30 = vadd.f32 %v6888_v59, %v6875_v50 }
 0x3a0   :  { %v13644_v20 = vld [vmem:[#allocation5 + $0x1b68] sm:$0xf0]  ;;  %v16991_v19 = vpop.f32.mrf.mxu0 }
 0x3a1   :  { %v16201_v12 = vld [vmem:[#allocation5 + $0x1d4c] sm:$0xf]  ;;  %v13647_v24 = vor.u32 %v16137_v21, %v13644_v20  ;;  %7147 = vmatpush.bf16.msrb.mxu0 %v13391_v29  ;;  %17597 = vst [vmem:[#allocation48_spill] sm:$0xff] %v16991_v19  ;;  %v12914_v19 = vld [vmem:[#allocation5 + $0x1590] sm:$0xf] }
 0x3a2   :  { %v13900_v8 = vld [vmem:[#allocation5 + $0x1d68] sm:$0xf0] }
 0x3a3   :  { %v16265_v62 = vld [vmem:[#allocation5 + $0x1f4c] sm:$0xf]  ;;  %v13903_v3 = vor.u32 %v16201_v12, %v13900_v8  ;;  %7161 = vmatpush.bf16.msrb.mxu1 %v13647_v24 }
 0x3a4   :  { %v14156_v9 = vld [vmem:[#allocation5 + $0x1f68] sm:$0xf0] }
 0x3a5   :  { %v16065_v27 = vld [vmem:[#allocation5 + $0x190c] sm:$0xf]  ;;  %v14159_v42 = vor.u32 %v16265_v62, %v14156_v9  ;;  %7175 = vmatpush.bf16.msrb.mxu2 %v13903_v3 }
 0x3a6   :  { %v13356_v7 = vld [vmem:[#allocation5 + $0x1928] sm:$0xf0] }
 0x3a7   :  { %v16129_v2 = vld [vmem:[#allocation5 + $0x1b0c] sm:$0xf]  ;;  %v13359_v55 = vor.u32 %v16065_v27, %v13356_v7  ;;  %7189 = vmatpush.bf16.msrb.mxu3 %v14159_v42 }
 0x3a8   :  { %v13612_v33 = vld [vmem:[#allocation5 + $0x1b28] sm:$0xf0] }
 0x3a9   :  { %v16193_v5 = vld [vmem:[#allocation5 + $0x1d0c] sm:$0xf]  ;;  %v13615_v60 = vor.u32 %v16129_v2, %v13612_v33  ;;  %7148 = vmatpush.bf16.msrb.mxu0 %v13359_v55  ;;  %v6902_v33 = vpop.f32.mrf.mxu2 }
 0x3aa   :  { %v13868_v14 = vld [vmem:[#allocation5 + $0x1d28] sm:$0xf0]  ;;  %v6903_v49 = vadd.f32 %v6902_v33, %v6889_v30 }
 0x3ab   :  { %v16257_v15 = vld [vmem:[#allocation5 + $0x1f0c] sm:$0xf]  ;;  %v13871_v57 = vor.u32 %v16193_v5, %v13868_v14  ;;  %7162 = vmatpush.bf16.msrb.mxu1 %v13615_v60 }
 0x3ac   :  { %v14124_v16 = vld [vmem:[#allocation5 + $0x1f28] sm:$0xf0] }
 0x3ad   :  { %v16057_v34 = vld [vmem:[#allocation5 + $0x18cc] sm:$0xf]  ;;  %v14127_v21 = vor.u32 %v16257_v15, %v14124_v16  ;;  %7176 = vmatpush.bf16.msrb.mxu2 %v13871_v57  ;;  %v6916_v15 = vpop.f32.mrf.mxu3 }
 0x3ae   :  { %v13324_v23 = vld [vmem:[#allocation5 + $0x18e8] sm:$0xf0]  ;;  %v16989_v59 = vadd.f32 %v6916_v15, %v6903_v49  ;;  %v10386_v49 = vld [vmem:[#allocation5 + $0x1d0] sm:$0xf] }
 0x3af   :  { %v16121_v13 = vld [vmem:[#allocation5 + $0x1acc] sm:$0xf]  ;;  %v13327_v29 = vor.u32 %v16057_v34, %v13324_v23  ;;  %7190 = vmatpush.bf16.msrb.mxu3 %v14127_v21  ;;  %v15326_v15 = vld [vmem:[#allocation5 + $0x1ec] sm:$0xf0] }
 0x3b0   :  { %v13580_v20 = vld [vmem:[#allocation5 + $0x1ae8] sm:$0xf0] }
 0x3b1   :  { %v16185_v12 = vld [vmem:[#allocation5 + $0x1ccc] sm:$0xf]  ;;  %v13583_v45 = vor.u32 %v16121_v13, %v13580_v20  ;;  %7149 = vmatpush.bf16.msrb.mxu0 %v13327_v29 }
 0x3b2   :  { %v13836_v8 = vld [vmem:[#allocation5 + $0x1ce8] sm:$0xf0] }
 0x3b3   :  { %v16249_v62 = vld [vmem:[#allocation5 + $0x1ecc] sm:$0xf]  ;;  %v13839_v24 = vor.u32 %v16185_v12, %v13836_v8  ;;  %7163 = vmatpush.bf16.msrb.mxu1 %v13583_v45 }
 0x3b4   :  { %v14092_v9 = vld [vmem:[#allocation5 + $0x1ee8] sm:$0xf0] }
 0x3b5   :  { %v16049_v3 = vld [vmem:[#allocation5 + $0x188c] sm:$0xf]  ;;  %v14095_v2 = vor.u32 %v16249_v62, %v14092_v9  ;;  %7177 = vmatpush.bf16.msrb.mxu2 %v13839_v24 }
 0x3b6   :  { %v13292_v27 = vld [vmem:[#allocation5 + $0x18a8] sm:$0xf0] }
 0x3b7   :  { %v16113_v7 = vld [vmem:[#allocation5 + $0x1a8c] sm:$0xf]  ;;  %v13295_v55 = vor.u32 %v16049_v3, %v13292_v27  ;;  %7191 = vmatpush.bf16.msrb.mxu3 %v14095_v2 }
 0x3b8   :  { %v13548_v42 = vld [vmem:[#allocation5 + $0x1aa8] sm:$0xf0] }
 0x3b9   :  { %v16177_v5 = vld [vmem:[#allocation5 + $0x1c8c] sm:$0xf]  ;;  %v13551_v60 = vor.u32 %v16113_v7, %v13548_v42  ;;  %7150 = vmatpush.bf16.msrb.mxu0 %v13295_v55  ;;  %v15390_v55 = vld [vmem:[#allocation5 + $0x3ec] sm:$0xf0] }
 0x3ba   :  { %v13804_v14 = vld [vmem:[#allocation5 + $0x1ca8] sm:$0xf0] }
 0x3bb   :  { %v16241_v16 = vld [vmem:[#allocation5 + $0x1e8c] sm:$0xf]  ;;  %v13807_v57 = vor.u32 %v16177_v5, %v13804_v14  ;;  %7164 = vmatpush.bf16.msrb.mxu1 %v13551_v60 }
 0x3bc   :  { %v14060_v50 = vld [vmem:[#allocation5 + $0x1ea8] sm:$0xf0] }
 0x3bd   :  { %v16041_v34 = vld [vmem:[#allocation5 + $0x184c] sm:$0xf]  ;;  %v14063_v21 = vor.u32 %v16241_v16, %v14060_v50  ;;  %7178 = vmatpush.bf16.msrb.mxu2 %v13807_v57  ;;  %v10642_v16 = vld [vmem:[#allocation5 + $0x3d0] sm:$0xf] }
 0x3be   :  { %v13260_v23 = vld [vmem:[#allocation5 + $0x1868] sm:$0xf0] }
 0x3bf   :  { %v16105_v13 = vld [vmem:[#allocation5 + $0x1a4c] sm:$0xf]  ;;  %v13263_v9 = vor.u32 %v16041_v34, %v13260_v23  ;;  %7192 = vmatpush.bf16.msrb.mxu3 %v14063_v21  ;;  %v10898_v34 = vld [vmem:[#allocation5 + $0x5d0] sm:$0xf] }
 0x3c0   :  { %v13516_v20 = vld [vmem:[#allocation5 + $0x1a68] sm:$0xf0]  ;;  %v15454_v23 = vld [vmem:[#allocation5 + $0x5ec] sm:$0xf0] }
 0x3c1   :  { %v16169_v12 = vld [vmem:[#allocation5 + $0x1c4c] sm:$0xf]  ;;  %v13519_v45 = vor.u32 %v16105_v13, %v13516_v20  ;;  %7151 = vmatpush.bf16.msrb.mxu0 %v13263_v9  ;;  %v11154_v13 = vld [vmem:[#allocation5 + $0x7d0] sm:$0xf] }
 0x3c2   :  { %v13772_v8 = vld [vmem:[#allocation5 + $0x1c68] sm:$0xf0]  ;;  %v15518_v20 = vld [vmem:[#allocation5 + $0x7ec] sm:$0xf0] }
 0x3c3   :  { %v16233_v30 = vld [vmem:[#allocation5 + $0x1e4c] sm:$0xf]  ;;  %v13775_v24 = vor.u32 %v16169_v12, %v13772_v8  ;;  %7165 = vmatpush.bf16.msrb.mxu1 %v13519_v45  ;;  %v10387_v12 = vor.u32 %v15326_v15, %v10386_v49  ;;  %v10643_v8 = vor.u32 %v15390_v55, %v10642_v16  ;;  %v11155_v9 = vor.u32 %v15518_v20, %v11154_v13  ;;  %v11122_v45 = vld [vmem:[#allocation5 + $0x790] sm:$0xf]  ;;  %v16999_v13 = vpop.f32.mrf.mxu2 }
 0x3c4   :  { %v14028_v62 = vld [vmem:[#allocation5 + $0x1e68] sm:$0xf0]  ;;  %v15374_v15 = vld [vmem:[#allocation5 + $0x36c] sm:$0xf0]  ;;  %17599 = vst [vmem:[#allocation50_spill] sm:$0xff] %v16999_v13 }
 0x3c5   :  { %v16033_v29 = vld [vmem:[#allocation5 + $0x180c] sm:$0xf]  ;;  %v14031_v42 = vor.u32 %v16233_v30, %v14028_v62  ;;  %7179 = vmatpush.bf16.msrb.mxu2 %v13775_v24  ;;  %v10899_v30 = vor.u32 %v15454_v23, %v10898_v34  ;;  %v10354_v62 = vld [vmem:[#allocation5 + $0x190] sm:$0xf] }
 0x3c6   :  { %v13228_v3 = vld [vmem:[#allocation5 + $0x1828] sm:$0xf0]  ;;  %v15510_v24 = vld [vmem:[#allocation5 + $0x7ac] sm:$0xf0] }
 0x3c7   :  { %v16097_v27 = vld [vmem:[#allocation5 + $0x1a0c] sm:$0xf]  ;;  %v13231_v50 = vor.u32 %v16033_v29, %v13228_v3  ;;  %7193 = vmatpush.bf16.msrb.mxu3 %v14031_v42  ;;  %v15382_v29 = vld [vmem:[#allocation5 + $0x3ac] sm:$0xf0]  ;;  %v11123_v49 = vor.u32 %v15510_v24, %v11122_v45 }
 0x3c8   :  { %v13484_v7 = vld [vmem:[#allocation5 + $0x1a28] sm:$0xf0]  ;;  %v10866_v3 = vld [vmem:[#allocation5 + $0x590] sm:$0xf] }
 0x3c9   :  { %v16161_v33 = vld [vmem:[#allocation5 + $0x1c0c] sm:$0xf]  ;;  %v13487_v60 = vor.u32 %v16097_v27, %v13484_v7  ;;  %7152 = vmatpush.bf16.msrb.mxu0 %v13231_v50  ;;  %v16993_v27 = vpop.f32.mrf.mxu1  ;;  %v10355_v7 = vor.u32 %v15318_v48, %v10354_v62  ;;  %v10867_v42 = vor.u32 %v15446_v4, %v10866_v3  ;;  %v10834_v16 = vld [vmem:[#allocation5 + $0x550] sm:$0xf]  ;;  %v6930_v62 = vpop.f32.mrf.mxu0 }
 0x3ca   :  { %v13740_v2 = vld [vmem:[#allocation5 + $0x1c28] sm:$0xf0]  ;;  %17598 = vst [vmem:[#allocation49_spill] sm:$0xff] %v16993_v27  ;;  %v15438_v50 = vld [vmem:[#allocation5 + $0x56c] sm:$0xf0]  ;;  %v6931_v3 = vadd.f32 %v6930_v62, %v16989_v59 }
 0x3cb   :  { %v16225_v5 = vld [vmem:[#allocation5 + $0x1e0c] sm:$0xf]  ;;  %v13743_v57 = vor.u32 %v16161_v33, %v13740_v2  ;;  %7166 = vmatpush.bf16.msrb.mxu1 %v13487_v60  ;;  %v10611_v33 = vor.u32 %v15382_v29, %v10610_v6  ;;  %v10322_v2 = vld [vmem:[#allocation5 + $0x150] sm:$0xf]  ;;  %v10835_v34 = vor.u32 %v15438_v50, %v10834_v16 }
 0x3cc   :  { %v13996_v14 = vld [vmem:[#allocation5 + $0x1e28] sm:$0xf0]  ;;  %7153 = vmatmul.bf16.vlgmr.msrb.gmra.mxu0 %v16810_v32  ;;  %v11090_v55 = vld [vmem:[#allocation5 + $0x750] sm:$0xf] }
 0x3cd   :  { %v13999_v21 = vor.u32 %v16225_v5, %v13996_v14  ;;  %7180 = vmatpush.bf16.msrb.mxu2 %v13743_v57  ;;  %7201 = vmatpush.bf16.msra.mxu0 %v10387_v12  ;;  %v15310_v5 = vld [vmem:[#allocation5 + $0x16c] sm:$0xf0] }
 0x3ce   :  { %v10578_v14 = vld [vmem:[#allocation5 + $0x350] sm:$0xf]  ;;  %7167 = vmatmul.bf16.vlgmr.msrb.gmra.mxu1 %v16814_v41  ;;  %v10323_v4 = vor.u32 %v15310_v5, %v10322_v2 }
 0x3cf   :  { %7194 = vmatpush.bf16.msrb.mxu3 %v13999_v21  ;;  %7215 = vmatpush.bf16.msra.mxu1 %v10643_v8  ;;  %v15502_v48 = vld [vmem:[#allocation5 + $0x76c] sm:$0xf0]  ;;  %v10579_v6 = vor.u32 %v15374_v15, %v10578_v14 }
 0x3d0   :  { %7181 = vmatmul.bf16.vlgmr.msrb.gmra.mxu2 %v16812_v38  ;;  %v10290_v23 = vld [vmem:[#allocation5 + $0x110] sm:$0xf]  ;;  %v11091_v20 = vor.u32 %v15502_v48, %v11090_v55 }
 0x3d1   :  { %7229 = vmatpush.bf16.msra.mxu2 %v10899_v30  ;;  %7202 = vmatpush.bf16.msra.mxu0 %v10355_v7  ;;  %v15302_v60 = vld [vmem:[#allocation5 + $0x12c] sm:$0xf0]  ;;  %v17001_v30 = vpop.f32.mrf.mxu3  ;;  %v6944_v24 = vpop.f32.mrf.mxu1 }
 0x3d2   :  { %7195 = vmatmul.bf16.vlgmr.msrb.gmra.mxu3 %v16816_v46  ;;  %v10546_v57 = vld [vmem:[#allocation5 + $0x310] sm:$0xf]  ;;  %17600 = vst [vmem:[#allocation51_spill] sm:$0xff] %v17001_v30  ;;  %v10291_v45 = vor.u32 %v15302_v60, %v10290_v23  ;;  %v17006_v27 = vpop.f32.mrf.mxu0 }
 0x3d3   :  { %7243 = vmatpush.bf16.msra.mxu3 %v11155_v9  ;;  %7216 = vmatpush.bf16.msra.mxu1 %v10611_v33  ;;  %v15366_v21 = vld [vmem:[#allocation5 + $0x32c] sm:$0xf0]  ;;  %17602 = vst [vmem:[#allocation53_spill] sm:$0xff] %v17006_v27 }
 0x3d4   :  { %v10802_v12 = vld [vmem:[#allocation5 + $0x510] sm:$0xf]  ;;  %v10547_v7 = vor.u32 %v15366_v21, %v10546_v57  ;;  %v6958_v21 = vpop.f32.mrf.mxu2 }
 0x3d5   :  { %7230 = vmatpush.bf16.msra.mxu2 %v10867_v42  ;;  %v15430_v8 = vld [vmem:[#allocation5 + $0x52c] sm:$0xf0]  ;;  %7203 = vmatpush.bf16.msra.mxu0 %v10323_v4 }
 0x3d6   :  { %v11058_v9 = vld [vmem:[#allocation5 + $0x710] sm:$0xf]  ;;  %v10803_v33 = vor.u32 %v15430_v8, %v10802_v12 }
 0x3d7   :  { %7244 = vmatpush.bf16.msra.mxu3 %v11123_v49  ;;  %v15494_v29 = vld [vmem:[#allocation5 + $0x72c] sm:$0xf0]  ;;  %7217 = vmatpush.bf16.msra.mxu1 %v10579_v6  ;;  %v6945_v49 = vadd.f32 %v6944_v24, %v6931_v3 }
 0x3d8   :  { %v10258_v42 = vld [vmem:[#allocation5 + $0xd0] sm:$0xf]  ;;  %v11059_v14 = vor.u32 %v15494_v29, %v11058_v9 }
 0x3d9   :  { %7231 = vmatpush.bf16.msra.mxu2 %v10835_v34  ;;  %v15294_v2 = vld [vmem:[#allocation5 + $0xec] sm:$0xf0]  ;;  %7204 = vmatpush.bf16.msra.mxu0 %v10291_v45  ;;  %v6959_v62 = vadd.f32 %v6958_v21, %v6945_v49  ;;  %v6972_v9 = vpop.f32.mrf.mxu3 }
 0x3da   :  { %v10514_v5 = vld [vmem:[#allocation5 + $0x2d0] sm:$0xf]  ;;  %v10259_v4 = vor.u32 %v15294_v2, %v10258_v42 }
 0x3db   :  { %7245 = vmatpush.bf16.msra.mxu3 %v11091_v20  ;;  %v15358_v15 = vld [vmem:[#allocation5 + $0x2ec] sm:$0xf0]  ;;  %7218 = vmatpush.bf16.msra.mxu1 %v10547_v7  ;;  %v17004_v24 = vadd.f32 %v6972_v9, %v6959_v62 }
 0x3dc   :  { %v10770_v16 = vld [vmem:[#allocation5 + $0x4d0] sm:$0xf]  ;;  %v10515_v59 = vor.u32 %v15358_v15, %v10514_v5 }
 0x3dd   :  { %v15422_v50 = vld [vmem:[#allocation5 + $0x4ec] sm:$0xf0]  ;;  %7232 = vmatpush.bf16.msra.mxu2 %v10803_v33  ;;  %7205 = vmatpush.bf16.msra.mxu0 %v10259_v4  ;;  %17601 = vst [vmem:[#allocation52_spill] sm:$0xff] %v17004_v24 }
 0x3de   :  { %v11026_v55 = vld [vmem:[#allocation5 + $0x6d0] sm:$0xf]  ;;  %v10771_v6 = vor.u32 %v15422_v50, %v10770_v16 }
 0x3df   :  { %v15486_v48 = vld [vmem:[#allocation5 + $0x6ec] sm:$0xf0]  ;;  %7246 = vmatpush.bf16.msra.mxu3 %v11059_v14  ;;  %7219 = vmatpush.bf16.msra.mxu1 %v10515_v59 }
 0x3e0   :  { %v10226_v34 = vld [vmem:[#allocation5 + $0x90] sm:$0xf]  ;;  %v11027_v57 = vor.u32 %v15486_v48, %v11026_v55 }
 0x3e1   :  { %v15286_v23 = vld [vmem:[#allocation5 + $0xac] sm:$0xf0]  ;;  %7233 = vmatpush.bf16.msra.mxu2 %v10771_v6 }
 0x3e2   :  { %v10482_v60 = vld [vmem:[#allocation5 + $0x290] sm:$0xf]  ;;  %v10227_v45 = vor.u32 %v15286_v23, %v10226_v34 }
 0x3e3   :  { %v15350_v20 = vld [vmem:[#allocation5 + $0x2ac] sm:$0xf0]  ;;  %7247 = vmatpush.bf16.msra.mxu3 %v11027_v57 }
 0x3e4   :  { %v10738_v12 = vld [vmem:[#allocation5 + $0x490] sm:$0xf]  ;;  %v10483_v7 = vor.u32 %v15350_v20, %v10482_v60  ;;  %7206 = vmatpush.bf16.msra.mxu0 %v10227_v45 }
 0x3e5   :  { %v15414_v8 = vld [vmem:[#allocation5 + $0x4ac] sm:$0xf0] }
 0x3e6   :  { %v10994_v29 = vld [vmem:[#allocation5 + $0x690] sm:$0xf]  ;;  %v10739_v33 = vor.u32 %v15414_v8, %v10738_v12  ;;  %7220 = vmatpush.bf16.msra.mxu1 %v10483_v7 }
 0x3e7   :  { %v15478_v3 = vld [vmem:[#allocation5 + $0x6ac] sm:$0xf0] }
 0x3e8   :  { %v10194_v42 = vld [vmem:[#allocation5 + $0x50] sm:$0xf]  ;;  %v10995_v14 = vor.u32 %v15478_v3, %v10994_v29  ;;  %7234 = vmatpush.bf16.msra.mxu2 %v10739_v33 }
 0x3e9   :  { %v15278_v2 = vld [vmem:[#allocation5 + $0x6c] sm:$0xf0] }
 0x3ea   :  { %v10450_v5 = vld [vmem:[#allocation5 + $0x250] sm:$0xf]  ;;  %v10195_v48 = vor.u32 %v15278_v2, %v10194_v42  ;;  %7248 = vmatpush.bf16.msra.mxu3 %v10995_v14 }
 0x3eb   :  { %v15342_v15 = vld [vmem:[#allocation5 + $0x26c] sm:$0xf0] }
 0x3ec   :  { %v10706_v16 = vld [vmem:[#allocation5 + $0x450] sm:$0xf]  ;;  %v10451_v59 = vor.u32 %v15342_v15, %v10450_v5  ;;  %7207 = vmatpush.bf16.msra.mxu0 %v10195_v48 }
 0x3ed   :  { %v15406_v50 = vld [vmem:[#allocation5 + $0x46c] sm:$0xf0] }
 0x3ee   :  { %v10962_v49 = vld [vmem:[#allocation5 + $0x650] sm:$0xf]  ;;  %v10707_v6 = vor.u32 %v15406_v50, %v10706_v16  ;;  %7221 = vmatpush.bf16.msra.mxu1 %v10451_v59 }
 0x3ef   :  { %v15470_v55 = vld [vmem:[#allocation5 + $0x66c] sm:$0xf0] }
 0x3f0   :  { %v10162_v4 = vld [vmem:[#allocation5 + $0x10] sm:$0xf]  ;;  %v10963_v20 = vor.u32 %v15470_v55, %v10962_v49  ;;  %7235 = vmatpush.bf16.msra.mxu2 %v10707_v6 }
 0x3f1   :  { %v15270_v34 = vld [vmem:[#allocation5 + $0x2c] sm:$0xf0] }
 0x3f2   :  { %v10418_v23 = vld [vmem:[#allocation5 + $0x210] sm:$0xf]  ;;  %v10163_v3 = vor.u32 %v15270_v34, %v10162_v4  ;;  %7249 = vmatpush.bf16.msra.mxu3 %v10963_v20 }
 0x3f3   :  { %v15334_v60 = vld [vmem:[#allocation5 + $0x22c] sm:$0xf0] }
 0x3f4   :  { %v10674_v21 = vld [vmem:[#allocation5 + $0x410] sm:$0xf]  ;;  %v10419_v7 = vor.u32 %v15334_v60, %v10418_v23  ;;  %7208 = vmatpush.bf16.msra.mxu0 %v10163_v3  ;;  %v17008_v60 = vpop.f32.mrf.mxu1 }
 0x3f5   :  { %v15398_v57 = vld [vmem:[#allocation5 + $0x42c] sm:$0xf0]  ;;  %17603 = vst [vmem:[#allocation54_spill] sm:$0xff] %v17008_v60 }
 0x3f6   :  { %v10930_v12 = vld [vmem:[#allocation5 + $0x610] sm:$0xf]  ;;  %v10675_v33 = vor.u32 %v15398_v57, %v10674_v21  ;;  %7222 = vmatpush.bf16.msra.mxu1 %v10419_v7 }
 0x3f7   :  { %v15462_v8 = vld [vmem:[#allocation5 + $0x62c] sm:$0xf0]  ;;  %7209 = vmatmul.bf16.vlgmr.msra.gmra.mxu0 %v16774_v58 }
 0x3f8   :  { %v11410_v62 = vld [vmem:[#allocation5 + $0x9d0] sm:$0xf]  ;;  %v10931_v14 = vor.u32 %v15462_v8, %v10930_v12  ;;  %7236 = vmatpush.bf16.msra.mxu2 %v10675_v33 }
 0x3f9   :  { %v15582_v9 = vld [vmem:[#allocation5 + $0x9ec] sm:$0xf0]  ;;  %7223 = vmatmul.bf16.vlgmr.msra.gmra.mxu1 %v16780_v10 }
 0x3fa   :  { %v11666_v29 = vld [vmem:[#allocation5 + $0xbd0] sm:$0xf]  ;;  %v11411_v16 = vor.u32 %v15582_v9, %v11410_v62  ;;  %7250 = vmatpush.bf16.msra.mxu3 %v10931_v14  ;;  %v17017_v14 = vpop.f32.mrf.mxu2 }
 0x3fb   :  { %v15646_v45 = vld [vmem:[#allocation5 + $0xbec] sm:$0xf0]  ;;  %7237 = vmatmul.bf16.vlgmr.msra.gmra.mxu2 %v16776_v1  ;;  %17604 = vst [vmem:[#allocation55_spill] sm:$0xff] %v17017_v14 }
 0x3fc   :  { %v11922_v42 = vld [vmem:[#allocation5 + $0xdd0] sm:$0xf]  ;;  %v11667_v50 = vor.u32 %v15646_v45, %v11666_v29  ;;  %7257 = vmatpush.bf16.msrb.mxu0 %v11411_v16 }
 0x3fd   :  { %v15710_v2 = vld [vmem:[#allocation5 + $0xdec] sm:$0xf0]  ;;  %7251 = vmatmul.bf16.vlgmr.msra.gmra.mxu3 %v16782_v17 }
 0x3fe   :  { %v12178_v5 = vld [vmem:[#allocation5 + $0xfd0] sm:$0xf]  ;;  %v11923_v49 = vor.u32 %v15710_v2, %v11922_v42  ;;  %7271 = vmatpush.bf16.msrb.mxu1 %v11667_v50 }
 0x3ff   :  { %v15774_v15 = vld [vmem:[#allocation5 + $0xfec] sm:$0xf0] }
 0x400   :  { %v11378_v55 = vld [vmem:[#allocation5 + $0x990] sm:$0xf]  ;;  %v12179_v48 = vor.u32 %v15774_v15, %v12178_v5  ;;  %7285 = vmatpush.bf16.msrb.mxu2 %v11923_v49 }
 0x401   :  { %v15574_v24 = vld [vmem:[#allocation5 + $0x9ac] sm:$0xf0] }
 0x402   :  { %v11634_v30 = vld [vmem:[#allocation5 + $0xb90] sm:$0xf]  ;;  %v11379_v23 = vor.u32 %v15574_v24, %v11378_v55  ;;  %7299 = vmatpush.bf16.msrb.mxu3 %v12179_v48 }
 0x403   :  { %v15638_v4 = vld [vmem:[#allocation5 + $0xbac] sm:$0xf0] }
 0x404   :  { %v11890_v34 = vld [vmem:[#allocation5 + $0xd90] sm:$0xf]  ;;  %v11635_v21 = vor.u32 %v15638_v4, %v11634_v30  ;;  %7258 = vmatpush.bf16.msrb.mxu0 %v11379_v23 }
 0x405   :  { %v15702_v13 = vld [vmem:[#allocation5 + $0xdac] sm:$0xf0] }
 0x406   :  { %v12146_v59 = vld [vmem:[#allocation5 + $0xf90] sm:$0xf]  ;;  %v11891_v20 = vor.u32 %v15702_v13, %v11890_v34  ;;  %v17014_v13 = vld [vmem:[#allocation7] sm:$0xff]  ;;  %7272 = vmatpush.bf16.msrb.mxu1 %v11635_v21  ;;  %v6986_v34 = vpop.f32.mrf.mxu0 }
 0x407   :  { %v15766_v6 = vld [vmem:[#allocation5 + $0xfac] sm:$0xf0]  ;;  %v17560_v30 = vperm.slane %v17014_v13, 3 }
 0x408   :  { %v11346_v57 = vld [vmem:[#allocation5 + $0x950] sm:$0xf]  ;;  %v12147_v62 = vor.u32 %v15766_v6, %v12146_v59  ;;  %7286 = vmatpush.bf16.msrb.mxu2 %v11891_v20  ;;  %v17019_v59 = vpop.f32.mrf.mxu3 }
 0x409   :  { %v15566_v12 = vld [vmem:[#allocation5 + $0x96c] sm:$0xf0]  ;;  %17605 = vst [vmem:[#allocation56_spill] sm:$0xff] %v17019_v59  ;;  %v6987_v23 = vadd.f32 %v6986_v34, %v17560_v30 }
 0x40a   :  { %v11602_v8 = vld [vmem:[#allocation5 + $0xb50] sm:$0xf]  ;;  %v11347_v24 = vor.u32 %v15566_v12, %v11346_v57  ;;  %7300 = vmatpush.bf16.msrb.mxu3 %v12147_v62  ;;  %v7000_v62 = vpop.f32.mrf.mxu1 }
 0x40b   :  { %v15630_v9 = vld [vmem:[#allocation5 + $0xb6c] sm:$0xf0] }
 0x40c   :  { %v11858_v29 = vld [vmem:[#allocation5 + $0xd50] sm:$0xf]  ;;  %v11603_v2 = vor.u32 %v15630_v9, %v11602_v8  ;;  %7259 = vmatpush.bf16.msrb.mxu0 %v11347_v24 }
 0x40d   :  { %v15694_v3 = vld [vmem:[#allocation5 + $0xd6c] sm:$0xf0] }
 0x40e   :  { %v12114_v45 = vld [vmem:[#allocation5 + $0xf50] sm:$0xf]  ;;  %v11859_v7 = vor.u32 %v15694_v3, %v11858_v29  ;;  %7273 = vmatpush.bf16.msrb.mxu1 %v11603_v2 }
 0x40f   :  { %v15758_v42 = vld [vmem:[#allocation5 + $0xf6c] sm:$0xf0] }
 0x410   :  { %v11314_v33 = vld [vmem:[#allocation5 + $0x910] sm:$0xf]  ;;  %v12115_v16 = vor.u32 %v15758_v42, %v12114_v45  ;;  %7287 = vmatpush.bf16.msrb.mxu2 %v11859_v7  ;;  %v7001_v42 = vadd.f32 %v7000_v62, %v6987_v23 }
 0x411   :  { %v15558_v5 = vld [vmem:[#allocation5 + $0x92c] sm:$0xf0] }
 0x412   :  { %v11570_v15 = vld [vmem:[#allocation5 + $0xb10] sm:$0xf]  ;;  %v11315_v6 = vor.u32 %v15558_v5, %v11314_v33  ;;  %7301 = vmatpush.bf16.msrb.mxu3 %v12115_v16 }
 0x413   :  { %v15622_v50 = vld [vmem:[#allocation5 + $0xb2c] sm:$0xf0] }
 0x414   :  { %v11826_v49 = vld [vmem:[#allocation5 + $0xd10] sm:$0xf]  ;;  %v11571_v21 = vor.u32 %v15622_v50, %v11570_v15  ;;  %7260 = vmatpush.bf16.msrb.mxu0 %v11315_v6  ;;  %v7028_v6 = vpop.f32.mrf.mxu3 }
 0x415   :  { %v15686_v55 = vld [vmem:[#allocation5 + $0xd2c] sm:$0xf0] }
 0x416   :  { %v12082_v48 = vld [vmem:[#allocation5 + $0xf10] sm:$0xf]  ;;  %v11827_v20 = vor.u32 %v15686_v55, %v11826_v49  ;;  %7274 = vmatpush.bf16.msrb.mxu1 %v11571_v21 }
 0x417   :  { %v15750_v4 = vld [vmem:[#allocation5 + $0xf2c] sm:$0xf0] }
 0x418   :  { %v11282_v57 = vld [vmem:[#allocation5 + $0x8d0] sm:$0xf]  ;;  %v12083_v9 = vor.u32 %v15750_v4, %v12082_v48  ;;  %7288 = vmatpush.bf16.msrb.mxu2 %v11827_v20  ;;  %v7014_v4 = vpop.f32.mrf.mxu2 }
 0x419   :  { %v15550_v12 = vld [vmem:[#allocation5 + $0x8ec] sm:$0xf0]  ;;  %v7015_v23 = vadd.f32 %v7014_v4, %v7001_v42 }
 0x41a   :  { %v11538_v8 = vld [vmem:[#allocation5 + $0xad0] sm:$0xf]  ;;  %v11283_v33 = vor.u32 %v15550_v12, %v11282_v57  ;;  %7302 = vmatpush.bf16.msrb.mxu3 %v12083_v9 }
 0x41b   :  { %v15614_v29 = vld [vmem:[#allocation5 + $0xaec] sm:$0xf0] }
 0x41c   :  { %v11794_v3 = vld [vmem:[#allocation5 + $0xcd0] sm:$0xf]  ;;  %v11539_v2 = vor.u32 %v15614_v29, %v11538_v8  ;;  %7261 = vmatpush.bf16.msrb.mxu0 %v11283_v33  ;;  %v17023_v29 = vadd.f32 %v7028_v6, %v7015_v23 }
 0x41d   :  { %v15678_v45 = vld [vmem:[#allocation5 + $0xcec] sm:$0xf0] }
 0x41e   :  { %v12050_v59 = vld [vmem:[#allocation5 + $0xed0] sm:$0xf]  ;;  %v11795_v7 = vor.u32 %v15678_v45, %v11794_v3  ;;  %7275 = vmatpush.bf16.msrb.mxu1 %v11539_v2 }
 0x41f   :  { %v15742_v24 = vld [vmem:[#allocation5 + $0xeec] sm:$0xf0] }
 0x420   :  { %v11250_v5 = vld [vmem:[#allocation5 + $0x890] sm:$0xf]  ;;  %v12051_v49 = vor.u32 %v15742_v24, %v12050_v59  ;;  %7289 = vmatpush.bf16.msrb.mxu2 %v11795_v7 }
 0x421   :  { %v15542_v15 = vld [vmem:[#allocation5 + $0x8ac] sm:$0xf0] }
 0x422   :  { %v11506_v50 = vld [vmem:[#allocation5 + $0xa90] sm:$0xf]  ;;  %v11251_v62 = vor.u32 %v15542_v15, %v11250_v5  ;;  %7303 = vmatpush.bf16.msrb.mxu3 %v12051_v49 }
 0x423   :  { %v15606_v55 = vld [vmem:[#allocation5 + $0xaac] sm:$0xf0] }
 0x424   :  { %v11762_v16 = vld [vmem:[#allocation5 + $0xc90] sm:$0xf]  ;;  %v11507_v21 = vor.u32 %v15606_v55, %v11506_v50  ;;  %7262 = vmatpush.bf16.msrb.mxu0 %v11251_v62 }
 0x425   :  { %v15670_v48 = vld [vmem:[#allocation5 + $0xcac] sm:$0xf0] }
 0x426   :  { %v12018_v34 = vld [vmem:[#allocation5 + $0xe90] sm:$0xf]  ;;  %v11763_v20 = vor.u32 %v15670_v48, %v11762_v16  ;;  %7276 = vmatpush.bf16.msrb.mxu1 %v11507_v21 }
 0x427   :  { %v15734_v30 = vld [vmem:[#allocation5 + $0xeac] sm:$0xf0] }
 0x428   :  { %v11218_v57 = vld [vmem:[#allocation5 + $0x850] sm:$0xf]  ;;  %v12019_v59 = vor.u32 %v15734_v30, %v12018_v34  ;;  %7290 = vmatpush.bf16.msrb.mxu2 %v11763_v20 }
 0x429   :  { %v15534_v12 = vld [vmem:[#allocation5 + $0x86c] sm:$0xf0] }
 0x42a   :  { %v11474_v8 = vld [vmem:[#allocation5 + $0xa50] sm:$0xf]  ;;  %v11219_v42 = vor.u32 %v15534_v12, %v11218_v57  ;;  %7304 = vmatpush.bf16.msrb.mxu3 %v12019_v59 }
 0x42b   :  { %v15598_v9 = vld [vmem:[#allocation5 + $0xa6c] sm:$0xf0] }
 0x42c   :  { %v11730_v3 = vld [vmem:[#allocation5 + $0xc50] sm:$0xf]  ;;  %v11475_v2 = vor.u32 %v15598_v9, %v11474_v8  ;;  %7263 = vmatpush.bf16.msrb.mxu0 %v11219_v42 }
 0x42d   :  { %v15662_v45 = vld [vmem:[#allocation5 + $0xc6c] sm:$0xf0] }
 0x42e   :  { %v11986_v24 = vld [vmem:[#allocation5 + $0xe50] sm:$0xf]  ;;  %v11731_v7 = vor.u32 %v15662_v45, %v11730_v3  ;;  %7277 = vmatpush.bf16.msrb.mxu1 %v11475_v2 }
 0x42f   :  { %v15726_v14 = vld [vmem:[#allocation5 + $0xe6c] sm:$0xf0] }
 0x430   :  { %v11186_v33 = vld [vmem:[#allocation5 + $0x810] sm:$0xf]  ;;  %v11987_v16 = vor.u32 %v15726_v14, %v11986_v24  ;;  %7291 = vmatpush.bf16.msrb.mxu2 %v11731_v7  ;;  %v17025_v24 = vpop.f32.mrf.mxu0 }
 0x431   :  { %v15526_v5 = vld [vmem:[#allocation5 + $0x82c] sm:$0xf0] }
 0x432   :  { %v11442_v15 = vld [vmem:[#allocation5 + $0xa10] sm:$0xf]  ;;  %v11187_v62 = vor.u32 %v15526_v5, %v11186_v33  ;;  %7305 = vmatpush.bf16.msrb.mxu3 %v11987_v16 }
 0x433   :  { %v15590_v50 = vld [vmem:[#allocation5 + $0xa2c] sm:$0xf0] }
 0x434   :  { %v11698_v55 = vld [vmem:[#allocation5 + $0xc10] sm:$0xf]  ;;  %v11443_v21 = vor.u32 %v15590_v50, %v11442_v15  ;;  %7264 = vmatpush.bf16.msrb.mxu0 %v11187_v62  ;;  %v17027_v50 = vpop.f32.mrf.mxu1 }
 0x435   :  { %v15654_v49 = vld [vmem:[#allocation5 + $0xc2c] sm:$0xf0]  ;;  %17606 = vst [vmem:[#allocation57_spill] sm:$0xff] %v17027_v50 }
 0x436   :  { %v11954_v30 = vld [vmem:[#allocation5 + $0xe10] sm:$0xf]  ;;  %v11699_v20 = vor.u32 %v15654_v49, %v11698_v55  ;;  %7278 = vmatpush.bf16.msrb.mxu1 %v11443_v21 }
 0x437   :  { %v15718_v48 = vld [vmem:[#allocation5 + $0xe2c] sm:$0xf0]  ;;  %7265 = vmatmul.bf16.vlgmr.msrb.gmra.mxu0 %v16786_v39 }
 0x438   :  { %v12434_v4 = vld [vmem:[#allocation5 + $0x11d0] sm:$0xf]  ;;  %v11955_v59 = vor.u32 %v15718_v48, %v11954_v30  ;;  %7292 = vmatpush.bf16.msrb.mxu2 %v11699_v20 }
 0x439   :  { %v15838_v34 = vld [vmem:[#allocation5 + $0x11ec] sm:$0xf0]  ;;  %7279 = vmatmul.bf16.vlgmr.msrb.gmra.mxu1 %v16790_v44 }
 0x43a   :  { %v12690_v23 = vld [vmem:[#allocation5 + $0x13d0] sm:$0xf]  ;;  %v12435_v14 = vor.u32 %v15838_v34, %v12434_v4  ;;  %7306 = vmatpush.bf16.msrb.mxu3 %v11955_v59 }
 0x43b   :  { %v15902_v6 = vld [vmem:[#allocation5 + $0x13ec] sm:$0xf0]  ;;  %7293 = vmatmul.bf16.vlgmr.msrb.gmra.mxu2 %v16788_v43 }
 0x43c   :  { %v12946_v57 = vld [vmem:[#allocation5 + $0x15d0] sm:$0xf]  ;;  %v12691_v3 = vor.u32 %v15902_v6, %v12690_v23  ;;  %7313 = vmatpush.bf16.msra.mxu0 %v12435_v14  ;;  %v17035_v14 = vpop.f32.mrf.mxu3 }
 0x43d   :  { %v15966_v12 = vld [vmem:[#allocation5 + $0x15ec] sm:$0xf0]  ;;  %7307 = vmatmul.bf16.vlgmr.msrb.gmra.mxu3 %v16792_v47  ;;  %17608 = vst [vmem:[#allocation59_spill] sm:$0xff] %v17035_v14 }
 0x43e   :  { %v13202_v8 = vld [vmem:[#allocation5 + $0x17d0] sm:$0xf]  ;;  %v12947_v45 = vor.u32 %v15966_v12, %v12946_v57  ;;  %7327 = vmatpush.bf16.msra.mxu1 %v12691_v3 }
 0x43f   :  { %v16030_v9 = vld [vmem:[#allocation5 + $0x17ec] sm:$0xf0] }
 0x440   :  { %v12402_v60 = vld [vmem:[#allocation5 + $0x1190] sm:$0xf]  ;;  %v13203_v33 = vor.u32 %v16030_v9, %v13202_v8  ;;  %7341 = vmatpush.bf16.msra.mxu2 %v12947_v45 }
 0x441   :  { %v15830_v27 = vld [vmem:[#allocation5 + $0x11ac] sm:$0xf0] }
 0x442   :  { %v12658_v42 = vld [vmem:[#allocation5 + $0x1390] sm:$0xf]  ;;  %v12403_v55 = vor.u32 %v15830_v27, %v12402_v60  ;;  %7355 = vmatpush.bf16.msra.mxu3 %v13203_v33  ;;  %v17033_v60 = vpop.f32.mrf.mxu2  ;;  %v7042_v33 = vpop.f32.mrf.mxu0 }
 0x443   :  { %v15894_v5 = vld [vmem:[#allocation5 + $0x13ac] sm:$0xf0]  ;;  %17607 = vst [vmem:[#allocation58_spill] sm:$0xff] %v17033_v60 }
 0x444   :  { %v15958_v2 = vld [vmem:[#allocation5 + $0x15ac] sm:$0xf0]  ;;  %v12659_v16 = vor.u32 %v15894_v5, %v12658_v42  ;;  %7314 = vmatpush.bf16.msra.mxu0 %v12403_v55 }
 0x445   :  { %v13170_v7 = vld [vmem:[#allocation5 + $0x1790] sm:$0xf]  ;;  %v12915_v49 = vor.u32 %v15958_v2, %v12914_v19 }
 0x446   :  { %v16022_v15 = vld [vmem:[#allocation5 + $0x17ac] sm:$0xf0]  ;;  %7328 = vmatpush.bf16.msra.mxu1 %v12659_v16 }
 0x447   :  { %v12370_v30 = vld [vmem:[#allocation5 + $0x1150] sm:$0xf]  ;;  %v13171_v34 = vor.u32 %v16022_v15, %v13170_v7  ;;  %7342 = vmatpush.bf16.msra.mxu2 %v12915_v49  ;;  %v7043_v7 = vadd.f32 %v7042_v33, %v17023_v29  ;;  %v7056_v49 = vpop.f32.mrf.mxu1 }
 0x448   :  { %v15822_v48 = vld [vmem:[#allocation5 + $0x116c] sm:$0xf0] }
 0x449   :  { %v12626_v4 = vld [vmem:[#allocation5 + $0x1350] sm:$0xf]  ;;  %v12371_v19 = vor.u32 %v15822_v48, %v12370_v30  ;;  %7356 = vmatpush.bf16.msra.mxu3 %v13171_v34 }
 0x44a   :  { %v15886_v23 = vld [vmem:[#allocation5 + $0x136c] sm:$0xf0]  ;;  %v17040_v50 = vpop.f32.mrf.mxu0 }
 0x44b   :  { %v12882_v62 = vld [vmem:[#allocation5 + $0x1550] sm:$0xf]  ;;  %v12627_v12 = vor.u32 %v15886_v23, %v12626_v4  ;;  %7315 = vmatpush.bf16.msra.mxu0 %v12371_v19  ;;  %v7057_v23 = vadd.f32 %v7056_v49, %v7043_v7  ;;  %v7084_v7 = vpop.f32.mrf.mxu3  ;;  %17609 = vst [vmem:[#allocation60_spill] sm:$0xff] %v17040_v50 }
 0x44c   :  { %v15950_v6 = vld [vmem:[#allocation5 + $0x156c] sm:$0xf0] }
 0x44d   :  { %v13138_v57 = vld [vmem:[#allocation5 + $0x1750] sm:$0xf]  ;;  %v12883_v21 = vor.u32 %v15950_v6, %v12882_v62  ;;  %7329 = vmatpush.bf16.msra.mxu1 %v12627_v12 }
 0x44e   :  { %v16014_v27 = vld [vmem:[#allocation5 + $0x176c] sm:$0xf0] }
 0x44f   :  { %v12338_v20 = vld [vmem:[#allocation5 + $0x1110] sm:$0xf]  ;;  %v13139_v59 = vor.u32 %v16014_v27, %v13138_v57  ;;  %7343 = vmatpush.bf16.msra.mxu2 %v12883_v21 }
 0x450   :  { %v15814_v8 = vld [vmem:[#allocation5 + $0x112c] sm:$0xf0] }
 0x451   :  { %v12594_v9 = vld [vmem:[#allocation5 + $0x1310] sm:$0xf]  ;;  %v12339_v15 = vor.u32 %v15814_v8, %v12338_v20  ;;  %7357 = vmatpush.bf16.msra.mxu3 %v13139_v59 }
 0x452   :  { %v15878_v3 = vld [vmem:[#allocation5 + $0x132c] sm:$0xf0] }
 0x453   :  { %v12850_v45 = vld [vmem:[#allocation5 + $0x1510] sm:$0xf]  ;;  %v12595_v55 = vor.u32 %v15878_v3, %v12594_v9  ;;  %7316 = vmatpush.bf16.msra.mxu0 %v12339_v15  ;;  %v7070_v3 = vpop.f32.mrf.mxu2 }
 0x454   :  { %v15942_v42 = vld [vmem:[#allocation5 + $0x152c] sm:$0xf0]  ;;  %v7071_v33 = vadd.f32 %v7070_v3, %v7057_v23 }
 0x455   :  { %v13106_v5 = vld [vmem:[#allocation5 + $0x1710] sm:$0xf]  ;;  %v12851_v16 = vor.u32 %v15942_v42, %v12850_v45  ;;  %7330 = vmatpush.bf16.msra.mxu1 %v12595_v55 }
 0x456   :  { %v16006_v2 = vld [vmem:[#allocation5 + $0x172c] sm:$0xf0]  ;;  %v17038_v55 = vadd.f32 %v7084_v7, %v7071_v33 }
 0x457   :  { %v12306_v30 = vld [vmem:[#allocation5 + $0x10d0] sm:$0xf]  ;;  %v13107_v34 = vor.u32 %v16006_v2, %v13106_v5  ;;  %7344 = vmatpush.bf16.msra.mxu2 %v12851_v16 }
 0x458   :  { %v15806_v48 = vld [vmem:[#allocation5 + $0x10ec] sm:$0xf0] }
 0x459   :  { %v12562_v4 = vld [vmem:[#allocation5 + $0x12d0] sm:$0xf]  ;;  %v12307_v19 = vor.u32 %v15806_v48, %v12306_v30  ;;  %7358 = vmatpush.bf16.msra.mxu3 %v13107_v34 }
 0x45a   :  { %v15870_v62 = vld [vmem:[#allocation5 + $0x12ec] sm:$0xf0] }
 0x45b   :  { %v12818_v6 = vld [vmem:[#allocation5 + $0x14d0] sm:$0xf]  ;;  %v12563_v29 = vor.u32 %v15870_v62, %v12562_v4  ;;  %7317 = vmatpush.bf16.msra.mxu0 %v12307_v19 }
 0x45c   :  { %v15934_v57 = vld [vmem:[#allocation5 + $0x14ec] sm:$0xf0] }
 0x45d   :  { %v13074_v27 = vld [vmem:[#allocation5 + $0x16d0] sm:$0xf]  ;;  %v12819_v12 = vor.u32 %v15934_v57, %v12818_v6  ;;  %7331 = vmatpush.bf16.msra.mxu1 %v12563_v29 }
 0x45e   :  { %v15998_v14 = vld [vmem:[#allocation5 + $0x16ec] sm:$0xf0] }
 0x45f   :  { %v12274_v21 = vld [vmem:[#allocation5 + $0x1090] sm:$0xf]  ;;  %v13075_v9 = vor.u32 %v15998_v14, %v13074_v27  ;;  %7345 = vmatpush.bf16.msra.mxu2 %v12819_v12 }
 0x460   :  { %v15798_v20 = vld [vmem:[#allocation5 + $0x10ac] sm:$0xf0] }
 0x461   :  { %v12530_v8 = vld [vmem:[#allocation5 + $0x1290] sm:$0xf]  ;;  %v12275_v15 = vor.u32 %v15798_v20, %v12274_v21  ;;  %7359 = vmatpush.bf16.msra.mxu3 %v13075_v9 }
 0x462   :  { %v15862_v59 = vld [vmem:[#allocation5 + $0x12ac] sm:$0xf0] }
 0x463   :  { %v12786_v45 = vld [vmem:[#allocation5 + $0x1490] sm:$0xf]  ;;  %v12531_v16 = vor.u32 %v15862_v59, %v12530_v8  ;;  %7318 = vmatpush.bf16.msra.mxu0 %v12275_v15 }
 0x464   :  { %v15926_v42 = vld [vmem:[#allocation5 + $0x14ac] sm:$0xf0] }
 0x465   :  { %v13042_v5 = vld [vmem:[#allocation5 + $0x1690] sm:$0xf]  ;;  %v12787_v49 = vor.u32 %v15926_v42, %v12786_v45  ;;  %7332 = vmatpush.bf16.msra.mxu1 %v12531_v16 }
 0x466   :  { %v15990_v2 = vld [vmem:[#allocation5 + $0x16ac] sm:$0xf0] }
 0x467   :  { %v12242_v30 = vld [vmem:[#allocation5 + $0x1050] sm:$0xf]  ;;  %v13043_v14 = vor.u32 %v15990_v2, %v13042_v5  ;;  %7346 = vmatpush.bf16.msra.mxu2 %v12787_v49 }
 0x468   :  { %v15790_v48 = vld [vmem:[#allocation5 + $0x106c] sm:$0xf0] }
 0x469   :  { %v12498_v4 = vld [vmem:[#allocation5 + $0x1250] sm:$0xf]  ;;  %v12243_v27 = vor.u32 %v15790_v48, %v12242_v30  ;;  %7360 = vmatpush.bf16.msra.mxu3 %v13043_v14 }
 0x46a   :  { %v15854_v34 = vld [vmem:[#allocation5 + $0x126c] sm:$0xf0] }
 0x46b   :  { %v12754_v62 = vld [vmem:[#allocation5 + $0x1450] sm:$0xf]  ;;  %v12499_v29 = vor.u32 %v15854_v34, %v12498_v4  ;;  %7319 = vmatpush.bf16.msra.mxu0 %v12243_v27 }
 0x46c   :  { %v15918_v6 = vld [vmem:[#allocation5 + $0x146c] sm:$0xf0] }
 0x46d   :  { %v13010_v23 = vld [vmem:[#allocation5 + $0x1650] sm:$0xf]  ;;  %v12755_v12 = vor.u32 %v15918_v6, %v12754_v62  ;;  %7333 = vmatpush.bf16.msra.mxu1 %v12499_v29 }
 0x46e   :  { %v15982_v57 = vld [vmem:[#allocation5 + $0x166c] sm:$0xf0] }
 0x46f   :  { %v12210_v19 = vld [vmem:[#allocation5 + $0x1010] sm:$0xf]  ;;  %v13011_v59 = vor.u32 %v15982_v57, %v13010_v23  ;;  %7347 = vmatpush.bf16.msra.mxu2 %v12755_v12 }
 0x470   :  { %v15782_v21 = vld [vmem:[#allocation5 + $0x102c] sm:$0xf0] }
 0x471   :  { %v12466_v20 = vld [vmem:[#allocation5 + $0x1210] sm:$0xf]  ;;  %v12211_v7 = vor.u32 %v15782_v21, %v12210_v19  ;;  %7361 = vmatpush.bf16.msra.mxu3 %v13011_v59 }
 0x472   :  { %v15846_v8 = vld [vmem:[#allocation5 + $0x122c] sm:$0xf0] }
 0x473   :  { %v12722_v3 = vld [vmem:[#allocation5 + $0x1410] sm:$0xf]  ;;  %v12467_v16 = vor.u32 %v15846_v8, %v12466_v20  ;;  %7320 = vmatpush.bf16.msra.mxu0 %v12211_v7  ;;  %v17042_v20 = vpop.f32.mrf.mxu1 }
 0x474   :  { %v15910_v9 = vld [vmem:[#allocation5 + $0x142c] sm:$0xf0]  ;;  %17610 = vst [vmem:[#allocation61_spill] sm:$0xff] %v17042_v20  ;;  %v10868_v20 = vld [vmem:[#allocation5 + $0x5b0] sm:$0xf0] }
 0x475   :  { %v12978_v45 = vld [vmem:[#allocation5 + $0x1610] sm:$0xf]  ;;  %v12723_v49 = vor.u32 %v15910_v9, %v12722_v3  ;;  %7334 = vmatpush.bf16.msra.mxu1 %v12467_v16 }
 0x476   :  { %v15974_v42 = vld [vmem:[#allocation5 + $0x162c] sm:$0xf0]  ;;  %7321 = vmatmul.bf16.vlgmr.msra.gmra.mxu0 %v16798_v31 }
 0x477   :  { %v13458_v33 = vld [vmem:[#allocation5 + $0x19d0] sm:$0xf]  ;;  %v12979_v14 = vor.u32 %v15974_v42, %v12978_v45  ;;  %7348 = vmatpush.bf16.msra.mxu2 %v12723_v49 }
 0x478   :  { %v16094_v5 = vld [vmem:[#allocation5 + $0x19ec] sm:$0xf0]  ;;  %7335 = vmatmul.bf16.vlgmr.msra.gmra.mxu1 %v16802_v36 }
 0x479   :  { %v13714_v2 = vld [vmem:[#allocation5 + $0x1bd0] sm:$0xf]  ;;  %v13459_v62 = vor.u32 %v16094_v5, %v13458_v33  ;;  %7362 = vmatpush.bf16.msra.mxu3 %v12979_v14 }
 0x47a   :  { %v16158_v15 = vld [vmem:[#allocation5 + $0x1bec] sm:$0xf0]  ;;  %7349 = vmatmul.bf16.vlgmr.msra.gmra.mxu2 %v16800_v35 }
 0x47b   :  { %v13970_v30 = vld [vmem:[#allocation5 + $0x1dd0] sm:$0xf]  ;;  %v13715_v6 = vor.u32 %v16158_v15, %v13714_v2  ;;  %7369 = vmatpush.bf16.msrb.mxu0 %v13459_v62 }
 0x47c   :  { %v16222_v48 = vld [vmem:[#allocation5 + $0x1dec] sm:$0xf0]  ;;  %7363 = vmatmul.bf16.vlgmr.msra.gmra.mxu3 %v16804_v40 }
 0x47d   :  { %v14226_v4 = vld [vmem:[#allocation5 + $0x1fd0] sm:$0xf]  ;;  %v13971_v23 = vor.u32 %v16222_v48, %v13970_v30  ;;  %7383 = vmatpush.bf16.msrb.mxu1 %v13715_v6 }
 0x47e   :  { %v16286_v34 = vld [vmem:[#allocation5 + $0x1fec] sm:$0xf0] }
 0x47f   :  { %v13426_v57 = vld [vmem:[#allocation5 + $0x1990] sm:$0xf]  ;;  %v14227_v27 = vor.u32 %v16286_v34, %v14226_v4  ;;  %7397 = vmatpush.bf16.msrb.mxu2 %v13971_v23  ;;  %v17048_v4 = vpop.f32.mrf.mxu2  ;;  %v17050_v23 = vpop.f32.mrf.mxu3 }
 0x480   :  { %v16086_v60 = vld [vmem:[#allocation5 + $0x19ac] sm:$0xf0]  ;;  %17611 = vst [vmem:[#allocation62_spill] sm:$0xff] %v17048_v4  ;;  %v15378_v4 = vld [vmem:[#allocation5 + $0x394] sm:$0xf] }
 0x481   :  { %v16150_v19 = vld [vmem:[#allocation5 + $0x1bac] sm:$0xf0]  ;;  %v13427_v8 = vor.u32 %v16086_v60, %v13426_v57  ;;  %7411 = vmatpush.bf16.msrb.mxu3 %v14227_v27  ;;  %17612 = vst [vmem:[#allocation63_spill] sm:$0xff] %v17050_v23  ;;  %v7098_v57 = vpop.f32.mrf.mxu0  ;;  %v10356_v23 = vld [vmem:[#allocation5 + $0x1b0] sm:$0xf0] }
 0x482   :  { %v13938_v21 = vld [vmem:[#allocation5 + $0x1d90] sm:$0xf]  ;;  %v13683_v3 = vor.u32 %v16150_v19, %v13682_v26 }
 0x483   :  { %v14194_v29 = vld [vmem:[#allocation5 + $0x1f90] sm:$0xf]  ;;  %v13939_v59 = vor.u32 %v16214_v37, %v13938_v21  ;;  %7370 = vmatpush.bf16.msrb.mxu0 %v13427_v8  ;;  %v7099_v21 = vadd.f32 %v7098_v57, %v17038_v55 }
 0x484   :  { %v16278_v12 = vld [vmem:[#allocation5 + $0x1fac] sm:$0xf0]  ;;  %7384 = vmatpush.bf16.msrb.mxu1 %v13683_v3 }
 0x485   :  { %v13394_v9 = vld [vmem:[#allocation5 + $0x1950] sm:$0xf]  ;;  %v14195_v33 = vor.u32 %v16278_v12, %v14194_v29  ;;  %7398 = vmatpush.bf16.msrb.mxu2 %v13939_v59  ;;  %v7112_v12 = vpop.f32.mrf.mxu1 }
 0x486   :  { %v16078_v45 = vld [vmem:[#allocation5 + $0x196c] sm:$0xf0] }
 0x487   :  { %v13650_v42 = vld [vmem:[#allocation5 + $0x1b50] sm:$0xf]  ;;  %v13395_v26 = vor.u32 %v16078_v45, %v13394_v9  ;;  %7412 = vmatpush.bf16.msrb.mxu3 %v14195_v33  ;;  %v7113_v33 = vadd.f32 %v7112_v12, %v7099_v21 }
 0x488   :  { %v16142_v5 = vld [vmem:[#allocation5 + $0x1b6c] sm:$0xf0] }
 0x489   :  { %v13906_v2 = vld [vmem:[#allocation5 + $0x1d50] sm:$0xf]  ;;  %v13651_v37 = vor.u32 %v16142_v5, %v13650_v42  ;;  %7371 = vmatpush.bf16.msrb.mxu0 %v13395_v26  ;;  %v17055_v50 = vpop.f32.mrf.mxu0 }
 0x48a   :  { %v16206_v7 = vld [vmem:[#allocation5 + $0x1d6c] sm:$0xf0]  ;;  %17613 = vst [vmem:[#allocation64_spill] sm:$0xff] %v17055_v50 }
 0x48b   :  { %v14162_v15 = vld [vmem:[#allocation5 + $0x1f50] sm:$0xf]  ;;  %v13907_v30 = vor.u32 %v16206_v7, %v13906_v2  ;;  %7385 = vmatpush.bf16.msrb.mxu1 %v13651_v37 }
 0x48c   :  { %v16270_v60 = vld [vmem:[#allocation5 + $0x1f6c] sm:$0xf0] }
 0x48d   :  { %v13362_v48 = vld [vmem:[#allocation5 + $0x1910] sm:$0xf]  ;;  %v14163_v34 = vor.u32 %v16270_v60, %v14162_v15  ;;  %7399 = vmatpush.bf16.msrb.mxu2 %v13907_v30 }
 0x48e   :  { %v16070_v16 = vld [vmem:[#allocation5 + $0x192c] sm:$0xf0] }
 0x48f   :  { %v13618_v49 = vld [vmem:[#allocation5 + $0x1b10] sm:$0xf]  ;;  %v13363_v29 = vor.u32 %v16070_v16, %v13362_v48  ;;  %7413 = vmatpush.bf16.msrb.mxu3 %v14163_v34 }
 0x490   :  { %v16134_v14 = vld [vmem:[#allocation5 + $0x1b2c] sm:$0xf0] }
 0x491   :  { %v13874_v62 = vld [vmem:[#allocation5 + $0x1d10] sm:$0xf]  ;;  %v13619_v8 = vor.u32 %v16134_v14, %v13618_v49  ;;  %7372 = vmatpush.bf16.msrb.mxu0 %v13363_v29  ;;  %v7126_v14 = vpop.f32.mrf.mxu2 }
 0x492   :  { %v16198_v6 = vld [vmem:[#allocation5 + $0x1d2c] sm:$0xf0]  ;;  %v7127_v57 = vadd.f32 %v7126_v14, %v7113_v33 }
 0x493   :  { %v14130_v27 = vld [vmem:[#allocation5 + $0x1f10] sm:$0xf]  ;;  %v13875_v3 = vor.u32 %v16198_v6, %v13874_v62  ;;  %7386 = vmatpush.bf16.msrb.mxu1 %v13619_v8 }
 0x494   :  { %v16262_v19 = vld [vmem:[#allocation5 + $0x1f2c] sm:$0xf0] }
 0x495   :  { %v13330_v59 = vld [vmem:[#allocation5 + $0x18d0] sm:$0xf]  ;;  %v14131_v42 = vor.u32 %v16262_v19, %v14130_v27  ;;  %7400 = vmatpush.bf16.msrb.mxu2 %v13875_v3  ;;  %v7140_v27 = vpop.f32.mrf.mxu3 }
 0x496   :  { %v16062_v9 = vld [vmem:[#allocation5 + $0x18ec] sm:$0xf0]  ;;  %v17053_v12 = vadd.f32 %v7140_v27, %v7127_v57  ;;  %v15322_v57 = vld [vmem:[#allocation5 + $0x1d4] sm:$0xf] }
 0x497   :  { %v13586_v45 = vld [vmem:[#allocation5 + $0x1ad0] sm:$0xf]  ;;  %v13331_v26 = vor.u32 %v16062_v9, %v13330_v59  ;;  %7414 = vmatpush.bf16.msrb.mxu3 %v14131_v42  ;;  %v10388_v27 = vld [vmem:[#allocation5 + $0x1f0] sm:$0xf0] }
 0x498   :  { %v16126_v5 = vld [vmem:[#allocation5 + $0x1aec] sm:$0xf0] }
 0x499   :  { %v13842_v2 = vld [vmem:[#allocation5 + $0x1cd0] sm:$0xf]  ;;  %v13587_v55 = vor.u32 %v16126_v5, %v13586_v45  ;;  %7373 = vmatpush.bf16.msrb.mxu0 %v13331_v26 }
 0x49a   :  { %v16190_v7 = vld [vmem:[#allocation5 + $0x1cec] sm:$0xf0] }
 0x49b   :  { %v14098_v15 = vld [vmem:[#allocation5 + $0x1ed0] sm:$0xf]  ;;  %v13843_v37 = vor.u32 %v16190_v7, %v13842_v2  ;;  %7387 = vmatpush.bf16.msrb.mxu1 %v13587_v55 }
 0x49c   :  { %v16254_v60 = vld [vmem:[#allocation5 + $0x1eec] sm:$0xf0] }
 0x49d   :  { %v13298_v30 = vld [vmem:[#allocation5 + $0x1890] sm:$0xf]  ;;  %v14099_v49 = vor.u32 %v16254_v60, %v14098_v15  ;;  %7401 = vmatpush.bf16.msrb.mxu2 %v13843_v37 }
 0x49e   :  { %v16054_v48 = vld [vmem:[#allocation5 + $0x18ac] sm:$0xf0] }
 0x49f   :  { %v13554_v16 = vld [vmem:[#allocation5 + $0x1a90] sm:$0xf]  ;;  %v13299_v29 = vor.u32 %v16054_v48, %v13298_v30  ;;  %7415 = vmatpush.bf16.msrb.mxu3 %v14099_v49 }
 0x4a0   :  { %v16118_v34 = vld [vmem:[#allocation5 + $0x1aac] sm:$0xf0] }
 0x4a1   :  { %v13810_v62 = vld [vmem:[#allocation5 + $0x1c90] sm:$0xf]  ;;  %v13555_v8 = vor.u32 %v16118_v34, %v13554_v16  ;;  %7374 = vmatpush.bf16.msrb.mxu0 %v13299_v29  ;;  %v10644_v29 = vld [vmem:[#allocation5 + $0x3f0] sm:$0xf0] }
 0x4a2   :  { %v16182_v6 = vld [vmem:[#allocation5 + $0x1cac] sm:$0xf0] }
 0x4a3   :  { %v14066_v19 = vld [vmem:[#allocation5 + $0x1e90] sm:$0xf]  ;;  %v13811_v3 = vor.u32 %v16182_v6, %v13810_v62  ;;  %7388 = vmatpush.bf16.msrb.mxu1 %v13555_v8 }
 0x4a4   :  { %v16246_v21 = vld [vmem:[#allocation5 + $0x1eac] sm:$0xf0] }
 0x4a5   :  { %v13266_v59 = vld [vmem:[#allocation5 + $0x1850] sm:$0xf]  ;;  %v14067_v42 = vor.u32 %v16246_v21, %v14066_v19  ;;  %7402 = vmatpush.bf16.msrb.mxu2 %v13811_v3  ;;  %v15386_v19 = vld [vmem:[#allocation5 + $0x3d4] sm:$0xf] }
 0x4a6   :  { %v16046_v9 = vld [vmem:[#allocation5 + $0x186c] sm:$0xf0] }
 0x4a7   :  { %v13522_v45 = vld [vmem:[#allocation5 + $0x1a50] sm:$0xf]  ;;  %v13267_v60 = vor.u32 %v16046_v9, %v13266_v59  ;;  %7416 = vmatpush.bf16.msrb.mxu3 %v14067_v42  ;;  %v15450_v59 = vld [vmem:[#allocation5 + $0x5d4] sm:$0xf] }
 0x4a8   :  { %v16110_v5 = vld [vmem:[#allocation5 + $0x1a6c] sm:$0xf0]  ;;  %v10900_v9 = vld [vmem:[#allocation5 + $0x5f0] sm:$0xf0] }
 0x4a9   :  { %v13778_v2 = vld [vmem:[#allocation5 + $0x1c50] sm:$0xf]  ;;  %v13523_v55 = vor.u32 %v16110_v5, %v13522_v45  ;;  %7375 = vmatpush.bf16.msrb.mxu0 %v13267_v60  ;;  %v15514_v45 = vld [vmem:[#allocation5 + $0x7d4] sm:$0xf] }
 0x4aa   :  { %v16174_v7 = vld [vmem:[#allocation5 + $0x1c6c] sm:$0xf0]  ;;  %v11156_v5 = vld [vmem:[#allocation5 + $0x7f0] sm:$0xf0] }
 0x4ab   :  { %v14034_v33 = vld [vmem:[#allocation5 + $0x1e50] sm:$0xf]  ;;  %v13779_v37 = vor.u32 %v16174_v7, %v13778_v2  ;;  %7389 = vmatpush.bf16.msrb.mxu1 %v13523_v55  ;;  %v10391_v2 = vor.u32 %v15322_v57, %v10388_v27  ;;  %v10647_v7 = vor.u32 %v15386_v19, %v10644_v29  ;;  %v11159_v60 = vor.u32 %v15514_v45, %v11156_v5  ;;  %v15506_v55 = vld [vmem:[#allocation5 + $0x794] sm:$0xf]  ;;  %v17063_v45 = vpop.f32.mrf.mxu2 }
 0x4ac   :  { %v16238_v15 = vld [vmem:[#allocation5 + $0x1e6c] sm:$0xf0]  ;;  %v10580_v27 = vld [vmem:[#allocation5 + $0x370] sm:$0xf0]  ;;  %17615 = vst [vmem:[#allocation66_spill] sm:$0xff] %v17063_v45 }
 0x4ad   :  { %v13234_v26 = vld [vmem:[#allocation5 + $0x1810] sm:$0xf]  ;;  %v14035_v34 = vor.u32 %v16238_v15, %v14034_v33  ;;  %7403 = vmatpush.bf16.msrb.mxu2 %v13779_v37  ;;  %v10903_v33 = vor.u32 %v15450_v59, %v10900_v9  ;;  %v15314_v15 = vld [vmem:[#allocation5 + $0x194] sm:$0xf] }
 0x4ae   :  { %v16038_v30 = vld [vmem:[#allocation5 + $0x182c] sm:$0xf0]  ;;  %v11124_v37 = vld [vmem:[#allocation5 + $0x7b0] sm:$0xf0] }
 0x4af   :  { %v13490_v48 = vld [vmem:[#allocation5 + $0x1a10] sm:$0xf]  ;;  %v13235_v21 = vor.u32 %v16038_v30, %v13234_v26  ;;  %7417 = vmatpush.bf16.msrb.mxu3 %v14035_v34  ;;  %v10612_v26 = vld [vmem:[#allocation5 + $0x3b0] sm:$0xf0]  ;;  %v11127_v57 = vor.u32 %v15506_v55, %v11124_v37 }
 0x4b0   :  { %v16102_v16 = vld [vmem:[#allocation5 + $0x1a2c] sm:$0xf0]  ;;  %v15442_v30 = vld [vmem:[#allocation5 + $0x594] sm:$0xf] }
 0x4b1   :  { %v13746_v14 = vld [vmem:[#allocation5 + $0x1c10] sm:$0xf]  ;;  %v13491_v8 = vor.u32 %v16102_v16, %v13490_v48  ;;  %7376 = vmatpush.bf16.msrb.mxu0 %v13235_v21  ;;  %v17057_v48 = vpop.f32.mrf.mxu1  ;;  %v10359_v16 = vor.u32 %v15314_v15, %v10356_v23  ;;  %v10871_v34 = vor.u32 %v15442_v30, %v10868_v20  ;;  %v15434_v19 = vld [vmem:[#allocation5 + $0x554] sm:$0xf]  ;;  %v7154_v15 = vpop.f32.mrf.mxu0 }
 0x4b2   :  { %v16166_v49 = vld [vmem:[#allocation5 + $0x1c2c] sm:$0xf0]  ;;  %17614 = vst [vmem:[#allocation65_spill] sm:$0xff] %v17057_v48  ;;  %v10836_v21 = vld [vmem:[#allocation5 + $0x570] sm:$0xf0]  ;;  %v7155_v30 = vadd.f32 %v7154_v15, %v17053_v12 }
 0x4b3   :  { %v14002_v62 = vld [vmem:[#allocation5 + $0x1e10] sm:$0xf]  ;;  %v13747_v3 = vor.u32 %v16166_v49, %v13746_v14  ;;  %7390 = vmatpush.bf16.msrb.mxu1 %v13491_v8  ;;  %v10615_v14 = vor.u32 %v15378_v4, %v10612_v26  ;;  %v15306_v49 = vld [vmem:[#allocation5 + $0x154] sm:$0xf]  ;;  %v10839_v59 = vor.u32 %v15434_v19, %v10836_v21 }
 0x4b4   :  { %v16230_v6 = vld [vmem:[#allocation5 + $0x1e2c] sm:$0xf0]  ;;  %7377 = vmatmul.bf16.vlgmr.msrb.gmra.mxu0 %v16810_v32  ;;  %v15498_v29 = vld [vmem:[#allocation5 + $0x754] sm:$0xf] }
 0x4b5   :  { %v14003_v42 = vor.u32 %v16230_v6, %v14002_v62  ;;  %7404 = vmatpush.bf16.msrb.mxu2 %v13747_v3  ;;  %7425 = vmatpush.bf16.msra.mxu0 %v10391_v2  ;;  %v10324_v62 = vld [vmem:[#allocation5 + $0x170] sm:$0xf0] }
 0x4b6   :  { %v15370_v6 = vld [vmem:[#allocation5 + $0x354] sm:$0xf]  ;;  %7391 = vmatmul.bf16.vlgmr.msrb.gmra.mxu1 %v16814_v41  ;;  %v10327_v20 = vor.u32 %v15306_v49, %v10324_v62 }
 0x4b7   :  { %7418 = vmatpush.bf16.msrb.mxu3 %v14003_v42  ;;  %7439 = vmatpush.bf16.msra.mxu1 %v10647_v7  ;;  %v11092_v23 = vld [vmem:[#allocation5 + $0x770] sm:$0xf0]  ;;  %v10583_v4 = vor.u32 %v15370_v6, %v10580_v27 }
 0x4b8   :  { %7405 = vmatmul.bf16.vlgmr.msrb.gmra.mxu2 %v16812_v38  ;;  %v15298_v9 = vld [vmem:[#allocation5 + $0x114] sm:$0xf]  ;;  %v11095_v5 = vor.u32 %v15498_v29, %v11092_v23 }
 0x4b9   :  { %7453 = vmatpush.bf16.msra.mxu2 %v10903_v33  ;;  %7426 = vmatpush.bf16.msra.mxu0 %v10359_v16  ;;  %v10292_v8 = vld [vmem:[#allocation5 + $0x130] sm:$0xf0]  ;;  %v17065_v33 = vpop.f32.mrf.mxu3  ;;  %v7168_v37 = vpop.f32.mrf.mxu1 }
 0x4ba   :  { %7419 = vmatmul.bf16.vlgmr.msrb.gmra.mxu3 %v16816_v46  ;;  %v15362_v3 = vld [vmem:[#allocation5 + $0x314] sm:$0xf]  ;;  %17616 = vst [vmem:[#allocation67_spill] sm:$0xff] %v17065_v33  ;;  %v10295_v55 = vor.u32 %v15298_v9, %v10292_v8  ;;  %v17070_v48 = vpop.f32.mrf.mxu0 }
 0x4bb   :  { %7467 = vmatpush.bf16.msra.mxu3 %v11159_v60  ;;  %7440 = vmatpush.bf16.msra.mxu1 %v10615_v14  ;;  %v10548_v42 = vld [vmem:[#allocation5 + $0x330] sm:$0xf0]  ;;  %17618 = vst [vmem:[#allocation69_spill] sm:$0xff] %v17070_v48 }
 0x4bc   :  { %v15426_v2 = vld [vmem:[#allocation5 + $0x514] sm:$0xf]  ;;  %v10551_v16 = vor.u32 %v15362_v3, %v10548_v42  ;;  %v7182_v42 = vpop.f32.mrf.mxu2 }
 0x4bd   :  { %7454 = vmatpush.bf16.msra.mxu2 %v10871_v34  ;;  %v10804_v7 = vld [vmem:[#allocation5 + $0x530] sm:$0xf0]  ;;  %7427 = vmatpush.bf16.msra.mxu0 %v10327_v20 }
 0x4be   :  { %v15490_v60 = vld [vmem:[#allocation5 + $0x714] sm:$0xf]  ;;  %v10807_v14 = vor.u32 %v15426_v2, %v10804_v7 }
 0x4bf   :  { %7468 = vmatpush.bf16.msra.mxu3 %v11127_v57  ;;  %v11060_v26 = vld [vmem:[#allocation5 + $0x730] sm:$0xf0]  ;;  %7441 = vmatpush.bf16.msra.mxu1 %v10583_v4  ;;  %v7169_v57 = vadd.f32 %v7168_v37, %v7155_v30 }
 0x4c0   :  { %v15290_v34 = vld [vmem:[#allocation5 + $0xd4] sm:$0xf]  ;;  %v11063_v6 = vor.u32 %v15490_v60, %v11060_v26 }
 0x4c1   :  { %7455 = vmatpush.bf16.msra.mxu2 %v10839_v59  ;;  %v10260_v49 = vld [vmem:[#allocation5 + $0xf0] sm:$0xf0]  ;;  %7428 = vmatpush.bf16.msra.mxu0 %v10295_v55  ;;  %v7183_v15 = vadd.f32 %v7182_v42, %v7169_v57  ;;  %v7196_v60 = vpop.f32.mrf.mxu3 }
 0x4c2   :  { %v15354_v62 = vld [vmem:[#allocation5 + $0x2d4] sm:$0xf]  ;;  %v10263_v20 = vor.u32 %v15290_v34, %v10260_v49 }
 0x4c3   :  { %7469 = vmatpush.bf16.msra.mxu3 %v11095_v5  ;;  %v10516_v27 = vld [vmem:[#allocation5 + $0x2f0] sm:$0xf0]  ;;  %7442 = vmatpush.bf16.msra.mxu1 %v10551_v16  ;;  %v17068_v37 = vadd.f32 %v7196_v60, %v7183_v15 }
 0x4c4   :  { %v15418_v19 = vld [vmem:[#allocation5 + $0x4d4] sm:$0xf]  ;;  %v10519_v12 = vor.u32 %v15354_v62, %v10516_v27 }
 0x4c5   :  { %v10772_v21 = vld [vmem:[#allocation5 + $0x4f0] sm:$0xf0]  ;;  %7456 = vmatpush.bf16.msra.mxu2 %v10807_v14  ;;  %7429 = vmatpush.bf16.msra.mxu0 %v10263_v20  ;;  %17617 = vst [vmem:[#allocation68_spill] sm:$0xff] %v17068_v37 }
 0x4c6   :  { %v15482_v29 = vld [vmem:[#allocation5 + $0x6d4] sm:$0xf]  ;;  %v10775_v4 = vor.u32 %v15418_v19, %v10772_v21 }
 0x4c7   :  { %v11028_v23 = vld [vmem:[#allocation5 + $0x6f0] sm:$0xf0]  ;;  %7470 = vmatpush.bf16.msra.mxu3 %v11063_v6  ;;  %7443 = vmatpush.bf16.msra.mxu1 %v10519_v12 }
 0x4c8   :  { %v15282_v59 = vld [vmem:[#allocation5 + $0x94] sm:$0xf]  ;;  %v11031_v3 = vor.u32 %v15482_v29, %v11028_v23 }
 0x4c9   :  { %v10228_v9 = vld [vmem:[#allocation5 + $0xb0] sm:$0xf0]  ;;  %7457 = vmatpush.bf16.msra.mxu2 %v10775_v4 }
 0x4ca   :  { %v15346_v8 = vld [vmem:[#allocation5 + $0x294] sm:$0xf]  ;;  %v10231_v55 = vor.u32 %v15282_v59, %v10228_v9 }
 0x4cb   :  { %v10484_v5 = vld [vmem:[#allocation5 + $0x2b0] sm:$0xf0]  ;;  %7471 = vmatpush.bf16.msra.mxu3 %v11031_v3 }
 0x4cc   :  { %v15410_v2 = vld [vmem:[#allocation5 + $0x494] sm:$0xf]  ;;  %v10487_v16 = vor.u32 %v15346_v8, %v10484_v5  ;;  %7430 = vmatpush.bf16.msra.mxu0 %v10231_v55 }
 0x4cd   :  { %v10740_v7 = vld [vmem:[#allocation5 + $0x4b0] sm:$0xf0] }
 0x4ce   :  { %v15474_v26 = vld [vmem:[#allocation5 + $0x694] sm:$0xf]  ;;  %v10743_v14 = vor.u32 %v15410_v2, %v10740_v7  ;;  %7444 = vmatpush.bf16.msra.mxu1 %v10487_v16 }
 0x4cf   :  { %v10996_v30 = vld [vmem:[#allocation5 + $0x6b0] sm:$0xf0] }
 0x4d0   :  { %v15274_v34 = vld [vmem:[#allocation5 + $0x54] sm:$0xf]  ;;  %v10999_v6 = vor.u32 %v15474_v26, %v10996_v30  ;;  %7458 = vmatpush.bf16.msra.mxu2 %v10743_v14 }
 0x4d1   :  { %v10196_v49 = vld [vmem:[#allocation5 + $0x70] sm:$0xf0] }
 0x4d2   :  { %v15338_v62 = vld [vmem:[#allocation5 + $0x254] sm:$0xf]  ;;  %v10199_v23 = vor.u32 %v15274_v34, %v10196_v49  ;;  %7472 = vmatpush.bf16.msra.mxu3 %v10999_v6 }
 0x4d3   :  { %v10452_v27 = vld [vmem:[#allocation5 + $0x270] sm:$0xf0] }
 0x4d4   :  { %v15402_v19 = vld [vmem:[#allocation5 + $0x454] sm:$0xf]  ;;  %v10455_v12 = vor.u32 %v15338_v62, %v10452_v27  ;;  %7431 = vmatpush.bf16.msra.mxu0 %v10199_v23 }
 0x4d5   :  { %v10708_v21 = vld [vmem:[#allocation5 + $0x470] sm:$0xf0] }
 0x4d6   :  { %v15466_v57 = vld [vmem:[#allocation5 + $0x654] sm:$0xf]  ;;  %v10711_v4 = vor.u32 %v15402_v19, %v10708_v21  ;;  %7445 = vmatpush.bf16.msra.mxu1 %v10455_v12 }
 0x4d7   :  { %v10964_v29 = vld [vmem:[#allocation5 + $0x670] sm:$0xf0] }
 0x4d8   :  { %v15266_v20 = vld [vmem:[#allocation5 + $0x14] sm:$0xf]  ;;  %v10967_v5 = vor.u32 %v15466_v57, %v10964_v29  ;;  %7459 = vmatpush.bf16.msra.mxu2 %v10711_v4 }
 0x4d9   :  { %v10164_v59 = vld [vmem:[#allocation5 + $0x30] sm:$0xf0] }
 0x4da   :  { %v15330_v9 = vld [vmem:[#allocation5 + $0x214] sm:$0xf]  ;;  %v10167_v30 = vor.u32 %v15266_v20, %v10164_v59  ;;  %7473 = vmatpush.bf16.msra.mxu3 %v10967_v5 }
 0x4db   :  { %v10420_v8 = vld [vmem:[#allocation5 + $0x230] sm:$0xf0] }
 0x4dc   :  { %v15394_v42 = vld [vmem:[#allocation5 + $0x414] sm:$0xf]  ;;  %v10423_v16 = vor.u32 %v15330_v9, %v10420_v8  ;;  %7432 = vmatpush.bf16.msra.mxu0 %v10167_v30  ;;  %v17072_v8 = vpop.f32.mrf.mxu1 }
 0x4dd   :  { %v10676_v3 = vld [vmem:[#allocation5 + $0x430] sm:$0xf0]  ;;  %17619 = vst [vmem:[#allocation70_spill] sm:$0xff] %v17072_v8 }
 0x4de   :  { %v15458_v2 = vld [vmem:[#allocation5 + $0x614] sm:$0xf]  ;;  %v10679_v14 = vor.u32 %v15394_v42, %v10676_v3  ;;  %7446 = vmatpush.bf16.msra.mxu1 %v10423_v16 }
 0x4df   :  { %v10932_v7 = vld [vmem:[#allocation5 + $0x630] sm:$0xf0]  ;;  %7433 = vmatmul.bf16.vlgmr.msra.gmra.mxu0 %v16774_v58 }
 0x4e0   :  { %v15578_v15 = vld [vmem:[#allocation5 + $0x9d4] sm:$0xf]  ;;  %v10935_v6 = vor.u32 %v15458_v2, %v10932_v7  ;;  %7460 = vmatpush.bf16.msra.mxu2 %v10679_v14 }
 0x4e1   :  { %v11412_v60 = vld [vmem:[#allocation5 + $0x9f0] sm:$0xf0]  ;;  %7447 = vmatmul.bf16.vlgmr.msra.gmra.mxu1 %v16780_v10 }
 0x4e2   :  { %v15642_v26 = vld [vmem:[#allocation5 + $0xbd4] sm:$0xf]  ;;  %v11415_v19 = vor.u32 %v15578_v15, %v11412_v60  ;;  %7474 = vmatpush.bf16.msra.mxu3 %v10935_v6  ;;  %v17081_v6 = vpop.f32.mrf.mxu2 }
 0x4e3   :  { %v11668_v55 = vld [vmem:[#allocation5 + $0xbf0] sm:$0xf0]  ;;  %7461 = vmatmul.bf16.vlgmr.msra.gmra.mxu2 %v16776_v1  ;;  %17621 = vst [vmem:[#allocation72_spill] sm:$0xff] %v17081_v6 }
 0x4e4   :  { %v15706_v34 = vld [vmem:[#allocation5 + $0xdd4] sm:$0xf]  ;;  %v11671_v21 = vor.u32 %v15642_v26, %v11668_v55  ;;  %7481 = vmatpush.bf16.msrb.mxu0 %v11415_v19 }
 0x4e5   :  { %v11924_v49 = vld [vmem:[#allocation5 + $0xdf0] sm:$0xf0]  ;;  %7475 = vmatmul.bf16.vlgmr.msra.gmra.mxu3 %v16782_v17 }
 0x4e6   :  { %v15770_v62 = vld [vmem:[#allocation5 + $0xfd4] sm:$0xf]  ;;  %v11927_v57 = vor.u32 %v15706_v34, %v11924_v49  ;;  %7495 = vmatpush.bf16.msrb.mxu1 %v11671_v21 }
 0x4e7   :  { %v12180_v27 = vld [vmem:[#allocation5 + $0xff0] sm:$0xf0] }
 0x4e8   :  { %v15570_v29 = vld [vmem:[#allocation5 + $0x994] sm:$0xf]  ;;  %v12183_v23 = vor.u32 %v15770_v62, %v12180_v27  ;;  %7509 = vmatpush.bf16.msrb.mxu2 %v11927_v57 }
 0x4e9   :  { %v11380_v37 = vld [vmem:[#allocation5 + $0x9b0] sm:$0xf0] }
 0x4ea   :  { %v15634_v33 = vld [vmem:[#allocation5 + $0xb94] sm:$0xf]  ;;  %v11383_v9 = vor.u32 %v15570_v29, %v11380_v37  ;;  %7523 = vmatpush.bf16.msrb.mxu3 %v12183_v23 }
 0x4eb   :  { %v11636_v20 = vld [vmem:[#allocation5 + $0xbb0] sm:$0xf0] }
 0x4ec   :  { %v15698_v59 = vld [vmem:[#allocation5 + $0xd94] sm:$0xf]  ;;  %v11639_v42 = vor.u32 %v15634_v33, %v11636_v20  ;;  %7482 = vmatpush.bf16.msrb.mxu0 %v11383_v9 }
 0x4ed   :  { %v11892_v45 = vld [vmem:[#allocation5 + $0xdb0] sm:$0xf0] }
 0x4ee   :  { %v15762_v12 = vld [vmem:[#allocation5 + $0xf94] sm:$0xf]  ;;  %v11895_v5 = vor.u32 %v15698_v59, %v11892_v45  ;;  %v17078_v45 = vld [vmem:[#allocation7] sm:$0xff]  ;;  %7496 = vmatpush.bf16.msrb.mxu1 %v11639_v42  ;;  %v7210_v59 = vpop.f32.mrf.mxu0 }
 0x4ef   :  { %v12148_v4 = vld [vmem:[#allocation5 + $0xfb0] sm:$0xf0]  ;;  %17620 = vst [vmem:[#allocation71_spill] sm:$0xff] %v17078_v45  ;;  %v17561_v33 = vperm.slane %v17078_v45, 4 }
 0x4f0   :  { %v15562_v3 = vld [vmem:[#allocation5 + $0x954] sm:$0xf]  ;;  %v12151_v15 = vor.u32 %v15762_v12, %v12148_v4  ;;  %7510 = vmatpush.bf16.msrb.mxu2 %v11895_v5  ;;  %v17083_v12 = vpop.f32.mrf.mxu3 }
 0x4f1   :  { %v11348_v2 = vld [vmem:[#allocation5 + $0x970] sm:$0xf0]  ;;  %17622 = vst [vmem:[#allocation73_spill] sm:$0xff] %v17083_v12  ;;  %v7211_v9 = vadd.f32 %v7210_v59, %v17561_v33 }
 0x4f2   :  { %v15626_v7 = vld [vmem:[#allocation5 + $0xb54] sm:$0xf]  ;;  %v11351_v37 = vor.u32 %v15562_v3, %v11348_v2  ;;  %7524 = vmatpush.bf16.msrb.mxu3 %v12151_v15  ;;  %v7224_v15 = vpop.f32.mrf.mxu1 }
 0x4f3   :  { %v11604_v60 = vld [vmem:[#allocation5 + $0xb70] sm:$0xf0] }
 0x4f4   :  { %v15690_v26 = vld [vmem:[#allocation5 + $0xd54] sm:$0xf]  ;;  %v11607_v49 = vor.u32 %v15626_v7, %v11604_v60  ;;  %7483 = vmatpush.bf16.msrb.mxu0 %v11351_v37 }
 0x4f5   :  { %v11860_v30 = vld [vmem:[#allocation5 + $0xd70] sm:$0xf0] }
 0x4f6   :  { %v15754_v55 = vld [vmem:[#allocation5 + $0xf54] sm:$0xf]  ;;  %v11863_v16 = vor.u32 %v15690_v26, %v11860_v30  ;;  %7497 = vmatpush.bf16.msrb.mxu1 %v11607_v49 }
 0x4f7   :  { %v12116_v34 = vld [vmem:[#allocation5 + $0xf70] sm:$0xf0] }
 0x4f8   :  { %v15554_v14 = vld [vmem:[#allocation5 + $0x914] sm:$0xf]  ;;  %v12119_v19 = vor.u32 %v15754_v55, %v12116_v34  ;;  %7511 = vmatpush.bf16.msrb.mxu2 %v11863_v16  ;;  %v7225_v34 = vadd.f32 %v7224_v15, %v7211_v9 }
 0x4f9   :  { %v11316_v62 = vld [vmem:[#allocation5 + $0x930] sm:$0xf0] }
 0x4fa   :  { %v15618_v27 = vld [vmem:[#allocation5 + $0xb14] sm:$0xf]  ;;  %v11319_v4 = vor.u32 %v15554_v14, %v11316_v62  ;;  %7525 = vmatpush.bf16.msrb.mxu3 %v12119_v19 }
 0x4fb   :  { %v11572_v21 = vld [vmem:[#allocation5 + $0xb30] sm:$0xf0] }
 0x4fc   :  { %v15682_v57 = vld [vmem:[#allocation5 + $0xd14] sm:$0xf]  ;;  %v11575_v42 = vor.u32 %v15618_v27, %v11572_v21  ;;  %7484 = vmatpush.bf16.msrb.mxu0 %v11319_v4  ;;  %v7252_v4 = vpop.f32.mrf.mxu3 }
 0x4fd   :  { %v11828_v29 = vld [vmem:[#allocation5 + $0xd30] sm:$0xf0] }
 0x4fe   :  { %v15746_v23 = vld [vmem:[#allocation5 + $0xf14] sm:$0xf]  ;;  %v11831_v5 = vor.u32 %v15682_v57, %v11828_v29  ;;  %7498 = vmatpush.bf16.msrb.mxu1 %v11575_v42 }
 0x4ff   :  { %v12084_v20 = vld [vmem:[#allocation5 + $0xf30] sm:$0xf0] }
 0x500   :  { %v15546_v3 = vld [vmem:[#allocation5 + $0x8d4] sm:$0xf]  ;;  %v12087_v60 = vor.u32 %v15746_v23, %v12084_v20  ;;  %7512 = vmatpush.bf16.msrb.mxu2 %v11831_v5  ;;  %v7238_v20 = vpop.f32.mrf.mxu2 }
 0x501   :  { %v11284_v2 = vld [vmem:[#allocation5 + $0x8f0] sm:$0xf0]  ;;  %v7239_v9 = vadd.f32 %v7238_v20, %v7225_v34 }
 0x502   :  { %v15610_v7 = vld [vmem:[#allocation5 + $0xad4] sm:$0xf]  ;;  %v11287_v14 = vor.u32 %v15546_v3, %v11284_v2  ;;  %7526 = vmatpush.bf16.msrb.mxu3 %v12087_v60 }
 0x503   :  { %v11540_v26 = vld [vmem:[#allocation5 + $0xaf0] sm:$0xf0] }
 0x504   :  { %v15674_v30 = vld [vmem:[#allocation5 + $0xcd4] sm:$0xf]  ;;  %v11543_v49 = vor.u32 %v15610_v7, %v11540_v26  ;;  %7485 = vmatpush.bf16.msrb.mxu0 %v11287_v14  ;;  %v17087_v26 = vadd.f32 %v7252_v4, %v7239_v9 }
 0x505   :  { %v11796_v55 = vld [vmem:[#allocation5 + $0xcf0] sm:$0xf0] }
 0x506   :  { %v15738_v12 = vld [vmem:[#allocation5 + $0xed4] sm:$0xf]  ;;  %v11799_v16 = vor.u32 %v15674_v30, %v11796_v55  ;;  %7499 = vmatpush.bf16.msrb.mxu1 %v11543_v49 }
 0x507   :  { %v12052_v37 = vld [vmem:[#allocation5 + $0xef0] sm:$0xf0] }
 0x508   :  { %v15538_v62 = vld [vmem:[#allocation5 + $0x894] sm:$0xf]  ;;  %v12055_v57 = vor.u32 %v15738_v12, %v12052_v37  ;;  %7513 = vmatpush.bf16.msrb.mxu2 %v11799_v16 }
 0x509   :  { %v11252_v27 = vld [vmem:[#allocation5 + $0x8b0] sm:$0xf0] }
 0x50a   :  { %v15602_v21 = vld [vmem:[#allocation5 + $0xa94] sm:$0xf]  ;;  %v11255_v15 = vor.u32 %v15538_v62, %v11252_v27  ;;  %7527 = vmatpush.bf16.msrb.mxu3 %v12055_v57 }
 0x50b   :  { %v11508_v29 = vld [vmem:[#allocation5 + $0xab0] sm:$0xf0] }
 0x50c   :  { %v15666_v19 = vld [vmem:[#allocation5 + $0xc94] sm:$0xf]  ;;  %v11511_v42 = vor.u32 %v15602_v21, %v11508_v29  ;;  %7486 = vmatpush.bf16.msrb.mxu0 %v11255_v15 }
 0x50d   :  { %v11764_v23 = vld [vmem:[#allocation5 + $0xcb0] sm:$0xf0] }
 0x50e   :  { %v15730_v59 = vld [vmem:[#allocation5 + $0xe94] sm:$0xf]  ;;  %v11767_v5 = vor.u32 %v15666_v19, %v11764_v23  ;;  %7500 = vmatpush.bf16.msrb.mxu1 %v11511_v42 }
 0x50f   :  { %v12020_v33 = vld [vmem:[#allocation5 + $0xeb0] sm:$0xf0] }
 0x510   :  { %v15530_v3 = vld [vmem:[#allocation5 + $0x854] sm:$0xf]  ;;  %v12023_v12 = vor.u32 %v15730_v59, %v12020_v33  ;;  %7514 = vmatpush.bf16.msrb.mxu2 %v11767_v5 }
 0x511   :  { %v11220_v2 = vld [vmem:[#allocation5 + $0x870] sm:$0xf0] }
 0x512   :  { %v15594_v7 = vld [vmem:[#allocation5 + $0xa54] sm:$0xf]  ;;  %v11223_v34 = vor.u32 %v15530_v3, %v11220_v2  ;;  %7528 = vmatpush.bf16.msrb.mxu3 %v12023_v12 }
 0x513   :  { %v11476_v60 = vld [vmem:[#allocation5 + $0xa70] sm:$0xf0] }
 0x514   :  { %v15658_v30 = vld [vmem:[#allocation5 + $0xc54] sm:$0xf]  ;;  %v11479_v49 = vor.u32 %v15594_v7, %v11476_v60  ;;  %7487 = vmatpush.bf16.msrb.mxu0 %v11223_v34 }
 0x515   :  { %v11732_v55 = vld [vmem:[#allocation5 + $0xc70] sm:$0xf0] }
 0x516   :  { %v15722_v37 = vld [vmem:[#allocation5 + $0xe54] sm:$0xf]  ;;  %v11735_v16 = vor.u32 %v15658_v30, %v11732_v55  ;;  %7501 = vmatpush.bf16.msrb.mxu1 %v11479_v49 }
 0x517   :  { %v11988_v6 = vld [vmem:[#allocation5 + $0xe70] sm:$0xf0] }
 0x518   :  { %v15522_v14 = vld [vmem:[#allocation5 + $0x814] sm:$0xf]  ;;  %v11991_v19 = vor.u32 %v15722_v37, %v11988_v6  ;;  %7515 = vmatpush.bf16.msrb.mxu2 %v11735_v16  ;;  %v17089_v37 = vpop.f32.mrf.mxu0 }
 0x519   :  { %v11188_v62 = vld [vmem:[#allocation5 + $0x830] sm:$0xf0]  ;;  %17623 = vst [vmem:[#allocation74_spill] sm:$0xff] %v17089_v37 }
 0x51a   :  { %v15586_v27 = vld [vmem:[#allocation5 + $0xa14] sm:$0xf]  ;;  %v11191_v15 = vor.u32 %v15522_v14, %v11188_v62  ;;  %7529 = vmatpush.bf16.msrb.mxu3 %v11991_v19 }
 0x51b   :  { %v11444_v21 = vld [vmem:[#allocation5 + $0xa30] sm:$0xf0] }
 0x51c   :  { %v15650_v29 = vld [vmem:[#allocation5 + $0xc14] sm:$0xf]  ;;  %v11447_v42 = vor.u32 %v15586_v27, %v11444_v21  ;;  %7488 = vmatpush.bf16.msrb.mxu0 %v11191_v15  ;;  %v17091_v21 = vpop.f32.mrf.mxu1 }
 0x51d   :  { %v11700_v57 = vld [vmem:[#allocation5 + $0xc30] sm:$0xf0]  ;;  %17624 = vst [vmem:[#allocation75_spill] sm:$0xff] %v17091_v21 }
 0x51e   :  { %v15714_v33 = vld [vmem:[#allocation5 + $0xe14] sm:$0xf]  ;;  %v11703_v5 = vor.u32 %v15650_v29, %v11700_v57  ;;  %7502 = vmatpush.bf16.msrb.mxu1 %v11447_v42 }
 0x51f   :  { %v11956_v23 = vld [vmem:[#allocation5 + $0xe30] sm:$0xf0]  ;;  %7489 = vmatmul.bf16.vlgmr.msrb.gmra.mxu0 %v16786_v39 }
 0x520   :  { %v15834_v20 = vld [vmem:[#allocation5 + $0x11d4] sm:$0xf]  ;;  %v11959_v12 = vor.u32 %v15714_v33, %v11956_v23  ;;  %7516 = vmatpush.bf16.msrb.mxu2 %v11703_v5 }
 0x521   :  { %v12436_v59 = vld [vmem:[#allocation5 + $0x11f0] sm:$0xf0]  ;;  %7503 = vmatmul.bf16.vlgmr.msrb.gmra.mxu1 %v16790_v44 }
 0x522   :  { %v15898_v9 = vld [vmem:[#allocation5 + $0x13d4] sm:$0xf]  ;;  %v12439_v6 = vor.u32 %v15834_v20, %v12436_v59  ;;  %7530 = vmatpush.bf16.msrb.mxu3 %v11959_v12 }
 0x523   :  { %v12692_v4 = vld [vmem:[#allocation5 + $0x13f0] sm:$0xf0]  ;;  %7517 = vmatmul.bf16.vlgmr.msrb.gmra.mxu2 %v16788_v43 }
 0x524   :  { %v15962_v3 = vld [vmem:[#allocation5 + $0x15d4] sm:$0xf]  ;;  %v12695_v30 = vor.u32 %v15898_v9, %v12692_v4  ;;  %7537 = vmatpush.bf16.msra.mxu0 %v12439_v6  ;;  %v17099_v6 = vpop.f32.mrf.mxu3 }
 0x525   :  { %v12948_v2 = vld [vmem:[#allocation5 + $0x15f0] sm:$0xf0]  ;;  %7531 = vmatmul.bf16.vlgmr.msrb.gmra.mxu3 %v16792_v47  ;;  %17626 = vst [vmem:[#allocation77_spill] sm:$0xff] %v17099_v6 }
 0x526   :  { %v16026_v7 = vld [vmem:[#allocation5 + $0x17d4] sm:$0xf]  ;;  %v12951_v55 = vor.u32 %v15962_v3, %v12948_v2  ;;  %7551 = vmatpush.bf16.msra.mxu1 %v12695_v30 }
 0x527   :  { %v13204_v60 = vld [vmem:[#allocation5 + $0x17f0] sm:$0xf0] }
 0x528   :  { %v15826_v8 = vld [vmem:[#allocation5 + $0x1194] sm:$0xf]  ;;  %v13207_v14 = vor.u32 %v16026_v7, %v13204_v60  ;;  %7565 = vmatpush.bf16.msra.mxu2 %v12951_v55 }
 0x529   :  { %v12404_v48 = vld [vmem:[#allocation5 + $0x11b0] sm:$0xf0] }
 0x52a   :  { %v15890_v34 = vld [vmem:[#allocation5 + $0x1394] sm:$0xf]  ;;  %v12407_v29 = vor.u32 %v15826_v8, %v12404_v48  ;;  %7579 = vmatpush.bf16.msra.mxu3 %v13207_v14  ;;  %v7266_v14 = vpop.f32.mrf.mxu0 }
 0x52b   :  { %v12660_v62 = vld [vmem:[#allocation5 + $0x13b0] sm:$0xf0] }
 0x52c   :  { %v15954_v45 = vld [vmem:[#allocation5 + $0x1594] sm:$0xf]  ;;  %v12663_v19 = vor.u32 %v15890_v34, %v12660_v62  ;;  %7538 = vmatpush.bf16.msra.mxu0 %v12407_v29 }
 0x52d   :  { %v12916_v49 = vld [vmem:[#allocation5 + $0x15b0] sm:$0xf0] }
 0x52e   :  { %v16018_v16 = vld [vmem:[#allocation5 + $0x1794] sm:$0xf]  ;;  %v12919_v57 = vor.u32 %v15954_v45, %v12916_v49  ;;  %v17097_v45 = vpop.f32.mrf.mxu2  ;;  %7552 = vmatpush.bf16.msra.mxu1 %v12663_v19 }
 0x52f   :  { %v13172_v27 = vld [vmem:[#allocation5 + $0x17b0] sm:$0xf0]  ;;  %17625 = vst [vmem:[#allocation76_spill] sm:$0xff] %v17097_v45 }
 0x530   :  { %v15818_v33 = vld [vmem:[#allocation5 + $0x1154] sm:$0xf]  ;;  %v13175_v59 = vor.u32 %v16018_v16, %v13172_v27  ;;  %7566 = vmatpush.bf16.msra.mxu2 %v12919_v57  ;;  %v7267_v16 = vadd.f32 %v7266_v14, %v17087_v26  ;;  %v7280_v57 = vpop.f32.mrf.mxu1 }
 0x531   :  { %v12372_v23 = vld [vmem:[#allocation5 + $0x1170] sm:$0xf0] }
 0x532   :  { %v15882_v20 = vld [vmem:[#allocation5 + $0x1354] sm:$0xf]  ;;  %v12375_v8 = vor.u32 %v15818_v33, %v12372_v23  ;;  %7580 = vmatpush.bf16.msra.mxu3 %v13175_v59  ;;  %v17104_v50 = vpop.f32.mrf.mxu0 }
 0x533   :  { %v12628_v9 = vld [vmem:[#allocation5 + $0x1370] sm:$0xf0]  ;;  %17627 = vst [vmem:[#allocation78_spill] sm:$0xff] %v17104_v50 }
 0x534   :  { %v15946_v15 = vld [vmem:[#allocation5 + $0x1554] sm:$0xf]  ;;  %v12631_v2 = vor.u32 %v15882_v20, %v12628_v9  ;;  %7539 = vmatpush.bf16.msra.mxu0 %v12375_v8  ;;  %v7281_v9 = vadd.f32 %v7280_v57, %v7267_v16  ;;  %v7308_v16 = vpop.f32.mrf.mxu3 }
 0x535   :  { %v12884_v4 = vld [vmem:[#allocation5 + $0x1570] sm:$0xf0] }
 0x536   :  { %v16010_v3 = vld [vmem:[#allocation5 + $0x1754] sm:$0xf]  ;;  %v12887_v42 = vor.u32 %v15946_v15, %v12884_v4  ;;  %7553 = vmatpush.bf16.msra.mxu1 %v12631_v2 }
 0x537   :  { %v13140_v48 = vld [vmem:[#allocation5 + $0x1770] sm:$0xf0] }
 0x538   :  { %v15810_v5 = vld [vmem:[#allocation5 + $0x1114] sm:$0xf]  ;;  %v13143_v12 = vor.u32 %v16010_v3, %v13140_v48  ;;  %7567 = vmatpush.bf16.msra.mxu2 %v12887_v42 }
 0x539   :  { %v12340_v7 = vld [vmem:[#allocation5 + $0x1130] sm:$0xf0] }
 0x53a   :  { %v15874_v60 = vld [vmem:[#allocation5 + $0x1314] sm:$0xf]  ;;  %v12343_v27 = vor.u32 %v15810_v5, %v12340_v7  ;;  %7581 = vmatpush.bf16.msra.mxu3 %v13143_v12 }
 0x53b   :  { %v12596_v30 = vld [vmem:[#allocation5 + $0x1330] sm:$0xf0] }
 0x53c   :  { %v15938_v55 = vld [vmem:[#allocation5 + $0x1514] sm:$0xf]  ;;  %v12599_v29 = vor.u32 %v15874_v60, %v12596_v30  ;;  %7540 = vmatpush.bf16.msra.mxu0 %v12343_v27  ;;  %v7294_v30 = vpop.f32.mrf.mxu2 }
 0x53d   :  { %v12852_v34 = vld [vmem:[#allocation5 + $0x1530] sm:$0xf0]  ;;  %v7295_v14 = vadd.f32 %v7294_v30, %v7281_v9 }
 0x53e   :  { %v16002_v62 = vld [vmem:[#allocation5 + $0x1714] sm:$0xf]  ;;  %v12855_v19 = vor.u32 %v15938_v55, %v12852_v34  ;;  %7554 = vmatpush.bf16.msra.mxu1 %v12599_v29 }
 0x53f   :  { %v13108_v49 = vld [vmem:[#allocation5 + $0x1730] sm:$0xf0]  ;;  %v17102_v29 = vadd.f32 %v7308_v16, %v7295_v14 }
 0x540   :  { %v15802_v33 = vld [vmem:[#allocation5 + $0x10d4] sm:$0xf]  ;;  %v13111_v59 = vor.u32 %v16002_v62, %v13108_v49  ;;  %7568 = vmatpush.bf16.msra.mxu2 %v12855_v19 }
 0x541   :  { %v12308_v23 = vld [vmem:[#allocation5 + $0x10f0] sm:$0xf0] }
 0x542   :  { %v15866_v20 = vld [vmem:[#allocation5 + $0x12d4] sm:$0xf]  ;;  %v12311_v8 = vor.u32 %v15802_v33, %v12308_v23  ;;  %7582 = vmatpush.bf16.msra.mxu3 %v13111_v59 }
 0x543   :  { %v12564_v15 = vld [vmem:[#allocation5 + $0x12f0] sm:$0xf0] }
 0x544   :  { %v15930_v4 = vld [vmem:[#allocation5 + $0x14d4] sm:$0xf]  ;;  %v12567_v26 = vor.u32 %v15866_v20, %v12564_v15  ;;  %7541 = vmatpush.bf16.msra.mxu0 %v12311_v8 }
 0x545   :  { %v12820_v3 = vld [vmem:[#allocation5 + $0x14f0] sm:$0xf0] }
 0x546   :  { %v15994_v48 = vld [vmem:[#allocation5 + $0x16d4] sm:$0xf]  ;;  %v12823_v2 = vor.u32 %v15930_v4, %v12820_v3  ;;  %7555 = vmatpush.bf16.msra.mxu1 %v12567_v26 }
 0x547   :  { %v13076_v6 = vld [vmem:[#allocation5 + $0x16f0] sm:$0xf0] }
 0x548   :  { %v15794_v42 = vld [vmem:[#allocation5 + $0x1094] sm:$0xf]  ;;  %v13079_v60 = vor.u32 %v15994_v48, %v13076_v6  ;;  %7569 = vmatpush.bf16.msra.mxu2 %v12823_v2 }
 0x549   :  { %v12276_v5 = vld [vmem:[#allocation5 + $0x10b0] sm:$0xf0] }
 0x54a   :  { %v15858_v7 = vld [vmem:[#allocation5 + $0x1294] sm:$0xf]  ;;  %v12279_v27 = vor.u32 %v15794_v42, %v12276_v5  ;;  %7583 = vmatpush.bf16.msra.mxu3 %v13079_v60 }
 0x54b   :  { %v12532_v12 = vld [vmem:[#allocation5 + $0x12b0] sm:$0xf0] }
 0x54c   :  { %v15922_v55 = vld [vmem:[#allocation5 + $0x1494] sm:$0xf]  ;;  %v12535_v19 = vor.u32 %v15858_v7, %v12532_v12  ;;  %7542 = vmatpush.bf16.msra.mxu0 %v12279_v27 }
 0x54d   :  { %v12788_v34 = vld [vmem:[#allocation5 + $0x14b0] sm:$0xf0] }
 0x54e   :  { %v15986_v62 = vld [vmem:[#allocation5 + $0x1694] sm:$0xf]  ;;  %v12791_v57 = vor.u32 %v15922_v55, %v12788_v34  ;;  %7556 = vmatpush.bf16.msra.mxu1 %v12535_v19 }
 0x54f   :  { %v13044_v49 = vld [vmem:[#allocation5 + $0x16b0] sm:$0xf0] }
 0x550   :  { %v15786_v33 = vld [vmem:[#allocation5 + $0x1054] sm:$0xf]  ;;  %v13047_v6 = vor.u32 %v15986_v62, %v13044_v49  ;;  %7570 = vmatpush.bf16.msra.mxu2 %v12791_v57 }
 0x551   :  { %v12244_v23 = vld [vmem:[#allocation5 + $0x1070] sm:$0xf0] }
 0x552   :  { %v15850_v20 = vld [vmem:[#allocation5 + $0x1254] sm:$0xf]  ;;  %v12247_v48 = vor.u32 %v15786_v33, %v12244_v23  ;;  %7584 = vmatpush.bf16.msra.mxu3 %v13047_v6 }
 0x553   :  { %v12500_v59 = vld [vmem:[#allocation5 + $0x1270] sm:$0xf0] }
 0x554   :  { %v15914_v15 = vld [vmem:[#allocation5 + $0x1454] sm:$0xf]  ;;  %v12503_v26 = vor.u32 %v15850_v20, %v12500_v59  ;;  %7543 = vmatpush.bf16.msra.mxu0 %v12247_v48 }
 0x555   :  { %v12756_v4 = vld [vmem:[#allocation5 + $0x1470] sm:$0xf0] }
 0x556   :  { %v15978_v9 = vld [vmem:[#allocation5 + $0x1654] sm:$0xf]  ;;  %v12759_v2 = vor.u32 %v15914_v15, %v12756_v4  ;;  %7557 = vmatpush.bf16.msra.mxu1 %v12503_v26 }
 0x557   :  { %v13012_v3 = vld [vmem:[#allocation5 + $0x1670] sm:$0xf0] }
 0x558   :  { %v15778_v8 = vld [vmem:[#allocation5 + $0x1014] sm:$0xf]  ;;  %v13015_v12 = vor.u32 %v15978_v9, %v13012_v3  ;;  %7571 = vmatpush.bf16.msra.mxu2 %v12759_v2 }
 0x559   :  { %v12212_v42 = vld [vmem:[#allocation5 + $0x1030] sm:$0xf0] }
 0x55a   :  { %v15842_v5 = vld [vmem:[#allocation5 + $0x1214] sm:$0xf]  ;;  %v12215_v16 = vor.u32 %v15778_v8, %v12212_v42  ;;  %7585 = vmatpush.bf16.msra.mxu3 %v13015_v12 }
 0x55b   :  { %v12468_v7 = vld [vmem:[#allocation5 + $0x1230] sm:$0xf0] }
 0x55c   :  { %v15906_v30 = vld [vmem:[#allocation5 + $0x1414] sm:$0xf]  ;;  %v12471_v19 = vor.u32 %v15842_v5, %v12468_v7  ;;  %7544 = vmatpush.bf16.msra.mxu0 %v12215_v16  ;;  %v17106_v5 = vpop.f32.mrf.mxu1 }
 0x55d   :  { %v12724_v60 = vld [vmem:[#allocation5 + $0x1430] sm:$0xf0]  ;;  %17628 = vst [vmem:[#allocation79_spill] sm:$0xff] %v17106_v5  ;;  %v15447_v5 = vld [vmem:[#allocation5 + $0x5b4] sm:$0xf0] }
 0x55e   :  { %v15970_v55 = vld [vmem:[#allocation5 + $0x1614] sm:$0xf]  ;;  %v12727_v57 = vor.u32 %v15906_v30, %v12724_v60  ;;  %7558 = vmatpush.bf16.msra.mxu1 %v12471_v19 }
 0x55f   :  { %v12980_v34 = vld [vmem:[#allocation5 + $0x1630] sm:$0xf0]  ;;  %7545 = vmatmul.bf16.vlgmr.msra.gmra.mxu0 %v16798_v31 }
 0x560   :  { %v16090_v14 = vld [vmem:[#allocation5 + $0x19d4] sm:$0xf]  ;;  %v12983_v6 = vor.u32 %v15970_v55, %v12980_v34  ;;  %7572 = vmatpush.bf16.msra.mxu2 %v12727_v57 }
 0x561   :  { %v13460_v62 = vld [vmem:[#allocation5 + $0x19f0] sm:$0xf0]  ;;  %7559 = vmatmul.bf16.vlgmr.msra.gmra.mxu1 %v16802_v36 }
 0x562   :  { %v16154_v49 = vld [vmem:[#allocation5 + $0x1bd4] sm:$0xf]  ;;  %v13463_v15 = vor.u32 %v16090_v14, %v13460_v62  ;;  %7586 = vmatpush.bf16.msra.mxu3 %v12983_v6 }
 0x563   :  { %v13716_v27 = vld [vmem:[#allocation5 + $0x1bf0] sm:$0xf0]  ;;  %7573 = vmatmul.bf16.vlgmr.msra.gmra.mxu2 %v16800_v35 }
 0x564   :  { %v16218_v33 = vld [vmem:[#allocation5 + $0x1dd4] sm:$0xf]  ;;  %v13719_v4 = vor.u32 %v16154_v49, %v13716_v27  ;;  %7593 = vmatpush.bf16.msrb.mxu0 %v13463_v15 }
 0x565   :  { %v13972_v23 = vld [vmem:[#allocation5 + $0x1df0] sm:$0xf0]  ;;  %7587 = vmatmul.bf16.vlgmr.msra.gmra.mxu3 %v16804_v40 }
 0x566   :  { %v16282_v20 = vld [vmem:[#allocation5 + $0x1fd4] sm:$0xf]  ;;  %v13975_v9 = vor.u32 %v16218_v33, %v13972_v23  ;;  %7607 = vmatpush.bf16.msrb.mxu1 %v13719_v4 }
 0x567   :  { %v14228_v59 = vld [vmem:[#allocation5 + $0x1ff0] sm:$0xf0] }
 0x568   :  { %v16082_v3 = vld [vmem:[#allocation5 + $0x1994] sm:$0xf]  ;;  %v14231_v48 = vor.u32 %v16282_v20, %v14228_v59  ;;  %7621 = vmatpush.bf16.msrb.mxu2 %v13975_v9  ;;  %v17112_v20 = vpop.f32.mrf.mxu2  ;;  %v17114_v9 = vpop.f32.mrf.mxu3 }
 0x569   :  { %v13428_v45 = vld [vmem:[#allocation5 + $0x19b0] sm:$0xf0]  ;;  %17629 = vst [vmem:[#allocation80_spill] sm:$0xff] %v17112_v20  ;;  %v10618_v20 = vld [vmem:[#allocation5 + $0x398] sm:$0xf] }
 0x56a   :  { %v16146_v21 = vld [vmem:[#allocation5 + $0x1b94] sm:$0xf]  ;;  %v13431_v7 = vor.u32 %v16082_v3, %v13428_v45  ;;  %7635 = vmatpush.bf16.msrb.mxu3 %v14231_v48  ;;  %17630 = vst [vmem:[#allocation81_spill] sm:$0xff] %v17114_v9  ;;  %v7322_v3 = vpop.f32.mrf.mxu0  ;;  %v15319_v9 = vld [vmem:[#allocation5 + $0x1b4] sm:$0xf0] }
 0x56b   :  { %v13684_v8 = vld [vmem:[#allocation5 + $0x1bb0] sm:$0xf0] }
 0x56c   :  { %v16210_v42 = vld [vmem:[#allocation5 + $0x1d94] sm:$0xf]  ;;  %v13687_v30 = vor.u32 %v16146_v21, %v13684_v8  ;;  %7594 = vmatpush.bf16.msrb.mxu0 %v13431_v7 }
 0x56d   :  { %v13940_v37 = vld [vmem:[#allocation5 + $0x1db0] sm:$0xf0] }
 0x56e   :  { %v16274_v26 = vld [vmem:[#allocation5 + $0x1f94] sm:$0xf]  ;;  %v13943_v12 = vor.u32 %v16210_v42, %v13940_v37  ;;  %7608 = vmatpush.bf16.msrb.mxu1 %v13687_v30  ;;  %v7323_v42 = vadd.f32 %v7322_v3, %v17102_v29 }
 0x56f   :  { %v14196_v2 = vld [vmem:[#allocation5 + $0x1fb0] sm:$0xf0] }
 0x570   :  { %v16074_v60 = vld [vmem:[#allocation5 + $0x1954] sm:$0xf]  ;;  %v14199_v14 = vor.u32 %v16274_v26, %v14196_v2  ;;  %7622 = vmatpush.bf16.msrb.mxu2 %v13943_v12  ;;  %v7336_v2 = vpop.f32.mrf.mxu1 }
 0x571   :  { %v13396_v55 = vld [vmem:[#allocation5 + $0x1970] sm:$0xf0] }
 0x572   :  { %v16138_v34 = vld [vmem:[#allocation5 + $0x1b54] sm:$0xf]  ;;  %v13399_v37 = vor.u32 %v16074_v60, %v13396_v55  ;;  %7636 = vmatpush.bf16.msrb.mxu3 %v14199_v14  ;;  %v7337_v14 = vadd.f32 %v7336_v2, %v7323_v42  ;;  %v17119_v50 = vpop.f32.mrf.mxu0 }
 0x573   :  { %v13652_v62 = vld [vmem:[#allocation5 + $0x1b70] sm:$0xf0]  ;;  %17631 = vst [vmem:[#allocation82_spill] sm:$0xff] %v17119_v50  ;;  %v12922_v50 = vld [vmem:[#allocation5 + $0x1598] sm:$0xf] }
 0x574   :  { %v16202_v49 = vld [vmem:[#allocation5 + $0x1d54] sm:$0xf]  ;;  %v13655_v21 = vor.u32 %v16138_v34, %v13652_v62  ;;  %7595 = vmatpush.bf16.msrb.mxu0 %v13399_v37 }
 0x575   :  { %v13908_v16 = vld [vmem:[#allocation5 + $0x1d70] sm:$0xf0] }
 0x576   :  { %v16266_v27 = vld [vmem:[#allocation5 + $0x1f54] sm:$0xf]  ;;  %v13911_v33 = vor.u32 %v16202_v49, %v13908_v16  ;;  %7609 = vmatpush.bf16.msrb.mxu1 %v13655_v21 }
 0x577   :  { %v14164_v45 = vld [vmem:[#allocation5 + $0x1f70] sm:$0xf0] }
 0x578   :  { %v16066_v23 = vld [vmem:[#allocation5 + $0x1914] sm:$0xf]  ;;  %v14167_v59 = vor.u32 %v16266_v27, %v14164_v45  ;;  %7623 = vmatpush.bf16.msrb.mxu2 %v13911_v33 }
 0x579   :  { %v13364_v19 = vld [vmem:[#allocation5 + $0x1930] sm:$0xf0] }
 0x57a   :  { %v16130_v57 = vld [vmem:[#allocation5 + $0x1b14] sm:$0xf]  ;;  %v13367_v26 = vor.u32 %v16066_v23, %v13364_v19  ;;  %7637 = vmatpush.bf16.msrb.mxu3 %v14167_v59 }
 0x57b   :  { %v13620_v6 = vld [vmem:[#allocation5 + $0x1b30] sm:$0xf0] }
 0x57c   :  { %v16194_v15 = vld [vmem:[#allocation5 + $0x1d14] sm:$0xf]  ;;  %v13623_v7 = vor.u32 %v16130_v57, %v13620_v6  ;;  %7596 = vmatpush.bf16.msrb.mxu0 %v13367_v26  ;;  %v7350_v6 = vpop.f32.mrf.mxu2 }
 0x57d   :  { %v13876_v4 = vld [vmem:[#allocation5 + $0x1d30] sm:$0xf0]  ;;  %v7351_v3 = vadd.f32 %v7350_v6, %v7337_v14 }
 0x57e   :  { %v16258_v48 = vld [vmem:[#allocation5 + $0x1f14] sm:$0xf]  ;;  %v13879_v30 = vor.u32 %v16194_v15, %v13876_v4  ;;  %7610 = vmatpush.bf16.msrb.mxu1 %v13623_v7 }
 0x57f   :  { %v14132_v8 = vld [vmem:[#allocation5 + $0x1f30] sm:$0xf0] }
 0x580   :  { %v16058_v12 = vld [vmem:[#allocation5 + $0x18d4] sm:$0xf]  ;;  %v14135_v34 = vor.u32 %v16258_v48, %v14132_v8  ;;  %7624 = vmatpush.bf16.msrb.mxu2 %v13879_v30  ;;  %v7364_v48 = vpop.f32.mrf.mxu3 }
 0x581   :  { %v13332_v60 = vld [vmem:[#allocation5 + $0x18f0] sm:$0xf0]  ;;  %v17117_v2 = vadd.f32 %v7364_v48, %v7351_v3  ;;  %v10394_v3 = vld [vmem:[#allocation5 + $0x1d8] sm:$0xf] }
 0x582   :  { %v16122_v55 = vld [vmem:[#allocation5 + $0x1ad4] sm:$0xf]  ;;  %v13335_v37 = vor.u32 %v16058_v12, %v13332_v60  ;;  %7638 = vmatpush.bf16.msrb.mxu3 %v14135_v34  ;;  %v15327_v48 = vld [vmem:[#allocation5 + $0x1f4] sm:$0xf0] }
 0x583   :  { %v13588_v62 = vld [vmem:[#allocation5 + $0x1af0] sm:$0xf0] }
 0x584   :  { %v16186_v49 = vld [vmem:[#allocation5 + $0x1cd4] sm:$0xf]  ;;  %v13591_v29 = vor.u32 %v16122_v55, %v13588_v62  ;;  %7597 = vmatpush.bf16.msrb.mxu0 %v13335_v37 }
 0x585   :  { %v13844_v16 = vld [vmem:[#allocation5 + $0x1cf0] sm:$0xf0] }
 0x586   :  { %v16250_v27 = vld [vmem:[#allocation5 + $0x1ed4] sm:$0xf]  ;;  %v13847_v21 = vor.u32 %v16186_v49, %v13844_v16  ;;  %7611 = vmatpush.bf16.msrb.mxu1 %v13591_v29 }
 0x587   :  { %v14100_v45 = vld [vmem:[#allocation5 + $0x1ef0] sm:$0xf0] }
 0x588   :  { %v16050_v33 = vld [vmem:[#allocation5 + $0x1894] sm:$0xf]  ;;  %v14103_v57 = vor.u32 %v16250_v27, %v14100_v45  ;;  %7625 = vmatpush.bf16.msrb.mxu2 %v13847_v21 }
 0x589   :  { %v13300_v23 = vld [vmem:[#allocation5 + $0x18b0] sm:$0xf0] }
 0x58a   :  { %v16114_v19 = vld [vmem:[#allocation5 + $0x1a94] sm:$0xf]  ;;  %v13303_v26 = vor.u32 %v16050_v33, %v13300_v23  ;;  %7639 = vmatpush.bf16.msrb.mxu3 %v14103_v57 }
 0x58b   :  { %v13556_v59 = vld [vmem:[#allocation5 + $0x1ab0] sm:$0xf0] }
 0x58c   :  { %v16178_v15 = vld [vmem:[#allocation5 + $0x1c94] sm:$0xf]  ;;  %v13559_v7 = vor.u32 %v16114_v19, %v13556_v59  ;;  %7598 = vmatpush.bf16.msrb.mxu0 %v13303_v26  ;;  %v15391_v26 = vld [vmem:[#allocation5 + $0x3f4] sm:$0xf0] }
 0x58d   :  { %v13812_v4 = vld [vmem:[#allocation5 + $0x1cb0] sm:$0xf0] }
 0x58e   :  { %v16242_v8 = vld [vmem:[#allocation5 + $0x1e94] sm:$0xf]  ;;  %v13815_v30 = vor.u32 %v16178_v15, %v13812_v4  ;;  %7612 = vmatpush.bf16.msrb.mxu1 %v13559_v7 }
 0x58f   :  { %v14068_v42 = vld [vmem:[#allocation5 + $0x1eb0] sm:$0xf0] }
 0x590   :  { %v16042_v12 = vld [vmem:[#allocation5 + $0x1854] sm:$0xf]  ;;  %v14071_v34 = vor.u32 %v16242_v8, %v14068_v42  ;;  %7626 = vmatpush.bf16.msrb.mxu2 %v13815_v30  ;;  %v10650_v8 = vld [vmem:[#allocation5 + $0x3d8] sm:$0xf] }
 0x591   :  { %v13268_v60 = vld [vmem:[#allocation5 + $0x1870] sm:$0xf0] }
 0x592   :  { %v16106_v55 = vld [vmem:[#allocation5 + $0x1a54] sm:$0xf]  ;;  %v13271_v45 = vor.u32 %v16042_v12, %v13268_v60  ;;  %7640 = vmatpush.bf16.msrb.mxu3 %v14071_v34  ;;  %v10906_v12 = vld [vmem:[#allocation5 + $0x5d8] sm:$0xf] }
 0x593   :  { %v13524_v62 = vld [vmem:[#allocation5 + $0x1a70] sm:$0xf0]  ;;  %v15455_v60 = vld [vmem:[#allocation5 + $0x5f4] sm:$0xf0] }
 0x594   :  { %v16170_v49 = vld [vmem:[#allocation5 + $0x1c54] sm:$0xf]  ;;  %v13527_v29 = vor.u32 %v16106_v55, %v13524_v62  ;;  %7599 = vmatpush.bf16.msrb.mxu0 %v13271_v45  ;;  %v11162_v55 = vld [vmem:[#allocation5 + $0x7d8] sm:$0xf] }
 0x595   :  { %v13780_v16 = vld [vmem:[#allocation5 + $0x1c70] sm:$0xf0]  ;;  %v15519_v62 = vld [vmem:[#allocation5 + $0x7f4] sm:$0xf0] }
 0x596   :  { %v16234_v14 = vld [vmem:[#allocation5 + $0x1e54] sm:$0xf]  ;;  %v13783_v21 = vor.u32 %v16170_v49, %v13780_v16  ;;  %7613 = vmatpush.bf16.msrb.mxu1 %v13527_v29  ;;  %v10395_v49 = vor.u32 %v15327_v48, %v10394_v3  ;;  %v10651_v16 = vor.u32 %v15391_v26, %v10650_v8  ;;  %v11163_v45 = vor.u32 %v15519_v62, %v11162_v55  ;;  %v11130_v29 = vld [vmem:[#allocation5 + $0x798] sm:$0xf]  ;;  %v17127_v55 = vpop.f32.mrf.mxu2 }
 0x597   :  { %v14036_v27 = vld [vmem:[#allocation5 + $0x1e70] sm:$0xf0]  ;;  %v15375_v48 = vld [vmem:[#allocation5 + $0x374] sm:$0xf0]  ;;  %17633 = vst [vmem:[#allocation84_spill] sm:$0xff] %v17127_v55 }
 0x598   :  { %v16034_v37 = vld [vmem:[#allocation5 + $0x1814] sm:$0xf]  ;;  %v14039_v59 = vor.u32 %v16234_v14, %v14036_v27  ;;  %7627 = vmatpush.bf16.msrb.mxu2 %v13783_v21  ;;  %v10907_v14 = vor.u32 %v15455_v60, %v10906_v12  ;;  %v10362_v27 = vld [vmem:[#allocation5 + $0x198] sm:$0xf] }
 0x599   :  { %v13236_v33 = vld [vmem:[#allocation5 + $0x1830] sm:$0xf0]  ;;  %v15511_v21 = vld [vmem:[#allocation5 + $0x7b4] sm:$0xf0] }
 0x59a   :  { %v16098_v23 = vld [vmem:[#allocation5 + $0x1a14] sm:$0xf]  ;;  %v13239_v42 = vor.u32 %v16034_v37, %v13236_v33  ;;  %7641 = vmatpush.bf16.msrb.mxu3 %v14039_v59  ;;  %v15383_v37 = vld [vmem:[#allocation5 + $0x3b4] sm:$0xf0]  ;;  %v11131_v3 = vor.u32 %v15511_v21, %v11130_v29 }
 0x59b   :  { %v13492_v19 = vld [vmem:[#allocation5 + $0x1a30] sm:$0xf0]  ;;  %v10874_v33 = vld [vmem:[#allocation5 + $0x598] sm:$0xf] }
 0x59c   :  { %v16162_v6 = vld [vmem:[#allocation5 + $0x1c14] sm:$0xf]  ;;  %v13495_v7 = vor.u32 %v16098_v23, %v13492_v19  ;;  %7600 = vmatpush.bf16.msrb.mxu0 %v13239_v42  ;;  %v17121_v23 = vpop.f32.mrf.mxu1  ;;  %v10363_v19 = vor.u32 %v15319_v9, %v10362_v27  ;;  %v10875_v59 = vor.u32 %v15447_v5, %v10874_v33  ;;  %v10842_v8 = vld [vmem:[#allocation5 + $0x558] sm:$0xf]  ;;  %v7378_v27 = vpop.f32.mrf.mxu0 }
 0x59d   :  { %v13748_v57 = vld [vmem:[#allocation5 + $0x1c30] sm:$0xf0]  ;;  %17632 = vst [vmem:[#allocation83_spill] sm:$0xff] %v17121_v23  ;;  %v15439_v42 = vld [vmem:[#allocation5 + $0x574] sm:$0xf0]  ;;  %v7379_v33 = vadd.f32 %v7378_v27, %v17117_v2 }
 0x59e   :  { %v16226_v15 = vld [vmem:[#allocation5 + $0x1e14] sm:$0xf]  ;;  %v13751_v30 = vor.u32 %v16162_v6, %v13748_v57  ;;  %7614 = vmatpush.bf16.msrb.mxu1 %v13495_v7  ;;  %v10619_v6 = vor.u32 %v15383_v37, %v10618_v20  ;;  %v10330_v57 = vld [vmem:[#allocation5 + $0x158] sm:$0xf]  ;;  %v10843_v12 = vor.u32 %v15439_v42, %v10842_v8 }
 0x59f   :  { %v14004_v4 = vld [vmem:[#allocation5 + $0x1e30] sm:$0xf0]  ;;  %7601 = vmatmul.bf16.vlgmr.msrb.gmra.mxu0 %v16810_v32  ;;  %v11098_v26 = vld [vmem:[#allocation5 + $0x758] sm:$0xf] }
 0x5a0   :  { %v14007_v34 = vor.u32 %v16226_v15, %v14004_v4  ;;  %7628 = vmatpush.bf16.msrb.mxu2 %v13751_v30  ;;  %7649 = vmatpush.bf16.msra.mxu0 %v10395_v49  ;;  %v15311_v15 = vld [vmem:[#allocation5 + $0x174] sm:$0xf0] }
 0x5a1   :  { %v10586_v4 = vld [vmem:[#allocation5 + $0x358] sm:$0xf]  ;;  %7615 = vmatmul.bf16.vlgmr.msrb.gmra.mxu1 %v16814_v41  ;;  %v10331_v5 = vor.u32 %v15311_v15, %v10330_v57 }
 0x5a2   :  { %7642 = vmatpush.bf16.msrb.mxu3 %v14007_v34  ;;  %7663 = vmatpush.bf16.msra.mxu1 %v10651_v16  ;;  %v15503_v9 = vld [vmem:[#allocation5 + $0x774] sm:$0xf0]  ;;  %v10587_v20 = vor.u32 %v15375_v48, %v10586_v4 }
 0x5a3   :  { %7629 = vmatmul.bf16.vlgmr.msrb.gmra.mxu2 %v16812_v38  ;;  %v10298_v60 = vld [vmem:[#allocation5 + $0x118] sm:$0xf]  ;;  %v11099_v62 = vor.u32 %v15503_v9, %v11098_v26 }
 0x5a4   :  { %7677 = vmatpush.bf16.msra.mxu2 %v10907_v14  ;;  %7650 = vmatpush.bf16.msra.mxu0 %v10363_v19  ;;  %v15303_v7 = vld [vmem:[#allocation5 + $0x134] sm:$0xf0]  ;;  %v17129_v14 = vpop.f32.mrf.mxu3  ;;  %v7392_v21 = vpop.f32.mrf.mxu1 }
 0x5a5   :  { %7643 = vmatmul.bf16.vlgmr.msrb.gmra.mxu3 %v16816_v46  ;;  %v10554_v30 = vld [vmem:[#allocation5 + $0x318] sm:$0xf]  ;;  %17634 = vst [vmem:[#allocation85_spill] sm:$0xff] %v17129_v14  ;;  %v10299_v29 = vor.u32 %v15303_v7, %v10298_v60  ;;  %v17134_v23 = vpop.f32.mrf.mxu0 }
 0x5a6   :  { %7691 = vmatpush.bf16.msra.mxu3 %v11163_v45  ;;  %7664 = vmatpush.bf16.msra.mxu1 %v10619_v6  ;;  %v15367_v34 = vld [vmem:[#allocation5 + $0x334] sm:$0xf0]  ;;  %17636 = vst [vmem:[#allocation87_spill] sm:$0xff] %v17134_v23 }
 0x5a7   :  { %v10810_v49 = vld [vmem:[#allocation5 + $0x518] sm:$0xf]  ;;  %v10555_v19 = vor.u32 %v15367_v34, %v10554_v30  ;;  %v7406_v34 = vpop.f32.mrf.mxu2 }
 0x5a8   :  { %7678 = vmatpush.bf16.msra.mxu2 %v10875_v59  ;;  %v15431_v16 = vld [vmem:[#allocation5 + $0x534] sm:$0xf0]  ;;  %7651 = vmatpush.bf16.msra.mxu0 %v10331_v5 }
 0x5a9   :  { %v11066_v45 = vld [vmem:[#allocation5 + $0x718] sm:$0xf]  ;;  %v10811_v6 = vor.u32 %v15431_v16, %v10810_v49 }
 0x5aa   :  { %7692 = vmatpush.bf16.msra.mxu3 %v11131_v3  ;;  %v15495_v37 = vld [vmem:[#allocation5 + $0x734] sm:$0xf0]  ;;  %7665 = vmatpush.bf16.msra.mxu1 %v10587_v20  ;;  %v7393_v3 = vadd.f32 %v7392_v21, %v7379_v33 }
 0x5ab   :  { %v10266_v59 = vld [vmem:[#allocation5 + $0xd8] sm:$0xf]  ;;  %v11067_v4 = vor.u32 %v15495_v37, %v11066_v45 }
 0x5ac   :  { %7679 = vmatpush.bf16.msra.mxu2 %v10843_v12  ;;  %v15295_v57 = vld [vmem:[#allocation5 + $0xf4] sm:$0xf0]  ;;  %7652 = vmatpush.bf16.msra.mxu0 %v10299_v29  ;;  %v7407_v27 = vadd.f32 %v7406_v34, %v7393_v3  ;;  %v7420_v45 = vpop.f32.mrf.mxu3 }
 0x5ad   :  { %v10522_v15 = vld [vmem:[#allocation5 + $0x2d8] sm:$0xf]  ;;  %v10267_v5 = vor.u32 %v15295_v57, %v10266_v59 }
 0x5ae   :  { %7693 = vmatpush.bf16.msra.mxu3 %v11099_v62  ;;  %v15359_v48 = vld [vmem:[#allocation5 + $0x2f4] sm:$0xf0]  ;;  %7666 = vmatpush.bf16.msra.mxu1 %v10555_v19  ;;  %v17132_v21 = vadd.f32 %v7420_v45, %v7407_v27 }
 0x5af   :  { %v10778_v8 = vld [vmem:[#allocation5 + $0x4d8] sm:$0xf]  ;;  %v10523_v2 = vor.u32 %v15359_v48, %v10522_v15 }
 0x5b0   :  { %v15423_v42 = vld [vmem:[#allocation5 + $0x4f4] sm:$0xf0]  ;;  %7680 = vmatpush.bf16.msra.mxu2 %v10811_v6  ;;  %7653 = vmatpush.bf16.msra.mxu0 %v10267_v5  ;;  %17635 = vst [vmem:[#allocation86_spill] sm:$0xff] %v17132_v21 }
 0x5b1   :  { %v11034_v26 = vld [vmem:[#allocation5 + $0x6d8] sm:$0xf]  ;;  %v10779_v20 = vor.u32 %v15423_v42, %v10778_v8 }
 0x5b2   :  { %v15487_v9 = vld [vmem:[#allocation5 + $0x6f4] sm:$0xf0]  ;;  %7694 = vmatpush.bf16.msra.mxu3 %v11067_v4  ;;  %7667 = vmatpush.bf16.msra.mxu1 %v10523_v2 }
 0x5b3   :  { %v10234_v12 = vld [vmem:[#allocation5 + $0x98] sm:$0xf]  ;;  %v11035_v30 = vor.u32 %v15487_v9, %v11034_v26 }
 0x5b4   :  { %v15287_v60 = vld [vmem:[#allocation5 + $0xb4] sm:$0xf0]  ;;  %7681 = vmatpush.bf16.msra.mxu2 %v10779_v20 }
 0x5b5   :  { %v10490_v7 = vld [vmem:[#allocation5 + $0x298] sm:$0xf]  ;;  %v10235_v29 = vor.u32 %v15287_v60, %v10234_v12 }
 0x5b6   :  { %v15351_v62 = vld [vmem:[#allocation5 + $0x2b4] sm:$0xf0]  ;;  %7695 = vmatpush.bf16.msra.mxu3 %v11035_v30 }
 0x5b7   :  { %v10746_v49 = vld [vmem:[#allocation5 + $0x498] sm:$0xf]  ;;  %v10491_v19 = vor.u32 %v15351_v62, %v10490_v7  ;;  %7654 = vmatpush.bf16.msra.mxu0 %v10235_v29 }
 0x5b8   :  { %v15415_v16 = vld [vmem:[#allocation5 + $0x4b4] sm:$0xf0] }
 0x5b9   :  { %v11002_v37 = vld [vmem:[#allocation5 + $0x698] sm:$0xf]  ;;  %v10747_v6 = vor.u32 %v15415_v16, %v10746_v49  ;;  %7668 = vmatpush.bf16.msra.mxu1 %v10491_v19 }
 0x5ba   :  { %v15479_v33 = vld [vmem:[#allocation5 + $0x6b4] sm:$0xf0] }
 0x5bb   :  { %v10202_v59 = vld [vmem:[#allocation5 + $0x58] sm:$0xf]  ;;  %v11003_v4 = vor.u32 %v15479_v33, %v11002_v37  ;;  %7682 = vmatpush.bf16.msra.mxu2 %v10747_v6 }
 0x5bc   :  { %v15279_v57 = vld [vmem:[#allocation5 + $0x74] sm:$0xf0] }
 0x5bd   :  { %v10458_v15 = vld [vmem:[#allocation5 + $0x258] sm:$0xf]  ;;  %v10203_v9 = vor.u32 %v15279_v57, %v10202_v59  ;;  %7696 = vmatpush.bf16.msra.mxu3 %v11003_v4 }
 0x5be   :  { %v15343_v48 = vld [vmem:[#allocation5 + $0x274] sm:$0xf0] }
 0x5bf   :  { %v10714_v8 = vld [vmem:[#allocation5 + $0x458] sm:$0xf]  ;;  %v10459_v2 = vor.u32 %v15343_v48, %v10458_v15  ;;  %7655 = vmatpush.bf16.msra.mxu0 %v10203_v9 }
 0x5c0   :  { %v15407_v42 = vld [vmem:[#allocation5 + $0x474] sm:$0xf0] }
 0x5c1   :  { %v10970_v3 = vld [vmem:[#allocation5 + $0x658] sm:$0xf]  ;;  %v10715_v20 = vor.u32 %v15407_v42, %v10714_v8  ;;  %7669 = vmatpush.bf16.msra.mxu1 %v10459_v2 }
 0x5c2   :  { %v15471_v26 = vld [vmem:[#allocation5 + $0x674] sm:$0xf0] }
 0x5c3   :  { %v10170_v5 = vld [vmem:[#allocation5 + $0x18] sm:$0xf]  ;;  %v10971_v62 = vor.u32 %v15471_v26, %v10970_v3  ;;  %7683 = vmatpush.bf16.msra.mxu2 %v10715_v20 }
 0x5c4   :  { %v15271_v12 = vld [vmem:[#allocation5 + $0x34] sm:$0xf0] }
 0x5c5   :  { %v10426_v60 = vld [vmem:[#allocation5 + $0x218] sm:$0xf]  ;;  %v10171_v33 = vor.u32 %v15271_v12, %v10170_v5  ;;  %7697 = vmatpush.bf16.msra.mxu3 %v10971_v62 }
 0x5c6   :  { %v15335_v7 = vld [vmem:[#allocation5 + $0x234] sm:$0xf0] }
 0x5c7   :  { %v10682_v34 = vld [vmem:[#allocation5 + $0x418] sm:$0xf]  ;;  %v10427_v19 = vor.u32 %v15335_v7, %v10426_v60  ;;  %7656 = vmatpush.bf16.msra.mxu0 %v10171_v33  ;;  %v17136_v7 = vpop.f32.mrf.mxu1 }
 0x5c8   :  { %v15399_v30 = vld [vmem:[#allocation5 + $0x434] sm:$0xf0]  ;;  %17637 = vst [vmem:[#allocation88_spill] sm:$0xff] %v17136_v7 }
 0x5c9   :  { %v10938_v49 = vld [vmem:[#allocation5 + $0x618] sm:$0xf]  ;;  %v10683_v6 = vor.u32 %v15399_v30, %v10682_v34  ;;  %7670 = vmatpush.bf16.msra.mxu1 %v10427_v19 }
 0x5ca   :  { %v15463_v16 = vld [vmem:[#allocation5 + $0x634] sm:$0xf0]  ;;  %7657 = vmatmul.bf16.vlgmr.msra.gmra.mxu0 %v16774_v58 }
 0x5cb   :  { %v11418_v27 = vld [vmem:[#allocation5 + $0x9d8] sm:$0xf]  ;;  %v10939_v4 = vor.u32 %v15463_v16, %v10938_v49  ;;  %7684 = vmatpush.bf16.msra.mxu2 %v10683_v6 }
 0x5cc   :  { %v15583_v45 = vld [vmem:[#allocation5 + $0x9f4] sm:$0xf0]  ;;  %7671 = vmatmul.bf16.vlgmr.msra.gmra.mxu1 %v16780_v10 }
 0x5cd   :  { %v11674_v37 = vld [vmem:[#allocation5 + $0xbd8] sm:$0xf]  ;;  %v11419_v8 = vor.u32 %v15583_v45, %v11418_v27  ;;  %7698 = vmatpush.bf16.msra.mxu3 %v10939_v4  ;;  %v17145_v4 = vpop.f32.mrf.mxu2 }
 0x5ce   :  { %v15647_v29 = vld [vmem:[#allocation5 + $0xbf4] sm:$0xf0]  ;;  %7685 = vmatmul.bf16.vlgmr.msra.gmra.mxu2 %v16776_v1  ;;  %17639 = vst [vmem:[#allocation90_spill] sm:$0xff] %v17145_v4 }
 0x5cf   :  { %v11930_v59 = vld [vmem:[#allocation5 + $0xdd8] sm:$0xf]  ;;  %v11675_v42 = vor.u32 %v15647_v29, %v11674_v37  ;;  %7705 = vmatpush.bf16.msrb.mxu0 %v11419_v8 }
 0x5d0   :  { %v15711_v57 = vld [vmem:[#allocation5 + $0xdf4] sm:$0xf0]  ;;  %7699 = vmatmul.bf16.vlgmr.msra.gmra.mxu3 %v16782_v17 }
 0x5d1   :  { %v12186_v15 = vld [vmem:[#allocation5 + $0xfd8] sm:$0xf]  ;;  %v11931_v3 = vor.u32 %v15711_v57, %v11930_v59  ;;  %7719 = vmatpush.bf16.msrb.mxu1 %v11675_v42 }
 0x5d2   :  { %v15775_v48 = vld [vmem:[#allocation5 + $0xff4] sm:$0xf0] }
 0x5d3   :  { %v11386_v26 = vld [vmem:[#allocation5 + $0x998] sm:$0xf]  ;;  %v12187_v9 = vor.u32 %v15775_v48, %v12186_v15  ;;  %7733 = vmatpush.bf16.msrb.mxu2 %v11931_v3 }
 0x5d4   :  { %v15575_v21 = vld [vmem:[#allocation5 + $0x9b4] sm:$0xf0] }
 0x5d5   :  { %v11642_v14 = vld [vmem:[#allocation5 + $0xb98] sm:$0xf]  ;;  %v11387_v60 = vor.u32 %v15575_v21, %v11386_v26  ;;  %7747 = vmatpush.bf16.msrb.mxu3 %v12187_v9 }
 0x5d6   :  { %v15639_v5 = vld [vmem:[#allocation5 + $0xbb4] sm:$0xf0] }
 0x5d7   :  { %v11898_v12 = vld [vmem:[#allocation5 + $0xd98] sm:$0xf]  ;;  %v11643_v34 = vor.u32 %v15639_v5, %v11642_v14  ;;  %7706 = vmatpush.bf16.msrb.mxu0 %v11387_v60 }
 0x5d8   :  { %v15703_v55 = vld [vmem:[#allocation5 + $0xdb4] sm:$0xf0] }
 0x5d9   :  { %v12154_v2 = vld [vmem:[#allocation5 + $0xf98] sm:$0xf]  ;;  %v11899_v62 = vor.u32 %v15703_v55, %v11898_v12  ;;  %v17142_v55 = vld [vmem:[#allocation7] sm:$0xff]  ;;  %7720 = vmatpush.bf16.msrb.mxu1 %v11643_v34  ;;  %v7434_v12 = vpop.f32.mrf.mxu0 }
 0x5da   :  { %v15767_v20 = vld [vmem:[#allocation5 + $0xfb4] sm:$0xf0]  ;;  %17638 = vst [vmem:[#allocation89_spill] sm:$0xff] %v17142_v55  ;;  %v17563_v14 = vperm.slane %v17142_v55, 5 }
 0x5db   :  { %v11354_v30 = vld [vmem:[#allocation5 + $0x958] sm:$0xf]  ;;  %v12155_v27 = vor.u32 %v15767_v20, %v12154_v2  ;;  %7734 = vmatpush.bf16.msrb.mxu2 %v11899_v62  ;;  %v17147_v2 = vpop.f32.mrf.mxu3 }
 0x5dc   :  { %v15567_v49 = vld [vmem:[#allocation5 + $0x974] sm:$0xf0]  ;;  %17640 = vst [vmem:[#allocation91_spill] sm:$0xff] %v17147_v2  ;;  %v7435_v60 = vadd.f32 %v7434_v12, %v17563_v14 }
 0x5dd   :  { %v11610_v16 = vld [vmem:[#allocation5 + $0xb58] sm:$0xf]  ;;  %v11355_v21 = vor.u32 %v15567_v49, %v11354_v30  ;;  %7748 = vmatpush.bf16.msrb.mxu3 %v12155_v27  ;;  %v7448_v27 = vpop.f32.mrf.mxu1 }
 0x5de   :  { %v15631_v45 = vld [vmem:[#allocation5 + $0xb74] sm:$0xf0] }
 0x5df   :  { %v11866_v37 = vld [vmem:[#allocation5 + $0xd58] sm:$0xf]  ;;  %v11611_v57 = vor.u32 %v15631_v45, %v11610_v16  ;;  %7707 = vmatpush.bf16.msrb.mxu0 %v11355_v21 }
 0x5e0   :  { %v15695_v33 = vld [vmem:[#allocation5 + $0xd74] sm:$0xf0] }
 0x5e1   :  { %v12122_v29 = vld [vmem:[#allocation5 + $0xf58] sm:$0xf]  ;;  %v11867_v19 = vor.u32 %v15695_v33, %v11866_v37  ;;  %7721 = vmatpush.bf16.msrb.mxu1 %v11611_v57 }
 0x5e2   :  { %v15759_v59 = vld [vmem:[#allocation5 + $0xf74] sm:$0xf0] }
 0x5e3   :  { %v11322_v6 = vld [vmem:[#allocation5 + $0x918] sm:$0xf]  ;;  %v12123_v8 = vor.u32 %v15759_v59, %v12122_v29  ;;  %7735 = vmatpush.bf16.msrb.mxu2 %v11867_v19  ;;  %v7449_v59 = vadd.f32 %v7448_v27, %v7435_v60 }
 0x5e4   :  { %v15559_v15 = vld [vmem:[#allocation5 + $0x934] sm:$0xf0] }
 0x5e5   :  { %v11578_v48 = vld [vmem:[#allocation5 + $0xb18] sm:$0xf]  ;;  %v11323_v20 = vor.u32 %v15559_v15, %v11322_v6  ;;  %7749 = vmatpush.bf16.msrb.mxu3 %v12123_v8 }
 0x5e6   :  { %v15623_v42 = vld [vmem:[#allocation5 + $0xb34] sm:$0xf0] }
 0x5e7   :  { %v11834_v3 = vld [vmem:[#allocation5 + $0xd18] sm:$0xf]  ;;  %v11579_v34 = vor.u32 %v15623_v42, %v11578_v48  ;;  %7708 = vmatpush.bf16.msrb.mxu0 %v11323_v20  ;;  %v7476_v20 = vpop.f32.mrf.mxu3 }
 0x5e8   :  { %v15687_v26 = vld [vmem:[#allocation5 + $0xd34] sm:$0xf0] }
 0x5e9   :  { %v12090_v9 = vld [vmem:[#allocation5 + $0xf18] sm:$0xf]  ;;  %v11835_v62 = vor.u32 %v15687_v26, %v11834_v3  ;;  %7722 = vmatpush.bf16.msrb.mxu1 %v11579_v34 }
 0x5ea   :  { %v15751_v5 = vld [vmem:[#allocation5 + $0xf34] sm:$0xf0] }
 0x5eb   :  { %v11290_v30 = vld [vmem:[#allocation5 + $0x8d8] sm:$0xf]  ;;  %v12091_v45 = vor.u32 %v15751_v5, %v12090_v9  ;;  %7736 = vmatpush.bf16.msrb.mxu2 %v11835_v62  ;;  %v7462_v5 = vpop.f32.mrf.mxu2 }
 0x5ec   :  { %v15551_v49 = vld [vmem:[#allocation5 + $0x8f4] sm:$0xf0]  ;;  %v7463_v60 = vadd.f32 %v7462_v5, %v7449_v59 }
 0x5ed   :  { %v11546_v16 = vld [vmem:[#allocation5 + $0xad8] sm:$0xf]  ;;  %v11291_v6 = vor.u32 %v15551_v49, %v11290_v30  ;;  %7750 = vmatpush.bf16.msrb.mxu3 %v12091_v45 }
 0x5ee   :  { %v15615_v37 = vld [vmem:[#allocation5 + $0xaf4] sm:$0xf0] }
 0x5ef   :  { %v11802_v33 = vld [vmem:[#allocation5 + $0xcd8] sm:$0xf]  ;;  %v11547_v57 = vor.u32 %v15615_v37, %v11546_v16  ;;  %7709 = vmatpush.bf16.msrb.mxu0 %v11291_v6  ;;  %v17151_v37 = vadd.f32 %v7476_v20, %v7463_v60 }
 0x5f0   :  { %v15679_v29 = vld [vmem:[#allocation5 + $0xcf4] sm:$0xf0] }
 0x5f1   :  { %v12058_v2 = vld [vmem:[#allocation5 + $0xed8] sm:$0xf]  ;;  %v11803_v19 = vor.u32 %v15679_v29, %v11802_v33  ;;  %7723 = vmatpush.bf16.msrb.mxu1 %v11547_v57 }
 0x5f2   :  { %v15743_v21 = vld [vmem:[#allocation5 + $0xef4] sm:$0xf0] }
 0x5f3   :  { %v11258_v15 = vld [vmem:[#allocation5 + $0x898] sm:$0xf]  ;;  %v12059_v3 = vor.u32 %v15743_v21, %v12058_v2  ;;  %7737 = vmatpush.bf16.msrb.mxu2 %v11803_v19 }
 0x5f4   :  { %v15543_v48 = vld [vmem:[#allocation5 + $0x8b4] sm:$0xf0] }
 0x5f5   :  { %v11514_v42 = vld [vmem:[#allocation5 + $0xa98] sm:$0xf]  ;;  %v11259_v27 = vor.u32 %v15543_v48, %v11258_v15  ;;  %7751 = vmatpush.bf16.msrb.mxu3 %v12059_v3 }
 0x5f6   :  { %v15607_v26 = vld [vmem:[#allocation5 + $0xab4] sm:$0xf0] }
 0x5f7   :  { %v11770_v8 = vld [vmem:[#allocation5 + $0xc98] sm:$0xf]  ;;  %v11515_v34 = vor.u32 %v15607_v26, %v11514_v42  ;;  %7710 = vmatpush.bf16.msrb.mxu0 %v11259_v27 }
 0x5f8   :  { %v15671_v9 = vld [vmem:[#allocation5 + $0xcb4] sm:$0xf0] }
 0x5f9   :  { %v12026_v12 = vld [vmem:[#allocation5 + $0xe98] sm:$0xf]  ;;  %v11771_v62 = vor.u32 %v15671_v9, %v11770_v8  ;;  %7724 = vmatpush.bf16.msrb.mxu1 %v11515_v34 }
 0x5fa   :  { %v15735_v14 = vld [vmem:[#allocation5 + $0xeb4] sm:$0xf0] }
 0x5fb   :  { %v11226_v30 = vld [vmem:[#allocation5 + $0x858] sm:$0xf]  ;;  %v12027_v2 = vor.u32 %v15735_v14, %v12026_v12  ;;  %7738 = vmatpush.bf16.msrb.mxu2 %v11771_v62 }
 0x5fc   :  { %v15535_v49 = vld [vmem:[#allocation5 + $0x874] sm:$0xf0] }
 0x5fd   :  { %v11482_v16 = vld [vmem:[#allocation5 + $0xa58] sm:$0xf]  ;;  %v11227_v59 = vor.u32 %v15535_v49, %v11226_v30  ;;  %7752 = vmatpush.bf16.msrb.mxu3 %v12027_v2 }
 0x5fe   :  { %v15599_v45 = vld [vmem:[#allocation5 + $0xa74] sm:$0xf0] }
 0x5ff   :  { %v11738_v33 = vld [vmem:[#allocation5 + $0xc58] sm:$0xf]  ;;  %v11483_v57 = vor.u32 %v15599_v45, %v11482_v16  ;;  %7711 = vmatpush.bf16.msrb.mxu0 %v11227_v59 }
 0x600   :  { %v15663_v29 = vld [vmem:[#allocation5 + $0xc74] sm:$0xf0] }
 0x601   :  { %v11994_v21 = vld [vmem:[#allocation5 + $0xe58] sm:$0xf]  ;;  %v11739_v19 = vor.u32 %v15663_v29, %v11738_v33  ;;  %7725 = vmatpush.bf16.msrb.mxu1 %v11483_v57 }
 0x602   :  { %v15727_v4 = vld [vmem:[#allocation5 + $0xe74] sm:$0xf0] }
 0x603   :  { %v11194_v6 = vld [vmem:[#allocation5 + $0x818] sm:$0xf]  ;;  %v11995_v8 = vor.u32 %v15727_v4, %v11994_v21  ;;  %7739 = vmatpush.bf16.msrb.mxu2 %v11739_v19  ;;  %v17153_v21 = vpop.f32.mrf.mxu0 }
 0x604   :  { %v15527_v15 = vld [vmem:[#allocation5 + $0x834] sm:$0xf0]  ;;  %17641 = vst [vmem:[#allocation92_spill] sm:$0xff] %v17153_v21 }
 0x605   :  { %v11450_v48 = vld [vmem:[#allocation5 + $0xa18] sm:$0xf]  ;;  %v11195_v27 = vor.u32 %v15527_v15, %v11194_v6  ;;  %7753 = vmatpush.bf16.msrb.mxu3 %v11995_v8 }
 0x606   :  { %v15591_v42 = vld [vmem:[#allocation5 + $0xa34] sm:$0xf0] }
 0x607   :  { %v11706_v26 = vld [vmem:[#allocation5 + $0xc18] sm:$0xf]  ;;  %v11451_v34 = vor.u32 %v15591_v42, %v11450_v48  ;;  %7712 = vmatpush.bf16.msrb.mxu0 %v11195_v27  ;;  %v17155_v42 = vpop.f32.mrf.mxu1 }
 0x608   :  { %v15655_v3 = vld [vmem:[#allocation5 + $0xc34] sm:$0xf0]  ;;  %17642 = vst [vmem:[#allocation93_spill] sm:$0xff] %v17155_v42 }
 0x609   :  { %v11962_v14 = vld [vmem:[#allocation5 + $0xe18] sm:$0xf]  ;;  %v11707_v62 = vor.u32 %v15655_v3, %v11706_v26  ;;  %7726 = vmatpush.bf16.msrb.mxu1 %v11451_v34 }
 0x60a   :  { %v15719_v9 = vld [vmem:[#allocation5 + $0xe34] sm:$0xf0]  ;;  %7713 = vmatmul.bf16.vlgmr.msrb.gmra.mxu0 %v16786_v39 }
 0x60b   :  { %v12442_v5 = vld [vmem:[#allocation5 + $0x11d8] sm:$0xf]  ;;  %v11963_v2 = vor.u32 %v15719_v9, %v11962_v14  ;;  %7740 = vmatpush.bf16.msrb.mxu2 %v11707_v62 }
 0x60c   :  { %v15839_v12 = vld [vmem:[#allocation5 + $0x11f4] sm:$0xf0]  ;;  %7727 = vmatmul.bf16.vlgmr.msrb.gmra.mxu1 %v16790_v44 }
 0x60d   :  { %v12698_v60 = vld [vmem:[#allocation5 + $0x13d8] sm:$0xf]  ;;  %v12443_v4 = vor.u32 %v15839_v12, %v12442_v5  ;;  %7754 = vmatpush.bf16.msrb.mxu3 %v11963_v2 }
 0x60e   :  { %v15903_v20 = vld [vmem:[#allocation5 + $0x13f4] sm:$0xf0]  ;;  %7741 = vmatmul.bf16.vlgmr.msrb.gmra.mxu2 %v16788_v43 }
 0x60f   :  { %v12954_v30 = vld [vmem:[#allocation5 + $0x15d8] sm:$0xf]  ;;  %v12699_v33 = vor.u32 %v15903_v20, %v12698_v60  ;;  %7761 = vmatpush.bf16.msra.mxu0 %v12443_v4  ;;  %v17163_v4 = vpop.f32.mrf.mxu3 }
 0x610   :  { %v15967_v49 = vld [vmem:[#allocation5 + $0x15f4] sm:$0xf0]  ;;  %7755 = vmatmul.bf16.vlgmr.msrb.gmra.mxu3 %v16792_v47  ;;  %17644 = vst [vmem:[#allocation95_spill] sm:$0xff] %v17163_v4 }
 0x611   :  { %v13210_v16 = vld [vmem:[#allocation5 + $0x17d8] sm:$0xf]  ;;  %v12955_v29 = vor.u32 %v15967_v49, %v12954_v30  ;;  %7775 = vmatpush.bf16.msra.mxu1 %v12699_v33 }
 0x612   :  { %v16031_v45 = vld [vmem:[#allocation5 + $0x17f4] sm:$0xf0] }
 0x613   :  { %v12410_v7 = vld [vmem:[#allocation5 + $0x1198] sm:$0xf]  ;;  %v13211_v6 = vor.u32 %v16031_v45, %v13210_v16  ;;  %7789 = vmatpush.bf16.msra.mxu2 %v12955_v29 }
 0x614   :  { %v15831_v23 = vld [vmem:[#allocation5 + $0x11b4] sm:$0xf0] }
 0x615   :  { %v12666_v59 = vld [vmem:[#allocation5 + $0x1398] sm:$0xf]  ;;  %v12411_v26 = vor.u32 %v15831_v23, %v12410_v7  ;;  %7803 = vmatpush.bf16.msra.mxu3 %v13211_v6  ;;  %v17161_v7 = vpop.f32.mrf.mxu2  ;;  %v7490_v6 = vpop.f32.mrf.mxu0 }
 0x616   :  { %v15895_v15 = vld [vmem:[#allocation5 + $0x13b4] sm:$0xf0]  ;;  %17643 = vst [vmem:[#allocation94_spill] sm:$0xff] %v17161_v7 }
 0x617   :  { %v15959_v57 = vld [vmem:[#allocation5 + $0x15b4] sm:$0xf0]  ;;  %v12667_v8 = vor.u32 %v15895_v15, %v12666_v59  ;;  %7762 = vmatpush.bf16.msra.mxu0 %v12411_v26 }
 0x618   :  { %v13178_v19 = vld [vmem:[#allocation5 + $0x1798] sm:$0xf]  ;;  %v12923_v3 = vor.u32 %v15959_v57, %v12922_v50 }
 0x619   :  { %v16023_v48 = vld [vmem:[#allocation5 + $0x17b4] sm:$0xf0]  ;;  %7776 = vmatpush.bf16.msra.mxu1 %v12667_v8 }
 0x61a   :  { %v12378_v14 = vld [vmem:[#allocation5 + $0x1158] sm:$0xf]  ;;  %v13179_v12 = vor.u32 %v16023_v48, %v13178_v19  ;;  %7790 = vmatpush.bf16.msra.mxu2 %v12923_v3  ;;  %v7491_v19 = vadd.f32 %v7490_v6, %v17151_v37  ;;  %v7504_v3 = vpop.f32.mrf.mxu1 }
 0x61b   :  { %v15823_v9 = vld [vmem:[#allocation5 + $0x1174] sm:$0xf0] }
 0x61c   :  { %v12634_v5 = vld [vmem:[#allocation5 + $0x1358] sm:$0xf]  ;;  %v12379_v50 = vor.u32 %v15823_v9, %v12378_v14  ;;  %7804 = vmatpush.bf16.msra.mxu3 %v13179_v12 }
 0x61d   :  { %v15887_v60 = vld [vmem:[#allocation5 + $0x1374] sm:$0xf0]  ;;  %v17168_v55 = vpop.f32.mrf.mxu0 }
 0x61e   :  { %v12890_v27 = vld [vmem:[#allocation5 + $0x1558] sm:$0xf]  ;;  %v12635_v49 = vor.u32 %v15887_v60, %v12634_v5  ;;  %7763 = vmatpush.bf16.msra.mxu0 %v12379_v50  ;;  %v7505_v60 = vadd.f32 %v7504_v3, %v7491_v19  ;;  %v7532_v19 = vpop.f32.mrf.mxu3  ;;  %17645 = vst [vmem:[#allocation96_spill] sm:$0xff] %v17168_v55 }
 0x61f   :  { %v15951_v20 = vld [vmem:[#allocation5 + $0x1574] sm:$0xf0] }
 0x620   :  { %v13146_v30 = vld [vmem:[#allocation5 + $0x1758] sm:$0xf]  ;;  %v12891_v34 = vor.u32 %v15951_v20, %v12890_v27  ;;  %7777 = vmatpush.bf16.msra.mxu1 %v12635_v49 }
 0x621   :  { %v16015_v23 = vld [vmem:[#allocation5 + $0x1774] sm:$0xf0] }
 0x622   :  { %v12346_v62 = vld [vmem:[#allocation5 + $0x1118] sm:$0xf]  ;;  %v13147_v2 = vor.u32 %v16015_v23, %v13146_v30  ;;  %7791 = vmatpush.bf16.msra.mxu2 %v12891_v34 }
 0x623   :  { %v15815_v16 = vld [vmem:[#allocation5 + $0x1134] sm:$0xf0] }
 0x624   :  { %v12602_v45 = vld [vmem:[#allocation5 + $0x1318] sm:$0xf]  ;;  %v12347_v48 = vor.u32 %v15815_v16, %v12346_v62  ;;  %7805 = vmatpush.bf16.msra.mxu3 %v13147_v2 }
 0x625   :  { %v15879_v33 = vld [vmem:[#allocation5 + $0x1334] sm:$0xf0] }
 0x626   :  { %v12858_v29 = vld [vmem:[#allocation5 + $0x1518] sm:$0xf]  ;;  %v12603_v26 = vor.u32 %v15879_v33, %v12602_v45  ;;  %7764 = vmatpush.bf16.msra.mxu0 %v12347_v48  ;;  %v7518_v33 = vpop.f32.mrf.mxu2 }
 0x627   :  { %v15943_v59 = vld [vmem:[#allocation5 + $0x1534] sm:$0xf0]  ;;  %v7519_v6 = vadd.f32 %v7518_v33, %v7505_v60 }
 0x628   :  { %v13114_v15 = vld [vmem:[#allocation5 + $0x1718] sm:$0xf]  ;;  %v12859_v8 = vor.u32 %v15943_v59, %v12858_v29  ;;  %7778 = vmatpush.bf16.msra.mxu1 %v12603_v26 }
 0x629   :  { %v16007_v57 = vld [vmem:[#allocation5 + $0x1734] sm:$0xf0]  ;;  %v17166_v26 = vadd.f32 %v7532_v19, %v7519_v6 }
 0x62a   :  { %v12314_v14 = vld [vmem:[#allocation5 + $0x10d8] sm:$0xf]  ;;  %v13115_v12 = vor.u32 %v16007_v57, %v13114_v15  ;;  %7792 = vmatpush.bf16.msra.mxu2 %v12859_v8 }
 0x62b   :  { %v15807_v9 = vld [vmem:[#allocation5 + $0x10f4] sm:$0xf0] }
 0x62c   :  { %v12570_v5 = vld [vmem:[#allocation5 + $0x12d8] sm:$0xf]  ;;  %v12315_v50 = vor.u32 %v15807_v9, %v12314_v14  ;;  %7806 = vmatpush.bf16.msra.mxu3 %v13115_v12 }
 0x62d   :  { %v15871_v27 = vld [vmem:[#allocation5 + $0x12f4] sm:$0xf0] }
 0x62e   :  { %v12826_v20 = vld [vmem:[#allocation5 + $0x14d8] sm:$0xf]  ;;  %v12571_v37 = vor.u32 %v15871_v27, %v12570_v5  ;;  %7765 = vmatpush.bf16.msra.mxu0 %v12315_v50 }
 0x62f   :  { %v15935_v30 = vld [vmem:[#allocation5 + $0x14f4] sm:$0xf0] }
 0x630   :  { %v13082_v23 = vld [vmem:[#allocation5 + $0x16d8] sm:$0xf]  ;;  %v12827_v49 = vor.u32 %v15935_v30, %v12826_v20  ;;  %7779 = vmatpush.bf16.msra.mxu1 %v12571_v37 }
 0x631   :  { %v15999_v4 = vld [vmem:[#allocation5 + $0x16f4] sm:$0xf0] }
 0x632   :  { %v12282_v34 = vld [vmem:[#allocation5 + $0x1098] sm:$0xf]  ;;  %v13083_v45 = vor.u32 %v15999_v4, %v13082_v23  ;;  %7793 = vmatpush.bf16.msra.mxu2 %v12827_v49 }
 0x633   :  { %v15799_v62 = vld [vmem:[#allocation5 + $0x10b4] sm:$0xf0] }
 0x634   :  { %v12538_v16 = vld [vmem:[#allocation5 + $0x1298] sm:$0xf]  ;;  %v12283_v48 = vor.u32 %v15799_v62, %v12282_v34  ;;  %7807 = vmatpush.bf16.msra.mxu3 %v13083_v45 }
 0x635   :  { %v15863_v2 = vld [vmem:[#allocation5 + $0x12b4] sm:$0xf0] }
 0x636   :  { %v12794_v29 = vld [vmem:[#allocation5 + $0x1498] sm:$0xf]  ;;  %v12539_v8 = vor.u32 %v15863_v2, %v12538_v16  ;;  %7766 = vmatpush.bf16.msra.mxu0 %v12283_v48 }
 0x637   :  { %v15927_v59 = vld [vmem:[#allocation5 + $0x14b4] sm:$0xf0] }
 0x638   :  { %v13050_v15 = vld [vmem:[#allocation5 + $0x1698] sm:$0xf]  ;;  %v12795_v3 = vor.u32 %v15927_v59, %v12794_v29  ;;  %7780 = vmatpush.bf16.msra.mxu1 %v12539_v8 }
 0x639   :  { %v15991_v57 = vld [vmem:[#allocation5 + $0x16b4] sm:$0xf0] }
 0x63a   :  { %v12250_v14 = vld [vmem:[#allocation5 + $0x1058] sm:$0xf]  ;;  %v13051_v4 = vor.u32 %v15991_v57, %v13050_v15  ;;  %7794 = vmatpush.bf16.msra.mxu2 %v12795_v3 }
 0x63b   :  { %v15791_v9 = vld [vmem:[#allocation5 + $0x1074] sm:$0xf0] }
 0x63c   :  { %v12506_v5 = vld [vmem:[#allocation5 + $0x1258] sm:$0xf]  ;;  %v12251_v23 = vor.u32 %v15791_v9, %v12250_v14  ;;  %7808 = vmatpush.bf16.msra.mxu3 %v13051_v4 }
 0x63d   :  { %v15855_v12 = vld [vmem:[#allocation5 + $0x1274] sm:$0xf0] }
 0x63e   :  { %v12762_v27 = vld [vmem:[#allocation5 + $0x1458] sm:$0xf]  ;;  %v12507_v37 = vor.u32 %v15855_v12, %v12506_v5  ;;  %7767 = vmatpush.bf16.msra.mxu0 %v12251_v23 }
 0x63f   :  { %v15919_v20 = vld [vmem:[#allocation5 + $0x1474] sm:$0xf0] }
 0x640   :  { %v13018_v60 = vld [vmem:[#allocation5 + $0x1658] sm:$0xf]  ;;  %v12763_v49 = vor.u32 %v15919_v20, %v12762_v27  ;;  %7781 = vmatpush.bf16.msra.mxu1 %v12507_v37 }
 0x641   :  { %v15983_v30 = vld [vmem:[#allocation5 + $0x1674] sm:$0xf0] }
 0x642   :  { %v12218_v50 = vld [vmem:[#allocation5 + $0x1018] sm:$0xf]  ;;  %v13019_v2 = vor.u32 %v15983_v30, %v13018_v60  ;;  %7795 = vmatpush.bf16.msra.mxu2 %v12763_v49 }
 0x643   :  { %v15783_v34 = vld [vmem:[#allocation5 + $0x1034] sm:$0xf0] }
 0x644   :  { %v12474_v62 = vld [vmem:[#allocation5 + $0x1218] sm:$0xf]  ;;  %v12219_v19 = vor.u32 %v15783_v34, %v12218_v50  ;;  %7809 = vmatpush.bf16.msra.mxu3 %v13019_v2 }
 0x645   :  { %v15847_v16 = vld [vmem:[#allocation5 + $0x1234] sm:$0xf0] }
 0x646   :  { %v12730_v33 = vld [vmem:[#allocation5 + $0x1418] sm:$0xf]  ;;  %v12475_v8 = vor.u32 %v15847_v16, %v12474_v62  ;;  %7768 = vmatpush.bf16.msra.mxu0 %v12219_v19  ;;  %v17170_v62 = vpop.f32.mrf.mxu1 }
 0x647   :  { %v15911_v45 = vld [vmem:[#allocation5 + $0x1434] sm:$0xf0]  ;;  %17646 = vst [vmem:[#allocation97_spill] sm:$0xff] %v17170_v62  ;;  %v10876_v62 = vld [vmem:[#allocation5 + $0x5b8] sm:$0xf0] }
 0x648   :  { %v12986_v29 = vld [vmem:[#allocation5 + $0x1618] sm:$0xf]  ;;  %v12731_v3 = vor.u32 %v15911_v45, %v12730_v33  ;;  %7782 = vmatpush.bf16.msra.mxu1 %v12475_v8 }
 0x649   :  { %v15975_v59 = vld [vmem:[#allocation5 + $0x1634] sm:$0xf0]  ;;  %7769 = vmatmul.bf16.vlgmr.msra.gmra.mxu0 %v16798_v31 }
 0x64a   :  { %v13466_v6 = vld [vmem:[#allocation5 + $0x19d8] sm:$0xf]  ;;  %v12987_v4 = vor.u32 %v15975_v59, %v12986_v29  ;;  %7796 = vmatpush.bf16.msra.mxu2 %v12731_v3 }
 0x64b   :  { %v16095_v15 = vld [vmem:[#allocation5 + $0x19f4] sm:$0xf0]  ;;  %7783 = vmatmul.bf16.vlgmr.msra.gmra.mxu1 %v16802_v36 }
 0x64c   :  { %v13722_v57 = vld [vmem:[#allocation5 + $0x1bd8] sm:$0xf]  ;;  %v13467_v27 = vor.u32 %v16095_v15, %v13466_v6  ;;  %7810 = vmatpush.bf16.msra.mxu3 %v12987_v4 }
 0x64d   :  { %v16159_v48 = vld [vmem:[#allocation5 + $0x1bf4] sm:$0xf0]  ;;  %7797 = vmatmul.bf16.vlgmr.msra.gmra.mxu2 %v16800_v35 }
 0x64e   :  { %v13978_v14 = vld [vmem:[#allocation5 + $0x1dd8] sm:$0xf]  ;;  %v13723_v20 = vor.u32 %v16159_v48, %v13722_v57  ;;  %7817 = vmatpush.bf16.msrb.mxu0 %v13467_v27 }
 0x64f   :  { %v16223_v9 = vld [vmem:[#allocation5 + $0x1df4] sm:$0xf0]  ;;  %7811 = vmatmul.bf16.vlgmr.msra.gmra.mxu3 %v16804_v40 }
 0x650   :  { %v14234_v5 = vld [vmem:[#allocation5 + $0x1fd8] sm:$0xf]  ;;  %v13979_v60 = vor.u32 %v16223_v9, %v13978_v14  ;;  %7831 = vmatpush.bf16.msrb.mxu1 %v13723_v20 }
 0x651   :  { %v16287_v12 = vld [vmem:[#allocation5 + $0x1ff4] sm:$0xf0] }
 0x652   :  { %v13434_v30 = vld [vmem:[#allocation5 + $0x1998] sm:$0xf]  ;;  %v14235_v23 = vor.u32 %v16287_v12, %v14234_v5  ;;  %7845 = vmatpush.bf16.msrb.mxu2 %v13979_v60  ;;  %v17176_v5 = vpop.f32.mrf.mxu2  ;;  %v17178_v60 = vpop.f32.mrf.mxu3 }
 0x653   :  { %v16087_v7 = vld [vmem:[#allocation5 + $0x19b4] sm:$0xf0]  ;;  %17647 = vst [vmem:[#allocation98_spill] sm:$0xff] %v17176_v5  ;;  %v15379_v5 = vld [vmem:[#allocation5 + $0x39c] sm:$0xf] }
 0x654   :  { %v13690_v42 = vld [vmem:[#allocation5 + $0x1b98] sm:$0xf]  ;;  %v13435_v16 = vor.u32 %v16087_v7, %v13434_v30  ;;  %7859 = vmatpush.bf16.msrb.mxu3 %v14235_v23  ;;  %17648 = vst [vmem:[#allocation99_spill] sm:$0xff] %v17178_v60  ;;  %v7546_v30 = vpop.f32.mrf.mxu0  ;;  %v10364_v60 = vld [vmem:[#allocation5 + $0x1b8] sm:$0xf0] }
 0x655   :  { %v16151_v50 = vld [vmem:[#allocation5 + $0x1bb4] sm:$0xf0] }
 0x656   :  { %v13946_v34 = vld [vmem:[#allocation5 + $0x1d98] sm:$0xf]  ;;  %v13691_v33 = vor.u32 %v16151_v50, %v13690_v42  ;;  %7818 = vmatpush.bf16.msrb.mxu0 %v13435_v16 }
 0x657   :  { %v16215_v21 = vld [vmem:[#allocation5 + $0x1db4] sm:$0xf0] }
 0x658   :  { %v14202_v37 = vld [vmem:[#allocation5 + $0x1f98] sm:$0xf]  ;;  %v13947_v2 = vor.u32 %v16215_v21, %v13946_v34  ;;  %7832 = vmatpush.bf16.msrb.mxu1 %v13691_v33  ;;  %v7547_v34 = vadd.f32 %v7546_v30, %v17166_v26 }
 0x659   :  { %v16279_v49 = vld [vmem:[#allocation5 + $0x1fb4] sm:$0xf0] }
 0x65a   :  { %v13402_v45 = vld [vmem:[#allocation5 + $0x1958] sm:$0xf]  ;;  %v14203_v6 = vor.u32 %v16279_v49, %v14202_v37  ;;  %7846 = vmatpush.bf16.msrb.mxu2 %v13947_v2  ;;  %v7560_v49 = vpop.f32.mrf.mxu1 }
 0x65b   :  { %v16079_v29 = vld [vmem:[#allocation5 + $0x1974] sm:$0xf0] }
 0x65c   :  { %v13658_v59 = vld [vmem:[#allocation5 + $0x1b58] sm:$0xf]  ;;  %v13403_v21 = vor.u32 %v16079_v29, %v13402_v45  ;;  %7860 = vmatpush.bf16.msrb.mxu3 %v14203_v6  ;;  %v7561_v6 = vadd.f32 %v7560_v49, %v7547_v34  ;;  %v17183_v55 = vpop.f32.mrf.mxu0 }
 0x65d   :  { %v16143_v15 = vld [vmem:[#allocation5 + $0x1b74] sm:$0xf0] }
 0x65e   :  { %v13914_v57 = vld [vmem:[#allocation5 + $0x1d58] sm:$0xf]  ;;  %v13659_v42 = vor.u32 %v16143_v15, %v13658_v59  ;;  %7819 = vmatpush.bf16.msrb.mxu0 %v13403_v21 }
 0x65f   :  { %v16207_v19 = vld [vmem:[#allocation5 + $0x1d74] sm:$0xf0] }
 0x660   :  { %v14170_v48 = vld [vmem:[#allocation5 + $0x1f58] sm:$0xf]  ;;  %v13915_v14 = vor.u32 %v16207_v19, %v13914_v57  ;;  %7833 = vmatpush.bf16.msrb.mxu1 %v13659_v42 }
 0x661   :  { %v16271_v7 = vld [vmem:[#allocation5 + $0x1f74] sm:$0xf0] }
 0x662   :  { %v13370_v9 = vld [vmem:[#allocation5 + $0x1918] sm:$0xf]  ;;  %v14171_v12 = vor.u32 %v16271_v7, %v14170_v48  ;;  %7847 = vmatpush.bf16.msrb.mxu2 %v13915_v14 }
 0x663   :  { %v16071_v8 = vld [vmem:[#allocation5 + $0x1934] sm:$0xf0] }
 0x664   :  { %v13626_v3 = vld [vmem:[#allocation5 + $0x1b18] sm:$0xf]  ;;  %v13371_v37 = vor.u32 %v16071_v8, %v13370_v9  ;;  %7861 = vmatpush.bf16.msrb.mxu3 %v14171_v12 }
 0x665   :  { %v16135_v4 = vld [vmem:[#allocation5 + $0x1b34] sm:$0xf0] }
 0x666   :  { %v13882_v27 = vld [vmem:[#allocation5 + $0x1d18] sm:$0xf]  ;;  %v13627_v16 = vor.u32 %v16135_v4, %v13626_v3  ;;  %7820 = vmatpush.bf16.msrb.mxu0 %v13371_v37  ;;  %v7574_v4 = vpop.f32.mrf.mxu2 }
 0x667   :  { %v16199_v20 = vld [vmem:[#allocation5 + $0x1d34] sm:$0xf0]  ;;  %v7575_v30 = vadd.f32 %v7574_v4, %v7561_v6 }
 0x668   :  { %v14138_v23 = vld [vmem:[#allocation5 + $0x1f18] sm:$0xf]  ;;  %v13883_v33 = vor.u32 %v16199_v20, %v13882_v27  ;;  %7834 = vmatpush.bf16.msrb.mxu1 %v13627_v16 }
 0x669   :  { %v16263_v50 = vld [vmem:[#allocation5 + $0x1f34] sm:$0xf0] }
 0x66a   :  { %v13338_v2 = vld [vmem:[#allocation5 + $0x18d8] sm:$0xf]  ;;  %v14139_v59 = vor.u32 %v16263_v50, %v14138_v23  ;;  %7848 = vmatpush.bf16.msrb.mxu2 %v13883_v33  ;;  %v7588_v23 = vpop.f32.mrf.mxu3 }
 0x66b   :  { %v16063_v45 = vld [vmem:[#allocation5 + $0x18f4] sm:$0xf0]  ;;  %v17181_v49 = vadd.f32 %v7588_v23, %v7575_v30  ;;  %v15323_v30 = vld [vmem:[#allocation5 + $0x1dc] sm:$0xf] }
 0x66c   :  { %v13594_v29 = vld [vmem:[#allocation5 + $0x1ad8] sm:$0xf]  ;;  %v13339_v21 = vor.u32 %v16063_v45, %v13338_v2  ;;  %7862 = vmatpush.bf16.msrb.mxu3 %v14139_v59  ;;  %v10396_v23 = vld [vmem:[#allocation5 + $0x1f8] sm:$0xf0] }
 0x66d   :  { %v16127_v15 = vld [vmem:[#allocation5 + $0x1af4] sm:$0xf0] }
 0x66e   :  { %v13850_v57 = vld [vmem:[#allocation5 + $0x1cd8] sm:$0xf]  ;;  %v13595_v26 = vor.u32 %v16127_v15, %v13594_v29  ;;  %7821 = vmatpush.bf16.msrb.mxu0 %v13339_v21 }
 0x66f   :  { %v16191_v19 = vld [vmem:[#allocation5 + $0x1cf4] sm:$0xf0] }
 0x670   :  { %v14106_v48 = vld [vmem:[#allocation5 + $0x1ed8] sm:$0xf]  ;;  %v13851_v42 = vor.u32 %v16191_v19, %v13850_v57  ;;  %7835 = vmatpush.bf16.msrb.mxu1 %v13595_v26 }
 0x671   :  { %v16255_v7 = vld [vmem:[#allocation5 + $0x1ef4] sm:$0xf0] }
 0x672   :  { %v13306_v14 = vld [vmem:[#allocation5 + $0x1898] sm:$0xf]  ;;  %v14107_v3 = vor.u32 %v16255_v7, %v14106_v48  ;;  %7849 = vmatpush.bf16.msrb.mxu2 %v13851_v42 }
 0x673   :  { %v16055_v9 = vld [vmem:[#allocation5 + $0x18b4] sm:$0xf0] }
 0x674   :  { %v13562_v8 = vld [vmem:[#allocation5 + $0x1a98] sm:$0xf]  ;;  %v13307_v37 = vor.u32 %v16055_v9, %v13306_v14  ;;  %7863 = vmatpush.bf16.msrb.mxu3 %v14107_v3 }
 0x675   :  { %v16119_v12 = vld [vmem:[#allocation5 + $0x1ab4] sm:$0xf0] }
 0x676   :  { %v13818_v27 = vld [vmem:[#allocation5 + $0x1c98] sm:$0xf]  ;;  %v13563_v16 = vor.u32 %v16119_v12, %v13562_v8  ;;  %7822 = vmatpush.bf16.msrb.mxu0 %v13307_v37  ;;  %v10652_v37 = vld [vmem:[#allocation5 + $0x3f8] sm:$0xf0] }
 0x677   :  { %v16183_v20 = vld [vmem:[#allocation5 + $0x1cb4] sm:$0xf0] }
 0x678   :  { %v14074_v50 = vld [vmem:[#allocation5 + $0x1e98] sm:$0xf]  ;;  %v13819_v33 = vor.u32 %v16183_v20, %v13818_v27  ;;  %7836 = vmatpush.bf16.msrb.mxu1 %v13563_v16 }
 0x679   :  { %v16247_v34 = vld [vmem:[#allocation5 + $0x1eb4] sm:$0xf0] }
 0x67a   :  { %v13274_v2 = vld [vmem:[#allocation5 + $0x1858] sm:$0xf]  ;;  %v14075_v59 = vor.u32 %v16247_v34, %v14074_v50  ;;  %7850 = vmatpush.bf16.msrb.mxu2 %v13819_v33  ;;  %v15387_v50 = vld [vmem:[#allocation5 + $0x3dc] sm:$0xf] }
 0x67b   :  { %v16047_v45 = vld [vmem:[#allocation5 + $0x1874] sm:$0xf0] }
 0x67c   :  { %v13530_v29 = vld [vmem:[#allocation5 + $0x1a58] sm:$0xf]  ;;  %v13275_v7 = vor.u32 %v16047_v45, %v13274_v2  ;;  %7864 = vmatpush.bf16.msrb.mxu3 %v14075_v59  ;;  %v15451_v2 = vld [vmem:[#allocation5 + $0x5dc] sm:$0xf] }
 0x67d   :  { %v16111_v15 = vld [vmem:[#allocation5 + $0x1a74] sm:$0xf0]  ;;  %v10908_v45 = vld [vmem:[#allocation5 + $0x5f8] sm:$0xf0] }
 0x67e   :  { %v13786_v57 = vld [vmem:[#allocation5 + $0x1c58] sm:$0xf]  ;;  %v13531_v26 = vor.u32 %v16111_v15, %v13530_v29  ;;  %7823 = vmatpush.bf16.msrb.mxu0 %v13275_v7  ;;  %v15515_v29 = vld [vmem:[#allocation5 + $0x7dc] sm:$0xf] }
 0x67f   :  { %v16175_v19 = vld [vmem:[#allocation5 + $0x1c74] sm:$0xf0]  ;;  %v11164_v15 = vld [vmem:[#allocation5 + $0x7f8] sm:$0xf0] }
 0x680   :  { %v14042_v6 = vld [vmem:[#allocation5 + $0x1e58] sm:$0xf]  ;;  %v13787_v42 = vor.u32 %v16175_v19, %v13786_v57  ;;  %7837 = vmatpush.bf16.msrb.mxu1 %v13531_v26  ;;  %v10399_v57 = vor.u32 %v15323_v30, %v10396_v23  ;;  %v10655_v19 = vor.u32 %v15387_v50, %v10652_v37  ;;  %v11167_v7 = vor.u32 %v15515_v29, %v11164_v15  ;;  %v15507_v26 = vld [vmem:[#allocation5 + $0x79c] sm:$0xf]  ;;  %v17191_v29 = vpop.f32.mrf.mxu2 }
 0x681   :  { %v16239_v48 = vld [vmem:[#allocation5 + $0x1e74] sm:$0xf0]  ;;  %v10588_v23 = vld [vmem:[#allocation5 + $0x378] sm:$0xf0]  ;;  %17649 = vst [vmem:[#allocation100_spill] sm:$0xff] %v17191_v29 }
 0x682   :  { %v13242_v21 = vld [vmem:[#allocation5 + $0x1818] sm:$0xf]  ;;  %v14043_v12 = vor.u32 %v16239_v48, %v14042_v6  ;;  %7851 = vmatpush.bf16.msrb.mxu2 %v13787_v42  ;;  %v10911_v6 = vor.u32 %v15451_v2, %v10908_v45  ;;  %v15315_v48 = vld [vmem:[#allocation5 + $0x19c] sm:$0xf] }
 0x683   :  { %v16039_v14 = vld [vmem:[#allocation5 + $0x1834] sm:$0xf0]  ;;  %v11132_v42 = vld [vmem:[#allocation5 + $0x7b8] sm:$0xf0] }
 0x684   :  { %v13498_v9 = vld [vmem:[#allocation5 + $0x1a18] sm:$0xf]  ;;  %v13243_v34 = vor.u32 %v16039_v14, %v13242_v21  ;;  %7865 = vmatpush.bf16.msrb.mxu3 %v14043_v12  ;;  %v10620_v21 = vld [vmem:[#allocation5 + $0x3b8] sm:$0xf0]  ;;  %v11135_v30 = vor.u32 %v15507_v26, %v11132_v42 }
 0x685   :  { %v16103_v8 = vld [vmem:[#allocation5 + $0x1a34] sm:$0xf0]  ;;  %v15443_v14 = vld [vmem:[#allocation5 + $0x59c] sm:$0xf] }
 0x686   :  { %v13754_v4 = vld [vmem:[#allocation5 + $0x1c18] sm:$0xf]  ;;  %v13499_v16 = vor.u32 %v16103_v8, %v13498_v9  ;;  %7824 = vmatpush.bf16.msrb.mxu0 %v13243_v34  ;;  %v17185_v9 = vpop.f32.mrf.mxu1  ;;  %v10367_v8 = vor.u32 %v15315_v48, %v10364_v60  ;;  %v10879_v12 = vor.u32 %v15443_v14, %v10876_v62  ;;  %v15435_v50 = vld [vmem:[#allocation5 + $0x55c] sm:$0xf]  ;;  %v7602_v48 = vpop.f32.mrf.mxu0 }
 0x687   :  { %v16167_v3 = vld [vmem:[#allocation5 + $0x1c34] sm:$0xf0]  ;;  %v10844_v34 = vld [vmem:[#allocation5 + $0x578] sm:$0xf0]  ;;  %v7603_v14 = vadd.f32 %v7602_v48, %v17181_v49 }
 0x688   :  { %v14010_v27 = vld [vmem:[#allocation5 + $0x1e18] sm:$0xf]  ;;  %v13755_v33 = vor.u32 %v16167_v3, %v13754_v4  ;;  %7838 = vmatpush.bf16.msrb.mxu1 %v13499_v16  ;;  %v10623_v4 = vor.u32 %v15379_v5, %v10620_v21  ;;  %v15307_v3 = vld [vmem:[#allocation5 + $0x15c] sm:$0xf]  ;;  %v10847_v2 = vor.u32 %v15435_v50, %v10844_v34 }
 0x689   :  { %v16231_v20 = vld [vmem:[#allocation5 + $0x1e34] sm:$0xf0]  ;;  %7825 = vmatmul.bf16.vlgmr.msrb.gmra.mxu0 %v16810_v32  ;;  %v15499_v37 = vld [vmem:[#allocation5 + $0x75c] sm:$0xf] }
 0x68a   :  { %v14011_v59 = vor.u32 %v16231_v20, %v14010_v27  ;;  %7852 = vmatpush.bf16.msrb.mxu2 %v13755_v33  ;;  %7873 = vmatpush.bf16.msra.mxu0 %v10399_v57  ;;  %v10332_v27 = vld [vmem:[#allocation5 + $0x178] sm:$0xf0] }
 0x68b   :  { %v15371_v20 = vld [vmem:[#allocation5 + $0x35c] sm:$0xf]  ;;  %7839 = vmatmul.bf16.vlgmr.msrb.gmra.mxu1 %v16814_v41  ;;  %v10335_v62 = vor.u32 %v15307_v3, %v10332_v27 }
 0x68c   :  { %7866 = vmatpush.bf16.msrb.mxu3 %v14011_v59  ;;  %7887 = vmatpush.bf16.msra.mxu1 %v10655_v19  ;;  %v11100_v60 = vld [vmem:[#allocation5 + $0x778] sm:$0xf0]  ;;  %v10591_v5 = vor.u32 %v15371_v20, %v10588_v23 }
 0x68d   :  { %7853 = vmatmul.bf16.vlgmr.msrb.gmra.mxu2 %v16812_v38  ;;  %v15299_v45 = vld [vmem:[#allocation5 + $0x11c] sm:$0xf]  ;;  %v11103_v15 = vor.u32 %v15499_v37, %v11100_v60 }
 0x68e   :  { %7901 = vmatpush.bf16.msra.mxu2 %v10911_v6  ;;  %7874 = vmatpush.bf16.msra.mxu0 %v10367_v8  ;;  %v10300_v16 = vld [vmem:[#allocation5 + $0x138] sm:$0xf0]  ;;  %v17193_v6 = vpop.f32.mrf.mxu3  ;;  %v7616_v42 = vpop.f32.mrf.mxu1 }
 0x68f   :  { %7867 = vmatmul.bf16.vlgmr.msrb.gmra.mxu3 %v16816_v46  ;;  %v15363_v33 = vld [vmem:[#allocation5 + $0x31c] sm:$0xf]  ;;  %17650 = vst [vmem:[#allocation101_spill] sm:$0xff] %v17193_v6  ;;  %v10303_v26 = vor.u32 %v15299_v45, %v10300_v16 }
 0x690   :  { %7915 = vmatpush.bf16.msra.mxu3 %v11167_v7  ;;  %7888 = vmatpush.bf16.msra.mxu1 %v10623_v4  ;;  %v10556_v59 = vld [vmem:[#allocation5 + $0x338] sm:$0xf0] }
 0x691   :  { %v15427_v57 = vld [vmem:[#allocation5 + $0x51c] sm:$0xf]  ;;  %v10559_v8 = vor.u32 %v15363_v33, %v10556_v59  ;;  %v7630_v59 = vpop.f32.mrf.mxu2 }
 0x692   :  { %7902 = vmatpush.bf16.msra.mxu2 %v10879_v12  ;;  %v10812_v19 = vld [vmem:[#allocation5 + $0x538] sm:$0xf0]  ;;  %7875 = vmatpush.bf16.msra.mxu0 %v10335_v62 }
 0x693   :  { %v15491_v7 = vld [vmem:[#allocation5 + $0x71c] sm:$0xf]  ;;  %v10815_v4 = vor.u32 %v15427_v57, %v10812_v19 }
 0x694   :  { %7916 = vmatpush.bf16.msra.mxu3 %v11135_v30  ;;  %v11068_v21 = vld [vmem:[#allocation5 + $0x738] sm:$0xf0]  ;;  %7889 = vmatpush.bf16.msra.mxu1 %v10591_v5  ;;  %v7617_v30 = vadd.f32 %v7616_v42, %v7603_v14 }
 0x695   :  { %v15291_v12 = vld [vmem:[#allocation5 + $0xdc] sm:$0xf]  ;;  %v11071_v20 = vor.u32 %v15491_v7, %v11068_v21 }
 0x696   :  { %7903 = vmatpush.bf16.msra.mxu2 %v10847_v2  ;;  %v10268_v3 = vld [vmem:[#allocation5 + $0xf8] sm:$0xf0]  ;;  %7876 = vmatpush.bf16.msra.mxu0 %v10303_v26  ;;  %v7631_v48 = vadd.f32 %v7630_v59, %v7617_v30  ;;  %v7644_v7 = vpop.f32.mrf.mxu3 }
 0x697   :  { %v15355_v27 = vld [vmem:[#allocation5 + $0x2dc] sm:$0xf]  ;;  %v10271_v62 = vor.u32 %v15291_v12, %v10268_v3 }
 0x698   :  { %7917 = vmatpush.bf16.msra.mxu3 %v11103_v15  ;;  %v10524_v23 = vld [vmem:[#allocation5 + $0x2f8] sm:$0xf0]  ;;  %7890 = vmatpush.bf16.msra.mxu1 %v10559_v8  ;;  %v17196_v42 = vadd.f32 %v7644_v7, %v7631_v48 }
 0x699   :  { %v15419_v50 = vld [vmem:[#allocation5 + $0x4dc] sm:$0xf]  ;;  %v10527_v49 = vor.u32 %v15355_v27, %v10524_v23 }
 0x69a   :  { %v10780_v34 = vld [vmem:[#allocation5 + $0x4f8] sm:$0xf0]  ;;  %7904 = vmatpush.bf16.msra.mxu2 %v10815_v4  ;;  %7877 = vmatpush.bf16.msra.mxu0 %v10271_v62  ;;  %17651 = vst [vmem:[#allocation102_spill] sm:$0xff] %v17196_v42 }
 0x69b   :  { %v15483_v37 = vld [vmem:[#allocation5 + $0x6dc] sm:$0xf]  ;;  %v10783_v5 = vor.u32 %v15419_v50, %v10780_v34 }
 0x69c   :  { %v11036_v60 = vld [vmem:[#allocation5 + $0x6f8] sm:$0xf0]  ;;  %7918 = vmatpush.bf16.msra.mxu3 %v11071_v20  ;;  %7891 = vmatpush.bf16.msra.mxu1 %v10527_v49 }
 0x69d   :  { %v15283_v2 = vld [vmem:[#allocation5 + $0x9c] sm:$0xf]  ;;  %v11039_v33 = vor.u32 %v15483_v37, %v11036_v60 }
 0x69e   :  { %v10236_v45 = vld [vmem:[#allocation5 + $0xb8] sm:$0xf0]  ;;  %7905 = vmatpush.bf16.msra.mxu2 %v10783_v5 }
 0x69f   :  { %v15347_v16 = vld [vmem:[#allocation5 + $0x29c] sm:$0xf]  ;;  %v10239_v26 = vor.u32 %v15283_v2, %v10236_v45 }
 0x6a0   :  { %v10492_v15 = vld [vmem:[#allocation5 + $0x2b8] sm:$0xf0]  ;;  %7919 = vmatpush.bf16.msra.mxu3 %v11039_v33 }
 0x6a1   :  { %v15411_v57 = vld [vmem:[#allocation5 + $0x49c] sm:$0xf]  ;;  %v10495_v8 = vor.u32 %v15347_v16, %v10492_v15  ;;  %7878 = vmatpush.bf16.msra.mxu0 %v10239_v26 }
 0x6a2   :  { %v10748_v19 = vld [vmem:[#allocation5 + $0x4b8] sm:$0xf0] }
 0x6a3   :  { %v15475_v21 = vld [vmem:[#allocation5 + $0x69c] sm:$0xf]  ;;  %v10751_v4 = vor.u32 %v15411_v57, %v10748_v19  ;;  %7892 = vmatpush.bf16.msra.mxu1 %v10495_v8 }
 0x6a4   :  { %v11004_v14 = vld [vmem:[#allocation5 + $0x6b8] sm:$0xf0] }
 0x6a5   :  { %v15275_v12 = vld [vmem:[#allocation5 + $0x5c] sm:$0xf]  ;;  %v11007_v20 = vor.u32 %v15475_v21, %v11004_v14  ;;  %7906 = vmatpush.bf16.msra.mxu2 %v10751_v4 }
 0x6a6   :  { %v10204_v3 = vld [vmem:[#allocation5 + $0x78] sm:$0xf0] }
 0x6a7   :  { %v15339_v27 = vld [vmem:[#allocation5 + $0x25c] sm:$0xf]  ;;  %v10207_v60 = vor.u32 %v15275_v12, %v10204_v3  ;;  %7920 = vmatpush.bf16.msra.mxu3 %v11007_v20 }
 0x6a8   :  { %v10460_v23 = vld [vmem:[#allocation5 + $0x278] sm:$0xf0] }
 0x6a9   :  { %v15403_v50 = vld [vmem:[#allocation5 + $0x45c] sm:$0xf]  ;;  %v10463_v49 = vor.u32 %v15339_v27, %v10460_v23  ;;  %7879 = vmatpush.bf16.msra.mxu0 %v10207_v60 }
 0x6aa   :  { %v10716_v34 = vld [vmem:[#allocation5 + $0x478] sm:$0xf0] }
 0x6ab   :  { %v15467_v30 = vld [vmem:[#allocation5 + $0x65c] sm:$0xf]  ;;  %v10719_v5 = vor.u32 %v15403_v50, %v10716_v34  ;;  %7893 = vmatpush.bf16.msra.mxu1 %v10463_v49 }
 0x6ac   :  { %v10972_v37 = vld [vmem:[#allocation5 + $0x678] sm:$0xf0] }
 0x6ad   :  { %v15267_v62 = vld [vmem:[#allocation5 + $0x1c] sm:$0xf]  ;;  %v10975_v15 = vor.u32 %v15467_v30, %v10972_v37  ;;  %7907 = vmatpush.bf16.msra.mxu2 %v10719_v5 }
 0x6ae   :  { %v10172_v2 = vld [vmem:[#allocation5 + $0x38] sm:$0xf0] }
 0x6af   :  { %v15331_v45 = vld [vmem:[#allocation5 + $0x21c] sm:$0xf]  ;;  %v10175_v14 = vor.u32 %v15267_v62, %v10172_v2  ;;  %7921 = vmatpush.bf16.msra.mxu3 %v10975_v15 }
 0x6b0   :  { %v10428_v16 = vld [vmem:[#allocation5 + $0x238] sm:$0xf0] }
 0x6b1   :  { %v15395_v59 = vld [vmem:[#allocation5 + $0x41c] sm:$0xf]  ;;  %v10431_v8 = vor.u32 %v15331_v45, %v10428_v16  ;;  %7880 = vmatpush.bf16.msra.mxu0 %v10175_v14 }
 0x6b2   :  { %v10684_v33 = vld [vmem:[#allocation5 + $0x438] sm:$0xf0] }
 0x6b3   :  { %v15459_v57 = vld [vmem:[#allocation5 + $0x61c] sm:$0xf]  ;;  %v10687_v4 = vor.u32 %v15395_v59, %v10684_v33  ;;  %7894 = vmatpush.bf16.msra.mxu1 %v10431_v8 }
 0x6b4   :  { %v10940_v19 = vld [vmem:[#allocation5 + $0x638] sm:$0xf0]  ;;  %7881 = vmatmul.bf16.vlgmr.msra.gmra.mxu0 %v16774_v58 }
 0x6b5   :  { %v15579_v48 = vld [vmem:[#allocation5 + $0x9dc] sm:$0xf]  ;;  %v10943_v20 = vor.u32 %v15459_v57, %v10940_v19  ;;  %7908 = vmatpush.bf16.msra.mxu2 %v10687_v4 }
 0x6b6   :  { %v11420_v7 = vld [vmem:[#allocation5 + $0x9f8] sm:$0xf0]  ;;  %7895 = vmatmul.bf16.vlgmr.msra.gmra.mxu1 %v16780_v10 }
 0x6b7   :  { %v15643_v21 = vld [vmem:[#allocation5 + $0xbdc] sm:$0xf]  ;;  %v11423_v50 = vor.u32 %v15579_v48, %v11420_v7  ;;  %7922 = vmatpush.bf16.msra.mxu3 %v10943_v20 }
 0x6b8   :  { %v11676_v26 = vld [vmem:[#allocation5 + $0xbf8] sm:$0xf0]  ;;  %7909 = vmatmul.bf16.vlgmr.msra.gmra.mxu2 %v16776_v1 }
 0x6b9   :  { %v15707_v12 = vld [vmem:[#allocation5 + $0xddc] sm:$0xf]  ;;  %v11679_v34 = vor.u32 %v15643_v21, %v11676_v26  ;;  %7929 = vmatpush.bf16.msrb.mxu0 %v11423_v50 }
 0x6ba   :  { %v11932_v3 = vld [vmem:[#allocation5 + $0xdf8] sm:$0xf0]  ;;  %7923 = vmatmul.bf16.vlgmr.msra.gmra.mxu3 %v16782_v17 }
 0x6bb   :  { %v15771_v27 = vld [vmem:[#allocation5 + $0xfdc] sm:$0xf]  ;;  %v11935_v30 = vor.u32 %v15707_v12, %v11932_v3  ;;  %7943 = vmatpush.bf16.msrb.mxu1 %v11679_v34 }
 0x6bc   :  { %v12188_v23 = vld [vmem:[#allocation5 + $0xff8] sm:$0xf0] }
 0x6bd   :  { %v15571_v37 = vld [vmem:[#allocation5 + $0x99c] sm:$0xf]  ;;  %v12191_v60 = vor.u32 %v15771_v27, %v12188_v23  ;;  %7957 = vmatpush.bf16.msrb.mxu2 %v11935_v30 }
 0x6be   :  { %v11388_v42 = vld [vmem:[#allocation5 + $0x9b8] sm:$0xf0] }
 0x6bf   :  { %v15635_v6 = vld [vmem:[#allocation5 + $0xb9c] sm:$0xf]  ;;  %v11391_v45 = vor.u32 %v15571_v37, %v11388_v42  ;;  %7971 = vmatpush.bf16.msrb.mxu3 %v12191_v60 }
 0x6c0   :  { %v11644_v62 = vld [vmem:[#allocation5 + $0xbb8] sm:$0xf0] }
 0x6c1   :  { %v15699_v2 = vld [vmem:[#allocation5 + $0xd9c] sm:$0xf]  ;;  %v11647_v16 = vor.u32 %v15635_v6, %v11644_v62  ;;  %7930 = vmatpush.bf16.msrb.mxu0 %v11391_v45 }
 0x6c2   :  { %v11900_v29 = vld [vmem:[#allocation5 + $0xdb8] sm:$0xf0] }
 0x6c3   :  { %v15763_v49 = vld [vmem:[#allocation5 + $0xf9c] sm:$0xf]  ;;  %v11903_v59 = vor.u32 %v15699_v2, %v11900_v29  ;;  %7944 = vmatpush.bf16.msrb.mxu1 %v11647_v16 }
 0x6c4   :  { %v12156_v5 = vld [vmem:[#allocation5 + $0xfb8] sm:$0xf0] }
 0x6c5   :  { %v15563_v15 = vld [vmem:[#allocation5 + $0x95c] sm:$0xf]  ;;  %v12159_v19 = vor.u32 %v15763_v49, %v12156_v5  ;;  %7958 = vmatpush.bf16.msrb.mxu2 %v11903_v59 }
 0x6c6   :  { %v11356_v33 = vld [vmem:[#allocation5 + $0x978] sm:$0xf0] }
 0x6c7   :  { %v15627_v57 = vld [vmem:[#allocation5 + $0xb5c] sm:$0xf]  ;;  %v11359_v42 = vor.u32 %v15563_v15, %v11356_v33  ;;  %7972 = vmatpush.bf16.msrb.mxu3 %v12159_v19 }
 0x6c8   :  { %v11612_v48 = vld [vmem:[#allocation5 + $0xb78] sm:$0xf0] }
 0x6c9   :  { %v15691_v7 = vld [vmem:[#allocation5 + $0xd5c] sm:$0xf]  ;;  %v11615_v29 = vor.u32 %v15627_v57, %v11612_v48  ;;  %7931 = vmatpush.bf16.msrb.mxu0 %v11359_v42 }
 0x6ca   :  { %v11868_v21 = vld [vmem:[#allocation5 + $0xd78] sm:$0xf0] }
 0x6cb   :  { %v15755_v14 = vld [vmem:[#allocation5 + $0xf5c] sm:$0xf]  ;;  %v11871_v6 = vor.u32 %v15691_v7, %v11868_v21  ;;  %7945 = vmatpush.bf16.msrb.mxu1 %v11615_v29 }
 0x6cc   :  { %v12124_v26 = vld [vmem:[#allocation5 + $0xf78] sm:$0xf0] }
 0x6cd   :  { %v15555_v12 = vld [vmem:[#allocation5 + $0x91c] sm:$0xf]  ;;  %v12127_v4 = vor.u32 %v15755_v14, %v12124_v26  ;;  %7959 = vmatpush.bf16.msrb.mxu2 %v11871_v6 }
 0x6ce   :  { %v11324_v3 = vld [vmem:[#allocation5 + $0x938] sm:$0xf0] }
 0x6cf   :  { %v15619_v8 = vld [vmem:[#allocation5 + $0xb1c] sm:$0xf]  ;;  %v11327_v10 = vor.u32 %v15555_v12, %v11324_v3  ;;  %7973 = vmatpush.bf16.msrb.mxu3 %v12127_v4 }
 0x6d0   :  { %v11580_v58 = vld [vmem:[#allocation5 + $0xb38] sm:$0xf0] }
 0x6d1   :  { %v15683_v27 = vld [vmem:[#allocation5 + $0xd1c] sm:$0xf]  ;;  %v11583_v50 = vor.u32 %v15619_v8, %v11580_v58  ;;  %7932 = vmatpush.bf16.msrb.mxu0 %v11327_v10 }
 0x6d2   :  { %v11836_v23 = vld [vmem:[#allocation5 + $0xd38] sm:$0xf0] }
 0x6d3   :  { %v15747_v20 = vld [vmem:[#allocation5 + $0xf1c] sm:$0xf]  ;;  %v11839_v17 = vor.u32 %v15683_v27, %v11836_v23  ;;  %7946 = vmatpush.bf16.msrb.mxu1 %v11583_v50 }
 0x6d4   :  { %v12092_v1 = vld [vmem:[#allocation5 + $0xf38] sm:$0xf0] }
 0x6d5   :  { %v15547_v34 = vld [vmem:[#allocation5 + $0x8dc] sm:$0xf]  ;;  %v12095_v60 = vor.u32 %v15747_v20, %v12092_v1  ;;  %7960 = vmatpush.bf16.msrb.mxu2 %v11839_v17 }
 0x6d6   :  { %v11292_v30 = vld [vmem:[#allocation5 + $0x8f8] sm:$0xf0] }
 0x6d7   :  { %v15611_v37 = vld [vmem:[#allocation5 + $0xadc] sm:$0xf]  ;;  %v11295_v16 = vor.u32 %v15547_v34, %v11292_v30  ;;  %7974 = vmatpush.bf16.msrb.mxu3 %v12095_v60 }
 0x6d8   :  { %v11548_v62 = vld [vmem:[#allocation5 + $0xaf8] sm:$0xf0] }
 0x6d9   :  { %v15675_v2 = vld [vmem:[#allocation5 + $0xcdc] sm:$0xf]  ;;  %v11551_v59 = vor.u32 %v15611_v37, %v11548_v62  ;;  %7933 = vmatpush.bf16.msrb.mxu0 %v11295_v16 }
 0x6da   :  { %v11804_v49 = vld [vmem:[#allocation5 + $0xcf8] sm:$0xf0] }
 0x6db   :  { %v15739_v5 = vld [vmem:[#allocation5 + $0xedc] sm:$0xf]  ;;  %v11807_v15 = vor.u32 %v15675_v2, %v11804_v49  ;;  %7947 = vmatpush.bf16.msrb.mxu1 %v11551_v59 }
 0x6dc   :  { %v12060_v45 = vld [vmem:[#allocation5 + $0xef8] sm:$0xf0] }
 0x6dd   :  { %v15539_v33 = vld [vmem:[#allocation5 + $0x89c] sm:$0xf]  ;;  %v12063_v48 = vor.u32 %v15739_v5, %v12060_v45  ;;  %7961 = vmatpush.bf16.msrb.mxu2 %v11807_v15 }
 0x6de   :  { %v11260_v57 = vld [vmem:[#allocation5 + $0x8b8] sm:$0xf0] }
 0x6df   :  { %v15603_v19 = vld [vmem:[#allocation5 + $0xa9c] sm:$0xf]  ;;  %v11263_v29 = vor.u32 %v15539_v33, %v11260_v57  ;;  %7975 = vmatpush.bf16.msrb.mxu3 %v12063_v48 }
 0x6e0   :  { %v11516_v7 = vld [vmem:[#allocation5 + $0xab8] sm:$0xf0] }
 0x6e1   :  { %v15667_v21 = vld [vmem:[#allocation5 + $0xc9c] sm:$0xf]  ;;  %v11519_v6 = vor.u32 %v15603_v19, %v11516_v7  ;;  %7934 = vmatpush.bf16.msrb.mxu0 %v11263_v29 }
 0x6e2   :  { %v11772_v14 = vld [vmem:[#allocation5 + $0xcb8] sm:$0xf0] }
 0x6e3   :  { %v15731_v26 = vld [vmem:[#allocation5 + $0xe9c] sm:$0xf]  ;;  %v11775_v12 = vor.u32 %v15667_v21, %v11772_v14  ;;  %7948 = vmatpush.bf16.msrb.mxu1 %v11519_v6 }
 0x6e4   :  { %v12028_v42 = vld [vmem:[#allocation5 + $0xeb8] sm:$0xf0] }
 0x6e5   :  { %v15531_v3 = vld [vmem:[#allocation5 + $0x85c] sm:$0xf]  ;;  %v12031_v58 = vor.u32 %v15731_v26, %v12028_v42  ;;  %7962 = vmatpush.bf16.msrb.mxu2 %v11775_v12 }
 0x6e6   :  { %v11228_v8 = vld [vmem:[#allocation5 + $0x878] sm:$0xf0] }
 0x6e7   :  { %v15595_v4 = vld [vmem:[#allocation5 + $0xa5c] sm:$0xf]  ;;  %v11231_v50 = vor.u32 %v15531_v3, %v11228_v8  ;;  %7976 = vmatpush.bf16.msrb.mxu3 %v12031_v58 }
 0x6e8   :  { %v11484_v27 = vld [vmem:[#allocation5 + $0xa78] sm:$0xf0] }
 0x6e9   :  { %v15659_v23 = vld [vmem:[#allocation5 + $0xc5c] sm:$0xf]  ;;  %v11487_v30 = vor.u32 %v15595_v4, %v11484_v27  ;;  %7935 = vmatpush.bf16.msrb.mxu0 %v11231_v50 }
 0x6ea   :  { %v11740_v20 = vld [vmem:[#allocation5 + $0xc78] sm:$0xf0] }
 0x6eb   :  { %v15723_v1 = vld [vmem:[#allocation5 + $0xe5c] sm:$0xf]  ;;  %v11743_v37 = vor.u32 %v15659_v23, %v11740_v20  ;;  %7949 = vmatpush.bf16.msrb.mxu1 %v11487_v30 }
 0x6ec   :  { %v11996_v10 = vld [vmem:[#allocation5 + $0xe78] sm:$0xf0] }
 0x6ed   :  { %v15523_v17 = vld [vmem:[#allocation5 + $0x81c] sm:$0xf]  ;;  %v11999_v49 = vor.u32 %v15723_v1, %v11996_v10  ;;  %7963 = vmatpush.bf16.msrb.mxu2 %v11743_v37 }
 0x6ee   :  { %v11196_v34 = vld [vmem:[#allocation5 + $0x838] sm:$0xf0] }
 0x6ef   :  { %v15587_v60 = vld [vmem:[#allocation5 + $0xa1c] sm:$0xf]  ;;  %v11199_v57 = vor.u32 %v15523_v17, %v11196_v34  ;;  %7977 = vmatpush.bf16.msrb.mxu3 %v11999_v49 }
 0x6f0   :  { %v11452_v62 = vld [vmem:[#allocation5 + $0xa38] sm:$0xf0] }
 0x6f1   :  { %v15651_v2 = vld [vmem:[#allocation5 + $0xc1c] sm:$0xf]  ;;  %v11455_v21 = vor.u32 %v15587_v60, %v11452_v62  ;;  %7936 = vmatpush.bf16.msrb.mxu0 %v11199_v57 }
 0x6f2   :  { %v11708_v5 = vld [vmem:[#allocation5 + $0xc38] sm:$0xf0] }
 0x6f3   :  { %v15715_v45 = vld [vmem:[#allocation5 + $0xe1c] sm:$0xf]  ;;  %v11711_v14 = vor.u32 %v15651_v2, %v11708_v5  ;;  %7950 = vmatpush.bf16.msrb.mxu1 %v11455_v21 }
 0x6f4   :  { %v11964_v16 = vld [vmem:[#allocation5 + $0xe38] sm:$0xf0]  ;;  %7937 = vmatmul.bf16.vlgmr.msrb.gmra.mxu0 %v16786_v39 }
 0x6f5   :  { %v15835_v59 = vld [vmem:[#allocation5 + $0x11dc] sm:$0xf]  ;;  %v11967_v29 = vor.u32 %v15715_v45, %v11964_v16  ;;  %7964 = vmatpush.bf16.msrb.mxu2 %v11711_v14 }
 0x6f6   :  { %v12444_v15 = vld [vmem:[#allocation5 + $0x11f8] sm:$0xf0]  ;;  %7951 = vmatmul.bf16.vlgmr.msrb.gmra.mxu1 %v16790_v44 }
 0x6f7   :  { %v15899_v33 = vld [vmem:[#allocation5 + $0x13dc] sm:$0xf]  ;;  %v12447_v6 = vor.u32 %v15835_v59, %v12444_v15  ;;  %7978 = vmatpush.bf16.msrb.mxu3 %v11967_v29 }
 0x6f8   :  { %v12700_v19 = vld [vmem:[#allocation5 + $0x13f8] sm:$0xf0]  ;;  %7965 = vmatmul.bf16.vlgmr.msrb.gmra.mxu2 %v16788_v43 }
 0x6f9   :  { %v15963_v48 = vld [vmem:[#allocation5 + $0x15dc] sm:$0xf]  ;;  %v12703_v12 = vor.u32 %v15899_v33, %v12700_v19  ;;  %7985 = vmatpush.bf16.msra.mxu0 %v12447_v6 }
 0x6fa   :  { %v12956_v7 = vld [vmem:[#allocation5 + $0x15f8] sm:$0xf0]  ;;  %7979 = vmatmul.bf16.vlgmr.msrb.gmra.mxu3 %v16792_v47 }
 0x6fb   :  { %v16027_v26 = vld [vmem:[#allocation5 + $0x17dc] sm:$0xf]  ;;  %v12959_v3 = vor.u32 %v15963_v48, %v12956_v7  ;;  %7999 = vmatpush.bf16.msra.mxu1 %v12703_v12 }
 0x6fc   :  { %v13212_v42 = vld [vmem:[#allocation5 + $0x17f8] sm:$0xf0] }
 0x6fd   :  { %v15827_v8 = vld [vmem:[#allocation5 + $0x119c] sm:$0xf]  ;;  %v13215_v27 = vor.u32 %v16027_v26, %v13212_v42  ;;  %8013 = vmatpush.bf16.msra.mxu2 %v12959_v3 }
 0x6fe   :  { %v12412_v4 = vld [vmem:[#allocation5 + $0x11b8] sm:$0xf0] }
 0x6ff   :  { %v15891_v58 = vld [vmem:[#allocation5 + $0x139c] sm:$0xf]  ;;  %v12415_v17 = vor.u32 %v15827_v8, %v12412_v4  ;;  %8027 = vmatpush.bf16.msra.mxu3 %v13215_v27 }
 0x700   :  { %v12668_v23 = vld [vmem:[#allocation5 + $0x13b8] sm:$0xf0] }
 0x701   :  { %v15955_v20 = vld [vmem:[#allocation5 + $0x159c] sm:$0xf]  ;;  %v12671_v34 = vor.u32 %v15891_v58, %v12668_v23  ;;  %7986 = vmatpush.bf16.msra.mxu0 %v12415_v17 }
 0x702   :  { %v12924_v1 = vld [vmem:[#allocation5 + $0x15b8] sm:$0xf0] }
 0x703   :  { %v16019_v10 = vld [vmem:[#allocation5 + $0x179c] sm:$0xf]  ;;  %v12927_v30 = vor.u32 %v15955_v20, %v12924_v1  ;;  %8000 = vmatpush.bf16.msra.mxu1 %v12671_v34 }
 0x704   :  { %v13180_v50 = vld [vmem:[#allocation5 + $0x17b8] sm:$0xf0] }
 0x705   :  { %v15819_v37 = vld [vmem:[#allocation5 + $0x115c] sm:$0xf]  ;;  %v13183_v2 = vor.u32 %v16019_v10, %v13180_v50  ;;  %8014 = vmatpush.bf16.msra.mxu2 %v12927_v30 }
 0x706   :  { %v12380_v60 = vld [vmem:[#allocation5 + $0x1178] sm:$0xf0] }
 0x707   :  { %v15883_v62 = vld [vmem:[#allocation5 + $0x135c] sm:$0xf]  ;;  %v12383_v15 = vor.u32 %v15819_v37, %v12380_v60  ;;  %8028 = vmatpush.bf16.msra.mxu3 %v13183_v2 }
 0x708   :  { %v12636_v49 = vld [vmem:[#allocation5 + $0x1378] sm:$0xf0] }
 0x709   :  { %v15947_v5 = vld [vmem:[#allocation5 + $0x155c] sm:$0xf]  ;;  %v12639_v33 = vor.u32 %v15883_v62, %v12636_v49  ;;  %7987 = vmatpush.bf16.msra.mxu0 %v12383_v15 }
 0x70a   :  { %v12892_v45 = vld [vmem:[#allocation5 + $0x1578] sm:$0xf0] }
 0x70b   :  { %v16011_v16 = vld [vmem:[#allocation5 + $0x175c] sm:$0xf]  ;;  %v12895_v57 = vor.u32 %v15947_v5, %v12892_v45  ;;  %8001 = vmatpush.bf16.msra.mxu1 %v12639_v33 }
 0x70c   :  { %v13148_v59 = vld [vmem:[#allocation5 + $0x1778] sm:$0xf0] }
 0x70d   :  { %v15811_v19 = vld [vmem:[#allocation5 + $0x111c] sm:$0xf]  ;;  %v13151_v7 = vor.u32 %v16011_v16, %v13148_v59  ;;  %8015 = vmatpush.bf16.msra.mxu2 %v12895_v57 }
 0x70e   :  { %v12348_v39 = vld [vmem:[#allocation5 + $0x1138] sm:$0xf0] }
 0x70f   :  { %v15875_v48 = vld [vmem:[#allocation5 + $0x131c] sm:$0xf]  ;;  %v12351_v42 = vor.u32 %v15811_v19, %v12348_v39  ;;  %8029 = vmatpush.bf16.msra.mxu3 %v13151_v7  ;;  %v17652_v19 = vperm.slane %v16822_v54, 0 }
 0x710   :  { %v12604_v21 = vld [vmem:[#allocation5 + $0x1338] sm:$0xf0] }
 0x711   :  { %v15939_v14 = vld [vmem:[#allocation5 + $0x151c] sm:$0xf]  ;;  %v12607_v47 = vor.u32 %v15875_v48, %v12604_v21  ;;  %7988 = vmatpush.bf16.msra.mxu0 %v12351_v42  ;;  %v6317_v39 = vadd.f32 %v16833_v51, %v17652_v19  ;;  %v17655_v19 = vperm.slane %v17014_v13, 3  ;;  %v17228_v13 = vpop.f32.mrf.mxu2 }
 0x712   :  { %v12860_v43 = vld [vmem:[#allocation5 + $0x1538] sm:$0xf0] }
 0x713   :  { %v16003_v26 = vld [vmem:[#allocation5 + $0x171c] sm:$0xf]  ;;  %v12863_v29 = vor.u32 %v15939_v14, %v12860_v43  ;;  %8002 = vmatpush.bf16.msra.mxu1 %v12607_v47 }
 0x714   :  { %v13116_v44 = vld [vmem:[#allocation5 + $0x1738] sm:$0xf0] }
 0x715   :  { %v15803_v6 = vld [vmem:[#allocation5 + $0x10dc] sm:$0xf]  ;;  %v13119_v8 = vor.u32 %v16003_v26, %v13116_v44  ;;  %8016 = vmatpush.bf16.msra.mxu2 %v12863_v29  ;;  %v17653_v44 = vperm.slane %v16886_v56, 1 }
 0x716   :  { %v12316_v12 = vld [vmem:[#allocation5 + $0x10f8] sm:$0xf0] }
 0x717   :  { %v15867_v3 = vld [vmem:[#allocation5 + $0x12dc] sm:$0xf]  ;;  %v12319_v1 = vor.u32 %v15803_v6, %v12316_v12  ;;  %8030 = vmatpush.bf16.msra.mxu3 %v13119_v8  ;;  %v6541_v42 = vadd.f32 %v16897_v53, %v17653_v44 }
 0x718   :  { %v12572_v4 = vld [vmem:[#allocation5 + $0x12f8] sm:$0xf0] }
 0x719   :  { %v15931_v58 = vld [vmem:[#allocation5 + $0x14dc] sm:$0xf]  ;;  %v12575_v10 = vor.u32 %v15867_v3, %v12572_v4  ;;  %7989 = vmatpush.bf16.msra.mxu0 %v12319_v1  ;;  %v6331_v4 = vadd.f32 %v16835_v0, %v6317_v39  ;;  %v17217_v0 = vpop.f32.mrf.mxu0  ;;  %v6989_v39 = vadd.f32 %v17025_v24, %v17655_v19 }
 0x71a   :  { %v12828_v27 = vld [vmem:[#allocation5 + $0x14f8] sm:$0xf0] }
 0x71b   :  { %v15995_v23 = vld [vmem:[#allocation5 + $0x16dc] sm:$0xf]  ;;  %v12831_v50 = vor.u32 %v15931_v58, %v12828_v27  ;;  %8003 = vmatpush.bf16.msra.mxu1 %v12575_v10  ;;  %v6555_v10 = vadd.f32 %v16899_v11, %v6541_v42 }
 0x71c   :  { %v13084_v20 = vld [vmem:[#allocation5 + $0x16f8] sm:$0xf0] }
 0x71d   :  { %v15795_v17 = vld [vmem:[#allocation5 + $0x109c] sm:$0xf]  ;;  %v13087_v37 = vor.u32 %v15995_v23, %v13084_v20  ;;  %8017 = vmatpush.bf16.msra.mxu2 %v12831_v50 }
 0x71e   :  { %v12284_v34 = vld [vmem:[#allocation5 + $0x10b8] sm:$0xf0] }
 0x71f   :  { %v15859_v30 = vld [vmem:[#allocation5 + $0x129c] sm:$0xf]  ;;  %v12287_v45 = vor.u32 %v15795_v17, %v12284_v34  ;;  %8031 = vmatpush.bf16.msra.mxu3 %v13087_v37  ;;  %v17654_v37 = vperm.slane %v16950_v52, 2 }
 0x720   :  { %v12540_v60 = vld [vmem:[#allocation5 + $0x12b8] sm:$0xf0] }
 0x721   :  { %v15923_v62 = vld [vmem:[#allocation5 + $0x149c] sm:$0xf]  ;;  %v12543_v16 = vor.u32 %v15859_v30, %v12540_v60  ;;  %7990 = vmatpush.bf16.msra.mxu0 %v12287_v45  ;;  %v6765_v60 = vadd.f32 %v16961_v61, %v17654_v37  ;;  %v6345_v45 = vadd.f32 %v16841_v18, %v6331_v4  ;;  %v6569_v61 = vadd.f32 %v16905_v22, %v6555_v10 }
 0x722   :  { %v12796_v2 = vld [vmem:[#allocation5 + $0x14b8] sm:$0xf0] }
 0x723   :  { %v15987_v49 = vld [vmem:[#allocation5 + $0x169c] sm:$0xf]  ;;  %v12799_v59 = vor.u32 %v15923_v62, %v12796_v2  ;;  %8004 = vmatpush.bf16.msra.mxu1 %v12543_v16  ;;  %v6779_v18 = vadd.f32 %v16963_v28, %v6765_v60  ;;  %v6359_v42 = vadd.f32 %v16843_v25, %v6345_v45 }
 0x724   :  { %v13052_v5 = vld [vmem:[#allocation5 + $0x16b8] sm:$0xf0] }
 0x725   :  { %v15787_v15 = vld [vmem:[#allocation5 + $0x105c] sm:$0xf]  ;;  %v13055_v48 = vor.u32 %v15987_v49, %v13052_v5  ;;  %8018 = vmatpush.bf16.msra.mxu2 %v12799_v59 }
 0x726   :  { %v12252_v33 = vld [vmem:[#allocation5 + $0x1078] sm:$0xf0] }
 0x727   :  { %v15851_v57 = vld [vmem:[#allocation5 + $0x125c] sm:$0xf]  ;;  %v12255_v47 = vor.u32 %v15787_v15, %v12252_v33  ;;  %8032 = vmatpush.bf16.msra.mxu3 %v13055_v48 }
 0x728   :  { %v12508_v7 = vld [vmem:[#allocation5 + $0x1278] sm:$0xf0] }
 0x729   :  { %v15915_v21 = vld [vmem:[#allocation5 + $0x145c] sm:$0xf]  ;;  %v12511_v54 = vor.u32 %v15851_v57, %v12508_v7  ;;  %7991 = vmatpush.bf16.msra.mxu0 %v12255_v47 }
 0x72a   :  { %v12764_v14 = vld [vmem:[#allocation5 + $0x1478] sm:$0xf0] }
 0x72b   :  { %v15979_v43 = vld [vmem:[#allocation5 + $0x165c] sm:$0xf]  ;;  %v12767_v12 = vor.u32 %v15915_v21, %v12764_v14  ;;  %8005 = vmatpush.bf16.msra.mxu1 %v12511_v54  ;;  %v6583_v54 = vadd.f32 %v16907_v63, %v6569_v61  ;;  %v17658_v63 = vld [vmem:[#allocation16_spill] sm:$0xff] }
 0x72c   :  { %v13020_v26 = vld [vmem:[#allocation5 + $0x1678] sm:$0xf0] }
 0x72d   :  { %v15779_v29 = vld [vmem:[#allocation5 + $0x101c] sm:$0xf]  ;;  %v13023_v58 = vor.u32 %v15979_v43, %v13020_v26  ;;  %8019 = vmatpush.bf16.msra.mxu2 %v12767_v12  ;;  %v17225_v43 = vpop.f32.mrf.mxu1  ;;  %v17656_v12 = vld [vmem:[#allocation57_spill] sm:$0xff] }
 0x72e   :  { %v12220_v6 = vld [vmem:[#allocation5 + $0x1038] sm:$0xf0] }
 0x72f   :  { %v15843_v51 = vld [vmem:[#allocation5 + $0x121c] sm:$0xf]  ;;  %v12223_v50 = vor.u32 %v15779_v29, %v12220_v6  ;;  %8033 = vmatpush.bf16.msra.mxu3 %v13023_v58 }
 0x730   :  { %v12476_v3 = vld [vmem:[#allocation5 + $0x1238] sm:$0xf0] }
 0x731   :  { %v15907_v8 = vld [vmem:[#allocation5 + $0x141c] sm:$0xf]  ;;  %v12479_v62 = vor.u32 %v15843_v51, %v12476_v3  ;;  %7992 = vmatpush.bf16.msra.mxu0 %v12223_v50  ;;  %v7003_v51 = vadd.f32 %v17656_v12, %v6989_v39 }
 0x732   :  { %v12732_v27 = vld [vmem:[#allocation5 + $0x1438] sm:$0xf0] }
 0x733   :  { %v15971_v23 = vld [vmem:[#allocation5 + $0x161c] sm:$0xf]  ;;  %v12735_v2 = vor.u32 %v15907_v8, %v12732_v27  ;;  %8006 = vmatpush.bf16.msra.mxu1 %v12479_v62 }
 0x734   :  { %v12988_v56 = vld [vmem:[#allocation5 + $0x1638] sm:$0xf0]  ;;  %7993 = vmatmul.bf16.vlgmr.msra.gmra.mxu0 %v16798_v31 }
 0x735   :  { %v16091_v20 = vld [vmem:[#allocation5 + $0x19dc] sm:$0xf]  ;;  %v12991_v11 = vor.u32 %v15971_v23, %v12988_v56  ;;  %8020 = vmatpush.bf16.msra.mxu2 %v12735_v2  ;;  %v17234_v23 = vpop.f32.mrf.mxu0 }
 0x736   :  { %v13468_v53 = vld [vmem:[#allocation5 + $0x19f8] sm:$0xf0]  ;;  %8007 = vmatmul.bf16.vlgmr.msra.gmra.mxu1 %v16802_v36 }
 0x737   :  { %v16155_v1 = vld [vmem:[#allocation5 + $0x1bdc] sm:$0xf]  ;;  %v13471_v16 = vor.u32 %v16091_v20, %v13468_v53  ;;  %8034 = vmatpush.bf16.msra.mxu3 %v12991_v11  ;;  %v6373_v53 = vadd.f32 %v17658_v63, %v6359_v42  ;;  %v17245_v11 = vpop.f32.mrf.mxu1 }
 0x738   :  { %v13724_v17 = vld [vmem:[#allocation5 + $0x1bf8] sm:$0xf0]  ;;  %8021 = vmatmul.bf16.vlgmr.msra.gmra.mxu2 %v16800_v35  ;;  %v17659_v35 = vld [vmem:[#allocation29_spill] sm:$0xff] }
 0x739   :  { %v16219_v34 = vld [vmem:[#allocation5 + $0x1ddc] sm:$0xf]  ;;  %v13727_v59 = vor.u32 %v16155_v1, %v13724_v17  ;;  %8041 = vmatpush.bf16.msrb.mxu0 %v13471_v16  ;;  %v17240_v1 = vpop.f32.mrf.mxu3  ;;  %v6597_v37 = vadd.f32 %v17659_v35, %v6583_v54 }
 0x73a   :  { %v13980_v30 = vld [vmem:[#allocation5 + $0x1df8] sm:$0xf0]  ;;  %8035 = vmatmul.bf16.vlgmr.msra.gmra.mxu3 %v16804_v40 }
 0x73b   :  { %v16283_v49 = vld [vmem:[#allocation5 + $0x1fdc] sm:$0xf]  ;;  %v13983_v15 = vor.u32 %v16219_v34, %v13980_v30  ;;  %8055 = vmatpush.bf16.msrb.mxu1 %v13727_v59 }
 0x73c   :  { %v14236_v5 = vld [vmem:[#allocation5 + $0x1ff8] sm:$0xf0] }
 0x73d   :  { %v16083_v33 = vld [vmem:[#allocation5 + $0x199c] sm:$0xf]  ;;  %v14239_v48 = vor.u32 %v16283_v49, %v14236_v5  ;;  %8069 = vmatpush.bf16.msrb.mxu2 %v13983_v15  ;;  %v17661_v5 = vld [vmem:[#allocation43_spill] sm:$0xff]  ;;  %v17662_v15 = vld [vmem:[#allocation17_spill] sm:$0xff] }
 0x73e   :  { %v13436_v57 = vld [vmem:[#allocation5 + $0x19b8] sm:$0xf0] }
 0x73f   :  { %v16147_v52 = vld [vmem:[#allocation5 + $0x1b9c] sm:$0xf]  ;;  %v13439_v22 = vor.u32 %v16083_v33, %v13436_v57  ;;  %8083 = vmatpush.bf16.msrb.mxu3 %v14239_v48  ;;  %v6387_v33 = vadd.f32 %v17662_v15, %v6373_v53  ;;  %v17668_v53 = vld [vmem:[#allocation19_spill] sm:$0xff]  ;;  %v17265_v15 = vpop.f32.mrf.mxu1 }
 0x740   :  { %v13692_v7 = vld [vmem:[#allocation5 + $0x1bb8] sm:$0xf0] }
 0x741   :  { %v16211_v21 = vld [vmem:[#allocation5 + $0x1d9c] sm:$0xf]  ;;  %v13695_v24 = vor.u32 %v16147_v52, %v13692_v7  ;;  %8042 = vmatpush.bf16.msrb.mxu0 %v13439_v22  ;;  %v17248_v52 = vpop.f32.mrf.mxu2 }
 0x742   :  { %v13948_v14 = vld [vmem:[#allocation5 + $0x1db8] sm:$0xf0] }
 0x743   :  { %v16275_v26 = vld [vmem:[#allocation5 + $0x1f9c] sm:$0xf]  ;;  %v13951_v47 = vor.u32 %v16211_v21, %v13948_v14  ;;  %8056 = vmatpush.bf16.msrb.mxu1 %v13695_v24 }
 0x744   :  { %v14204_v44 = vld [vmem:[#allocation5 + $0x1fb8] sm:$0xf0] }
 0x745   :  { %v16075_v29 = vld [vmem:[#allocation5 + $0x195c] sm:$0xf]  ;;  %v14207_v25 = vor.u32 %v16275_v26, %v14204_v44  ;;  %8070 = vmatpush.bf16.msrb.mxu2 %v13951_v47  ;;  %v17665_v44 = vld [vmem:[#allocation59_spill] sm:$0xff] }
 0x746   :  { %v13404_v6 = vld [vmem:[#allocation5 + $0x1978] sm:$0xf0] }
 0x747   :  { %v16139_v28 = vld [vmem:[#allocation5 + $0x1b5c] sm:$0xf]  ;;  %v13407_v31 = vor.u32 %v16075_v29, %v13404_v6  ;;  %8084 = vmatpush.bf16.msrb.mxu3 %v14207_v25  ;;  %v17666_v6 = vld [vmem:[#allocation44_spill] sm:$0xff] }
 0x748   :  { %v13660_v3 = vld [vmem:[#allocation5 + $0x1b78] sm:$0xf0] }
 0x749   :  { %v16203_v8 = vld [vmem:[#allocation5 + $0x1d5c] sm:$0xf]  ;;  %v13663_v10 = vor.u32 %v16139_v28, %v13660_v3  ;;  %8043 = vmatpush.bf16.msrb.mxu0 %v13407_v31 }
 0x74a   :  { %v13916_v4 = vld [vmem:[#allocation5 + $0x1d78] sm:$0xf0] }
 0x74b   :  { %v17657_v58 = vld [vmem:[#allocation42_spill] sm:$0xff]  ;;  %v13919_v50 = vor.u32 %v16203_v8, %v13916_v4  ;;  %8057 = vmatpush.bf16.msrb.mxu1 %v13663_v10  ;;  %v17255_v8 = vpop.f32.mrf.mxu0  ;;  %v17257_v4 = vpop.f32.mrf.mxu3  ;;  %v17669_v10 = vld [vmem:[#allocation60_spill] sm:$0xff] }
 0x74c   :  { %v6793_v27 = vadd.f32 %v17657_v58, %v6779_v18  ;;  %v16267_v56 = vld [vmem:[#allocation5 + $0x1f5c] sm:$0xf] }
 0x74d   :  { %v14172_v20 = vld [vmem:[#allocation5 + $0x1f78] sm:$0xf0]  ;;  %8071 = vmatpush.bf16.msrb.mxu2 %v13919_v50 }
 0x74e   :  { %v16067_v17 = vld [vmem:[#allocation5 + $0x191c] sm:$0xf]  ;;  %v14175_v62 = vor.u32 %v16267_v56, %v14172_v20  ;;  %v6807_v45 = vadd.f32 %v17661_v5, %v6793_v27 }
 0x74f   :  { %v13372_v34 = vld [vmem:[#allocation5 + $0x1938] sm:$0xf0] }
 0x750   :  { %v16131_v30 = vld [vmem:[#allocation5 + $0x1b1c] sm:$0xf]  ;;  %v13375_v57 = vor.u32 %v16067_v17, %v13372_v34  ;;  %8085 = vmatpush.bf16.msrb.mxu3 %v14175_v62  ;;  %v6821_v28 = vadd.f32 %v17666_v6, %v6807_v45 }
 0x751   :  { %v17660_v36 = vld [vmem:[#allocation58_spill] sm:$0xff] }
 0x752   :  { %v7017_v60 = vadd.f32 %v17660_v36, %v7003_v51  ;;  %v13628_v2 = vld [vmem:[#allocation5 + $0x1b38] sm:$0xf0]  ;;  %v17667_v51 = vld [vmem:[#allocation31_spill] sm:$0xff]  ;;  %8044 = vmatpush.bf16.msrb.mxu0 %v13375_v57 }
 0x753   :  { %v16195_v49 = vld [vmem:[#allocation5 + $0x1d1c] sm:$0xf]  ;;  %v13631_v61 = vor.u32 %v16131_v30, %v13628_v2  ;;  %v17671_v2 = vld [vmem:[#allocation20_spill] sm:$0xff] }
 0x754   :  { %v13884_v40 = vld [vmem:[#allocation5 + $0x1d38] sm:$0xf0]  ;;  %v7031_v42 = vadd.f32 %v17665_v44, %v7017_v60  ;;  %v17675_v44 = vld [vmem:[#allocation33_spill] sm:$0xff] }
 0x755   :  { %v16259_v16 = vld [vmem:[#allocation5 + $0x1f1c] sm:$0xf]  ;;  %v13887_v19 = vor.u32 %v16195_v49, %v13884_v40  ;;  %8058 = vmatpush.bf16.msrb.mxu1 %v13631_v61  ;;  %v17672_v40 = vld [vmem:[#allocation32_spill] sm:$0xff] }
 0x756   :  { %v14140_v59 = vld [vmem:[#allocation5 + $0x1f38] sm:$0xf0]  ;;  %v7045_v50 = vadd.f32 %v17669_v10, %v7031_v42 }
 0x757   :  { %v16059_v39 = vld [vmem:[#allocation5 + $0x18dc] sm:$0xf]  ;;  %v14143_v22 = vor.u32 %v16259_v16, %v14140_v59  ;;  %8072 = vmatpush.bf16.msrb.mxu2 %v13887_v19 }
 0x758   :  { %v13340_v48 = vld [vmem:[#allocation5 + $0x18f8] sm:$0xf0] }
 0x759   :  { %v16123_v7 = vld [vmem:[#allocation5 + $0x1adc] sm:$0xf]  ;;  %v13343_v3 = vor.u32 %v16059_v39, %v13340_v48  ;;  %8086 = vmatpush.bf16.msrb.mxu3 %v14143_v22  ;;  %v17674_v48 = vld [vmem:[#allocation61_spill] sm:$0xff]  ;;  %v17269_v22 = vpop.f32.mrf.mxu2 }
 0x75a   :  { %v17663_v21 = vld [vmem:[#allocation18_spill] sm:$0xff] }
 0x75b   :  { %v6401_v14 = vadd.f32 %v17663_v21, %v6387_v33  ;;  %v17664_v18 = vld [vmem:[#allocation30_spill] sm:$0xff]  ;;  %8045 = vmatpush.bf16.msrb.mxu0 %v13343_v3  ;;  %v17678_v3 = vld [vmem:[#allocation47_spill] sm:$0xff] }
 0x75c   :  { %v6611_v26 = vadd.f32 %v17664_v18, %v6597_v37  ;;  %v13596_v24 = vld [vmem:[#allocation5 + $0x1af8] sm:$0xf0]  ;;  %v17670_v37 = vld [vmem:[#allocation45_spill] sm:$0xff] }
 0x75d   :  { %v16187_v47 = vld [vmem:[#allocation5 + $0x1cdc] sm:$0xf]  ;;  %v13599_v58 = vor.u32 %v16123_v7, %v13596_v24  ;;  %v6415_v31 = vadd.f32 %v17668_v53, %v6401_v14  ;;  %v6835_v36 = vadd.f32 %v17670_v37, %v6821_v28  ;;  %v7059_v7 = vadd.f32 %v17674_v48, %v7045_v50 }
 0x75e   :  { %v13852_v29 = vld [vmem:[#allocation5 + $0x1cf8] sm:$0xf0]  ;;  %v6625_v25 = vadd.f32 %v17667_v51, %v6611_v26 }
 0x75f   :  { %v16251_v54 = vld [vmem:[#allocation5 + $0x1edc] sm:$0xf]  ;;  %v13855_v27 = vor.u32 %v16187_v47, %v13852_v29  ;;  %v6429_v49 = vadd.f32 %v17671_v2, %v6415_v31  ;;  %8059 = vmatpush.bf16.msrb.mxu1 %v13599_v58  ;;  %v17676_v29 = vld [vmem:[#allocation21_spill] sm:$0xff]  ;;  %v17279_v2 = vpop.f32.mrf.mxu0 }
 0x760   :  { %v14108_v12 = vld [vmem:[#allocation5 + $0x1ef8] sm:$0xf0]  ;;  %v6639_v5 = vadd.f32 %v17672_v40, %v6625_v25  ;;  %v16318_v40 = vld [vmem:[#allocation8 + $0xec] sm:$0xf0] }
 0x761   :  { %v16051_v56 = vld [vmem:[#allocation5 + $0x189c] sm:$0xf]  ;;  %v14111_v17 = vor.u32 %v16251_v54, %v14108_v12  ;;  %8073 = vmatpush.bf16.msrb.mxu2 %v13855_v27  ;;  %v6443_v6 = vadd.f32 %v17676_v29, %v6429_v49  ;;  %v14354_v49 = vld [vmem:[#allocation8 + $0xe0] sm:$0xf] }
 0x762   :  { %v13308_v20 = vld [vmem:[#allocation5 + $0x18b8] sm:$0xf0]  ;;  %v6653_v42 = vadd.f32 %v17675_v44, %v6639_v5  ;;  %v14482_v5 = vld [vmem:[#allocation8 + $0x1e0] sm:$0xf]  ;;  %v17284_v44 = vld [vmem:[#allocation7] sm:$0xff] }
 0x763   :  { %v16115_v63 = vld [vmem:[#allocation5 + $0x1a9c] sm:$0xf]  ;;  %v13311_v45 = vor.u32 %v16051_v56, %v13308_v20  ;;  %8087 = vmatpush.bf16.msrb.mxu3 %v14111_v17  ;;  %v17685_v29 = vld [vmem:[#allocation23_spill] sm:$0xff] }
 0x764   :  { %v13564_v34 = vld [vmem:[#allocation5 + $0x1ab8] sm:$0xf0] }
 0x765   :  { %v16179_v30 = vld [vmem:[#allocation5 + $0x1c9c] sm:$0xf]  ;;  %v13567_v33 = vor.u32 %v16115_v63, %v13564_v34  ;;  %8046 = vmatpush.bf16.msrb.mxu0 %v13311_v45  ;;  %v17682_v45 = vld [vmem:[#allocation63_spill] sm:$0xff] }
 0x766   :  { %v13820_v35 = vld [vmem:[#allocation5 + $0x1cb8] sm:$0xf0] }
 0x767   :  { %v16243_v60 = vld [vmem:[#allocation5 + $0x1e9c] sm:$0xf]  ;;  %v13823_v57 = vor.u32 %v16179_v30, %v13820_v35  ;;  %8060 = vmatpush.bf16.msrb.mxu1 %v13567_v33  ;;  %v16350_v33 = vld [vmem:[#allocation8 + $0x1ec] sm:$0xf0] }
 0x768   :  { %v14076_v62 = vld [vmem:[#allocation5 + $0x1eb8] sm:$0xf0] }
 0x769   :  { %v17673_v16 = vld [vmem:[#allocation46_spill] sm:$0xff]  ;;  %v14079_v21 = vor.u32 %v16243_v60, %v14076_v62  ;;  %8074 = vmatpush.bf16.msrb.mxu2 %v13823_v57  ;;  %v17277_v62 = vpop.f32.mrf.mxu3  ;;  %v14610_v57 = vld [vmem:[#allocation8 + $0x2e0] sm:$0xf] }
 0x76a   :  { %v6849_v59 = vadd.f32 %v17673_v16, %v6835_v36  ;;  %v16043_v61 = vld [vmem:[#allocation5 + $0x185c] sm:$0xf]  ;;  %v17681_v36 = vld [vmem:[#allocation48_spill] sm:$0xff] }
 0x76b   :  { %v13276_v19 = vld [vmem:[#allocation5 + $0x1878] sm:$0xf0]  ;;  %8088 = vmatpush.bf16.msrb.mxu3 %v14079_v21  ;;  %v14738_v21 = vld [vmem:[#allocation8 + $0x3e0] sm:$0xf] }
 0x76c   :  { %v16107_v39 = vld [vmem:[#allocation5 + $0x1a5c] sm:$0xf]  ;;  %v13279_v12 = vor.u32 %v16043_v61, %v13276_v19  ;;  %v6863_v58 = vadd.f32 %v17678_v3, %v6849_v59  ;;  %v16382_v61 = vld [vmem:[#allocation8 + $0x2ec] sm:$0xf0]  ;;  %v17683_v19 = vld [vmem:[#allocation35_spill] sm:$0xff] }
 0x76d   :  { %v13532_v14 = vld [vmem:[#allocation5 + $0x1a78] sm:$0xf0]  ;;  %v14338_v3 = vld [vmem:[#allocation8 + $0xc0] sm:$0xf] }
 0x76e   :  { %v16171_v18 = vld [vmem:[#allocation5 + $0x1c5c] sm:$0xf]  ;;  %v13535_v27 = vor.u32 %v16107_v39, %v13532_v14  ;;  %v6877_v60 = vadd.f32 %v17681_v36, %v6863_v58  ;;  %8047 = vmatpush.bf16.msrb.mxu0 %v13279_v12  ;;  %v16414_v14 = vld [vmem:[#allocation8 + $0x3ec] sm:$0xf0]  ;;  %v17289_v12 = vpop.f32.mrf.mxu1 }
 0x76f   :  { %v13788_v26 = vld [vmem:[#allocation5 + $0x1c78] sm:$0xf0]  ;;  %v16314_v58 = vld [vmem:[#allocation8 + $0xcc] sm:$0xf0] }
 0x770   :  { %v16235_v24 = vld [vmem:[#allocation5 + $0x1e5c] sm:$0xf]  ;;  %v13791_v56 = vor.u32 %v16171_v18, %v13788_v26  ;;  %8061 = vmatpush.bf16.msrb.mxu1 %v13535_v27  ;;  %v17684_v18 = vld [vmem:[#allocation64_spill] sm:$0xff]  ;;  %v14466_v27 = vld [vmem:[#allocation8 + $0x1c0] sm:$0xf] }
 0x771   :  { %v14044_v47 = vld [vmem:[#allocation5 + $0x1e78] sm:$0xf0]  ;;  %v16410_v36 = vld [vmem:[#allocation8 + $0x3cc] sm:$0xf0] }
 0x772   :  { %v17677_v28 = vld [vmem:[#allocation62_spill] sm:$0xff]  ;;  %v14047_v31 = vor.u32 %v16235_v24, %v14044_v47  ;;  %8075 = vmatpush.bf16.msrb.mxu2 %v13791_v56  ;;  %v14355_v47 = vor.u32 %v16318_v40, %v14354_v49  ;;  %v14739_v56 = vor.u32 %v16414_v14, %v14738_v21  ;;  %v17691_v40 = vld [vmem:[#allocation71_spill] sm:$0xff]  ;;  %v16310_v21 = vld [vmem:[#allocation8 + $0xac] sm:$0xf0] }
 0x773   :  { %v7073_v54 = vadd.f32 %v17677_v28, %v7059_v7  ;;  %v16035_v51 = vld [vmem:[#allocation5 + $0x181c] sm:$0xf]  ;;  %v17686_v28 = vld [vmem:[#allocation49_spill] sm:$0xff]  ;;  %v14450_v14 = vld [vmem:[#allocation8 + $0x1a0] sm:$0xf] }
 0x774   :  { %v13244_v25 = vld [vmem:[#allocation5 + $0x1838] sm:$0xf0]  ;;  %8089 = vmatpush.bf16.msrb.mxu3 %v14047_v31 }
 0x775   :  { %v16099_v20 = vld [vmem:[#allocation5 + $0x1a1c] sm:$0xf]  ;;  %v7087_v16 = vadd.f32 %v17682_v45, %v7073_v54  ;;  %v13247_v59 = vor.u32 %v16035_v51, %v13244_v25  ;;  %v6891_v54 = vadd.f32 %v17686_v28, %v6877_v60  ;;  %v14483_v51 = vor.u32 %v16350_v33, %v14482_v5  ;;  %v17690_v60 = vld [vmem:[#allocation65_spill] sm:$0xff] }
 0x776   :  { %v13500_v63 = vld [vmem:[#allocation5 + $0x1a38] sm:$0xf0]  ;;  %v14611_v25 = vor.u32 %v16382_v61, %v14610_v57  ;;  %v17692_v5 = vperm.slane %v17691_v40, 4  ;;  %v17694_v33 = vld [vmem:[#allocation89_spill] sm:$0xff]  ;;  %v17696_v61 = vld [vmem:[#allocation92_spill] sm:$0xff] }
 0x777   :  { %v16163_v53 = vld [vmem:[#allocation5 + $0x1c1c] sm:$0xf]  ;;  %v13503_v48 = vor.u32 %v16099_v20, %v13500_v63  ;;  %v7101_v26 = vadd.f32 %v17684_v18, %v7087_v16  ;;  %8048 = vmatpush.bf16.msrb.mxu0 %v13247_v59  ;;  %v16346_v20 = vld [vmem:[#allocation8 + $0x1cc] sm:$0xf0]  ;;  %v14594_v63 = vld [vmem:[#allocation8 + $0x2c0] sm:$0xf]  ;;  %v14339_v59 = vor.u32 %v16314_v58, %v14338_v3  ;;  %v17308_v3 = vpop.f32.mrf.mxu0  ;;  %v17310_v58 = vpop.f32.mrf.mxu3 }
 0x778   :  { %v13756_v10 = vld [vmem:[#allocation5 + $0x1c38] sm:$0xf0]  ;;  %v17695_v57 = vperm.slane %v17694_v33, 5  ;;  %v16370_v40 = vld [vmem:[#allocation8 + $0x28c] sm:$0xf0]  ;;  %v17323_v33 = vpop.f32.mrf.mxu1 }
 0x779   :  { %v16227_v50 = vld [vmem:[#allocation5 + $0x1e1c] sm:$0xf]  ;;  %v13759_v7 = vor.u32 %v16163_v53, %v13756_v10  ;;  %v16378_v53 = vld [vmem:[#allocation8 + $0x2cc] sm:$0xf0]  ;;  %8062 = vmatpush.bf16.msrb.mxu1 %v13503_v48  ;;  %v7115_v49 = vadd.f32 %v17690_v60, %v7101_v26 }
 0x77a   :  { %v14012_v17 = vld [vmem:[#allocation5 + $0x1e38] sm:$0xf0]  ;;  %v17687_v10 = vld [vmem:[#allocation25_spill] sm:$0xff]  ;;  %v14595_v48 = vor.u32 %v16378_v53, %v14594_v63  ;;  %8049 = vmatmul.bf16.vlgmr.msrb.gmra.mxu0 %v16810_v32 }
 0x77b   :  { %v17679_v34 = vld [vmem:[#allocation22_spill] sm:$0xff]  ;;  %v14015_v24 = vor.u32 %v16227_v50, %v14012_v17  ;;  %v17688_v50 = vld [vmem:[#allocation36_spill] sm:$0xff]  ;;  %8076 = vmatpush.bf16.msrb.mxu2 %v13759_v7  ;;  %9667 = vmatpush.bf16.msra.mxu0 %v14355_v47  ;;  %v14322_v7 = vld [vmem:[#allocation8 + $0xa0] sm:$0xf] }
 0x77c   :  { %v6457_v30 = vadd.f32 %v17679_v34, %v6443_v6  ;;  %v17680_v35 = vld [vmem:[#allocation34_spill] sm:$0xff]  ;;  %v16342_v47 = vld [vmem:[#allocation8 + $0x1ac] sm:$0xf0]  ;;  %8063 = vmatmul.bf16.vlgmr.msrb.gmra.mxu1 %v16814_v41 }
 0x77d   :  { %v6667_v37 = vadd.f32 %v17680_v35, %v6653_v42  ;;  %v1175_v42 = vperm.slane %v17284_v44, 6  ;;  %v17689_v34 = vld [vmem:[#allocation50_spill] sm:$0xff]  ;;  %v17294_v35 = vpop.f32.mrf.mxu2  ;;  %8090 = vmatpush.bf16.msrb.mxu3 %v14015_v24  ;;  %9681 = vmatpush.bf16.msra.mxu1 %v14483_v51  ;;  %v17701_v63 = vld [vmem:[#allocation93_spill] sm:$0xff] }
 0x77e   :  { %v6471_v6 = vadd.f32 %v17685_v29, %v6457_v30  ;;  %v6905_v30 = vadd.f32 %v17689_v34, %v6891_v54  ;;  %v17693_v45 = vld [vmem:[#allocation74_spill] sm:$0xff]  ;;  %v14578_v29 = vld [vmem:[#allocation8 + $0x2a0] sm:$0xf]  ;;  %8077 = vmatmul.bf16.vlgmr.msrb.gmra.mxu2 %v16812_v38  ;;  %v16306_v41 = vld [vmem:[#allocation8 + $0x8c] sm:$0xf0] }
 0x77f   :  { %v6681_v39 = vadd.f32 %v17683_v19, %v6667_v37  ;;  %v14722_v37 = vld [vmem:[#allocation8 + $0x3c0] sm:$0xf]  ;;  %v7213_v16 = vadd.f32 %v17693_v45, %v17692_v5  ;;  %v7437_v19 = vadd.f32 %v17696_v61, %v17695_v57  ;;  %9695 = vmatpush.bf16.msra.mxu2 %v14611_v25  ;;  %v7659_v18 = vadd.f32 %v17234_v23, %v1175_v42  ;;  %v17697_v28 = vld [vmem:[#allocation26_spill] sm:$0xff]  ;;  %v16402_v61 = vld [vmem:[#allocation8 + $0x38c] sm:$0xf0] }
 0x780   :  { %v6485_v31 = vadd.f32 %v17687_v10, %v6471_v6  ;;  %v7661_v26 = vadd.f32 %v17255_v8, %v1175_v42  ;;  %v14723_v24 = vor.u32 %v16410_v36, %v14722_v37  ;;  %v16374_v6 = vld [vmem:[#allocation8 + $0x2ac] sm:$0xf0]  ;;  %v17698_v51 = vld [vmem:[#allocation38_spill] sm:$0xff]  ;;  %v14706_v23 = vld [vmem:[#allocation8 + $0x3a0] sm:$0xf]  ;;  %8091 = vmatmul.bf16.vlgmr.msrb.gmra.mxu3 %v16816_v46  ;;  %9668 = vmatpush.bf16.msra.mxu0 %v14339_v59 }
 0x781   :  { %v6695_v17 = vadd.f32 %v17688_v50, %v6681_v39  ;;  %v14467_v39 = vor.u32 %v16346_v20, %v14466_v27  ;;  %9709 = vmatpush.bf16.msra.mxu3 %v14739_v56  ;;  %v16406_v8 = vld [vmem:[#allocation8 + $0x3ac] sm:$0xf0]  ;;  %v17699_v42 = vld [vmem:[#allocation66_spill] sm:$0xff]  ;;  %v17700_v27 = vld [vmem:[#allocation75_spill] sm:$0xff]  ;;  %v14323_v20 = vor.u32 %v16310_v21, %v14322_v7  ;;  %v7451_v53 = vadd.f32 %v17701_v63, %v7437_v19 }
 0x782   :  { %v6499_v54 = vadd.f32 %v17697_v28, %v6485_v31  ;;  %v7129_v32 = vadd.f32 %v17699_v42, %v7115_v49  ;;  %v7227_v56 = vadd.f32 %v17700_v27, %v7213_v16  ;;  %v14451_v10 = vor.u32 %v16342_v47, %v14450_v14  ;;  %v14306_v50 = vld [vmem:[#allocation8 + $0x80] sm:$0xf]  ;;  %v16338_v46 = vld [vmem:[#allocation8 + $0x18c] sm:$0xf0]  ;;  %v17708_v21 = vld [vmem:[#allocation94_spill] sm:$0xff] }
 0x783   :  { %v6709_v25 = vadd.f32 %v17698_v51, %v6695_v17  ;;  %9682 = vmatpush.bf16.msra.mxu1 %v14467_v39  ;;  %9696 = vmatpush.bf16.msra.mxu2 %v14595_v48  ;;  %v14579_v31 = vor.u32 %v16374_v6, %v14578_v29  ;;  %v14434_v17 = vld [vmem:[#allocation8 + $0x180] sm:$0xf]  ;;  %v7673_v37 = vadd.f32 %v17245_v11, %v7659_v18  ;;  %v17705_v19 = vld [vmem:[#allocation53_spill] sm:$0xff]  ;;  %v17707_v11 = vld [vmem:[#allocation76_spill] sm:$0xff] }
 0x784   :  { %v17702_v38 = vld [vmem:[#allocation51_spill] sm:$0xff]  ;;  %v7675_v36 = vadd.f32 %v17265_v15, %v7661_v26  ;;  %v14707_v60 = vor.u32 %v16406_v8, %v14706_v23  ;;  %v7241_v7 = vadd.f32 %v17707_v11, %v7227_v56  ;;  %9669 = vmatpush.bf16.msra.mxu0 %v14323_v20  ;;  %v14307_v15 = vor.u32 %v16306_v41, %v14306_v50  ;;  %v16302_v29 = vld [vmem:[#allocation8 + $0x6c] sm:$0xf0]  ;;  %v17710_v27 = vld [vmem:[#allocation28_spill] sm:$0xff] }
 0x785   :  { %v6919_v34 = vadd.f32 %v17702_v38, %v6905_v30  ;;  %9710 = vmatpush.bf16.msra.mxu3 %v14723_v24  ;;  %v14562_v49 = vld [vmem:[#allocation8 + $0x280] sm:$0xf]  ;;  %v7465_v14 = vadd.f32 %v17708_v21, %v7451_v53  ;;  %v17329_v18 = vpop.f32.mrf.mxu2  ;;  %v14435_v26 = vor.u32 %v16338_v46, %v14434_v17  ;;  %v17709_v28 = vld [vmem:[#allocation69_spill] sm:$0xff]  ;;  %v7687_v51 = vadd.f32 %v17248_v52, %v7673_v37  ;;  %v17711_v20 = vld [vmem:[#allocation40_spill] sm:$0xff]  ;;  %v17338_v53 = vpop.f32.mrf.mxu0 }
 0x786   :  { %v17703_v5 = vld [vmem:[#allocation27_spill] sm:$0xff]  ;;  %v14563_v24 = vor.u32 %v16370_v40, %v14562_v49  ;;  %v16334_v8 = vld [vmem:[#allocation8 + $0x16c] sm:$0xf0]  ;;  %v17712_v50 = vld [vmem:[#allocation24_spill] sm:$0xff] }
 0x787   :  { %v6513_v45 = vadd.f32 %v17703_v5, %v6499_v54  ;;  %v17704_v16 = vld [vmem:[#allocation39_spill] sm:$0xff]  ;;  %v6933_v39 = vadd.f32 %v17705_v19, %v6919_v34  ;;  %9683 = vmatpush.bf16.msra.mxu1 %v14451_v10  ;;  %9697 = vmatpush.bf16.msra.mxu2 %v14579_v31  ;;  %v16398_v31 = vld [vmem:[#allocation8 + $0x36c] sm:$0xf0]  ;;  %v8097_v41 = vmax.f32 %v17712_v50, 0.0  ;;  %v17713_v17 = vld [vmem:[#allocation54_spill] sm:$0xff] }
 0x788   :  { %v6723_v59 = vadd.f32 %v17704_v16, %v6709_v25  ;;  %v14690_v57 = vld [vmem:[#allocation8 + $0x380] sm:$0xf]  ;;  %v7689_v25 = vadd.f32 %v17269_v22, %v7675_v36  ;;  %v17714_v38 = vld [vmem:[#allocation77_spill] sm:$0xff]  ;;  %9670 = vmatpush.bf16.msra.mxu0 %v14307_v15  ;;  %v17716_v16 = vld [vmem:[#allocation70_spill] sm:$0xff] }
 0x789   :  { %v17706_v30 = vld [vmem:[#allocation67_spill] sm:$0xff]  ;;  %9711 = vmatpush.bf16.msra.mxu3 %v14707_v60  ;;  %v14691_v23 = vor.u32 %v16402_v61, %v14690_v57  ;;  %v17335_v56 = vadd.f32 %v17710_v27, %v6513_v45  ;;  %v6947_v52 = vadd.f32 %v17713_v17, %v6933_v39  ;;  %v7255_v22 = vadd.f32 %v17714_v38, %v7241_v7  ;;  %v17344_v60 = vpop.f32.mrf.mxu3  ;;  %v16298_v5 = vld [vmem:[#allocation8 + $0x4c] sm:$0xf0] }
 0x78a   :  { %v7143_v48 = vadd.f32 %v17706_v30, %v7129_v32  ;;  %v14290_v47 = vld [vmem:[#allocation8 + $0x60] sm:$0xf]  ;;  %v16366_v32 = vld [vmem:[#allocation8 + $0x26c] sm:$0xf0]  ;;  %v6737_v63 = vadd.f32 %v17711_v20, %v6723_v59  ;;  %v7701_v57 = vadd.f32 %v17257_v4, %v7687_v51  ;;  %v7703_v61 = vadd.f32 %v17277_v62, %v7689_v25  ;;  %v17722_v25 = vld [vmem:[#allocation96_spill] sm:$0xff] }
 0x78b   :  { %v14418_v6 = vld [vmem:[#allocation8 + $0x160] sm:$0xf]  ;;  %v14291_v34 = vor.u32 %v16302_v29, %v14290_v47  ;;  %9684 = vmatpush.bf16.msra.mxu1 %v14435_v26  ;;  %9698 = vmatpush.bf16.msra.mxu2 %v14563_v24  ;;  %v16330_v39 = vld [vmem:[#allocation8 + $0x14c] sm:$0xf0]  ;;  %v8105_v11 = vmax.f32 %v17335_v56, 0.0  ;;  %v17354_v26 = vpop.f32.mrf.mxu1  ;;  %v17733_v56 = vld [vmem:[#allocation68_spill] sm:$0xff] }
 0x78c   :  { %v7157_v54 = vadd.f32 %v17709_v28, %v7143_v48  ;;  %v14546_v42 = vld [vmem:[#allocation8 + $0x260] sm:$0xf]  ;;  %v14419_v46 = vor.u32 %v16334_v8, %v14418_v6  ;;  %v16362_v48 = vld [vmem:[#allocation8 + $0x24c] sm:$0xf0]  ;;  %v17720_v6 = vld [vmem:[#allocation72_spill] sm:$0xff] }
 0x78d   :  { %v14674_v10 = vld [vmem:[#allocation8 + $0x360] sm:$0xf]  ;;  %v14547_v49 = vor.u32 %v16366_v32, %v14546_v42  ;;  %9712 = vmatpush.bf16.msra.mxu3 %v14691_v23  ;;  %v17717_v7 = vld [vmem:[#allocation37_spill] sm:$0xff]  ;;  %v17721_v28 = vld [vmem:[#allocation78_spill] sm:$0xff]  ;;  %9671 = vmatpush.bf16.msra.mxu0 %v14291_v34  ;;  %v17360_v8 = vpop.f32.mrf.mxu2 }
 0x78e   :  { %v17715_v37 = vld [vmem:[#allocation95_spill] sm:$0xff]  ;;  %v7171_v59 = vadd.f32 %v17716_v16, %v7157_v54  ;;  %v14675_v19 = vor.u32 %v16398_v31, %v14674_v10  ;;  %v8098_v15 = vmax.f32 %v17717_v7, 0.0  ;;  %v17718_v21 = vld [vmem:[#allocation41_spill] sm:$0xff]  ;;  %v7269_v54 = vadd.f32 %v17721_v28, %v7255_v22 }
 0x78f   :  { %v7479_v36 = vadd.f32 %v17715_v37, %v7465_v14  ;;  %v14274_v40 = vld [vmem:[#allocation8 + $0x40] sm:$0xf]  ;;  %v17352_v14 = vadd.f32 %v17718_v21, %v6737_v63  ;;  %v16394_v47 = vld [vmem:[#allocation8 + $0x34c] sm:$0xf0]  ;;  %9685 = vmatpush.bf16.msra.mxu1 %v14419_v46  ;;  %9699 = vmatpush.bf16.msra.mxu2 %v14547_v49  ;;  %v7715_v10 = vadd.f32 %v17279_v2, %v7701_v57  ;;  %v17723_v37 = vld [vmem:[#allocation52_spill] sm:$0xff] }
 0x790   :  { %v14402_v45 = vld [vmem:[#allocation8 + $0x140] sm:$0xf]  ;;  %v7185_v62 = vadd.f32 %v17720_v6, %v7171_v59  ;;  %v14275_v51 = vor.u32 %v16298_v5, %v14274_v40  ;;  %v16294_v20 = vld [vmem:[#allocation8 + $0x2c] sm:$0xf0]  ;;  %v7717_v31 = vadd.f32 %v17308_v3, %v7703_v61  ;;  %v17724_v40 = vld [vmem:[#allocation56_spill] sm:$0xff] }
 0x791   :  { %v14530_v30 = vld [vmem:[#allocation8 + $0x240] sm:$0xf]  ;;  %v7493_v23 = vadd.f32 %v17722_v25, %v7479_v36  ;;  %v14403_v42 = vor.u32 %v16330_v39, %v14402_v45  ;;  %9713 = vmatpush.bf16.msra.mxu3 %v14675_v19  ;;  %v16358_v22 = vld [vmem:[#allocation8 + $0x22c] sm:$0xf0]  ;;  %v8106_v34 = vmax.f32 %v17352_v14, 0.0  ;;  %v8099_v36 = vmax.f32 %v17723_v37, 0.0 }
 0x792   :  { %v14658_v24 = vld [vmem:[#allocation8 + $0x340] sm:$0xf]  ;;  %v14531_v32 = vor.u32 %v16362_v48, %v14530_v30  ;;  %v16390_v49 = vld [vmem:[#allocation8 + $0x32c] sm:$0xf0]  ;;  %9672 = vmatpush.bf16.msra.mxu0 %v14275_v51  ;;  %v7772_v30 = vpop.f32.mrf.mxu0  ;;  %v17374_v48 = vpop.f32.mrf.mxu3  ;;  %v17728_v6 = vld [vmem:[#allocation80_spill] sm:$0xff]  ;;  %v7729_v28 = vadd.f32 %v17289_v12, %v7715_v10 }
 0x793   :  { %v17719_v29 = vld [vmem:[#allocation55_spill] sm:$0xff]  ;;  %v14659_v17 = vor.u32 %v16394_v47, %v14658_v24  ;;  %v17725_v45 = vld [vmem:[#allocation73_spill] sm:$0xff]  ;;  %9686 = vmatpush.bf16.msra.mxu1 %v14403_v42  ;;  %v7786_v10 = vpop.f32.mrf.mxu1 }
 0x794   :  { %v6961_v4 = vadd.f32 %v17719_v29, %v6947_v52  ;;  %v14258_v27 = vld [vmem:[#allocation8 + $0x20] sm:$0xf]  ;;  %v16326_v52 = vld [vmem:[#allocation8 + $0x12c] sm:$0xf0]  ;;  %v17370_v16 = vadd.f32 %v17725_v45, %v7185_v62  ;;  %9700 = vmatpush.bf16.msra.mxu2 %v14531_v32 }
 0x795   :  { %v14386_v63 = vld [vmem:[#allocation8 + $0x120] sm:$0xf]  ;;  %v14259_v3 = vor.u32 %v16294_v20, %v14258_v27  ;;  %v16290_v61 = vld [vmem:[#allocation8 + $0xc] sm:$0xf0]  ;;  %9714 = vmatpush.bf16.msra.mxu3 %v14659_v17  ;;  %v17729_v20 = vld [vmem:[#allocation98_spill] sm:$0xff] }
 0x796   :  { %v14514_v38 = vld [vmem:[#allocation8 + $0x220] sm:$0xf]  ;;  %v17367_v5 = vadd.f32 %v17724_v40, %v6961_v4  ;;  %v17727_v19 = vld [vmem:[#allocation97_spill] sm:$0xff]  ;;  %v14387_v21 = vor.u32 %v16326_v52, %v14386_v63 }
 0x797   :  { %v14642_v46 = vld [vmem:[#allocation8 + $0x320] sm:$0xf]  ;;  %v7507_v39 = vadd.f32 %v17727_v19, %v7493_v23  ;;  %v14515_v24 = vor.u32 %v16358_v22, %v14514_v38  ;;  %v16322_v29 = vld [vmem:[#allocation8 + $0x10c] sm:$0xf0]  ;;  %9673 = vmatpush.bf16.msra.mxu0 %v14259_v3  ;;  %v7800_v19 = vpop.f32.mrf.mxu2 }
 0x798   :  { %v17726_v2 = vld [vmem:[#allocation79_spill] sm:$0xff]  ;;  %v14643_v51 = vor.u32 %v16390_v49, %v14642_v46  ;;  %v16354_v25 = vld [vmem:[#allocation8 + $0x20c] sm:$0xf0]  ;;  %v8107_v12 = vmax.f32 %v17367_v5, 0.0  ;;  %9687 = vmatpush.bf16.msra.mxu1 %v14387_v21  ;;  %v17390_v21 = vpack.c.bf16 %v8105_v11, %v8097_v41  ;;  %v8100_v41 = vmax.f32 %v17733_v56, 0.0 }
 0x799   :  { %v7283_v59 = vadd.f32 %v17726_v2, %v7269_v54  ;;  %v14242_v57 = vld [vmem:[#allocation8] sm:$0xf]  ;;  %v7731_v54 = vadd.f32 %v17323_v33, %v7717_v31  ;;  %v16386_v27 = vld [vmem:[#allocation8 + $0x30c] sm:$0xf0]  ;;  %v7521_v40 = vadd.f32 %v17729_v20, %v7507_v39  ;;  %v8108_v33 = vmax.f32 %v17370_v16, 0.0  ;;  %9701 = vmatpush.bf16.msra.mxu2 %v14515_v24  ;;  %v17732_v24 = vld [vmem:[#allocation82_spill] sm:$0xff] }
 0x79a   :  { %v14370_v47 = vld [vmem:[#allocation8 + $0x100] sm:$0xf]  ;;  %v16446_v32 = vld [vmem:[#allocation8 + $0x4ec] sm:$0xf0]  ;;  %v14243_v38 = vor.u32 %v16290_v61, %v14242_v57  ;;  %9715 = vmatpush.bf16.msra.mxu3 %v14643_v51  ;;  %v17402_v50 = vpack.c.bf16 %v8107_v12, %v8099_v36  ;;  %v17406_v51 = vpop.f32.mrf.mxu0  ;;  %v7814_v14 = vpop.f32.mrf.mxu3 }
 0x79b   :  { %v14498_v4 = vld [vmem:[#allocation8 + $0x200] sm:$0xf]  ;;  %v7297_v62 = vadd.f32 %v17728_v6, %v7283_v59  ;;  %v7745_v52 = vadd.f32 %v17329_v18, %v7731_v54  ;;  %v16478_v22 = vld [vmem:[#allocation8 + $0x5ec] sm:$0xf0]  ;;  %v14371_v31 = vor.u32 %v16322_v29, %v14370_v47  ;;  %v7743_v59 = vadd.f32 %v17294_v35, %v7729_v28 }
 0x79c   :  { %v14626_v23 = vld [vmem:[#allocation8 + $0x300] sm:$0xf]  ;;  %v16510_v2 = vld [vmem:[#allocation8 + $0x6ec] sm:$0xf0]  ;;  %v14499_v17 = vor.u32 %v16354_v25, %v14498_v4  ;;  %9674 = vmatpush.bf16.msra.mxu0 %v14243_v38  ;;  %v17398_v28 = vpack.c.bf16 %v8106_v34, %v8098_v15  ;;  %v17409_v15 = vpack.c.bf16 %v8108_v33, %v8100_v41 }
 0x79d   :  { %v14866_v42 = vld [vmem:[#allocation8 + $0x4e0] sm:$0xf]  ;;  %v17730_v46 = vld [vmem:[#allocation81_spill] sm:$0xff]  ;;  %v14627_v18 = vor.u32 %v16386_v27, %v14626_v23  ;;  %v7759_v35 = vadd.f32 %v17344_v60, %v7745_v52  ;;  %9688 = vmatpush.bf16.msra.mxu1 %v14371_v31  ;;  %v7757_v60 = vadd.f32 %v17310_v58, %v7743_v59  ;;  %v17735_v52 = vld [vmem:[#allocation84_spill] sm:$0xff] }
 0x79e   :  { %v14994_v63 = vld [vmem:[#allocation8 + $0x5e0] sm:$0xf]  ;;  %v7311_v49 = vadd.f32 %v17730_v46, %v7297_v62  ;;  %v14867_v3 = vor.u32 %v16446_v32, %v14866_v42  ;;  %v16442_v54 = vld [vmem:[#allocation8 + $0x4cc] sm:$0xf0]  ;;  %9702 = vmatpush.bf16.msra.mxu2 %v14499_v17 }
 0x79f   :  { %v15122_v45 = vld [vmem:[#allocation8 + $0x6e0] sm:$0xf]  ;;  %v14995_v39 = vor.u32 %v16478_v22, %v14994_v63  ;;  %v16474_v29 = vld [vmem:[#allocation8 + $0x5cc] sm:$0xf0]  ;;  %v7773_v25 = vadd.f32 %v7772_v30, %v7759_v35  ;;  %9716 = vmatpush.bf16.msra.mxu3 %v14627_v18  ;;  %9675 = vmatmul.bf16.vlgmr.msra.gmra.mxu0 %v17390_v21  ;;  %v17416_v63 = vpop.f32.mrf.mxu1  ;;  %v17422_v12 = vpop.f32.mrf.mxu2 }
 0x7a0   :  { %v17731_v57 = vld [vmem:[#allocation99_spill] sm:$0xff]  ;;  %v15123_v6 = vor.u32 %v16510_v2, %v15122_v45  ;;  %v7325_v47 = vadd.f32 %v17732_v24, %v7311_v49  ;;  %v16506_v62 = vld [vmem:[#allocation8 + $0x6cc] sm:$0xf0]  ;;  %9723 = vmatpush.bf16.msrb.mxu0 %v14867_v3  ;;  %9689 = vmatmul.bf16.vlgmr.msra.gmra.mxu1 %v17398_v28  ;;  %v17736_v45 = vld [vmem:[#allocation100_spill] sm:$0xff] }
 0x7a1   :  { %v7535_v61 = vadd.f32 %v17731_v57, %v7521_v40  ;;  %v14850_v5 = vld [vmem:[#allocation8 + $0x4c0] sm:$0xf]  ;;  %9737 = vmatpush.bf16.msrb.mxu1 %v14995_v39  ;;  %v16438_v23 = vld [vmem:[#allocation8 + $0x4ac] sm:$0xf0]  ;;  %v7771_v40 = vadd.f32 %v17338_v53, %v7757_v60  ;;  %9703 = vmatmul.bf16.vlgmr.msra.gmra.mxu2 %v17402_v50  ;;  %v7787_v22 = vadd.f32 %v7786_v10, %v7773_v25 }
 0x7a2   :  { %v14978_v16 = vld [vmem:[#allocation8 + $0x5c0] sm:$0xf]  ;;  %v14851_v7 = vor.u32 %v16442_v54, %v14850_v5  ;;  %9751 = vmatpush.bf16.msrb.mxu2 %v15123_v6  ;;  %v16470_v58 = vld [vmem:[#allocation8 + $0x5ac] sm:$0xf0]  ;;  %9717 = vmatmul.bf16.vlgmr.msra.gmra.mxu3 %v17409_v15  ;;  %v17428_v24 = vpop.f32.mrf.mxu3 }
 0x7a3   :  { %v15106_v4 = vld [vmem:[#allocation8 + $0x6c0] sm:$0xf]  ;;  %v7549_v11 = vadd.f32 %v17183_v55, %v7535_v61  ;;  %v14979_v34 = vor.u32 %v16474_v29, %v14978_v16  ;;  %v16502_v42 = vld [vmem:[#allocation8 + $0x6ac] sm:$0xf0]  ;;  %v7785_v49 = vadd.f32 %v17354_v26, %v7771_v40  ;;  %v7801_v59 = vadd.f32 %v7800_v19, %v7787_v22  ;;  %v7828_v16 = vpop.f32.mrf.mxu0  ;;  %v17740_v40 = vld [vmem:[#allocation88_spill] sm:$0xff] }
 0x7a4   :  { %v15107_v37 = vor.u32 %v16506_v62, %v15106_v4  ;;  %v14834_v36 = vld [vmem:[#allocation8 + $0x4a0] sm:$0xf]  ;;  %9724 = vmatpush.bf16.msrb.mxu0 %v14851_v7  ;;  %v16434_v17 = vld [vmem:[#allocation8 + $0x48c] sm:$0xf0] }
 0x7a5   :  { %v14962_v55 = vld [vmem:[#allocation8 + $0x5a0] sm:$0xf]  ;;  %v7563_v32 = vadd.f32 %v17185_v9, %v7549_v11  ;;  %v14835_v53 = vor.u32 %v16438_v23, %v14834_v36  ;;  %9738 = vmatpush.bf16.msrb.mxu1 %v14979_v34  ;;  %v16466_v18 = vld [vmem:[#allocation8 + $0x58c] sm:$0xf0]  ;;  %v7799_v39 = vadd.f32 %v17360_v8, %v7785_v49  ;;  %v7815_v56 = vadd.f32 %v7814_v14, %v7801_v59 }
 0x7a6   :  { %v17734_v27 = vld [vmem:[#allocation83_spill] sm:$0xff]  ;;  %9752 = vmatpush.bf16.msrb.mxu2 %v15107_v37  ;;  %v14963_v33 = vor.u32 %v16470_v58, %v14962_v55  ;;  %v16498_v57 = vld [vmem:[#allocation8 + $0x68c] sm:$0xf0] }
 0x7a7   :  { %v7339_v20 = vadd.f32 %v17734_v27, %v7325_v47  ;;  %v15090_v30 = vld [vmem:[#allocation8 + $0x6a0] sm:$0xf]  ;;  %v7577_v2 = vadd.f32 %v17736_v45, %v7563_v32  ;;  %v17737_v10 = vld [vmem:[#allocation85_spill] sm:$0xff]  ;;  %v7813_v25 = vadd.f32 %v17374_v48, %v7799_v39  ;;  %v7829_v7 = vadd.f32 %v7828_v16, %v7815_v56  ;;  %v7842_v37 = vpop.f32.mrf.mxu1  ;;  %v7856_v32 = vpop.f32.mrf.mxu2 }
 0x7a8   :  { %v15091_v31 = vor.u32 %v16502_v42, %v15090_v30  ;;  %v14818_v9 = vld [vmem:[#allocation8 + $0x480] sm:$0xf]  ;;  %9725 = vmatpush.bf16.msrb.mxu0 %v14835_v53  ;;  %v17738_v5 = vld [vmem:[#allocation101_spill] sm:$0xff] }
 0x7a9   :  { %v7353_v38 = vadd.f32 %v17735_v52, %v7339_v20  ;;  %v14946_v46 = vld [vmem:[#allocation8 + $0x580] sm:$0xf]  ;;  %v14819_v6 = vor.u32 %v16434_v17, %v14818_v9  ;;  %v7591_v54 = vadd.f32 %v17738_v5, %v7577_v2  ;;  %9739 = vmatpush.bf16.msrb.mxu1 %v14963_v33  ;;  %v16430_v19 = vld [vmem:[#allocation8 + $0x46c] sm:$0xf0]  ;;  %v7827_v58 = vadd.f32 %v17406_v51, %v7813_v25  ;;  %v17741_v52 = vld [vmem:[#allocation90_spill] sm:$0xff] }
 0x7aa   :  { %v15074_v3 = vld [vmem:[#allocation8 + $0x680] sm:$0xf]  ;;  %9753 = vmatpush.bf16.msrb.mxu2 %v15091_v31  ;;  %v14947_v47 = vor.u32 %v16466_v18, %v14946_v46  ;;  %v16462_v41 = vld [vmem:[#allocation8 + $0x56c] sm:$0xf0]  ;;  %v7843_v22 = vadd.f32 %v7842_v37, %v7829_v7  ;;  %v7870_v18 = vpop.f32.mrf.mxu3  ;;  %v17744_v37 = vld [vmem:[#allocation102_spill] sm:$0xff] }
 0x7ab   :  { %v7367_v61 = vadd.f32 %v17737_v10, %v7353_v38  ;;  %v15075_v35 = vor.u32 %v16498_v57, %v15074_v3  ;;  %v14802_v26 = vld [vmem:[#allocation8 + $0x460] sm:$0xf]  ;;  %v16494_v8 = vld [vmem:[#allocation8 + $0x66c] sm:$0xf0]  ;;  %v7605_v60 = vadd.f32 %v17217_v0, %v7591_v54  ;;  %v7841_v17 = vadd.f32 %v17416_v63, %v7827_v58  ;;  %v16344_v58 = vld [vmem:[#allocation8 + $0x1c4] sm:$0xf] }
 0x7ac   :  { %v14930_v29 = vld [vmem:[#allocation8 + $0x560] sm:$0xf]  ;;  %9726 = vmatpush.bf16.msrb.mxu0 %v14819_v6  ;;  %v14803_v34 = vor.u32 %v16430_v19, %v14802_v26  ;;  %v16426_v27 = vld [vmem:[#allocation8 + $0x44c] sm:$0xf0]  ;;  %v7857_v46 = vadd.f32 %v7856_v32, %v7843_v22  ;;  %v16316_v19 = vld [vmem:[#allocation8 + $0xe4] sm:$0xf] }
 0x7ad   :  { %v17739_v4 = vld [vmem:[#allocation87_spill] sm:$0xff]  ;;  %9740 = vmatpush.bf16.msrb.mxu1 %v14947_v47  ;;  %v14931_v36 = vor.u32 %v16462_v41, %v14930_v29  ;;  %v16458_v30 = vld [vmem:[#allocation8 + $0x54c] sm:$0xf0]  ;;  %v7619_v48 = vadd.f32 %v17225_v43, %v7605_v60  ;;  %v7855_v10 = vadd.f32 %v17422_v12, %v7841_v17  ;;  %v14356_v29 = vld [vmem:[#allocation8 + $0xf0] sm:$0xf0] }
 0x7ae   :  { %v7381_v62 = vadd.f32 %v17739_v4, %v7367_v61  ;;  %v15058_v11 = vld [vmem:[#allocation8 + $0x660] sm:$0xf]  ;;  %9754 = vmatpush.bf16.msrb.mxu2 %v15075_v35  ;;  %v16490_v0 = vld [vmem:[#allocation8 + $0x64c] sm:$0xf0]  ;;  %v7871_v47 = vadd.f32 %v7870_v18, %v7857_v46  ;;  %v16348_v4 = vld [vmem:[#allocation8 + $0x1e4] sm:$0xf] }
 0x7af   :  { %v15059_v23 = vor.u32 %v16494_v8, %v15058_v11  ;;  %v14786_v55 = vld [vmem:[#allocation8 + $0x440] sm:$0xf]  ;;  %v7633_v45 = vadd.f32 %v17228_v13, %v7619_v48  ;;  %v16422_v9 = vld [vmem:[#allocation8 + $0x42c] sm:$0xf0]  ;;  %v17743_v12 = vld [vmem:[#allocation86_spill] sm:$0xff]  ;;  %v7869_v41 = vadd.f32 %v17428_v24, %v7855_v10 }
 0x7b0   :  { %v14914_v20 = vld [vmem:[#allocation8 + $0x540] sm:$0xf]  ;;  %v7395_v14 = vadd.f32 %v17740_v40, %v7381_v62  ;;  %9727 = vmatpush.bf16.msrb.mxu0 %v14803_v34  ;;  %v14787_v53 = vor.u32 %v16426_v27, %v14786_v55  ;;  %v16454_v49 = vld [vmem:[#allocation8 + $0x52c] sm:$0xf0]  ;;  %v14484_v62 = vld [vmem:[#allocation8 + $0x1f0] sm:$0xf0]  ;;  %v14359_v55 = vor.u32 %v16316_v19, %v14356_v29 }
 0x7b1   :  { %v15042_v42 = vld [vmem:[#allocation8 + $0x640] sm:$0xf]  ;;  %9741 = vmatpush.bf16.msrb.mxu1 %v14931_v36  ;;  %v14915_v2 = vor.u32 %v16458_v30, %v14914_v20  ;;  %v16486_v59 = vld [vmem:[#allocation8 + $0x62c] sm:$0xf0]  ;;  %v7647_v39 = vadd.f32 %v17240_v1, %v7633_v45  ;;  %v8101_v56 = vmax.f32 %v17743_v12, 0.0  ;;  %v8102_v36 = vmax.f32 %v17744_v37, 0.0 }
 0x7b2   :  { %v7409_v38 = vadd.f32 %v17741_v52, %v7395_v14  ;;  %9755 = vmatpush.bf16.msrb.mxu2 %v15059_v23  ;;  %v15043_v33 = vor.u32 %v16490_v0, %v15042_v42  ;;  %v14770_v31 = vld [vmem:[#allocation8 + $0x420] sm:$0xf]  ;;  %v16418_v54 = vld [vmem:[#allocation8 + $0x40c] sm:$0xf0]  ;;  %v16380_v11 = vld [vmem:[#allocation8 + $0x2e4] sm:$0xf]  ;;  %v14487_v27 = vor.u32 %v16348_v4, %v14484_v62 }
 0x7b3   :  { %v14898_v51 = vld [vmem:[#allocation8 + $0x520] sm:$0xf]  ;;  %v14771_v13 = vor.u32 %v16422_v9, %v14770_v31  ;;  %v16450_v16 = vld [vmem:[#allocation8 + $0x50c] sm:$0xf0]  ;;  %v14612_v8 = vld [vmem:[#allocation8 + $0x2f0] sm:$0xf0] }
 0x7b4   :  { %v15026_v43 = vld [vmem:[#allocation8 + $0x620] sm:$0xf]  ;;  %9728 = vmatpush.bf16.msrb.mxu0 %v14787_v53  ;;  %v14899_v6 = vor.u32 %v16454_v49, %v14898_v51  ;;  %v16482_v26 = vld [vmem:[#allocation8 + $0x60c] sm:$0xf0]  ;;  %v8110_v25 = vmax.f32 %v7647_v39, 0.0  ;;  %v8111_v23 = vmax.f32 %v7871_v47, 0.0  ;;  %v14615_v40 = vor.u32 %v16380_v11, %v14612_v8 }
 0x7b5   :  { %v17742_v3 = vld [vmem:[#allocation91_spill] sm:$0xff]  ;;  %9742 = vmatpush.bf16.msrb.mxu1 %v14915_v2  ;;  %v15027_v5 = vor.u32 %v16486_v59, %v15026_v43  ;;  %v16312_v20 = vld [vmem:[#allocation8 + $0xc4] sm:$0xf]  ;;  %v14340_v14 = vld [vmem:[#allocation8 + $0xd0] sm:$0xf0]  ;;  %v8103_v30 = vmax.f32 %v7869_v41, 0.0 }
 0x7b6   :  { %v7423_v57 = vadd.f32 %v17742_v3, %v7409_v38  ;;  %v14754_v61 = vld [vmem:[#allocation8 + $0x400] sm:$0xf]  ;;  %9756 = vmatpush.bf16.msrb.mxu2 %v15043_v33  ;;  %v14468_v24 = vld [vmem:[#allocation8 + $0x1d0] sm:$0xf0]  ;;  %v16376_v42 = vld [vmem:[#allocation8 + $0x2c4] sm:$0xf]  ;;  %v17447_v32 = vpack.c.bf16 %v8110_v25, %v8102_v36  ;;  %v14343_v38 = vor.u32 %v16312_v20, %v14340_v14 }
 0x7b7   :  { %v14882_v63 = vld [vmem:[#allocation8 + $0x500] sm:$0xf]  ;;  %v14755_v1 = vor.u32 %v16418_v54, %v14754_v61  ;;  %v14596_v0 = vld [vmem:[#allocation8 + $0x2d0] sm:$0xf0]  ;;  %v17449_v52 = vpack.c.bf16 %v8111_v23, %v8103_v30  ;;  %v14471_v22 = vor.u32 %v16344_v58, %v14468_v24  ;;  %v16308_v53 = vld [vmem:[#allocation8 + $0xa4] sm:$0xf] }
 0x7b8   :  { %v15010_v35 = vld [vmem:[#allocation8 + $0x600] sm:$0xf]  ;;  %9729 = vmatpush.bf16.msrb.mxu0 %v14771_v13  ;;  %v8109_v60 = vmax.f32 %v7423_v57, 0.0  ;;  %v14883_v7 = vor.u32 %v16450_v16, %v14882_v63  ;;  %v14324_v45 = vld [vmem:[#allocation8 + $0xb0] sm:$0xf0]  ;;  %v14599_v33 = vor.u32 %v16376_v42, %v14596_v0 }
 0x7b9   :  { %9743 = vmatpush.bf16.msrb.mxu1 %v14899_v6  ;;  %v15011_v34 = vor.u32 %v16482_v26, %v15010_v35  ;;  %v16340_v2 = vld [vmem:[#allocation8 + $0x1a4] sm:$0xf]  ;;  %v14452_v31 = vld [vmem:[#allocation8 + $0x1b0] sm:$0xf0]  ;;  %v15250_v9 = vld [vmem:[#allocation8 + $0x7e0] sm:$0xf]  ;;  %v14327_v43 = vor.u32 %v16308_v53, %v14324_v45  ;;  %v17458_v45 = vpop.f32.mrf.mxu2 }
 0x7ba   :  { %9757 = vmatpush.bf16.msrb.mxu2 %v15027_v5  ;;  %v17445_v48 = vpack.c.bf16 %v8109_v60, %v8101_v56  ;;  %v16542_v51 = vld [vmem:[#allocation8 + $0x7ec] sm:$0xf0]  ;;  %v16372_v17 = vld [vmem:[#allocation8 + $0x2a4] sm:$0xf]  ;;  %v14580_v46 = vld [vmem:[#allocation8 + $0x2b0] sm:$0xf0]  ;;  %v14455_v59 = vor.u32 %v16340_v2, %v14452_v31 }
 0x7bb   :  { %v15251_v49 = vor.u32 %v16542_v51, %v15250_v9  ;;  %v16304_v18 = vld [vmem:[#allocation8 + $0x84] sm:$0xf]  ;;  %v15234_v3 = vld [vmem:[#allocation8 + $0x7c0] sm:$0xf]  ;;  %v16538_v57 = vld [vmem:[#allocation8 + $0x7cc] sm:$0xf0]  ;;  %v14583_v10 = vor.u32 %v16372_v17, %v14580_v46  ;;  %v17460_v9 = vpop.f32.mrf.mxu3 }
 0x7bc   :  { %9730 = vmatpush.bf16.msrb.mxu0 %v14755_v1  ;;  %v14308_v13 = vld [vmem:[#allocation8 + $0x90] sm:$0xf0]  ;;  %v16336_v61 = vld [vmem:[#allocation8 + $0x184] sm:$0xf]  ;;  %v15235_v6 = vor.u32 %v16538_v57, %v15234_v3  ;;  %v15218_v35 = vld [vmem:[#allocation8 + $0x7a0] sm:$0xf]  ;;  %v17454_v1 = vpop.f32.mrf.mxu0 }
 0x7bd   :  { %9744 = vmatpush.bf16.msrb.mxu1 %v14883_v7  ;;  %v14436_v39 = vld [vmem:[#allocation8 + $0x190] sm:$0xf0]  ;;  %9765 = vmatpush.bf16.msrb.mxu3 %v15251_v49  ;;  %v16368_v5 = vld [vmem:[#allocation8 + $0x284] sm:$0xf]  ;;  %v14311_v63 = vor.u32 %v16304_v18, %v14308_v13  ;;  %v16534_v26 = vld [vmem:[#allocation8 + $0x7ac] sm:$0xf0] }
 0x7be   :  { %9758 = vmatpush.bf16.msrb.mxu2 %v15011_v34  ;;  %v14564_v54 = vld [vmem:[#allocation8 + $0x290] sm:$0xf0]  ;;  %v14439_v16 = vor.u32 %v16336_v61, %v14436_v39  ;;  %v16300_v47 = vld [vmem:[#allocation8 + $0x64] sm:$0xf]  ;;  %v15219_v12 = vor.u32 %v16534_v26, %v15218_v35  ;;  %v15202_v25 = vld [vmem:[#allocation8 + $0x780] sm:$0xf] }
 0x7bf   :  { %9731 = vmatmul.bf16.vlgmr.msrb.gmra.mxu0 %v17445_v48  ;;  %v14567_v19 = vor.u32 %v16368_v5, %v14564_v54  ;;  %v14292_v29 = vld [vmem:[#allocation8 + $0x70] sm:$0xf0]  ;;  %v16332_v4 = vld [vmem:[#allocation8 + $0x164] sm:$0xf]  ;;  %v16530_v7 = vld [vmem:[#allocation8 + $0x78c] sm:$0xf0] }
 0x7c0   :  { %9779 = vmatpush.bf16.msra.mxu0 %v14359_v55  ;;  %9745 = vmatmul.bf16.vlgmr.msrb.gmra.mxu1 %v17447_v32  ;;  %v14420_v62 = vld [vmem:[#allocation8 + $0x170] sm:$0xf0]  ;;  %v16364_v56 = vld [vmem:[#allocation8 + $0x264] sm:$0xf]  ;;  %v14295_v11 = vor.u32 %v16300_v47, %v14292_v29  ;;  %v15203_v55 = vor.u32 %v16530_v7, %v15202_v25  ;;  %v16526_v53 = vld [vmem:[#allocation8 + $0x76c] sm:$0xf0] }
 0x7c1   :  { %9793 = vmatpush.bf16.msra.mxu1 %v14487_v27  ;;  %9759 = vmatmul.bf16.vlgmr.msrb.gmra.mxu2 %v17449_v52  ;;  %v14548_v41 = vld [vmem:[#allocation8 + $0x270] sm:$0xf0]  ;;  %v14423_v8 = vor.u32 %v16332_v4, %v14420_v62  ;;  %v16296_v60 = vld [vmem:[#allocation8 + $0x44] sm:$0xf]  ;;  %v17456_v27 = vpop.f32.mrf.mxu1  ;;  %v16522_v18 = vld [vmem:[#allocation8 + $0x74c] sm:$0xf0] }
 0x7c2   :  { %9807 = vmatpush.bf16.msra.mxu2 %v14615_v40  ;;  %9766 = vmatpush.bf16.msrb.mxu3 %v15235_v6  ;;  %v14551_v34 = vor.u32 %v16364_v56, %v14548_v41  ;;  %v14276_v37 = vld [vmem:[#allocation8 + $0x50] sm:$0xf0]  ;;  %v16328_v36 = vld [vmem:[#allocation8 + $0x144] sm:$0xf]  ;;  %v1176_v29 = vperm.slane %v17284_v44, 7 }
 0x7c3   :  { %v14404_v23 = vld [vmem:[#allocation8 + $0x150] sm:$0xf0]  ;;  %v16360_v20 = vld [vmem:[#allocation8 + $0x244] sm:$0xf]  ;;  %v14279_v14 = vor.u32 %v16296_v60, %v14276_v37  ;;  %v16518_v56 = vld [vmem:[#allocation8 + $0x72c] sm:$0xf0]  ;;  %v17469_v44 = vpop.f32.mrf.mxu3 }
 0x7c4   :  { %9780 = vmatpush.bf16.msra.mxu0 %v14343_v38  ;;  %v14532_v40 = vld [vmem:[#allocation8 + $0x250] sm:$0xf0]  ;;  %v14407_v58 = vor.u32 %v16328_v36, %v14404_v23  ;;  %v16292_v24 = vld [vmem:[#allocation8 + $0x24] sm:$0xf]  ;;  %v17462_v3 = vpop.f32.mrf.mxu0  ;;  %v17467_v36 = vpop.f32.mrf.mxu2 }
 0x7c5   :  { %9794 = vmatpush.bf16.msra.mxu1 %v14471_v22  ;;  %v14260_v30 = vld [vmem:[#allocation8 + $0x30] sm:$0xf0]  ;;  %v16324_v42 = vld [vmem:[#allocation8 + $0x124] sm:$0xf]  ;;  %v14535_v0 = vor.u32 %v16360_v20, %v14532_v40  ;;  %v15186_v22 = vld [vmem:[#allocation8 + $0x760] sm:$0xf] }
 0x7c6   :  { %9808 = vmatpush.bf16.msra.mxu2 %v14599_v33  ;;  %9767 = vmatpush.bf16.msrb.mxu3 %v15219_v12  ;;  %v14388_v38 = vld [vmem:[#allocation8 + $0x130] sm:$0xf0]  ;;  %v16356_v2 = vld [vmem:[#allocation8 + $0x224] sm:$0xf]  ;;  %v15187_v31 = vor.u32 %v16526_v53, %v15186_v22  ;;  %v14263_v46 = vor.u32 %v16292_v24, %v14260_v30  ;;  %v15154_v12 = vld [vmem:[#allocation8 + $0x720] sm:$0xf] }
 0x7c7   :  { %v14516_v33 = vld [vmem:[#allocation8 + $0x230] sm:$0xf0]  ;;  %v16288_v51 = vld [vmem:[#allocation8 + $0x4] sm:$0xf]  ;;  %v14391_v49 = vor.u32 %v16324_v42, %v14388_v38  ;;  %v15155_v23 = vor.u32 %v16518_v56, %v15154_v12  ;;  %v15138_v40 = vld [vmem:[#allocation8 + $0x700] sm:$0xf] }
 0x7c8   :  { %9781 = vmatpush.bf16.msra.mxu0 %v14327_v43  ;;  %v14244_v17 = vld [vmem:[#allocation8 + $0x10] sm:$0xf0]  ;;  %v16320_v43 = vld [vmem:[#allocation8 + $0x104] sm:$0xf]  ;;  %v14519_v57 = vor.u32 %v16356_v2, %v14516_v33 }
 0x7c9   :  { %9795 = vmatpush.bf16.msra.mxu1 %v14455_v59  ;;  %v15170_v59 = vld [vmem:[#allocation8 + $0x740] sm:$0xf]  ;;  %v16352_v13 = vld [vmem:[#allocation8 + $0x204] sm:$0xf]  ;;  %v14500_v61 = vld [vmem:[#allocation8 + $0x210] sm:$0xf0]  ;;  %v17464_v35 = vpop.f32.mrf.mxu1  ;;  %v14247_v26 = vor.u32 %v16288_v51, %v14244_v17 }
 0x7ca   :  { %9809 = vmatpush.bf16.msra.mxu2 %v14583_v10  ;;  %9768 = vmatpush.bf16.msrb.mxu3 %v15203_v55  ;;  %v14372_v10 = vld [vmem:[#allocation8 + $0x110] sm:$0xf0]  ;;  %v15171_v39 = vor.u32 %v16522_v18, %v15170_v59  ;;  %v16444_v6 = vld [vmem:[#allocation8 + $0x4e4] sm:$0xf]  ;;  %v14503_v4 = vor.u32 %v16352_v13, %v14500_v61 }
 0x7cb   :  { %v14868_v5 = vld [vmem:[#allocation8 + $0x4f0] sm:$0xf0]  ;;  %v16476_v54 = vld [vmem:[#allocation8 + $0x5e4] sm:$0xf] }
 0x7cc   :  { %9782 = vmatpush.bf16.msra.mxu0 %v14311_v63  ;;  %v14996_v63 = vld [vmem:[#allocation8 + $0x5f0] sm:$0xf0]  ;;  %v14871_v62 = vor.u32 %v16444_v6, %v14868_v5  ;;  %v16472_v25 = vld [vmem:[#allocation8 + $0x5c4] sm:$0xf]  ;;  %v17472_v22 = vpop.f32.mrf.mxu0 }
 0x7cd   :  { %9796 = vmatpush.bf16.msra.mxu1 %v14439_v16  ;;  %v16508_v16 = vld [vmem:[#allocation8 + $0x6e4] sm:$0xf]  ;;  %v15124_v47 = vld [vmem:[#allocation8 + $0x6f0] sm:$0xf0]  ;;  %v14999_v41 = vor.u32 %v16476_v54, %v14996_v63  ;;  %v7885_v54 = vadd.f32 %v17462_v3, %v1176_v29 }
 0x7ce   :  { %9810 = vmatpush.bf16.msra.mxu2 %v14567_v19  ;;  %9769 = vmatpush.bf16.msrb.mxu3 %v15187_v31  ;;  %v14375_v19 = vor.u32 %v16320_v43, %v14372_v10  ;;  %v14852_v60 = vld [vmem:[#allocation8 + $0x4d0] sm:$0xf0]  ;;  %v16436_v20 = vld [vmem:[#allocation8 + $0x4a4] sm:$0xf] }
 0x7cf   :  { %v14980_v7 = vld [vmem:[#allocation8 + $0x5d0] sm:$0xf0]  ;;  %v16500_v53 = vld [vmem:[#allocation8 + $0x6a4] sm:$0xf] }
 0x7d0   :  { %9783 = vmatpush.bf16.msra.mxu0 %v14295_v11  ;;  %v15127_v11 = vor.u32 %v16508_v16, %v15124_v47  ;;  %v15108_v37 = vld [vmem:[#allocation8 + $0x6d0] sm:$0xf0]  ;;  %v14983_v24 = vor.u32 %v16472_v25, %v14980_v7  ;;  %v16412_v33 = vld [vmem:[#allocation8 + $0x3e4] sm:$0xf] }
 0x7d1   :  { %9797 = vmatpush.bf16.msra.mxu1 %v14423_v8  ;;  %v16440_v8 = vld [vmem:[#allocation8 + $0x4c4] sm:$0xf]  ;;  %v14836_v42 = vld [vmem:[#allocation8 + $0x4b0] sm:$0xf0]  ;;  %v17478_v59 = vpop.f32.mrf.mxu1 }
 0x7d2   :  { %9811 = vmatpush.bf16.msra.mxu2 %v14551_v34  ;;  %9770 = vmatpush.bf16.msrb.mxu3 %v15171_v39  ;;  %v16504_v34 = vld [vmem:[#allocation8 + $0x6c4] sm:$0xf]  ;;  %v14855_v55 = vor.u32 %v16440_v8, %v14852_v60  ;;  %v14964_v38 = vld [vmem:[#allocation8 + $0x5b0] sm:$0xf0]  ;;  %v14839_v51 = vor.u32 %v16436_v20, %v14836_v42  ;;  %v7899_v60 = vadd.f32 %v17464_v35, %v7885_v54 }
 0x7d3   :  { %v15111_v30 = vor.u32 %v16504_v34, %v15108_v37  ;;  %v15092_v2 = vld [vmem:[#allocation8 + $0x6b0] sm:$0xf0]  ;;  %v16432_v17 = vld [vmem:[#allocation8 + $0x484] sm:$0xf] }
 0x7d4   :  { %9784 = vmatpush.bf16.msra.mxu0 %v14279_v14  ;;  %v16514_v14 = vld [vmem:[#allocation8 + $0x70c] sm:$0xf0]  ;;  %v14740_v31 = vld [vmem:[#allocation8 + $0x3f0] sm:$0xf0]  ;;  %v16464_v10 = vld [vmem:[#allocation8 + $0x584] sm:$0xf]  ;;  %v17487_v25 = vpop.f32.mrf.mxu0 }
 0x7d5   :  { %9798 = vmatpush.bf16.msra.mxu1 %v14407_v58  ;;  %v7883_v58 = vadd.f32 %v17454_v1, %v1176_v29  ;;  %v15139_v1 = vor.u32 %v16514_v14, %v15138_v40  ;;  %v16408_v13 = vld [vmem:[#allocation8 + $0x3c4] sm:$0xf]  ;;  %v14724_v61 = vld [vmem:[#allocation8 + $0x3d0] sm:$0xf0] }
 0x7d6   :  { %9812 = vmatpush.bf16.msra.mxu2 %v14535_v0  ;;  %v16468_v0 = vld [vmem:[#allocation8 + $0x5a4] sm:$0xf]  ;;  %9771 = vmatpush.bf16.msrb.mxu3 %v15155_v23  ;;  %v14948_v39 = vld [vmem:[#allocation8 + $0x590] sm:$0xf0] }
 0x7d7   :  { %v7897_v43 = vadd.f32 %v17456_v27, %v7883_v58  ;;  %v14967_v18 = vor.u32 %v16468_v0, %v14964_v38  ;;  %v16496_v6 = vld [vmem:[#allocation8 + $0x684] sm:$0xf]  ;;  %v15076_v5 = vld [vmem:[#allocation8 + $0x690] sm:$0xf0]  ;;  %v14727_v27 = vor.u32 %v16408_v13, %v14724_v61  ;;  %v7913_v0 = vadd.f32 %v17467_v36, %v7899_v60  ;;  %v16383_v60 = vld [vmem:[#allocation8 + $0x2f4] sm:$0xf0] }
 0x7d8   :  { %9785 = vmatpush.bf16.msra.mxu0 %v14263_v46  ;;  %v14820_v46 = vld [vmem:[#allocation8 + $0x490] sm:$0xf0]  ;;  %v16428_v16 = vld [vmem:[#allocation8 + $0x464] sm:$0xf] }
 0x7d9   :  { %9799 = vmatpush.bf16.msra.mxu1 %v14391_v49  ;;  %v14743_v49 = vor.u32 %v16412_v33, %v14740_v31  ;;  %v14823_v63 = vor.u32 %v16432_v17, %v14820_v46  ;;  %v14804_v47 = vld [vmem:[#allocation8 + $0x470] sm:$0xf0]  ;;  %v16460_v12 = vld [vmem:[#allocation8 + $0x564] sm:$0xf]  ;;  %v17490_v42 = vpop.f32.mrf.mxu1  ;;  %v7927_v36 = vadd.f32 %v17469_v44, %v7913_v0 }
 0x7da   :  { %9813 = vmatpush.bf16.msra.mxu2 %v14519_v57  ;;  %v15095_v57 = vor.u32 %v16500_v53, %v15092_v2  ;;  %9772 = vmatpush.bf16.msrb.mxu3 %v15139_v1  ;;  %v14932_v56 = vld [vmem:[#allocation8 + $0x570] sm:$0xf0]  ;;  %v16404_v29 = vld [vmem:[#allocation8 + $0x3a4] sm:$0xf] }
 0x7db   :  { %v15060_v3 = vld [vmem:[#allocation8 + $0x670] sm:$0xf0]  ;;  %v16424_v7 = vld [vmem:[#allocation8 + $0x444] sm:$0xf] }
 0x7dc   :  { %9786 = vmatpush.bf16.msra.mxu0 %v14247_v26  ;;  %v7911_v26 = vadd.f32 %v17458_v45, %v7897_v43  ;;  %v14708_v8 = vld [vmem:[#allocation8 + $0x3b0] sm:$0xf0]  ;;  %v14807_v45 = vor.u32 %v16428_v16, %v14804_v47  ;;  %v16456_v40 = vld [vmem:[#allocation8 + $0x544] sm:$0xf]  ;;  %v17497_v13 = vpop.f32.mrf.mxu0 }
 0x7dd   :  { %9800 = vmatpush.bf16.msra.mxu1 %v14375_v19  ;;  %v17482_v19 = vpop.f32.mrf.mxu2  ;;  %v14788_v34 = vld [vmem:[#allocation8 + $0x450] sm:$0xf0]  ;;  %v14711_v37 = vor.u32 %v16404_v29, %v14708_v8  ;;  %v16400_v14 = vld [vmem:[#allocation8 + $0x384] sm:$0xf]  ;;  %v7941_v29 = vadd.f32 %v17487_v25, %v7927_v36  ;;  %v16315_v25 = vld [vmem:[#allocation8 + $0xd4] sm:$0xf0] }
 0x7de   :  { %9814 = vmatpush.bf16.msra.mxu2 %v14503_v4  ;;  %9821 = vmatpush.bf16.msra.mxu3 %v14743_v49  ;;  %v14951_v4 = vor.u32 %v16464_v10, %v14948_v39  ;;  %v7925_v23 = vadd.f32 %v17460_v9, %v7911_v26  ;;  %v14692_v58 = vld [vmem:[#allocation8 + $0x390] sm:$0xf0]  ;;  %v14791_v38 = vor.u32 %v16424_v7, %v14788_v34  ;;  %v16420_v53 = vld [vmem:[#allocation8 + $0x424] sm:$0xf]  ;;  %v16343_v36 = vld [vmem:[#allocation8 + $0x1b4] sm:$0xf0] }
 0x7df   :  { %9787 = vmatmul.bf16.vlgmr.msra.gmra.mxu0 %v17390_v21  ;;  %v15044_v35 = vld [vmem:[#allocation8 + $0x650] sm:$0xf0]  ;;  %v14695_v9 = vor.u32 %v16400_v14, %v14692_v58  ;;  %v16484_v46 = vld [vmem:[#allocation8 + $0x624] sm:$0xf]  ;;  %v7955_v0 = vadd.f32 %v17490_v42, %v7941_v29 }
 0x7e0   :  { %9835 = vmatpush.bf16.msrb.mxu0 %v14871_v62  ;;  %9801 = vmatmul.bf16.vlgmr.msra.gmra.mxu1 %v17398_v28  ;;  %v15079_v62 = vor.u32 %v16496_v6, %v15076_v5  ;;  %v14772_v2 = vld [vmem:[#allocation8 + $0x430] sm:$0xf0]  ;;  %v7939_v33 = vadd.f32 %v17472_v22, %v7925_v23  ;;  %v16396_v43 = vld [vmem:[#allocation8 + $0x364] sm:$0xf] }
 0x7e1   :  { %9849 = vmatpush.bf16.msrb.mxu1 %v14999_v41  ;;  %9815 = vmatmul.bf16.vlgmr.msra.gmra.mxu2 %v17402_v50  ;;  %v16492_v41 = vld [vmem:[#allocation8 + $0x664] sm:$0xf]  ;;  %v14900_v17 = vld [vmem:[#allocation8 + $0x530] sm:$0xf0]  ;;  %v14775_v61 = vor.u32 %v16420_v53, %v14772_v2  ;;  %v16379_v53 = vld [vmem:[#allocation8 + $0x2d4] sm:$0xf0] }
 0x7e2   :  { %9863 = vmatpush.bf16.msrb.mxu2 %v15127_v11  ;;  %v17484_v11 = vpop.f32.mrf.mxu3  ;;  %9822 = vmatpush.bf16.msra.mxu3 %v14727_v27  ;;  %v15063_v20 = vor.u32 %v16492_v41, %v15060_v3  ;;  %v15028_v49 = vld [vmem:[#allocation8 + $0x630] sm:$0xf0]  ;;  %v16416_v22 = vld [vmem:[#allocation8 + $0x404] sm:$0xf]  ;;  %v7953_v54 = vadd.f32 %v17478_v59, %v7939_v33  ;;  %v14490_v41 = vld [vmem:[#allocation8 + $0x1e8] sm:$0xf] }
 0x7e3   :  { %v14756_v39 = vld [vmem:[#allocation8 + $0x410] sm:$0xf0]  ;;  %v16448_v6 = vld [vmem:[#allocation8 + $0x504] sm:$0xf]  ;;  %v15031_v16 = vor.u32 %v16484_v46, %v15028_v49  ;;  %v16351_v3 = vld [vmem:[#allocation8 + $0x1f4] sm:$0xf0] }
 0x7e4   :  { %9836 = vmatpush.bf16.msrb.mxu0 %v14855_v55  ;;  %v14935_v55 = vor.u32 %v16460_v12, %v14932_v56  ;;  %v14884_v47 = vld [vmem:[#allocation8 + $0x510] sm:$0xf0]  ;;  %v16392_v27 = vld [vmem:[#allocation8 + $0x344] sm:$0xf]  ;;  %v17500_v12 = vpop.f32.mrf.mxu1  ;;  %v16319_v56 = vld [vmem:[#allocation8 + $0xf4] sm:$0xf0]  ;;  %v14759_v8 = vor.u32 %v16416_v22, %v14756_v39  ;;  %v7967_v7 = vadd.f32 %v17482_v19, %v7953_v54 }
 0x7e5   :  { %9850 = vmatpush.bf16.msrb.mxu1 %v14983_v24  ;;  %v14916_v24 = vld [vmem:[#allocation8 + $0x550] sm:$0xf0]  ;;  %v16480_v26 = vld [vmem:[#allocation8 + $0x604] sm:$0xf]  ;;  %v14618_v59 = vld [vmem:[#allocation8 + $0x2e8] sm:$0xf]  ;;  %v14887_v34 = vor.u32 %v16448_v6, %v14884_v47 }
 0x7e6   :  { %9864 = vmatpush.bf16.msrb.mxu2 %v15111_v30  ;;  %v16488_v30 = vld [vmem:[#allocation8 + $0x644] sm:$0xf]  ;;  %9823 = vmatpush.bf16.msra.mxu3 %v14711_v37  ;;  %v14919_v1 = vor.u32 %v16456_v40, %v14916_v24  ;;  %v14660_v44 = vld [vmem:[#allocation8 + $0x350] sm:$0xf0]  ;;  %v14619_v24 = vor.u32 %v16383_v60, %v14618_v59  ;;  %v14602_v19 = vld [vmem:[#allocation8 + $0x2c8] sm:$0xf]  ;;  %v7981_v2 = vadd.f32 %v17484_v11, %v7967_v7 }
 0x7e7   :  { %v15047_v31 = vor.u32 %v16488_v30, %v15044_v35  ;;  %v16388_v40 = vld [vmem:[#allocation8 + $0x324] sm:$0xf]  ;;  %v14644_v14 = vld [vmem:[#allocation8 + $0x330] sm:$0xf0]  ;;  %v14474_v30 = vld [vmem:[#allocation8 + $0x1c8] sm:$0xf]  ;;  %v14603_v49 = vor.u32 %v16379_v53, %v14602_v19 }
 0x7e8   :  { %9837 = vmatpush.bf16.msrb.mxu0 %v14839_v51  ;;  %v16452_v51 = vld [vmem:[#allocation8 + $0x524] sm:$0xf]  ;;  %v16347_v35 = vld [vmem:[#allocation8 + $0x1d4] sm:$0xf0]  ;;  %v14628_v42 = vld [vmem:[#allocation8 + $0x310] sm:$0xf0]  ;;  %v7995_v11 = vadd.f32 %v17497_v13, %v7981_v2 }
 0x7e9   :  { %9851 = vmatpush.bf16.msrb.mxu1 %v14967_v18  ;;  %v14676_v18 = vld [vmem:[#allocation8 + $0x370] sm:$0xf0]  ;;  %v16384_v46 = vld [vmem:[#allocation8 + $0x304] sm:$0xf]  ;;  %v16307_v47 = vld [vmem:[#allocation8 + $0x94] sm:$0xf0] }
 0x7ea   :  { %9865 = vmatpush.bf16.msrb.mxu2 %v15095_v57  ;;  %v7968_v57 = vpop.f32.mrf.mxu2  ;;  %v17495_v10 = vpop.f32.mrf.mxu3  ;;  %9824 = vmatpush.bf16.msra.mxu3 %v14695_v9  ;;  %v14679_v5 = vor.u32 %v16396_v43, %v14676_v18  ;;  %v14647_v9 = vor.u32 %v16388_v40, %v14644_v14  ;;  %v16311_v43 = vld [vmem:[#allocation8 + $0xb4] sm:$0xf0]  ;;  %v14458_v18 = vld [vmem:[#allocation8 + $0x1a8] sm:$0xf]  ;;  %v14631_v39 = vor.u32 %v16384_v46, %v14628_v42 }
 0x7eb   :  { %v7969_v33 = vadd.f32 %v7968_v57, %v7955_v0  ;;  %v14586_v57 = vld [vmem:[#allocation8 + $0x2a8] sm:$0xf]  ;;  %v14459_v54 = vor.u32 %v16343_v36, %v14458_v18  ;;  %v16303_v60 = vld [vmem:[#allocation8 + $0x74] sm:$0xf0] }
 0x7ec   :  { %9838 = vmatpush.bf16.msrb.mxu0 %v14823_v63  ;;  %v14903_v63 = vor.u32 %v16452_v51, %v14900_v17  ;;  %v14475_v51 = vor.u32 %v16347_v35, %v14474_v30  ;;  %v14330_v17 = vld [vmem:[#allocation8 + $0xa8] sm:$0xf]  ;;  %v8010_v22 = vpop.f32.mrf.mxu1  ;;  %v16299_v30 = vld [vmem:[#allocation8 + $0x54] sm:$0xf0] }
 0x7ed   :  { %9852 = vmatpush.bf16.msrb.mxu1 %v14951_v4  ;;  %v15012_v4 = vld [vmem:[#allocation8 + $0x610] sm:$0xf0]  ;;  %v7983_v6 = vadd.f32 %v17495_v10, %v7969_v33  ;;  %v14442_v13 = vld [vmem:[#allocation8 + $0x188] sm:$0xf]  ;;  %v16331_v0 = vld [vmem:[#allocation8 + $0x154] sm:$0xf0] }
 0x7ee   :  { %9866 = vmatpush.bf16.msrb.mxu2 %v15079_v62  ;;  %v14362_v62 = vld [vmem:[#allocation8 + $0xe8] sm:$0xf]  ;;  %9825 = vmatpush.bf16.msra.mxu3 %v14679_v5  ;;  %v15015_v37 = vor.u32 %v16480_v26, %v15012_v4  ;;  %v14331_v5 = vor.u32 %v16311_v43, %v14330_v17  ;;  %v16363_v2 = vld [vmem:[#allocation8 + $0x254] sm:$0xf0] }
 0x7ef   :  { %v14363_v23 = vor.u32 %v16319_v56, %v14362_v62  ;;  %v14570_v4 = vld [vmem:[#allocation8 + $0x288] sm:$0xf]  ;;  %v16371_v62 = vld [vmem:[#allocation8 + $0x294] sm:$0xf0] }
 0x7f0   :  { %9839 = vmatpush.bf16.msrb.mxu0 %v14807_v45  ;;  %v14663_v45 = vor.u32 %v16392_v27, %v14660_v44  ;;  %v16339_v27 = vld [vmem:[#allocation8 + $0x194] sm:$0xf0]  ;;  %v8009_v44 = vadd.f32 %v17500_v12, %v7995_v11  ;;  %v14298_v59 = vld [vmem:[#allocation8 + $0x68] sm:$0xf] }
 0x7f1   :  { %9853 = vmatpush.bf16.msrb.mxu1 %v14935_v55  ;;  %v14491_v55 = vor.u32 %v16351_v3, %v14490_v41  ;;  %v14426_v7 = vld [vmem:[#allocation8 + $0x168] sm:$0xf]  ;;  %v16295_v42 = vld [vmem:[#allocation8 + $0x34] sm:$0xf0] }
 0x7f2   :  { %9867 = vmatpush.bf16.msrb.mxu2 %v15063_v20  ;;  %v14346_v20 = vld [vmem:[#allocation8 + $0xc8] sm:$0xf]  ;;  %v8022_v58 = vpop.f32.mrf.mxu2  ;;  %9826 = vmatpush.bf16.msra.mxu3 %v14663_v45  ;;  %v14571_v45 = vor.u32 %v16371_v62, %v14570_v4  ;;  %v16327_v43 = vld [vmem:[#allocation8 + $0x134] sm:$0xf0] }
 0x7f3   :  { %v8023_v41 = vadd.f32 %v8022_v58, %v8009_v44  ;;  %v14554_v12 = vld [vmem:[#allocation8 + $0x268] sm:$0xf]  ;;  %v16447_v4 = vld [vmem:[#allocation8 + $0x4f4] sm:$0xf0] }
 0x7f4   :  { %9840 = vmatpush.bf16.msrb.mxu0 %v14791_v38  ;;  %v17505_v38 = vpop.f32.mrf.mxu3  ;;  %v14410_v35 = vld [vmem:[#allocation8 + $0x148] sm:$0xf] }
 0x7f5   :  { %9854 = vmatpush.bf16.msrb.mxu1 %v14919_v1  ;;  %v7996_v1 = vpop.f32.mrf.mxu0  ;;  %v8037_v40 = vadd.f32 %v17505_v38, %v8023_v41  ;;  %v14538_v53 = vld [vmem:[#allocation8 + $0x248] sm:$0xf] }
 0x7f6   :  { %9868 = vmatpush.bf16.msrb.mxu2 %v15047_v31  ;;  %v14347_v31 = vor.u32 %v16315_v25, %v14346_v20  ;;  %9827 = vmatpush.bf16.msra.mxu3 %v14647_v9  ;;  %v7997_v26 = vadd.f32 %v7996_v1, %v7983_v6  ;;  %v14299_v20 = vor.u32 %v16303_v60, %v14298_v59  ;;  %v14266_v17 = vld [vmem:[#allocation8 + $0x28] sm:$0xf] }
 0x7f7   :  { %v14539_v46 = vor.u32 %v16363_v2, %v14538_v53  ;;  %v14522_v11 = vld [vmem:[#allocation8 + $0x228] sm:$0xf] }
 0x7f8   :  { %9841 = vmatpush.bf16.msrb.mxu0 %v14775_v61  ;;  %v16375_v61 = vld [vmem:[#allocation8 + $0x2b4] sm:$0xf0]  ;;  %v14250_v6 = vld [vmem:[#allocation8 + $0x8] sm:$0xf] }
 0x7f9   :  { %9855 = vmatpush.bf16.msrb.mxu1 %v14903_v63  ;;  %v14314_v63 = vld [vmem:[#allocation8 + $0x88] sm:$0xf] }
 0x7fa   :  { %9869 = vmatpush.bf16.msrb.mxu2 %v15031_v16  ;;  %v14587_v16 = vor.u32 %v16375_v61, %v14586_v57  ;;  %v8024_v56 = vpop.f32.mrf.mxu2  ;;  %9828 = vmatpush.bf16.msra.mxu3 %v14631_v39  ;;  %v14315_v29 = vor.u32 %v16307_v47, %v14314_v63  ;;  %v16359_v57 = vld [vmem:[#allocation8 + $0x234] sm:$0xf0]  ;;  %v15002_v62 = vld [vmem:[#allocation8 + $0x5e8] sm:$0xf] }
 0x7fb   :  { %v16323_v47 = vld [vmem:[#allocation8 + $0x114] sm:$0xf0]  ;;  %v14842_v2 = vld [vmem:[#allocation8 + $0x4a8] sm:$0xf] }
 0x7fc   :  { %9842 = vmatpush.bf16.msrb.mxu0 %v14759_v8  ;;  %v8038_v3 = vpop.f32.mrf.mxu3  ;;  %v14443_v8 = vor.u32 %v16339_v27, %v14442_v13  ;;  %v14506_v13 = vld [vmem:[#allocation8 + $0x208] sm:$0xf]  ;;  %v16355_v27 = vld [vmem:[#allocation8 + $0x214] sm:$0xf0] }
 0x7fd   :  { %9856 = vmatpush.bf16.msrb.mxu1 %v14887_v34  ;;  %v8050_v10 = vpop.f32.mrf.mxu0  ;;  %v16335_v34 = vld [vmem:[#allocation8 + $0x174] sm:$0xf0] }
 0x7fe   :  { %9870 = vmatpush.bf16.msrb.mxu2 %v15015_v37  ;;  %v8011_v37 = vadd.f32 %v8010_v22, %v7997_v26  ;;  %v14427_v58 = vor.u32 %v16335_v34, %v14426_v7  ;;  %v8051_v19 = vadd.f32 %v8050_v10, %v8037_v40  ;;  %v14267_v22 = vor.u32 %v16295_v42, %v14266_v17  ;;  %v14874_v26 = vld [vmem:[#allocation8 + $0x4e8] sm:$0xf]  ;;  %v15236_v17 = vld [vmem:[#allocation8 + $0x7d0] sm:$0xf0] }
 0x7ff   :  { %9843 = vmatmul.bf16.vlgmr.msrb.gmra.mxu0 %v17445_v48  ;;  %v15130_v10 = vld [vmem:[#allocation8 + $0x6e8] sm:$0xf]  ;;  %v14507_v7 = vor.u32 %v16355_v27, %v14506_v13  ;;  %v14875_v34 = vor.u32 %v16447_v4, %v14874_v26  ;;  %v16431_v27 = vld [vmem:[#allocation8 + $0x474] sm:$0xf0] }
 0x800   :  { %9891 = vmatpush.bf16.msra.mxu0 %v14363_v23  ;;  %9857 = vmatmul.bf16.vlgmr.msrb.gmra.mxu1 %v17447_v32  ;;  %v16367_v23 = vld [vmem:[#allocation8 + $0x274] sm:$0xf0]  ;;  %v8025_v14 = vadd.f32 %v8024_v56, %v8011_v37  ;;  %v14858_v37 = vld [vmem:[#allocation8 + $0x4c8] sm:$0xf] }
 0x801   :  { %9905 = vmatpush.bf16.msra.mxu1 %v14491_v55  ;;  %9871 = vmatmul.bf16.vlgmr.msrb.gmra.mxu2 %v17449_v52  ;;  %v8064_v55 = vpop.f32.mrf.mxu1  ;;  %v14555_v25 = vor.u32 %v16367_v23, %v14554_v12  ;;  %v16443_v12 = vld [vmem:[#allocation8 + $0x4d4] sm:$0xf0]  ;;  %v14986_v40 = vld [vmem:[#allocation8 + $0x5c8] sm:$0xf] }
 0x802   :  { %9919 = vmatpush.bf16.msra.mxu2 %v14619_v24  ;;  %v14282_v24 = vld [vmem:[#allocation8 + $0x48] sm:$0xf]  ;;  %v8078_v9 = vpop.f32.mrf.mxu2  ;;  %v8039_v33 = vadd.f32 %v8038_v3, %v8025_v14  ;;  %v8065_v18 = vadd.f32 %v8064_v55, %v8051_v19  ;;  %v16479_v3 = vld [vmem:[#allocation8 + $0x5f4] sm:$0xf0]  ;;  %v16540_v14 = vld [vmem:[#allocation8 + $0x7e4] sm:$0xf]  ;;  %v14859_v19 = vor.u32 %v16443_v12, %v14858_v37 }
 0x803   :  { %v14283_v38 = vor.u32 %v16299_v30, %v14282_v24  ;;  %v15003_v55 = vor.u32 %v16479_v3, %v15002_v62  ;;  %v16475_v24 = vld [vmem:[#allocation8 + $0x5d4] sm:$0xf0]  ;;  %v15098_v42 = vld [vmem:[#allocation8 + $0x6a8] sm:$0xf]  ;;  %v16528_v62 = vld [vmem:[#allocation8 + $0x784] sm:$0xf] }
 0x804   :  { %9892 = vmatpush.bf16.msra.mxu0 %v14347_v31  ;;  %v8092_v1 = vpop.f32.mrf.mxu3  ;;  %v8079_v61 = vadd.f32 %v8078_v9, %v8065_v18  ;;  %v16507_v30 = vld [vmem:[#allocation8 + $0x6d4] sm:$0xf0]  ;;  %v14810_v13 = vld [vmem:[#allocation8 + $0x468] sm:$0xf]  ;;  %v16524_v37 = vld [vmem:[#allocation8 + $0x764] sm:$0xf] }
 0x805   :  { %9906 = vmatpush.bf16.msra.mxu1 %v14475_v51  ;;  %v8052_v31 = vpop.f32.mrf.mxu0  ;;  %v14411_v51 = vor.u32 %v16331_v0, %v14410_v35  ;;  %v16439_v9 = vld [vmem:[#allocation8 + $0x4b4] sm:$0xf0]  ;;  %v14938_v4 = vld [vmem:[#allocation8 + $0x568] sm:$0xf]  ;;  %v15188_v12 = vld [vmem:[#allocation8 + $0x770] sm:$0xf0] }
 0x806   :  { %9920 = vmatpush.bf16.msra.mxu2 %v14603_v49  ;;  %v14394_v49 = vld [vmem:[#allocation8 + $0x128] sm:$0xf]  ;;  %v8053_v36 = vadd.f32 %v8052_v31, %v8039_v33 }
 0x807   :  { %v14395_v39 = vor.u32 %v16327_v43, %v14394_v49  ;;  %v16503_v49 = vld [vmem:[#allocation8 + $0x6b4] sm:$0xf0]  ;;  %v14843_v43 = vor.u32 %v16439_v9, %v14842_v2  ;;  %v15066_v3 = vld [vmem:[#allocation8 + $0x668] sm:$0xf] }
 0x808   :  { %9893 = vmatpush.bf16.msra.mxu0 %v14331_v5  ;;  %v16291_v5 = vld [vmem:[#allocation8 + $0x14] sm:$0xf0]  ;;  %v15034_v2 = vld [vmem:[#allocation8 + $0x628] sm:$0xf] }
 0x809   :  { %9907 = vmatpush.bf16.msra.mxu1 %v14459_v54  ;;  %v14378_v54 = vld [vmem:[#allocation8 + $0x108] sm:$0xf]  ;;  %v8066_v63 = vpop.f32.mrf.mxu1  ;;  %v14251_v41 = vor.u32 %v16291_v5, %v14250_v6  ;;  %v15220_v6 = vld [vmem:[#allocation8 + $0x7b0] sm:$0xf0]  ;;  %v16467_v5 = vld [vmem:[#allocation8 + $0x594] sm:$0xf0] }
 0x80a   :  { %9921 = vmatpush.bf16.msra.mxu2 %v14587_v16  ;;  %v14523_v16 = vor.u32 %v16359_v57, %v14522_v11  ;;  %v8067_v44 = vadd.f32 %v8066_v63, %v8053_v36  ;;  %v8080_v56 = vpop.f32.mrf.mxu2  ;;  %v14379_v60 = vor.u32 %v16323_v47, %v14378_v54  ;;  %v14826_v36 = vld [vmem:[#allocation8 + $0x488] sm:$0xf]  ;;  %v16435_v11 = vld [vmem:[#allocation8 + $0x494] sm:$0xf0] }
 0x80b   :  { %v15082_v54 = vld [vmem:[#allocation8 + $0x688] sm:$0xf]  ;;  %v16499_v63 = vld [vmem:[#allocation8 + $0x694] sm:$0xf0] }
 0x80c   :  { %9894 = vmatpush.bf16.msra.mxu0 %v14315_v29  ;;  %v16511_v29 = vld [vmem:[#allocation8 + $0x6f4] sm:$0xf0]  ;;  %v8081_v59 = vadd.f32 %v8080_v56, %v8067_v44  ;;  %v15083_v26 = vor.u32 %v16499_v63, %v15082_v54  ;;  %v15204_v56 = vld [vmem:[#allocation8 + $0x790] sm:$0xf0]  ;;  %v16381_v54 = vld [vmem:[#allocation8 + $0x2ec] sm:$0xf] }
 0x80d   :  { %9908 = vmatpush.bf16.msra.mxu1 %v14443_v8  ;;  %v8093_v8 = vadd.f32 %v8092_v1, %v8079_v61  ;;  %v14987_v1 = vor.u32 %v16475_v24, %v14986_v40  ;;  %v15099_v61 = vor.u32 %v16503_v49, %v15098_v42  ;;  %v16423_v24 = vld [vmem:[#allocation8 + $0x434] sm:$0xf0]  ;;  %v14620_v63 = vld [vmem:[#allocation8 + $0x2f8] sm:$0xf0] }
 0x80e   :  { %9922 = vmatpush.bf16.msra.mxu2 %v14571_v45  ;;  %v8094_v45 = vpop.f32.mrf.mxu3  ;;  %v16487_v9 = vld [vmem:[#allocation8 + $0x634] sm:$0xf0] }
 0x80f   :  { %v8095_v23 = vadd.f32 %v8094_v45, %v8081_v59  ;;  %v8104_v35 = vmax.f32 %v8093_v8, 0.0  ;;  %v15207_v8 = vor.u32 %v16528_v62, %v15204_v56  ;;  %v14794_v59 = vld [vmem:[#allocation8 + $0x448] sm:$0xf]  ;;  %v15035_v42 = vor.u32 %v16487_v9, %v15034_v2  ;;  %v16451_v49 = vld [vmem:[#allocation8 + $0x514] sm:$0xf0] }
 0x810   :  { %9895 = vmatpush.bf16.msra.mxu0 %v14299_v20  ;;  %v15131_v20 = vor.u32 %v16511_v29, %v15130_v10  ;;  %v16495_v10 = vld [vmem:[#allocation8 + $0x674] sm:$0xf0]  ;;  %v14811_v29 = vor.u32 %v16431_v27, %v14810_v13  ;;  %v16512_v13 = vld [vmem:[#allocation8 + $0x704] sm:$0xf]  ;;  %v14348_v62 = vld [vmem:[#allocation8 + $0xd8] sm:$0xf0]  ;;  %v14623_v56 = vor.u32 %v16381_v54, %v14620_v63 }
 0x811   :  { %9909 = vmatpush.bf16.msra.mxu1 %v14427_v58  ;;  %v15252_v58 = vld [vmem:[#allocation8 + $0x7f0] sm:$0xf0]  ;;  %v8112_v0 = vmax.f32 %v8095_v23, 0.0  ;;  %v16459_v23 = vld [vmem:[#allocation8 + $0x554] sm:$0xf0] }
 0x812   :  { %9923 = vmatpush.bf16.msra.mxu2 %v14555_v25  ;;  %v15114_v25 = vld [vmem:[#allocation8 + $0x6c8] sm:$0xf]  ;;  %v15255_v53 = vor.u32 %v16540_v14, %v15252_v58  ;;  %v15191_v14 = vor.u32 %v16524_v37, %v15188_v12  ;;  %v14332_v37 = vld [vmem:[#allocation8 + $0xb8] sm:$0xf0]  ;;  %v16337_v2 = vld [vmem:[#allocation8 + $0x18c] sm:$0xf] }
 0x813   :  { %v17515_v33 = vpack.c.bf16 %v8112_v0, %v8104_v35  ;;  %v15115_v31 = vor.u32 %v16507_v30, %v15114_v25  ;;  %v14778_v58 = vld [vmem:[#allocation8 + $0x428] sm:$0xf]  ;;  %v16520_v0 = vld [vmem:[#allocation8 + $0x744] sm:$0xf]  ;;  %v14444_v9 = vld [vmem:[#allocation8 + $0x198] sm:$0xf0] }
 0x814   :  { %9896 = vmatpush.bf16.msra.mxu0 %v14283_v38  ;;  %v14970_v38 = vld [vmem:[#allocation8 + $0x5a8] sm:$0xf]  ;;  %v16297_v54 = vld [vmem:[#allocation8 + $0x4c] sm:$0xf]  ;;  %v14284_v63 = vld [vmem:[#allocation8 + $0x58] sm:$0xf0] }
 0x815   :  { %9910 = vmatpush.bf16.msra.mxu1 %v14411_v51  ;;  %v16536_v51 = vld [vmem:[#allocation8 + $0x7c4] sm:$0xf]  ;;  %9773 = vmatmul.bf16.vlgmr.msrb.gmra.mxu3 %v17515_v33  ;;  %v14906_v35 = vld [vmem:[#allocation8 + $0x528] sm:$0xf] }
 0x816   :  { %9924 = vmatpush.bf16.msra.mxu2 %v14539_v46  ;;  %v16471_v46 = vld [vmem:[#allocation8 + $0x5b4] sm:$0xf0]  ;;  %9877 = vmatpush.bf16.msrb.mxu3 %v15255_v53  ;;  %v15239_v18 = vor.u32 %v16536_v51, %v15236_v17  ;;  %v14890_v17 = vld [vmem:[#allocation8 + $0x508] sm:$0xf] }
 0x817   :  { %v14971_v57 = vor.u32 %v16471_v46, %v14970_v38  ;;  %v16455_v53 = vld [vmem:[#allocation8 + $0x534] sm:$0xf0]  ;;  %v14762_v38 = vld [vmem:[#allocation8 + $0x408] sm:$0xf] }
 0x818   :  { %9897 = vmatpush.bf16.msra.mxu0 %v14267_v22  ;;  %v14954_v22 = vld [vmem:[#allocation8 + $0x588] sm:$0xf]  ;;  %v16419_v51 = vld [vmem:[#allocation8 + $0x414] sm:$0xf0]  ;;  %v14907_v46 = vor.u32 %v16455_v53, %v14906_v35  ;;  %v16305_v35 = vld [vmem:[#allocation8 + $0x8c] sm:$0xf] }
 0x819   :  { %9911 = vmatpush.bf16.msra.mxu1 %v14395_v39  ;;  %v16532_v39 = vld [vmem:[#allocation8 + $0x7a4] sm:$0xf]  ;;  %v14955_v44 = vor.u32 %v16467_v5, %v14954_v22  ;;  %v16349_v22 = vld [vmem:[#allocation8 + $0x1ec] sm:$0xf] }
 0x81a   :  { %9925 = vmatpush.bf16.msra.mxu2 %v14523_v16  ;;  %9878 = vmatpush.bf16.msrb.mxu3 %v15239_v18  ;;  %v14827_v16 = vor.u32 %v16435_v11, %v14826_v36  ;;  %v15223_v47 = vor.u32 %v16532_v39, %v15220_v6  ;;  %v15156_v18 = vld [vmem:[#allocation8 + $0x730] sm:$0xf0]  ;;  %v15018_v36 = vld [vmem:[#allocation8 + $0x608] sm:$0xf]  ;;  %v16483_v11 = vld [vmem:[#allocation8 + $0x614] sm:$0xf0]  ;;  %v14763_v6 = vor.u32 %v16419_v51, %v14762_v38 }
 0x81b   :  { %v14492_v39 = vld [vmem:[#allocation8 + $0x1f8] sm:$0xf0]  ;;  %v14714_v38 = vld [vmem:[#allocation8 + $0x3a8] sm:$0xf]  ;;  %v16407_v51 = vld [vmem:[#allocation8 + $0x3b4] sm:$0xf0] }
 0x81c   :  { %9898 = vmatpush.bf16.msra.mxu0 %v14251_v41  ;;  %v16463_v41 = vld [vmem:[#allocation8 + $0x574] sm:$0xf0] }
 0x81d   :  { %9912 = vmatpush.bf16.msra.mxu1 %v14379_v60  ;;  %v16427_v60 = vld [vmem:[#allocation8 + $0x454] sm:$0xf0]  ;;  %v14939_v45 = vor.u32 %v16463_v41, %v14938_v4  ;;  %v16313_v4 = vld [vmem:[#allocation8 + $0xcc] sm:$0xf] }
 0x81e   :  { %9926 = vmatpush.bf16.msra.mxu2 %v14507_v7  ;;  %9879 = vmatpush.bf16.msrb.mxu3 %v15223_v47  ;;  %v15067_v7 = vor.u32 %v16495_v10, %v15066_v3  ;;  %v14795_v40 = vor.u32 %v16427_v60, %v14794_v59  ;;  %v15019_v47 = vor.u32 %v16483_v11, %v15018_v36  ;;  %v16345_v41 = vld [vmem:[#allocation8 + $0x1cc] sm:$0xf]  ;;  %v14476_v3 = vld [vmem:[#allocation8 + $0x1d8] sm:$0xf0]  ;;  %v16415_v59 = vld [vmem:[#allocation8 + $0x3f4] sm:$0xf0] }
 0x81f   :  { %9899 = vmatmul.bf16.vlgmr.msra.gmra.mxu0 %v17390_v21  ;;  %v16377_v10 = vld [vmem:[#allocation8 + $0x2cc] sm:$0xf]  ;;  %v14428_v11 = vld [vmem:[#allocation8 + $0x178] sm:$0xf0] }
 0x820   :  { %9947 = vmatpush.bf16.msrb.mxu0 %v14875_v34  ;;  %9913 = vmatmul.bf16.vlgmr.msra.gmra.mxu1 %v17398_v28  ;;  %v14922_v34 = vld [vmem:[#allocation8 + $0x548] sm:$0xf]  ;;  %v16333_v36 = vld [vmem:[#allocation8 + $0x16c] sm:$0xf] }
 0x821   :  { %9961 = vmatpush.bf16.msrb.mxu1 %v15003_v55  ;;  %9927 = vmatmul.bf16.vlgmr.msra.gmra.mxu2 %v17402_v50  ;;  %v15050_v55 = vld [vmem:[#allocation8 + $0x648] sm:$0xf]  ;;  %v14923_v25 = vor.u32 %v16459_v23, %v14922_v34  ;;  %v16309_v34 = vld [vmem:[#allocation8 + $0xac] sm:$0xf] }
 0x822   :  { %9975 = vmatpush.bf16.msrb.mxu2 %v15131_v20  ;;  %v16491_v20 = vld [vmem:[#allocation8 + $0x654] sm:$0xf0]  ;;  %9880 = vmatpush.bf16.msrb.mxu3 %v15207_v8  ;;  %v14746_v8 = vld [vmem:[#allocation8 + $0x3e8] sm:$0xf] }
 0x823   :  { %v15051_v30 = vor.u32 %v16491_v20, %v15050_v55  ;;  %v14747_v23 = vor.u32 %v16415_v59, %v14746_v8  ;;  %v16341_v55 = vld [vmem:[#allocation8 + $0x1ac] sm:$0xf]  ;;  %v14460_v20 = vld [vmem:[#allocation8 + $0x1b8] sm:$0xf0] }
 0x824   :  { %9948 = vmatpush.bf16.msrb.mxu0 %v14859_v19  ;;  %v15172_v19 = vld [vmem:[#allocation8 + $0x750] sm:$0xf0]  ;;  %v16325_v59 = vld [vmem:[#allocation8 + $0x12c] sm:$0xf] }
 0x825   :  { %9962 = vmatpush.bf16.msrb.mxu1 %v14987_v1  ;;  %9829 = vmatmul.bf16.vlgmr.msra.gmra.mxu3 %v17409_v15  ;;  %v14779_v1 = vor.u32 %v16423_v24, %v14778_v58  ;;  %v14730_v58 = vld [vmem:[#allocation8 + $0x3c8] sm:$0xf]  ;;  %v16411_v24 = vld [vmem:[#allocation8 + $0x3d4] sm:$0xf0] }
 0x826   :  { %9976 = vmatpush.bf16.msrb.mxu2 %v15115_v31  ;;  %9881 = vmatpush.bf16.msrb.mxu3 %v15191_v14  ;;  %v15175_v31 = vor.u32 %v16520_v0, %v15172_v19  ;;  %v14588_v14 = vld [vmem:[#allocation8 + $0x2b8] sm:$0xf0]  ;;  %v14731_v53 = vor.u32 %v16411_v24, %v14730_v58 }
 0x827   :  { %v14316_v0 = vld [vmem:[#allocation8 + $0x98] sm:$0xf0] }
 0x828   :  { %9949 = vmatpush.bf16.msrb.mxu0 %v14843_v43  ;;  %v16516_v43 = vld [vmem:[#allocation8 + $0x724] sm:$0xf]  ;;  %v14380_v24 = vld [vmem:[#allocation8 + $0x118] sm:$0xf0] }
 0x829   :  { %9963 = vmatpush.bf16.msrb.mxu1 %v14971_v57  ;;  %v16317_v57 = vld [vmem:[#allocation8 + $0xec] sm:$0xf]  ;;  %v15159_v5 = vor.u32 %v16516_v43, %v15156_v18  ;;  %v14715_v18 = vor.u32 %v16407_v51, %v14714_v38  ;;  %v15132_v51 = vld [vmem:[#allocation8 + $0x6f8] sm:$0xf0] }
 0x82a   :  { %9977 = vmatpush.bf16.msrb.mxu2 %v15099_v61  ;;  %v14364_v61 = vld [vmem:[#allocation8 + $0xf8] sm:$0xf0]  ;;  %9882 = vmatpush.bf16.msrb.mxu3 %v15175_v31  ;;  %v16509_v38 = vld [vmem:[#allocation8 + $0x6ec] sm:$0xf] }
 0x82b   :  { %v14367_v27 = vor.u32 %v16317_v57, %v14364_v61  ;;  %v14572_v31 = vld [vmem:[#allocation8 + $0x298] sm:$0xf0]  ;;  %v16365_v57 = vld [vmem:[#allocation8 + $0x26c] sm:$0xf] }
 0x82c   :  { %9950 = vmatpush.bf16.msrb.mxu0 %v14827_v16  ;;  %v14891_v16 = vor.u32 %v16451_v49, %v14890_v17  ;;  %v14319_v17 = vor.u32 %v16305_v35, %v14316_v0  ;;  %v14300_v49 = vld [vmem:[#allocation8 + $0x78] sm:$0xf0]  ;;  %v14650_v35 = vld [vmem:[#allocation8 + $0x328] sm:$0xf]  ;;  %v16391_v0 = vld [vmem:[#allocation8 + $0x334] sm:$0xf0] }
 0x82d   :  { %9964 = vmatpush.bf16.msrb.mxu1 %v14955_v44  ;;  %v14495_v44 = vor.u32 %v16349_v22, %v14492_v39  ;;  %v14556_v61 = vld [vmem:[#allocation8 + $0x278] sm:$0xf0]  ;;  %v14698_v22 = vld [vmem:[#allocation8 + $0x388] sm:$0xf]  ;;  %v16403_v39 = vld [vmem:[#allocation8 + $0x394] sm:$0xf0] }
 0x82e   :  { %9978 = vmatpush.bf16.msrb.mxu2 %v15083_v26  ;;  %v15140_v26 = vld [vmem:[#allocation8 + $0x710] sm:$0xf0]  ;;  %9883 = vmatpush.bf16.msrb.mxu3 %v15159_v5  ;;  %v14431_v5 = vor.u32 %v16333_v36, %v14428_v11  ;;  %v16441_v36 = vld [vmem:[#allocation8 + $0x4cc] sm:$0xf]  ;;  %v14860_v11 = vld [vmem:[#allocation8 + $0x4d8] sm:$0xf0] }
 0x82f   :  { %v15143_v60 = vor.u32 %v16512_v13, %v15140_v26  ;;  %v16329_v13 = vld [vmem:[#allocation8 + $0x14c] sm:$0xf]  ;;  %v14540_v26 = vld [vmem:[#allocation8 + $0x258] sm:$0xf0] }
 0x830   :  { %9951 = vmatpush.bf16.msrb.mxu0 %v14811_v29  ;;  %v14604_v29 = vld [vmem:[#allocation8 + $0x2d8] sm:$0xf0] }
 0x831   :  { %9965 = vmatpush.bf16.msrb.mxu1 %v14939_v45  ;;  %v14351_v45 = vor.u32 %v16313_v4, %v14348_v62  ;;  %v14607_v12 = vor.u32 %v16377_v10, %v14604_v29  ;;  %v14682_v4 = vld [vmem:[#allocation8 + $0x368] sm:$0xf]  ;;  %v16399_v62 = vld [vmem:[#allocation8 + $0x374] sm:$0xf0]  ;;  %v14268_v10 = vld [vmem:[#allocation8 + $0x38] sm:$0xf0] }
 0x832   :  { %9979 = vmatpush.bf16.msrb.mxu2 %v15067_v7  ;;  %v14479_v7 = vor.u32 %v16345_v41, %v14476_v3  ;;  %9884 = vmatpush.bf16.msrb.mxu3 %v15143_v60  ;;  %v16293_v3 = vld [vmem:[#allocation8 + $0x2c] sm:$0xf]  ;;  %v14683_v8 = vor.u32 %v16399_v62, %v14682_v4  ;;  %v14396_v60 = vld [vmem:[#allocation8 + $0x138] sm:$0xf0] }
 0x833   :  { %v16469_v4 = vld [vmem:[#allocation8 + $0x5ac] sm:$0xf]  ;;  %v14972_v62 = vld [vmem:[#allocation8 + $0x5b8] sm:$0xf0] }
 0x834   :  { %9952 = vmatpush.bf16.msrb.mxu0 %v14795_v40  ;;  %v16373_v40 = vld [vmem:[#allocation8 + $0x2ac] sm:$0xf] }
 0x835   :  { %9966 = vmatpush.bf16.msrb.mxu1 %v14923_v25  ;;  %v14335_v25 = vor.u32 %v16309_v34, %v14332_v37  ;;  %v14591_v19 = vor.u32 %v16373_v40, %v14588_v14  ;;  %9885 = vmatmul.bf16.vlgmr.msrb.gmra.mxu3 %v17515_v33  ;;  %v14666_v34 = vld [vmem:[#allocation8 + $0x348] sm:$0xf]  ;;  %v16395_v37 = vld [vmem:[#allocation8 + $0x354] sm:$0xf0]  ;;  %v16321_v40 = vld [vmem:[#allocation8 + $0x10c] sm:$0xf] }
 0x836   :  { %9980 = vmatpush.bf16.msrb.mxu2 %v15051_v30  ;;  %v14463_v30 = vor.u32 %v16341_v55, %v14460_v20  ;;  %9933 = vmatpush.bf16.msra.mxu3 %v14747_v23  ;;  %v14399_v23 = vor.u32 %v16325_v59, %v14396_v60  ;;  %v16289_v55 = vld [vmem:[#allocation8 + $0xc] sm:$0xf]  ;;  %v14252_v20 = vld [vmem:[#allocation8 + $0x18] sm:$0xf0]  ;;  %v14667_v58 = vor.u32 %v16395_v37, %v14666_v34 }
 0x837   :  { %v16433_v59 = vld [vmem:[#allocation8 + $0x48c] sm:$0xf]  ;;  %v14828_v60 = vld [vmem:[#allocation8 + $0x498] sm:$0xf0] }
 0x838   :  { %9953 = vmatpush.bf16.msrb.mxu0 %v14779_v1  ;;  %v16369_v1 = vld [vmem:[#allocation8 + $0x28c] sm:$0xf]  ;;  %v14956_v34 = vld [vmem:[#allocation8 + $0x598] sm:$0xf0] }
 0x839   :  { %9967 = vmatpush.bf16.msrb.mxu1 %v14907_v46  ;;  %v14447_v46 = vor.u32 %v16337_v2, %v14444_v9  ;;  %v14575_v43 = vor.u32 %v16369_v1, %v14572_v31  ;;  %v16477_v2 = vld [vmem:[#allocation8 + $0x5ec] sm:$0xf]  ;;  %v15004_v9 = vld [vmem:[#allocation8 + $0x5f8] sm:$0xf0]  ;;  %v14255_v1 = vor.u32 %v16289_v55, %v14252_v20  ;;  %v14383_v31 = vor.u32 %v16321_v40, %v14380_v24 }
 0x83a   :  { %9981 = vmatpush.bf16.msrb.mxu2 %v15035_v42  ;;  %v16301_v42 = vld [vmem:[#allocation8 + $0x6c] sm:$0xf]  ;;  %9934 = vmatpush.bf16.msra.mxu3 %v14731_v53  ;;  %v14876_v53 = vld [vmem:[#allocation8 + $0x4f8] sm:$0xf0] }
 0x83b   :  { %v16497_v37 = vld [vmem:[#allocation8 + $0x68c] sm:$0xf]  ;;  %v14812_v40 = vld [vmem:[#allocation8 + $0x478] sm:$0xf0] }
 0x83c   :  { %9954 = vmatpush.bf16.msrb.mxu0 %v14763_v6  ;;  %v14303_v6 = vor.u32 %v16301_v42, %v14300_v49  ;;  %v14634_v42 = vld [vmem:[#allocation8 + $0x308] sm:$0xf]  ;;  %v16429_v20 = vld [vmem:[#allocation8 + $0x46c] sm:$0xf] }
 0x83d   :  { %9968 = vmatpush.bf16.msrb.mxu1 %v14891_v16  ;;  %v14559_v16 = vor.u32 %v16365_v57, %v14556_v61  ;;  %v15135_v57 = vor.u32 %v16509_v38, %v15132_v51  ;;  %v16473_v61 = vld [vmem:[#allocation8 + $0x5cc] sm:$0xf] }
 0x83e   :  { %9982 = vmatpush.bf16.msrb.mxu2 %v15019_v47  ;;  %9935 = vmatpush.bf16.msra.mxu3 %v14715_v18  ;;  %v14699_v47 = vor.u32 %v16403_v39, %v14698_v22  ;;  %v16387_v18 = vld [vmem:[#allocation8 + $0x314] sm:$0xf0]  ;;  %v14988_v22 = vld [vmem:[#allocation8 + $0x5d8] sm:$0xf0]  ;;  %v16505_v39 = vld [vmem:[#allocation8 + $0x6cc] sm:$0xf] }
 0x83f   :  { %9955 = vmatmul.bf16.vlgmr.msrb.gmra.mxu0 %v17445_v48  ;;  %v16461_v24 = vld [vmem:[#allocation8 + $0x56c] sm:$0xf] }
 0x840   :  { %10003 = vmatpush.bf16.msra.mxu0 %v14367_v27  ;;  %9969 = vmatmul.bf16.vlgmr.msrb.gmra.mxu1 %v17447_v32  ;;  %v14412_v27 = vld [vmem:[#allocation8 + $0x158] sm:$0xf0]  ;;  %v16457_v51 = vld [vmem:[#allocation8 + $0x54c] sm:$0xf] }
 0x841   :  { %10017 = vmatpush.bf16.msra.mxu1 %v14495_v44  ;;  %9983 = vmatmul.bf16.vlgmr.msrb.gmra.mxu2 %v17449_v52  ;;  %v16361_v44 = vld [vmem:[#allocation8 + $0x24c] sm:$0xf]  ;;  %v14415_v41 = vor.u32 %v16329_v13, %v14412_v27  ;;  %v14844_v27 = vld [vmem:[#allocation8 + $0x4b8] sm:$0xf0] }
 0x842   :  { %10031 = vmatpush.bf16.msra.mxu2 %v14623_v56  ;;  %v14287_v56 = vor.u32 %v16297_v54, %v14284_v63  ;;  %9936 = vmatpush.bf16.msra.mxu3 %v14699_v47  ;;  %v14543_v29 = vor.u32 %v16361_v44, %v14540_v26  ;;  %v16543_v54 = vld [vmem:[#allocation8 + $0x7f4] sm:$0xf0]  ;;  %v14635_v63 = vor.u32 %v16387_v18, %v14634_v42  ;;  %v16437_v13 = vld [vmem:[#allocation8 + $0x4ac] sm:$0xf]  ;;  %v15052_v42 = vld [vmem:[#allocation8 + $0x658] sm:$0xf0] }
 0x843   :  { %v14991_v47 = vor.u32 %v16473_v61, %v14988_v22 }
 0x844   :  { %10004 = vmatpush.bf16.msra.mxu0 %v14351_v45  ;;  %v16357_v45 = vld [vmem:[#allocation8 + $0x22c] sm:$0xf] }
 0x845   :  { %10018 = vmatpush.bf16.msra.mxu1 %v14479_v7  ;;  %v14524_v7 = vld [vmem:[#allocation8 + $0x238] sm:$0xf0] }
 0x846   :  { %10032 = vmatpush.bf16.msra.mxu2 %v14607_v12  ;;  %v14271_v12 = vor.u32 %v16293_v3, %v14268_v10  ;;  %9937 = vmatpush.bf16.msra.mxu3 %v14683_v8  ;;  %v14527_v14 = vor.u32 %v16357_v45, %v14524_v7  ;;  %v15242_v3 = vld [vmem:[#allocation8 + $0x7c8] sm:$0xf]  ;;  %v16539_v10 = vld [vmem:[#allocation8 + $0x7d4] sm:$0xf0]  ;;  %v14975_v8 = vor.u32 %v16469_v4, %v14972_v62  ;;  %v16465_v7 = vld [vmem:[#allocation8 + $0x58c] sm:$0xf] }
 0x847   :  { %v15243_v45 = vor.u32 %v16539_v10, %v15242_v3  ;;  %v14959_v55 = vor.u32 %v16465_v7, %v14956_v34  ;;  %v16449_v62 = vld [vmem:[#allocation8 + $0x50c] sm:$0xf]  ;;  %v15020_v3 = vld [vmem:[#allocation8 + $0x618] sm:$0xf0]  ;;  %v15162_v10 = vld [vmem:[#allocation8 + $0x728] sm:$0xf] }
 0x848   :  { %10005 = vmatpush.bf16.msra.mxu0 %v14335_v25  ;;  %v16353_v25 = vld [vmem:[#allocation8 + $0x20c] sm:$0xf]  ;;  %v16515_v7 = vld [vmem:[#allocation8 + $0x714] sm:$0xf0] }
 0x849   :  { %10019 = vmatpush.bf16.msra.mxu1 %v14463_v30  ;;  %v14508_v30 = vld [vmem:[#allocation8 + $0x218] sm:$0xf0]  ;;  %v16413_v34 = vld [vmem:[#allocation8 + $0x3ec] sm:$0xf] }
 0x84a   :  { %10033 = vmatpush.bf16.msra.mxu2 %v14591_v19  ;;  %v16445_v19 = vld [vmem:[#allocation8 + $0x4ec] sm:$0xf]  ;;  %9938 = vmatpush.bf16.msra.mxu3 %v14667_v58 }
 0x84b   :  { %v14879_v49 = vor.u32 %v16445_v19, %v14876_v53  ;;  %v16531_v19 = vld [vmem:[#allocation8 + $0x794] sm:$0xf0]  ;;  %v14815_v53 = vor.u32 %v16429_v20, %v14812_v40  ;;  %v16405_v20 = vld [vmem:[#allocation8 + $0x3ac] sm:$0xf]  ;;  %v14716_v40 = vld [vmem:[#allocation8 + $0x3b8] sm:$0xf0] }
 0x84c   :  { %10006 = vmatpush.bf16.msra.mxu0 %v14319_v17  ;;  %v14511_v17 = vor.u32 %v16353_v25, %v14508_v30  ;;  %v14940_v25 = vld [vmem:[#allocation8 + $0x578] sm:$0xf0]  ;;  %v16493_v30 = vld [vmem:[#allocation8 + $0x66c] sm:$0xf] }
 0x84d   :  { %10020 = vmatpush.bf16.msra.mxu1 %v14447_v46  ;;  %v14651_v46 = vor.u32 %v16391_v0, %v14650_v35  ;;  %v15068_v35 = vld [vmem:[#allocation8 + $0x678] sm:$0xf0]  ;;  %v15210_v0 = vld [vmem:[#allocation8 + $0x788] sm:$0xf] }
 0x84e   :  { %10034 = vmatpush.bf16.msra.mxu2 %v14575_v43  ;;  %v15007_v43 = vor.u32 %v16477_v2, %v15004_v9  ;;  %v14943_v2 = vor.u32 %v16461_v24, %v14940_v25  ;;  %v16425_v9 = vld [vmem:[#allocation8 + $0x44c] sm:$0xf]  ;;  %v15211_v38 = vor.u32 %v16531_v19, %v15210_v0  ;;  %v14700_v24 = vld [vmem:[#allocation8 + $0x398] sm:$0xf0]  ;;  %v9676_v25 = vpop.f32.mrf.mxu0 }
 0x84f   :  { %9939 = vmatpush.bf16.msra.mxu3 %v14651_v46  ;;  %v16489_v46 = vld [vmem:[#allocation8 + $0x64c] sm:$0xf]  ;;  %v14668_v19 = vld [vmem:[#allocation8 + $0x358] sm:$0xf0] }
 0x850   :  { %10007 = vmatpush.bf16.msra.mxu0 %v14303_v6  ;;  %v15116_v6 = vld [vmem:[#allocation8 + $0x6d8] sm:$0xf0]  ;;  %v15055_v61 = vor.u32 %v16489_v46, %v15052_v42 }
 0x851   :  { %10021 = vmatpush.bf16.msra.mxu1 %v14431_v5  ;;  %v15258_v5 = vld [vmem:[#allocation8 + $0x7e8] sm:$0xf]  ;;  %v15119_v44 = vor.u32 %v16505_v39, %v15116_v6  ;;  %v16453_v39 = vld [vmem:[#allocation8 + $0x52c] sm:$0xf]  ;;  %v14908_v6 = vld [vmem:[#allocation8 + $0x538] sm:$0xf0] }
 0x852   :  { %10035 = vmatpush.bf16.msra.mxu2 %v14559_v16  ;;  %v14863_v16 = vor.u32 %v16441_v36, %v14860_v11  ;;  %v15259_v26 = vor.u32 %v16543_v54, %v15258_v5  ;;  %v16421_v11 = vld [vmem:[#allocation8 + $0x42c] sm:$0xf]  ;;  %v15036_v54 = vld [vmem:[#allocation8 + $0x638] sm:$0xf0] }
 0x853   :  { %9940 = vmatpush.bf16.msra.mxu3 %v14635_v63  ;;  %v16485_v5 = vld [vmem:[#allocation8 + $0x62c] sm:$0xf]  ;;  %v15178_v63 = vld [vmem:[#allocation8 + $0x748] sm:$0xf] }
 0x854   :  { %10008 = vmatpush.bf16.msra.mxu0 %v14287_v56  ;;  %v16501_v56 = vld [vmem:[#allocation8 + $0x6ac] sm:$0xf] }
 0x855   :  { %10022 = vmatpush.bf16.msra.mxu1 %v14415_v41  ;;  %v15100_v41 = vld [vmem:[#allocation8 + $0x6b8] sm:$0xf0] }
 0x856   :  { %10036 = vmatpush.bf16.msra.mxu2 %v14543_v29  ;;  %v14847_v29 = vor.u32 %v16437_v13, %v14844_v27  ;;  %9941 = vmatmul.bf16.vlgmr.msra.gmra.mxu3 %v17409_v15  ;;  %v14911_v13 = vor.u32 %v16453_v39, %v14908_v6  ;;  %v16417_v27 = vld [vmem:[#allocation8 + $0x40c] sm:$0xf] }
 0x857   :  { %9989 = vmatpush.bf16.msrb.mxu3 %v15259_v26  ;;  %v15039_v26 = vor.u32 %v16485_v5, %v15036_v54  ;;  %v16537_v5 = vld [vmem:[#allocation8 + $0x7cc] sm:$0xf]  ;;  %v15244_v54 = vld [vmem:[#allocation8 + $0x7d8] sm:$0xf0] }
 0x858   :  { %10009 = vmatpush.bf16.msra.mxu0 %v14271_v12  ;;  %v16535_v12 = vld [vmem:[#allocation8 + $0x7b4] sm:$0xf0] }
 0x859   :  { %10023 = vmatpush.bf16.msra.mxu1 %v14399_v23  ;;  %v14831_v23 = vor.u32 %v16433_v59, %v14828_v60 }
 0x85a   :  { %10037 = vmatpush.bf16.msra.mxu2 %v14527_v14 }
 0x85b   :  { %9990 = vmatpush.bf16.msrb.mxu3 %v15243_v45  ;;  %v15146_v45 = vld [vmem:[#allocation8 + $0x708] sm:$0xf] }
 0x85c   :  { %10010 = vmatpush.bf16.msra.mxu0 %v14255_v1  ;;  %v14796_v1 = vld [vmem:[#allocation8 + $0x458] sm:$0xf0] }
 0x85d   :  { %10024 = vmatpush.bf16.msra.mxu1 %v14383_v31  ;;  %v15071_v31 = vor.u32 %v16493_v30, %v15068_v35  ;;  %v14799_v18 = vor.u32 %v16425_v9, %v14796_v1  ;;  %v16397_v30 = vld [vmem:[#allocation8 + $0x36c] sm:$0xf]  ;;  %v9690_v35 = vpop.f32.mrf.mxu1 }
 0x85e   :  { %10038 = vmatpush.bf16.msra.mxu2 %v14511_v17  ;;  %v14924_v17 = vld [vmem:[#allocation8 + $0x558] sm:$0xf0] }
 0x85f   :  { %10011 = vmatmul.bf16.vlgmr.msra.gmra.mxu0 %v17390_v21  ;;  %v15103_v21 = vor.u32 %v16501_v56, %v15100_v41  ;;  %v14927_v36 = vor.u32 %v16457_v51, %v14924_v17  ;;  %v14892_v56 = vld [vmem:[#allocation8 + $0x518] sm:$0xf0]  ;;  %v16481_v41 = vld [vmem:[#allocation8 + $0x60c] sm:$0xf] }
 0x860   :  { %10059 = vmatpush.bf16.msrb.mxu0 %v14879_v49  ;;  %10025 = vmatmul.bf16.vlgmr.msra.gmra.mxu1 %v17398_v28  ;;  %v15084_v28 = vld [vmem:[#allocation8 + $0x698] sm:$0xf0]  ;;  %v15194_v49 = vld [vmem:[#allocation8 + $0x768] sm:$0xf]  ;;  %v14895_v59 = vor.u32 %v16449_v62, %v14892_v56  ;;  %v15023_v60 = vor.u32 %v16481_v41, %v15020_v3 }
 0x861   :  { %10073 = vmatpush.bf16.msrb.mxu1 %v15007_v43  ;;  %10039 = vmatmul.bf16.vlgmr.msra.gmra.mxu2 %v17402_v50  ;;  %v15226_v50 = vld [vmem:[#allocation8 + $0x7a8] sm:$0xf]  ;;  %v15087_v14 = vor.u32 %v16497_v37, %v15084_v28  ;;  %v16527_v43 = vld [vmem:[#allocation8 + $0x774] sm:$0xf0]  ;;  %v14748_v37 = vld [vmem:[#allocation8 + $0x3f8] sm:$0xf0]  ;;  %v15147_v28 = vor.u32 %v16515_v7, %v15146_v45 }
 0x862   :  { %10087 = vmatpush.bf16.msrb.mxu2 %v15135_v57  ;;  %v15227_v58 = vor.u32 %v16535_v12, %v15226_v50  ;;  %v14780_v57 = vld [vmem:[#allocation8 + $0x438] sm:$0xf0]  ;;  %v15195_v22 = vor.u32 %v16527_v43, %v15194_v49  ;;  %v14751_v50 = vor.u32 %v16413_v34, %v14748_v37  ;;  %v16409_v12 = vld [vmem:[#allocation8 + $0x3cc] sm:$0xf] }
 0x863   :  { %v14652_v51 = vld [vmem:[#allocation8 + $0x338] sm:$0xf0]  ;;  %v16385_v49 = vld [vmem:[#allocation8 + $0x30c] sm:$0xf] }
 0x864   :  { %10060 = vmatpush.bf16.msrb.mxu0 %v14863_v16  ;;  %9991 = vmatpush.bf16.msrb.mxu3 %v15227_v58  ;;  %v16523_v16 = vld [vmem:[#allocation8 + $0x754] sm:$0xf0]  ;;  %v16401_v58 = vld [vmem:[#allocation8 + $0x38c] sm:$0xf]  ;;  %v14636_v43 = vld [vmem:[#allocation8 + $0x318] sm:$0xf0] }
 0x865   :  { %10074 = vmatpush.bf16.msrb.mxu1 %v14991_v47  ;;  %v14783_v47 = vor.u32 %v16421_v11, %v14780_v57  ;;  %v15179_v4 = vor.u32 %v16523_v16, %v15178_v63  ;;  %v9692_v42 = vpop.f32.mrf.mxu1  ;;  %v15260_v11 = vld [vmem:[#allocation8 + $0x7f8] sm:$0xf0]  ;;  %v14639_v57 = vor.u32 %v16385_v49, %v14636_v43  ;;  %v16525_v45 = vld [vmem:[#allocation8 + $0x76c] sm:$0xf] }
 0x866   :  { %10088 = vmatpush.bf16.msrb.mxu2 %v15119_v44  ;;  %v14764_v44 = vld [vmem:[#allocation8 + $0x418] sm:$0xf0] }
 0x867   :  { %v15196_v7 = vld [vmem:[#allocation8 + $0x778] sm:$0xf0] }
 0x868   :  { %10061 = vmatpush.bf16.msrb.mxu0 %v14847_v29  ;;  %9992 = vmatpush.bf16.msrb.mxu3 %v15211_v38  ;;  %v16519_v29 = vld [vmem:[#allocation8 + $0x734] sm:$0xf0]  ;;  %v16389_v38 = vld [vmem:[#allocation8 + $0x32c] sm:$0xf] }
 0x869   :  { %10075 = vmatpush.bf16.msrb.mxu1 %v14975_v8  ;;  %v14767_v8 = vor.u32 %v16417_v27, %v14764_v44  ;;  %v14655_v17 = vor.u32 %v16389_v38, %v14652_v51  ;;  %v16533_v27 = vld [vmem:[#allocation8 + $0x7ac] sm:$0xf]  ;;  %v15228_v44 = vld [vmem:[#allocation8 + $0x7b8] sm:$0xf0] }
 0x86a   :  { %10089 = vmatpush.bf16.msrb.mxu2 %v15103_v21  ;;  %v15163_v21 = vor.u32 %v16519_v29, %v15162_v10  ;;  %v15231_v3 = vor.u32 %v16533_v27, %v15228_v44  ;;  %v16529_v10 = vld [vmem:[#allocation8 + $0x78c] sm:$0xf]  ;;  %v15212_v29 = vld [vmem:[#allocation8 + $0x798] sm:$0xf0] }
 0x86c   :  { %10062 = vmatpush.bf16.msrb.mxu0 %v14831_v23  ;;  %9993 = vmatpush.bf16.msrb.mxu3 %v15195_v22  ;;  %v14732_v23 = vld [vmem:[#allocation8 + $0x3d8] sm:$0xf0] }
 0x86d   :  { %10076 = vmatpush.bf16.msrb.mxu1 %v14959_v55  ;;  %v14735_v55 = vor.u32 %v16409_v12, %v14732_v23  ;;  %v15199_v23 = vor.u32 %v16525_v45, %v15196_v7 }
 0x86e   :  { %10090 = vmatpush.bf16.msrb.mxu2 %v15087_v14  ;;  %v14719_v14 = vor.u32 %v16405_v20, %v14716_v40  ;;  %v15180_v20 = vld [vmem:[#allocation8 + $0x758] sm:$0xf0] }
 0x870   :  { %10063 = vmatpush.bf16.msrb.mxu0 %v14815_v53  ;;  %9994 = vmatpush.bf16.msrb.mxu3 %v15179_v4  ;;  %v17534_v53 = vld [vmem:[#allocation10] sm:$0xf] }
 0x871   :  { %10077 = vmatpush.bf16.msrb.mxu1 %v14943_v2  ;;  %v9704_v2 = vpop.f32.mrf.mxu2  ;;  %v8379_v1 = vperm.slane %v17534_v53, 0 }
 0x872   :  { %10091 = vmatpush.bf16.msrb.mxu2 %v15071_v31  ;;  %v9678_v31 = vpop.f32.mrf.mxu0 }
 0x873   :  { %v9677_v46 = vadd.f32 %v9676_v25, %v8379_v1  ;;  %v9679_v16 = vadd.f32 %v9678_v31, %v8379_v1  ;;  %v16517_v25 = vld [vmem:[#allocation8 + $0x72c] sm:$0xf] }
 0x874   :  { %10064 = vmatpush.bf16.msrb.mxu0 %v14799_v18  ;;  %9995 = vmatpush.bf16.msrb.mxu3 %v15163_v21  ;;  %v9718_v18 = vpop.f32.mrf.mxu3  ;;  %v15215_v21 = vor.u32 %v16529_v10, %v15212_v29  ;;  %v8381_v29 = vperm.slane %v17534_v53, 2 }
 0x875   :  { %10078 = vmatpush.bf16.msrb.mxu1 %v14927_v36  ;;  %v16541_v36 = vld [vmem:[#allocation8 + $0x7ec] sm:$0xf]  ;;  %v9693_v62 = vadd.f32 %v9692_v42, %v9679_v16 }
 0x876   :  { %10092 = vmatpush.bf16.msrb.mxu2 %v15055_v61  ;;  %v9691_v61 = vadd.f32 %v9690_v35, %v9677_v46  ;;  %v15263_v6 = vor.u32 %v16541_v36, %v15260_v11  ;;  %v8380_v35 = vperm.slane %v17534_v53, 1 }
 0x878   :  { %10065 = vmatpush.bf16.msrb.mxu0 %v14783_v47  ;;  %9996 = vmatpush.bf16.msrb.mxu3 %v15147_v28  ;;  %v9705_v63 = vadd.f32 %v9704_v2, %v9691_v61  ;;  %v9746_v47 = vpop.f32.mrf.mxu1  ;;  %v16513_v2 = vld [vmem:[#allocation8 + $0x70c] sm:$0xf] }
 0x879   :  { %10079 = vmatpush.bf16.msrb.mxu1 %v14911_v13  ;;  %v9706_v22 = vpop.f32.mrf.mxu2  ;;  %v15247_v13 = vor.u32 %v16537_v5, %v15244_v54 }
 0x87a   :  { %10093 = vmatpush.bf16.msrb.mxu2 %v15039_v26  ;;  %v9732_v39 = vpop.f32.mrf.mxu0  ;;  %v9719_v26 = vadd.f32 %v9718_v18, %v9705_v63 }
 0x87b   :  { %9997 = vmatmul.bf16.vlgmr.msrb.gmra.mxu3 %v17515_v33 }
 0x87c   :  { %10066 = vmatpush.bf16.msrb.mxu0 %v14767_v8  ;;  %10045 = vmatpush.bf16.msra.mxu3 %v14751_v50  ;;  %v9720_v4 = vpop.f32.mrf.mxu3  ;;  %v9733_v56 = vadd.f32 %v9732_v39, %v9719_v26  ;;  %v9707_v8 = vadd.f32 %v9706_v22, %v9693_v62 }
 0x87d   :  { %10080 = vmatpush.bf16.msrb.mxu1 %v14895_v59 }
 0x87e   :  { %10094 = vmatpush.bf16.msrb.mxu2 %v15023_v60  ;;  %v9747_v60 = vadd.f32 %v9746_v47, %v9733_v56  ;;  %v9721_v34 = vadd.f32 %v9720_v4, %v9707_v8 }
 0x87f   :  { %10067 = vmatmul.bf16.vlgmr.msrb.gmra.mxu0 %v17445_v48  ;;  %v14703_v48 = vor.u32 %v16401_v58, %v14700_v24 }
 0x880   :  { %10081 = vmatmul.bf16.vlgmr.msrb.gmra.mxu1 %v17447_v32  ;;  %10046 = vmatpush.bf16.msra.mxu3 %v14735_v55  ;;  %v14684_v32 = vld [vmem:[#allocation8 + $0x378] sm:$0xf0]  ;;  %v9748_v28 = vpop.f32.mrf.mxu1  ;;  %v16521_v55 = vld [vmem:[#allocation8 + $0x74c] sm:$0xf] }
 0x881   :  { %10095 = vmatmul.bf16.vlgmr.msrb.gmra.mxu2 %v17449_v52  ;;  %v14687_v0 = vor.u32 %v16397_v30, %v14684_v32  ;;  %v16393_v52 = vld [vmem:[#allocation8 + $0x34c] sm:$0xf]  ;;  %v9760_v41 = vpop.f32.mrf.mxu2  ;;  %v15183_v24 = vor.u32 %v16521_v55, %v15180_v20 }
 0x882   :  { %v14671_v9 = vor.u32 %v16393_v52, %v14668_v19  ;;  %v9734_v59 = vpop.f32.mrf.mxu0  ;;  %v9761_v37 = vadd.f32 %v9760_v41, %v9747_v60 }
 0x884   :  { %10047 = vmatpush.bf16.msra.mxu3 %v14719_v14 }
 0x888   :  { %10048 = vmatpush.bf16.msra.mxu3 %v14703_v48  ;;  %v15164_v48 = vld [vmem:[#allocation8 + $0x738] sm:$0xf0]  ;;  %v9802_v32 = vpop.f32.mrf.mxu1 }
 0x889   :  { %v9762_v40 = vpop.f32.mrf.mxu2  ;;  %v15167_v19 = vor.u32 %v16517_v25, %v15164_v48 }
 0x88a   :  { %v9788_v14 = vpop.f32.mrf.mxu0 }
 0x88b   :  { %v9789_v31 = vadd.f32 %v9788_v14, %v8380_v35 }
 0x88c   :  { %10049 = vmatpush.bf16.msra.mxu3 %v14687_v0 }
 0x890   :  { %10050 = vmatpush.bf16.msra.mxu3 %v14671_v9  ;;  %v15148_v9 = vld [vmem:[#allocation8 + $0x718] sm:$0xf0]  ;;  %v9804_v42 = vpop.f32.mrf.mxu1 }
 0x891   :  { %v9816_v1 = vpop.f32.mrf.mxu2  ;;  %v15151_v51 = vor.u32 %v16513_v2, %v15148_v9 }
 0x892   :  { %v9790_v38 = vpop.f32.mrf.mxu0 }
 0x893   :  { %v9791_v43 = vadd.f32 %v9790_v38, %v8380_v35 }
 0x894   :  { %10051 = vmatpush.bf16.msra.mxu3 %v14655_v17  ;;  %v9803_v17 = vadd.f32 %v9802_v32, %v9789_v31 }
 0x896   :  { %v9817_v49 = vadd.f32 %v9816_v1, %v9803_v17 }
 0x898   :  { %10052 = vmatpush.bf16.msra.mxu3 %v14639_v57  ;;  %v9774_v50 = vpop.f32.mrf.mxu3  ;;  %v9805_v57 = vadd.f32 %v9804_v42, %v9791_v43  ;;  %v9858_v39 = vpop.f32.mrf.mxu1 }
 0x899   :  { %v9775_v12 = vadd.f32 %v9774_v50, %v9761_v37  ;;  %v9818_v36 = vpop.f32.mrf.mxu2 }
 0x89a   :  { %v9844_v11 = vpop.f32.mrf.mxu0 }
 0x89b   :  { %10053 = vmatmul.bf16.vlgmr.msra.gmra.mxu3 %v17409_v15  ;;  %v9735_v15 = vadd.f32 %v9734_v59, %v9721_v34  ;;  %10115 = vst [vmem:[#allocation11] sm:$0xff] %v9775_v12 }
 0x89c   :  { %10101 = vmatpush.bf16.msrb.mxu3 %v15263_v6  ;;  %v9819_v6 = vadd.f32 %v9818_v36, %v9805_v57 }
 0x89d   :  { %v9749_v58 = vadd.f32 %v9748_v28, %v9735_v15 }
 0x89f   :  { %v9763_v30 = vadd.f32 %v9762_v40, %v9749_v58 }
 0x8a0   :  { %10102 = vmatpush.bf16.msrb.mxu3 %v15247_v13  ;;  %v9776_v0 = vpop.f32.mrf.mxu3  ;;  %v9860_v26 = vpop.f32.mrf.mxu1 }
 0x8a1   :  { %v9777_v52 = vadd.f32 %v9776_v0, %v9763_v30  ;;  %v9872_v63 = vpop.f32.mrf.mxu2 }
 0x8a2   :  { %v9846_v16 = vpop.f32.mrf.mxu0 }
 0x8a3   :  { %10119 = vst [vmem:[#allocation11 + $0x20] sm:$0xff] %v9777_v52 }
 0x8a4   :  { %10103 = vmatpush.bf16.msrb.mxu3 %v15231_v3 }
 0x8a8   :  { %10104 = vmatpush.bf16.msrb.mxu3 %v15215_v21  ;;  %v9830_v46 = vpop.f32.mrf.mxu3  ;;  %v9914_v10 = vpop.f32.mrf.mxu1 }
 0x8a9   :  { %v9831_v18 = vadd.f32 %v9830_v46, %v9817_v49  ;;  %v9874_v62 = vpop.f32.mrf.mxu2 }
 0x8aa   :  { %v9900_v3 = vpop.f32.mrf.mxu0 }
 0x8ab   :  { %v9845_v61 = vadd.f32 %v9844_v11, %v9831_v18  ;;  %v9901_v59 = vadd.f32 %v9900_v3, %v8381_v29 }
 0x8ac   :  { %10105 = vmatpush.bf16.msrb.mxu3 %v15199_v23 }
 0x8ad   :  { %v9859_v54 = vadd.f32 %v9858_v39, %v9845_v61  ;;  %v9915_v45 = vadd.f32 %v9914_v10, %v9901_v59 }
 0x8af   :  { %v9873_v13 = vadd.f32 %v9872_v63, %v9859_v54 }
 0x8b0   :  { %10106 = vmatpush.bf16.msrb.mxu3 %v15183_v24  ;;  %v9832_v22 = vpop.f32.mrf.mxu3  ;;  %v9916_v7 = vpop.f32.mrf.mxu1 }
 0x8b1   :  { %v9833_v5 = vadd.f32 %v9832_v22, %v9819_v6  ;;  %v9928_v8 = vpop.f32.mrf.mxu2 }
 0x8b2   :  { %v9902_v60 = vpop.f32.mrf.mxu0  ;;  %v9929_v34 = vadd.f32 %v9928_v8, %v9915_v45 }
 0x8b3   :  { %v9847_v47 = vadd.f32 %v9846_v16, %v9833_v5  ;;  %v9903_v37 = vadd.f32 %v9902_v60, %v8381_v29 }
 0x8b4   :  { %10107 = vmatpush.bf16.msrb.mxu3 %v15167_v19 }
 0x8b5   :  { %v9861_v4 = vadd.f32 %v9860_v26, %v9847_v47  ;;  %v9917_v12 = vadd.f32 %v9916_v7, %v9903_v37 }
 0x8b8   :  { %10108 = vmatpush.bf16.msrb.mxu3 %v15151_v51  ;;  %v9886_v27 = vpop.f32.mrf.mxu3  ;;  %v8382_v51 = vperm.slane %v17534_v53, 3 }
 0x8b9   :  { %v9887_v44 = vadd.f32 %v9886_v27, %v9873_v13  ;;  %v9930_v50 = vpop.f32.mrf.mxu2 }
 0x8ba   :  { %v9931_v40 = vadd.f32 %v9930_v50, %v9917_v12 }
 0x8bb   :  { %10109 = vmatmul.bf16.vlgmr.msrb.gmra.mxu3 %v17515_v33  ;;  %10116 = vst [vmem:[#allocation11 + $0x8] sm:$0xff] %v9887_v44  ;;  %v9875_v33 = vadd.f32 %v9874_v62, %v9861_v4 }
 0x8bc   :  { %v9956_v15 = vpop.f32.mrf.mxu0 }
 0x8bd   :  { %v9970_v55 = vpop.f32.mrf.mxu1 }
 0x8c0   :  { %v9888_v56 = vpop.f32.mrf.mxu3 }
 0x8c1   :  { %v9889_v41 = vadd.f32 %v9888_v56, %v9875_v33 }
 0x8c3   :  { %10120 = vst [vmem:[#allocation11 + $0x28] sm:$0xff] %v9889_v41 }
 0x8c4   :  { %v9984_v24 = vpop.f32.mrf.mxu2  ;;  %v9958_v25 = vpop.f32.mrf.mxu0 }
 0x8c5   :  { %v9972_v0 = vpop.f32.mrf.mxu1 }
 0x8cc   :  { %v9986_v19 = vpop.f32.mrf.mxu2 }
 0x8d9   :  { %v9942_v21 = vpop.f32.mrf.mxu3 }
 0x8da   :  { %v9943_v28 = vadd.f32 %v9942_v21, %v9929_v34 }
 0x8dc   :  { %v9957_v23 = vadd.f32 %v9956_v15, %v9943_v28  ;;  %v10012_v31 = vpop.f32.mrf.mxu0 }
 0x8dd   :  { %v10026_v38 = vpop.f32.mrf.mxu1  ;;  %v10013_v46 = vadd.f32 %v10012_v31, %v8382_v51 }
 0x8de   :  { %v9971_v58 = vadd.f32 %v9970_v55, %v9957_v23 }
 0x8df   :  { %v10027_v43 = vadd.f32 %v10026_v38, %v10013_v46 }
 0x8e0   :  { %v9985_v30 = vadd.f32 %v9984_v24, %v9971_v58 }
 0x8e1   :  { %v9944_v20 = vpop.f32.mrf.mxu3 }
 0x8e2   :  { %v9945_v14 = vadd.f32 %v9944_v20, %v9931_v40 }
 0x8e4   :  { %v9959_v48 = vadd.f32 %v9958_v25, %v9945_v14  ;;  %v10040_v17 = vpop.f32.mrf.mxu2  ;;  %v10014_v42 = vpop.f32.mrf.mxu0 }
 0x8e5   :  { %v10028_v18 = vpop.f32.mrf.mxu1  ;;  %v10041_v36 = vadd.f32 %v10040_v17, %v10027_v43  ;;  %v10015_v11 = vadd.f32 %v10014_v42, %v8382_v51 }
 0x8e6   :  { %v9973_v52 = vadd.f32 %v9972_v0, %v9959_v48 }
 0x8e7   :  { %v10029_v39 = vadd.f32 %v10028_v18, %v10015_v11 }
 0x8e8   :  { %v9987_v2 = vadd.f32 %v9986_v19, %v9973_v52 }
 0x8ec   :  { %v10042_v61 = vpop.f32.mrf.mxu2 }
 0x8ed   :  { %v10043_v63 = vadd.f32 %v10042_v61, %v10029_v39 }
 0x8fc   :  { %v10068_v22 = vpop.f32.mrf.mxu0 }
 0x8fd   :  { %v10082_v5 = vpop.f32.mrf.mxu1 }
 0x8fe   :  { %v9998_v32 = vpop.f32.mrf.mxu3 }
 0x8ff   :  { %v9999_v35 = vadd.f32 %v9998_v32, %v9985_v30 }
 0x901   :  { %10117 = vst [vmem:[#allocation11 + $0x10] sm:$0xff] %v9999_v35 }
 0x904   :  { %v10096_v13 = vpop.f32.mrf.mxu2  ;;  %v10070_v53 = vpop.f32.mrf.mxu0 }
 0x905   :  { %v10084_v62 = vpop.f32.mrf.mxu1 }
 0x906   :  { %v10000_v9 = vpop.f32.mrf.mxu3 }
 0x907   :  { %v10001_v1 = vadd.f32 %v10000_v9, %v9987_v2 }
 0x909   :  { %10121 = vst [vmem:[#allocation11 + $0x30] sm:$0xff] %v10001_v1 }
 0x90c   :  { %v10098_v56 = vpop.f32.mrf.mxu2 }
 0x91e   :  { %v10054_v49 = vpop.f32.mrf.mxu3 }
 0x91f   :  { %v10055_v57 = vadd.f32 %v10054_v49, %v10041_v36 }
 0x921   :  { %v10069_v6 = vadd.f32 %v10068_v22, %v10055_v57 }
 0x923   :  { %v10083_v47 = vadd.f32 %v10082_v5, %v10069_v6 }
 0x925   :  { %v10097_v44 = vadd.f32 %v10096_v13, %v10083_v47 }
 0x926   :  { %v10056_v54 = vpop.f32.mrf.mxu3 }
 0x927   :  { %v10057_v16 = vadd.f32 %v10056_v54, %v10043_v63 }
 0x929   :  { %v10071_v27 = vadd.f32 %v10070_v53, %v10057_v16 }
 0x92b   :  { %v10085_v33 = vadd.f32 %v10084_v62, %v10071_v27 }
 0x92d   :  { %v10099_v41 = vadd.f32 %v10098_v56, %v10085_v33 }
 0x93e   :  { %v10110_v26 = vpop.f32.mrf.mxu3 }
 0x93f   :  { %v10111_v4 = vadd.f32 %v10110_v26, %v10097_v44 }
 0x941   :  { %10118 = vst [vmem:[#allocation11 + $0x18] sm:$0xff] %v10111_v4 }
 0x946   :  { %v10112_v3 = vpop.f32.mrf.mxu3 }
 0x947   :  { %v10113_v10 = vadd.f32 %v10112_v3, %v10099_v41 }
 0x949   :  { %10122 = vst [vmem:[#allocation11 + $0x38] sm:$0xff] %v10113_v10 }
 0x94a   :  { %10135 = dma.vmem_to_hbm [thread:$0]  %s10128_s4, 1024, %s10130_s23, [#allocation4], %s16715_s26, %s16715_s26, %s16716_s27  }
 0x94b   :  { %16712 = dma.done.wait [#allocation4], 1024  }
 0x94c   :  { %16713 = vsyncadd [#allocation4], 4294966272 }
 0x94d   :  { %10140 = vsyncpa [#allocation3], 1 }
 0x94e   :  { %10141 = vsyncpa [#allocation6], 1 }
 0x94f   :  { %10142 = vsyncpa [#allocation9], 1 }
 0x950   :  { %10143 = vsyncpa [#allocation4], 1 }

</bundles_post_ra>
